<compile_context>
chip_gen: v7x
topology: tpu7x:2x2x1
jax: 0.10.0
libtpu: 0.0.40
codegen_flags: <defaults>
</compile_context>

<pallas_src>
import functools
import math

import jax
import jax.numpy as jnp
from jax.experimental import pallas as pl
from jax.experimental.pallas import tpu as pltpu


def _round_up(x, m):
    return ((x + m - 1) // m) * m


def _decoder_kernel(num_atoms, apply_sigmoid,
                    lab_ref, x_ref,
                    w1_ref, b1_ref, w2_ref, b2_ref, w3_ref, b3_ref,
                    o_ref):
    tb, ca = x_ref.shape

    # --- in-kernel capsule mask: one compare per element ---------------------
    lab = lab_ref[...]                                           # [TB, 1] int32
    col = jax.lax.broadcasted_iota(jnp.int32, (tb, ca), 1)       # flat atom idx
    if num_atoms & (num_atoms - 1) == 0:                         # power of two
        caps = col >> (num_atoms.bit_length() - 1)
    else:
        caps = col // num_atoms
    keep = caps == lab                                           # [TB, C*A] bool
    xv = x_ref[...]                                              # bf16 activations
    x = jnp.where(keep, xv, jnp.zeros_like(xv))

    # --- 3-layer MLP, bf16 operands / f32 accumulation -----------------------
    h1 = jnp.dot(x, w1_ref[...], preferred_element_type=jnp.float32) + b1_ref[...]
    h1 = jnp.maximum(h1, 0.0).astype(jnp.bfloat16)               # ReLU
    h2 = jnp.dot(h1, w2_ref[...], preferred_element_type=jnp.float32) + b2_ref[...]
    h2 = jnp.maximum(h2, 0.0).astype(jnp.bfloat16)               # ReLU
    out = jnp.dot(h2, w3_ref[...], preferred_element_type=jnp.float32) + b3_ref[...]
    if apply_sigmoid:                                            # static Python bool
        e = jnp.exp(-out)                                        # EUP
        out = pl.reciprocal(1.0 + e, approx=True)                # EUP vrcp
    o_ref[...] = out.astype(o_ref.dtype)                         # bf16 store


def init_decoder_params(key, in_channels, layer_sizes, num_pixels):
    """Deterministic PyTorch-style (uniform +-1/sqrt(fan_in)) Linear init, f32."""
    l1, l2 = layer_sizes
    ks = jax.random.split(key, 6)

    def lin(kw, kb, fan_in, fan_out):
        bound = 1.0 / math.sqrt(fan_in)
        w = jax.random.uniform(kw, (fan_in, fan_out), jnp.float32, -bound, bound)
        b = jax.random.uniform(kb, (1, fan_out), jnp.float32, -bound, bound)
        return w, b

    w1, b1 = lin(ks[0], ks[1], in_channels, l1)
    w2, b2 = lin(ks[2], ks[3], l1, l2)
    w3, b3 = lin(ks[4], ks[5], l2, num_pixels)
    return (w1, b1, w2, b2, w3, b3)


def prepare_decoder_params(params_f32, num_pixels):
    """One-time conversion for the kernel: bf16 weights, f32 biases,
    last layer lane-padded to a multiple of 128 columns."""
    w1, b1, w2, b2, w3, b3 = params_f32
    np_pad = _round_up(num_pixels, 128)
    pad = np_pad - num_pixels
    w3p = jnp.pad(w3, ((0, 0), (0, pad)))
    b3p = jnp.pad(b3, ((0, 0), (0, pad)))
    return (w1.astype(jnp.bfloat16), b1.astype(jnp.float32),
            w2.astype(jnp.bfloat16), b2.astype(jnp.float32),
            w3p.astype(jnp.bfloat16), b3p.astype(jnp.float32))


def _tpu_vmem_capacity_bytes():
    """Best-effort per-core VMEM capacity; conservative (v7x) fallback."""
    try:
        return int(pltpu.get_tpu_info().vmem_capacity_bytes)
    except Exception:
        return 64 * 1024 * 1024


def decoder_forward(capsule_embedding, labels, num_classes, prepared_params,
                    original_shape, *, batch_tile=None):
    """Pallas equivalent of Decoder.forward.

    capsule_embedding: [B, num_classes, num_atoms] float32
    labels:            [B] int32
    prepared_params:   output of prepare_decoder_params
    returns:           [B, prod(original_shape)] float32
    """
    B, C, A = capsule_embedding.shape
    assert C == num_classes
    ca = C * A
    num_pixels = int(math.prod(original_shape))
    np_pad = _round_up(num_pixels, 128)

    w1, b1, w2, b2, w3, b3 = prepared_params
    l1 = w1.shape[1]
    l2 = w2.shape[1]
    assert w3.shape == (l2, np_pad) and b3.shape == (1, np_pad)

    # ---- per-generation tiling / VMEM budget --------------------------------
    vmem_cap = _tpu_vmem_capacity_bytes()
    big_vmem = vmem_cap >= 100 * 1024 * 1024          # v5e / v6e (128 MiB parts)
    tb_cap = 2048 if big_vmem else 1024               # v7x: 64 MiB per core
    vmem_limit = (96 if big_vmem else 48) * 1024 * 1024
    if batch_tile is not None:
        tb_cap = min(tb_cap, _round_up(max(batch_tile, 8), 8))

    tb = min(tb_cap, _round_up(max(B, 8), 8))
    if (not big_vmem) and B > 8:
        # v7x has 2 TensorCores and batch is the only parallel axis: keep grid >= 2.
        tb = max(8, min(tb, _round_up(pl.cdiv(B, 2), 8)))
    b_pad = _round_up(B, tb)
    grid = (b_pad // tb,)

    # Activations streamed as bf16 (matmul operands are bf16 anyway).
    x = capsule_embedding.reshape(B, ca).astype(jnp.bfloat16)
    lab = labels.astype(jnp.int32).reshape(B, 1)
    if b_pad != B:
        x = jnp.pad(x, ((0, b_pad - B), (0, 0)))
        lab = jnp.pad(lab, ((0, b_pad - B), (0, 0)))

    apply_sigmoid = (original_shape[0] == 1)  # matches the nn.Sigmoid add_module
    kernel = functools.partial(_decoder_kernel, A, apply_sigmoid)

    batch_map = lambda i: (i, 0)   # tiles marching over the batch
    const_map = lambda i: (0, 0)   # weights/biases: fetched once, VMEM-resident

    weight_bytes = (w1.size + w2.size + w3.size) * 2 + (b1.size + b2.size + b3.size) * 4
    act_bytes = x.size * 2 + lab.size * 4 + b_pad * np_pad * 2
    cost = pl.CostEstimate(
        flops=2 * b_pad * (ca * l1 + l1 * l2 + l2 * np_pad),
        transcendentals=(b_pad * np_pad) if apply_sigmoid else 0,
        bytes_accessed=weight_bytes + act_bytes,
    )

    def _run(single_buffer_weights):
        if single_buffer_weights:
            # Constant index_map -> a second buffer is pure VMEM waste.
            const_spec = lambda a: pl.BlockSpec(a.shape, const_map,
                                                pipeline_mode=pl.Buffered(1))
        else:
            const_spec = lambda a: pl.BlockSpec(a.shape, const_map)
        out = pl.pallas_call(
            kernel,
            out_shape=jax.ShapeDtypeStruct((b_pad, np_pad), jnp.bfloat16),
            grid_spec=pltpu.PrefetchScalarGridSpec(
                num_scalar_prefetch=0,
                grid=grid,
                in_specs=[
                    pl.BlockSpec((tb, 1), batch_map),     # per-row labels
                    pl.BlockSpec((tb, ca), batch_map),    # capsule activations (bf16)
                    const_spec(w1), const_spec(b1),
                    const_spec(w2), const_spec(b2),
                    const_spec(w3), const_spec(b3),
                ],
                out_specs=pl.BlockSpec((tb, np_pad), batch_map),
            ),
            compiler_params=pltpu.CompilerParams(
                dimension_semantics=("parallel",),
                vmem_limit_bytes=vmem_limit,
            ),
            cost_estimate=cost,
        )(lab, x, w1, b1, w2, b2, w3, b3)
        return jax.block_until_ready(out)

    try:
        out = _run(single_buffer_weights=True)
    except Exception:
        # Fallback if this JAX build rejects single-buffered (Buffered(1)) specs.
        out = _run(single_buffer_weights=False)

    # NOTE: downstream consumers that can work on the padded [b_pad, np_pad]
    # bf16 layout should do so and fuse this slice/cast into the loss to avoid
    # an extra HBM round-trip; the module API requires [B, num_pixels] float.
    return out[:B, :num_pixels].astype(jnp.float32)


def _reference_forward(capsule_embedding, labels, num_classes, params_f32, original_shape):
    """Pure-JAX f32 reference of the PyTorch forward (sanity check)."""
    w1, b1, w2, b2, w3, b3 = params_f32
    mask = jax.nn.one_hot(labels, num_classes, dtype=capsule_embedding.dtype)
    filtered = capsule_embedding * mask[:, :, None]
    x = filtered.reshape(capsule_embedding.shape[0], -1)
    h1 = jax.nn.relu(x @ w1 + b1)
    h2 = jax.nn.relu(h1 @ w2 + b2)
    out = h2 @ w3 + b3
    if original_shape[0] == 1:
        out = jax.nn.sigmoid(out)
    return out


if __name__ == "__main__":
    # small, forward-consistent shapes
    B = 2
    num_classes = 10
    num_atoms = 16
    original_shape = (1, 28, 28)           # grayscale -> sigmoid branch taken
    layer_sizes = (512, 1024)
    in_channels = num_classes * num_atoms  # Flatten() output of [B, 10, num_atoms]
    num_pixels = int(math.prod(original_shape))

    key = jax.random.PRNGKey(0)
    k_emb, k_params = jax.random.split(key)

    capsule_embedding = jax.random.normal(
        k_emb, (B, num_classes, num_atoms), dtype=jnp.float32)
    labels = jnp.array([3, 7], dtype=jnp.int32)

    params_f32 = init_decoder_params(k_params, in_channels, layer_sizes, num_pixels)
    prepared = prepare_decoder_params(params_f32, num_pixels)

    out = decoder_forward(capsule_embedding, labels, num_classes, prepared, original_shape)
    out = jax.block_until_ready(out)

    ref = _reference_forward(capsule_embedding, labels, num_classes, params_f32, original_shape)
    assert out.shape == (B, num_pixels)
    # bf16 weights/activations/output + approx-reciprocal sigmoid vs f32
    # reference: loosened tolerance (acceptable for image reconstruction).
    assert jnp.allclose(out, ref, atol=3e-2, rtol=3e-2), float(jnp.max(jnp.abs(out - ref)))

    print("KERNEL_OK")
</pallas_src>

<mosaic_0001>
module attributes {stable_mosaic.version = 11 : i64} {
  func.func @_decoder_kernel(%arg0: i32, %arg1: memref<8x1xi32, #tpu.memory_space<vmem>>, %arg2: memref<8x160xbf16, #tpu.memory_space<vmem>>, %arg3: memref<160x512xbf16, #tpu.memory_space<vmem>>, %arg4: memref<1x512xf32, #tpu.memory_space<vmem>>, %arg5: memref<512x1024xbf16, #tpu.memory_space<vmem>>, %arg6: memref<1x1024xf32, #tpu.memory_space<vmem>>, %arg7: memref<1024x896xbf16, #tpu.memory_space<vmem>>, %arg8: memref<1x896xf32, #tpu.memory_space<vmem>>, %arg9: memref<8x896xbf16, #tpu.memory_space<vmem>>) attributes {dimension_semantics = [#tpu.dimension_semantics<parallel>], iteration_bounds = array<i64: 1>, scalar_prefetch = 0 : i64, scratch_operands = 0 : i64, tpu.core_type = #tpu.core_type<tc>, window_params = [{transform_indices = @transform_0, window_bounds = array<i64: 8, 1>}, {transform_indices = @transform_1, window_bounds = array<i64: 8, 160>}, {pipeline_mode = #tpu.pipeline_mode<synchronous>, transform_indices = @transform_2, window_bounds = array<i64: 160, 512>}, {pipeline_mode = #tpu.pipeline_mode<synchronous>, transform_indices = @transform_3, window_bounds = array<i64: 1, 512>}, {pipeline_mode = #tpu.pipeline_mode<synchronous>, transform_indices = @transform_4, window_bounds = array<i64: 512, 1024>}, {pipeline_mode = #tpu.pipeline_mode<synchronous>, transform_indices = @transform_5, window_bounds = array<i64: 1, 1024>}, {pipeline_mode = #tpu.pipeline_mode<synchronous>, transform_indices = @transform_6, window_bounds = array<i64: 1024, 896>}, {pipeline_mode = #tpu.pipeline_mode<synchronous>, transform_indices = @transform_7, window_bounds = array<i64: 1, 896>}, {transform_indices = @transform_8, window_bounds = array<i64: 8, 896>}]} {
    %c0 = arith.constant 0 : index
    %c0_0 = arith.constant 0 : index
    %0 = vector.load %arg1[%c0, %c0_0] : memref<8x1xi32, #tpu.memory_space<vmem>>, vector<8x1xi32>
    %1 = tpu.iota {dimensions = array<i32: 1>} : vector<8x160xi32>
    %c4_i32 = arith.constant 4 : i32
    %2 = vector.broadcast %c4_i32 : i32 to vector<8x160xi32>
    %3 = arith.shrsi %1, %2 : vector<8x160xi32>
    %4 = vector.broadcast %0 : vector<8x1xi32> to vector<8x160xi32>
    %5 = arith.cmpi eq, %3, %4 : vector<8x160xi32>
    %c0_1 = arith.constant 0 : index
    %c0_2 = arith.constant 0 : index
    %6 = vector.load %arg2[%c0_1, %c0_2] : memref<8x160xbf16, #tpu.memory_space<vmem>>, vector<8x160xbf16>
    %cst = arith.constant 0.000000e+00 : bf16
    %7 = vector.broadcast %cst : bf16 to vector<8x160xbf16>
    %8 = arith.select %5, %6, %7 : vector<8x160xi1>, vector<8x160xbf16>
    %c0_3 = arith.constant 0 : index
    %c0_4 = arith.constant 0 : index
    %9 = vector.load %arg3[%c0_3, %c0_4] : memref<160x512xbf16, #tpu.memory_space<vmem>>, vector<160x512xbf16>
    %cst_5 = arith.constant dense<0.000000e+00> : vector<8x512xf32>
    %10 = tpu.matmul %8, %9, %cst_5 {dimension_numbers = #tpu.dot_dimension_numbers<[1], [0], [0], [1], [0, 0, 1, 1], [], []>} : vector<8x160xbf16>, vector<160x512xbf16>, vector<8x512xf32> -> vector<8x512xf32>
    %c0_6 = arith.constant 0 : index
    %c0_7 = arith.constant 0 : index
    %11 = vector.load %arg4[%c0_6, %c0_7] : memref<1x512xf32, #tpu.memory_space<vmem>>, vector<1x512xf32>
    %12 = vector.broadcast %11 : vector<1x512xf32> to vector<8x512xf32>
    %13 = arith.addf %10, %12 : vector<8x512xf32>
    %cst_8 = arith.constant 0.000000e+00 : f32
    %14 = vector.broadcast %cst_8 : f32 to vector<8x512xf32>
    %15 = arith.maximumf %13, %14 : vector<8x512xf32>
    %16 = arith.truncf %15 : vector<8x512xf32> to vector<8x512xbf16>
    %c0_9 = arith.constant 0 : index
    %c0_10 = arith.constant 0 : index
    %17 = vector.load %arg5[%c0_9, %c0_10] : memref<512x1024xbf16, #tpu.memory_space<vmem>>, vector<512x1024xbf16>
    %cst_11 = arith.constant dense<0.000000e+00> : vector<8x1024xf32>
    %18 = tpu.matmul %16, %17, %cst_11 {dimension_numbers = #tpu.dot_dimension_numbers<[1], [0], [0], [1], [0, 0, 1, 1], [], []>} : vector<8x512xbf16>, vector<512x1024xbf16>, vector<8x1024xf32> -> vector<8x1024xf32>
    %c0_12 = arith.constant 0 : index
    %c0_13 = arith.constant 0 : index
    %19 = vector.load %arg6[%c0_12, %c0_13] : memref<1x1024xf32, #tpu.memory_space<vmem>>, vector<1x1024xf32>
    %20 = vector.broadcast %19 : vector<1x1024xf32> to vector<8x1024xf32>
    %21 = arith.addf %18, %20 : vector<8x1024xf32>
    %cst_14 = arith.constant 0.000000e+00 : f32
    %22 = vector.broadcast %cst_14 : f32 to vector<8x1024xf32>
    %23 = arith.maximumf %21, %22 : vector<8x1024xf32>
    %24 = arith.truncf %23 : vector<8x1024xf32> to vector<8x1024xbf16>
    %c0_15 = arith.constant 0 : index
    %c0_16 = arith.constant 0 : index
    %25 = vector.load %arg7[%c0_15, %c0_16] : memref<1024x896xbf16, #tpu.memory_space<vmem>>, vector<1024x896xbf16>
    %cst_17 = arith.constant dense<0.000000e+00> : vector<8x896xf32>
    %26 = tpu.matmul %24, %25, %cst_17 {dimension_numbers = #tpu.dot_dimension_numbers<[1], [0], [0], [1], [0, 0, 1, 1], [], []>} : vector<8x1024xbf16>, vector<1024x896xbf16>, vector<8x896xf32> -> vector<8x896xf32>
    %c0_18 = arith.constant 0 : index
    %c0_19 = arith.constant 0 : index
    %27 = vector.load %arg8[%c0_18, %c0_19] : memref<1x896xf32, #tpu.memory_space<vmem>>, vector<1x896xf32>
    %28 = vector.broadcast %27 : vector<1x896xf32> to vector<8x896xf32>
    %29 = arith.addf %26, %28 : vector<8x896xf32>
    %cst_20 = arith.constant 0.000000e+00 : f32
    %30 = vector.broadcast %cst_20 : f32 to vector<8x896xf32>
    %31 = arith.subf %30, %29 : vector<8x896xf32>
    %32 = math.exp %31 : vector<8x896xf32>
    %cst_21 = arith.constant 1.000000e+00 : f32
    %33 = vector.broadcast %cst_21 : f32 to vector<8x896xf32>
    %34 = arith.addf %33, %32 : vector<8x896xf32>
    %35 = tpu.reciprocal %34 {approx = true} : vector<8x896xf32> -> vector<8x896xf32>
    %36 = arith.truncf %35 : vector<8x896xf32> to vector<8x896xbf16>
    %c0_22 = arith.constant 0 : index
    %c0_23 = arith.constant 0 : index
    %37 = vector.load %arg9[%c0_22, %c0_23] : memref<8x896xbf16, #tpu.memory_space<vmem>>, vector<8x896xbf16>
    tpu.vector_store %arg9[%c0_22, %c0_23], %36 {strides = array<i32>} : memref<8x896xbf16, #tpu.memory_space<vmem>>, vector<8x896xbf16>,
    return
  }
  func.func @transform_0(%arg0: i32) -> (i32, i32) {
    %c0_i32 = arith.constant 0 : i32
    %c0_i32_0 = arith.constant 0 : i32
    return %arg0, %c0_i32 : i32, i32
  }
  func.func @transform_1(%arg0: i32) -> (i32, i32) {
    %c0_i32 = arith.constant 0 : i32
    %c0_i32_0 = arith.constant 0 : i32
    return %arg0, %c0_i32 : i32, i32
  }
  func.func @transform_2(%arg0: i32) -> (i32, i32) {
    %c0_i32 = arith.constant 0 : i32
    %c0_i32_0 = arith.constant 0 : i32
    %c0_i32_1 = arith.constant 0 : i32
    return %c0_i32, %c0_i32_0 : i32, i32
  }
  func.func @transform_3(%arg0: i32) -> (i32, i32) {
    %c0_i32 = arith.constant 0 : i32
    %c0_i32_0 = arith.constant 0 : i32
    %c0_i32_1 = arith.constant 0 : i32
    return %c0_i32, %c0_i32_0 : i32, i32
  }
  func.func @transform_4(%arg0: i32) -> (i32, i32) {
    %c0_i32 = arith.constant 0 : i32
    %c0_i32_0 = arith.constant 0 : i32
    %c0_i32_1 = arith.constant 0 : i32
    return %c0_i32, %c0_i32_0 : i32, i32
  }
  func.func @transform_5(%arg0: i32) -> (i32, i32) {
    %c0_i32 = arith.constant 0 : i32
    %c0_i32_0 = arith.constant 0 : i32
    %c0_i32_1 = arith.constant 0 : i32
    return %c0_i32, %c0_i32_0 : i32, i32
  }
  func.func @transform_6(%arg0: i32) -> (i32, i32) {
    %c0_i32 = arith.constant 0 : i32
    %c0_i32_0 = arith.constant 0 : i32
    %c0_i32_1 = arith.constant 0 : i32
    return %c0_i32, %c0_i32_0 : i32, i32
  }
  func.func @transform_7(%arg0: i32) -> (i32, i32) {
    %c0_i32 = arith.constant 0 : i32
    %c0_i32_0 = arith.constant 0 : i32
    %c0_i32_1 = arith.constant 0 : i32
    return %c0_i32, %c0_i32_0 : i32, i32
  }
  func.func @transform_8(%arg0: i32) -> (i32, i32) {
    %c0_i32 = arith.constant 0 : i32
    %c0_i32_0 = arith.constant 0 : i32
    return %arg0, %c0_i32 : i32, i32
  }
}

module attributes {stable_mosaic.version = 11 : i64} {
  func.func @_decoder_kernel(%arg0: i32, %arg1: memref<8x1xi32, #tpu.memory_space<vmem>>, %arg2: memref<8x160xbf16, #tpu.memory_space<vmem>>, %arg3: memref<160x512xbf16, #tpu.memory_space<vmem>>, %arg4: memref<1x512xf32, #tpu.memory_space<vmem>>, %arg5: memref<512x1024xbf16, #tpu.memory_space<vmem>>, %arg6: memref<1x1024xf32, #tpu.memory_space<vmem>>, %arg7: memref<1024x896xbf16, #tpu.memory_space<vmem>>, %arg8: memref<1x896xf32, #tpu.memory_space<vmem>>, %arg9: memref<8x896xbf16, #tpu.memory_space<vmem>>) attributes {dimension_semantics = [#tpu.dimension_semantics<parallel>], iteration_bounds = array<i64: 1>, scalar_prefetch = 0 : i64, scratch_operands = 0 : i64, tpu.core_type = #tpu.core_type<tc>, window_params = [{transform_indices = @transform_0, window_bounds = array<i64: 8, 1>}, {transform_indices = @transform_1, window_bounds = array<i64: 8, 160>}, {pipeline_mode = #tpu.pipeline_mode<synchronous>, transform_indices = @transform_2, window_bounds = array<i64: 160, 512>}, {pipeline_mode = #tpu.pipeline_mode<synchronous>, transform_indices = @transform_3, window_bounds = array<i64: 1, 512>}, {pipeline_mode = #tpu.pipeline_mode<synchronous>, transform_indices = @transform_4, window_bounds = array<i64: 512, 1024>}, {pipeline_mode = #tpu.pipeline_mode<synchronous>, transform_indices = @transform_5, window_bounds = array<i64: 1, 1024>}, {pipeline_mode = #tpu.pipeline_mode<synchronous>, transform_indices = @transform_6, window_bounds = array<i64: 1024, 896>}, {pipeline_mode = #tpu.pipeline_mode<synchronous>, transform_indices = @transform_7, window_bounds = array<i64: 1, 896>}, {transform_indices = @transform_8, window_bounds = array<i64: 8, 896>}]} {
    %c0 = arith.constant 0 : index
    %c0_0 = arith.constant 0 : index
    %0 = vector.load %arg1[%c0, %c0_0] : memref<8x1xi32, #tpu.memory_space<vmem>>, vector<8x1xi32>
    %1 = tpu.iota {dimensions = array<i32: 1>} : vector<8x160xi32>
    %c4_i32 = arith.constant 4 : i32
    %2 = vector.broadcast %c4_i32 : i32 to vector<8x160xi32>
    %3 = arith.shrsi %1, %2 : vector<8x160xi32>
    %4 = vector.broadcast %0 : vector<8x1xi32> to vector<8x160xi32>
    %5 = arith.cmpi eq, %3, %4 : vector<8x160xi32>
    %c0_1 = arith.constant 0 : index
    %c0_2 = arith.constant 0 : index
    %6 = vector.load %arg2[%c0_1, %c0_2] : memref<8x160xbf16, #tpu.memory_space<vmem>>, vector<8x160xbf16>
    %cst = arith.constant 0.000000e+00 : bf16
    %7 = vector.broadcast %cst : bf16 to vector<8x160xbf16>
    %8 = arith.select %5, %6, %7 : vector<8x160xi1>, vector<8x160xbf16>
    %c0_3 = arith.constant 0 : index
    %c0_4 = arith.constant 0 : index
    %9 = vector.load %arg3[%c0_3, %c0_4] : memref<160x512xbf16, #tpu.memory_space<vmem>>, vector<160x512xbf16>
    %cst_5 = arith.constant dense<0.000000e+00> : vector<8x512xf32>
    %10 = tpu.matmul %8, %9, %cst_5 {dimension_numbers = #tpu.dot_dimension_numbers<[1], [0], [0], [1], [0, 0, 1, 1], [], []>} : vector<8x160xbf16>, vector<160x512xbf16>, vector<8x512xf32> -> vector<8x512xf32>
    %c0_6 = arith.constant 0 : index
    %c0_7 = arith.constant 0 : index
    %11 = vector.load %arg4[%c0_6, %c0_7] : memref<1x512xf32, #tpu.memory_space<vmem>>, vector<1x512xf32>
    %12 = vector.broadcast %11 : vector<1x512xf32> to vector<8x512xf32>
    %13 = arith.addf %10, %12 : vector<8x512xf32>
    %cst_8 = arith.constant 0.000000e+00 : f32
    %14 = vector.broadcast %cst_8 : f32 to vector<8x512xf32>
    %15 = arith.maximumf %13, %14 : vector<8x512xf32>
    %16 = arith.truncf %15 : vector<8x512xf32> to vector<8x512xbf16>
    %c0_9 = arith.constant 0 : index
    %c0_10 = arith.constant 0 : index
    %17 = vector.load %arg5[%c0_9, %c0_10] : memref<512x1024xbf16, #tpu.memory_space<vmem>>, vector<512x1024xbf16>
    %cst_11 = arith.constant dense<0.000000e+00> : vector<8x1024xf32>
    %18 = tpu.matmul %16, %17, %cst_11 {dimension_numbers = #tpu.dot_dimension_numbers<[1], [0], [0], [1], [0, 0, 1, 1], [], []>} : vector<8x512xbf16>, vector<512x1024xbf16>, vector<8x1024xf32> -> vector<8x1024xf32>
    %c0_12 = arith.constant 0 : index
    %c0_13 = arith.constant 0 : index
    %19 = vector.load %arg6[%c0_12, %c0_13] : memref<1x1024xf32, #tpu.memory_space<vmem>>, vector<1x1024xf32>
    %20 = vector.broadcast %19 : vector<1x1024xf32> to vector<8x1024xf32>
    %21 = arith.addf %18, %20 : vector<8x1024xf32>
    %cst_14 = arith.constant 0.000000e+00 : f32
    %22 = vector.broadcast %cst_14 : f32 to vector<8x1024xf32>
    %23 = arith.maximumf %21, %22 : vector<8x1024xf32>
    %24 = arith.truncf %23 : vector<8x1024xf32> to vector<8x1024xbf16>
    %c0_15 = arith.constant 0 : index
    %c0_16 = arith.constant 0 : index
    %25 = vector.load %arg7[%c0_15, %c0_16] : memref<1024x896xbf16, #tpu.memory_space<vmem>>, vector<1024x896xbf16>
    %cst_17 = arith.constant dense<0.000000e+00> : vector<8x896xf32>
    %26 = tpu.matmul %24, %25, %cst_17 {dimension_numbers = #tpu.dot_dimension_numbers<[1], [0], [0], [1], [0, 0, 1, 1], [], []>} : vector<8x1024xbf16>, vector<1024x896xbf16>, vector<8x896xf32> -> vector<8x896xf32>
    %c0_18 = arith.constant 0 : index
    %c0_19 = arith.constant 0 : index
    %27 = vector.load %arg8[%c0_18, %c0_19] : memref<1x896xf32, #tpu.memory_space<vmem>>, vector<1x896xf32>
    %28 = vector.broadcast %27 : vector<1x896xf32> to vector<8x896xf32>
    %29 = arith.addf %26, %28 : vector<8x896xf32>
    %cst_20 = arith.constant 0.000000e+00 : f32
    %30 = vector.broadcast %cst_20 : f32 to vector<8x896xf32>
    %31 = arith.subf %30, %29 : vector<8x896xf32>
    %32 = math.exp %31 : vector<8x896xf32>
    %cst_21 = arith.constant 1.000000e+00 : f32
    %33 = vector.broadcast %cst_21 : f32 to vector<8x896xf32>
    %34 = arith.addf %33, %32 : vector<8x896xf32>
    %35 = tpu.reciprocal %34 {approx = true} : vector<8x896xf32> -> vector<8x896xf32>
    %36 = arith.truncf %35 : vector<8x896xf32> to vector<8x896xbf16>
    %c0_22 = arith.constant 0 : index
    %c0_23 = arith.constant 0 : index
    %37 = vector.load %arg9[%c0_22, %c0_23] : memref<8x896xbf16, #tpu.memory_space<vmem>>, vector<8x896xbf16>
    tpu.vector_store %arg9[%c0_22, %c0_23], %36 {strides = array<i32>} : memref<8x896xbf16, #tpu.memory_space<vmem>>, vector<8x896xbf16>,
    return
  }
  func.func @transform_0(%arg0: i32) -> (i32, i32) {
    %c0_i32 = arith.constant 0 : i32
    %c0_i32_0 = arith.constant 0 : i32
    return %arg0, %c0_i32 : i32, i32
  }
  func.func @transform_1(%arg0: i32) -> (i32, i32) {
    %c0_i32 = arith.constant 0 : i32
    %c0_i32_0 = arith.constant 0 : i32
    return %arg0, %c0_i32 : i32, i32
  }
  func.func @transform_2(%arg0: i32) -> (i32, i32) {
    %c0_i32 = arith.constant 0 : i32
    %c0_i32_0 = arith.constant 0 : i32
    %c0_i32_1 = arith.constant 0 : i32
    return %c0_i32, %c0_i32_0 : i32, i32
  }
  func.func @transform_3(%arg0: i32) -> (i32, i32) {
    %c0_i32 = arith.constant 0 : i32
    %c0_i32_0 = arith.constant 0 : i32
    %c0_i32_1 = arith.constant 0 : i32
    return %c0_i32, %c0_i32_0 : i32, i32
  }
  func.func @transform_4(%arg0: i32) -> (i32, i32) {
    %c0_i32 = arith.constant 0 : i32
    %c0_i32_0 = arith.constant 0 : i32
    %c0_i32_1 = arith.constant 0 : i32
    return %c0_i32, %c0_i32_0 : i32, i32
  }
  func.func @transform_5(%arg0: i32) -> (i32, i32) {
    %c0_i32 = arith.constant 0 : i32
    %c0_i32_0 = arith.constant 0 : i32
    %c0_i32_1 = arith.constant 0 : i32
    return %c0_i32, %c0_i32_0 : i32, i32
  }
  func.func @transform_6(%arg0: i32) -> (i32, i32) {
    %c0_i32 = arith.constant 0 : i32
    %c0_i32_0 = arith.constant 0 : i32
    %c0_i32_1 = arith.constant 0 : i32
    return %c0_i32, %c0_i32_0 : i32, i32
  }
  func.func @transform_7(%arg0: i32) -> (i32, i32) {
    %c0_i32 = arith.constant 0 : i32
    %c0_i32_0 = arith.constant 0 : i32
    %c0_i32_1 = arith.constant 0 : i32
    return %c0_i32, %c0_i32_0 : i32, i32
  }
  func.func @transform_8(%arg0: i32) -> (i32, i32) {
    %c0_i32 = arith.constant 0 : i32
    %c0_i32_0 = arith.constant 0 : i32
    return %arg0, %c0_i32 : i32, i32
  }
}

</mosaic_0001>

<bundles_post_ra>
// kernel: tpu_custom_call.1
= control target key start
LH: loop header
LB: loop body
LE: loop exit
PB: predicated region body
PF: predicated region fallthrough
CT: control target
= control target key end

     0   :  { %13 = vsyncpa [#allocation3], 0  ;;  %s8141_s0 = inlined_call_operand.vmem [shape: s32[8,1], index: 0, kind: input, shape index: {}]   ;;  %s8142_s1 = inlined_call_operand.hbm [shape: bf16[8,160], index: 1, kind: input, shape index: {}]   ;;  %s8143_s2 = inlined_call_operand.hbm [shape: bf16[160,512], index: 2, kind: input, shape index: {}]   ;;  %s8144_s3 = inlined_call_operand.hbm [shape: f32[1,512], index: 3, kind: input, shape index: {}]   ;;  %s8145_s4 = inlined_call_operand.hbm [shape: bf16[512,1024], index: 4, kind: input, shape index: {}]   ;;  %s8146_s5 = inlined_call_operand.hbm [shape: f32[1,1024], index: 5, kind: input, shape index: {}]   ;;  %s8147_s6 = inlined_call_operand.hbm [shape: bf16[1024,896], index: 6, kind: input, shape index: {}]   ;;  %s8148_s7 = inlined_call_operand.hbm [shape: f32[1,896], index: 7, kind: input, shape index: {}]   ;;  %s8149_s8 = inlined_call_operand.hbm [shape: bf16[8,896], index: 8, kind: output, shape index: {}]  }
   0x1   :  { %14 = vsyncpa [#allocation6], 0 }
   0x2   :  { %15 = vsyncpa [#allocation9], 0 }
   0x3   :  { %16 = vsyncpa [#allocation12], 0 }
   0x4   :  { %17 = vsyncpa [#allocation4], 0  ;;  %s7846_s27 = smov [#allocation5]   ;;  %s7660_s9 = scalar_lea.hbm %s8143_s2, 5120 }
   0x5   :  { %s35_s28 = sshll.u32 %s7846_s27, 4  ;;  %p7661_p0 = scmp.ne.s32.totalorder %s8143_s2, %s7660_s9  ;;  %s36_s28 = int_to_ptr.vmem [resolvable:$true] %s35_s28 }
   0x6   :  { %p7664_p1 = scmp.lt.u32.totalorder %s7660_s9, %s8143_s2 }
   0x8   :  { %p7666_p2 = pnand %p7664_p1, %p7661_p0 }
   0xa   :  { %7669 = shalt.err (!%p7666_p2)
}
   0xb   :  { %s7670_s14 = scalar_lea.vmem %s36_s28, 5120  ;;  %p7675_p4 = scmp.lt.s32.totalorder %s36_s28, %s36_s28 }
   0xc   :  { %p7671_p3 = scmp.ne.s32.totalorder %s36_s28, %s7670_s14  ;;  %p7676_p5 = scmp.lt.s32.totalorder %s7670_s14, %s7670_s14 }
   0xe   :  { %p7677_p6 = por %p7676_p5, %p7675_p4 }
  0x10   :  { %p7678_p7 = pnand %p7677_p6, %p7671_p3 }
  0x12   :  { %7681 = shalt.err (!%p7678_p7)
}
  0x13   :  { %s7847_s15 = smov 256   ;;  %s7848_s16 = smov 16  }
  0x14   :  { %41 = dma.hbm_to_vmem [thread:$0]  %s8143_s2, 5120, %s36_s28, [#allocation6], %s7847_s15, %s7847_s15, %s7848_s16  }
  0x15   :  { %s7849_s19 = smov [#allocation8]   ;;  %s7682_s23 = scalar_lea.hbm %s8145_s4, 32768 }
  0x16   :  { %s57_s20 = sshll.u32 %s7849_s19, 4  ;;  %p7683_p8 = scmp.ne.s32.totalorder %s8145_s4, %s7682_s23  ;;  %s58_s20 = int_to_ptr.vmem [resolvable:$true] %s57_s20 }
  0x17   :  { %p7686_p9 = scmp.lt.u32.totalorder %s7682_s23, %s8145_s4 }
  0x19   :  { %p7688_p10 = pnand %p7686_p9, %p7683_p8 }
  0x1b   :  { %7691 = shalt.err (!%p7688_p10)
}
  0x1c   :  { %s7692_s29 = scalar_lea.vmem %s58_s20, 32768  ;;  %p7697_p12 = scmp.lt.s32.totalorder %s58_s20, %s58_s20 }
  0x1d   :  { %p7693_p11 = scmp.ne.s32.totalorder %s58_s20, %s7692_s29  ;;  %p7698_p13 = scmp.lt.s32.totalorder %s7692_s29, %s7692_s29 }
  0x1f   :  { %p7699_p0 = por %p7698_p13, %p7697_p12 }
  0x21   :  { %p7700_p1 = pnand %p7699_p0, %p7693_p11 }
  0x23   :  { %7703 = shalt.err (!%p7700_p1)
}
  0x24   :  { %s7850_s2 = smov 512   ;;  %s7851_s28 = smov 32  }
  0x25   :  { %63 = dma.hbm_to_vmem [thread:$0]  %s8145_s4, 32768, %s58_s20, [#allocation9], %s7850_s2, %s7850_s2, %s7851_s28  }
  0x26   :  { %s7852_s10 = smov [#allocation11]   ;;  %s7704_s14 = scalar_lea.hbm %s8147_s6, 57344 }
  0x27   :  { %s79_s11 = sshll.u32 %s7852_s10, 4  ;;  %p7705_p2 = scmp.ne.s32.totalorder %s8147_s6, %s7704_s14  ;;  %s80_s11 = int_to_ptr.vmem [resolvable:$true] %s79_s11 }
  0x28   :  { %p7708_p3 = scmp.lt.u32.totalorder %s7704_s14, %s8147_s6 }
  0x2a   :  { %p7710_p4 = pnand %p7708_p3, %p7705_p2 }
  0x2c   :  { %7713 = shalt.err (!%p7710_p4)
}
  0x2d   :  { %s7714_s19 = scalar_lea.vmem %s80_s11, 57344  ;;  %p7719_p6 = scmp.lt.s32.totalorder %s80_s11, %s80_s11 }
  0x2e   :  { %p7715_p5 = scmp.ne.s32.totalorder %s80_s11, %s7714_s19  ;;  %p7720_p7 = scmp.lt.s32.totalorder %s7714_s19, %s7714_s19 }
  0x30   :  { %p7721_p8 = por %p7720_p7, %p7719_p6 }
  0x32   :  { %p7722_p9 = pnand %p7721_p8, %p7715_p5 }
  0x34   :  { %7725 = shalt.err (!%p7722_p9)
}
  0x35   :  { %s7853_s4 = smov 448   ;;  %s7854_s20 = smov 28  }
  0x36   :  { %85 = dma.hbm_to_vmem [thread:$0]  %s8147_s6, 57344, %s80_s11, [#allocation12], %s7853_s4, %s7853_s4, %s7854_s20  }
  0x37   :  { %s7855_s23 = smov [#allocation2]   ;;  %s7856_s25 = smov [#allocation7]  }
  0x38   :  { %s26_s24 = sshll.u32 %s7855_s23, 4  ;;  %s48_s26 = sshll.u32 %s7856_s25, 4  ;;  %s27_s24 = int_to_ptr.vmem [resolvable:$true] %s26_s24  ;;  %s49_s26 = int_to_ptr.vmem [resolvable:$true] %s48_s26 }
  0x39   :  { %s7726_s2 = scalar_lea.hbm %s8142_s1, 128 }
  0x3a   :  { %p7727_p10 = scmp.ne.s32.totalorder %s8142_s1, %s7726_s2  ;;  %p7730_p11 = scmp.lt.u32.totalorder %s7726_s2, %s8142_s1 }
  0x3c   :  { %p7732_p12 = pnand %p7730_p11, %p7727_p10 }
  0x3e   :  { %7735 = shalt.err (!%p7732_p12)
}
  0x3f   :  { %s7736_s6 = scalar_lea.vmem %s27_s24, 128  ;;  %p7741_p0 = scmp.lt.s32.totalorder %s27_s24, %s27_s24 }
  0x40   :  { %p7737_p13 = scmp.ne.s32.totalorder %s27_s24, %s7736_s6  ;;  %p7742_p1 = scmp.lt.s32.totalorder %s7736_s6, %s7736_s6 }
  0x42   :  { %p7743_p2 = por %p7742_p1, %p7741_p0 }
  0x44   :  { %p7744_p3 = pnand %p7743_p2, %p7737_p13 }
  0x46   :  { %7747 = shalt.err (!%p7744_p3)
}
  0x47   :  { %29 = dma.hbm_to_vmem [thread:$0]  %s8142_s1, 128, %s27_s24, [#allocation3]  }
  0x48   :  { %s7748_s15 = scalar_lea.hbm %s8144_s3, 64 }
  0x49   :  { %p7749_p4 = scmp.ne.s32.totalorder %s8144_s3, %s7748_s15  ;;  %p7752_p5 = scmp.lt.u32.totalorder %s7748_s15, %s8144_s3 }
  0x4b   :  { %p7754_p6 = pnand %p7752_p5, %p7749_p4 }
  0x4d   :  { %7757 = shalt.err (!%p7754_p6)
}
  0x4e   :  { %s7758_s4 = scalar_lea.vmem %s49_s26, 64  ;;  %p7763_p8 = scmp.lt.s32.totalorder %s49_s26, %s49_s26 }
  0x4f   :  { %p7759_p7 = scmp.ne.s32.totalorder %s49_s26, %s7758_s4  ;;  %p7764_p9 = scmp.lt.s32.totalorder %s7758_s4, %s7758_s4 }
  0x51   :  { %p7765_p10 = por %p7764_p9, %p7763_p8 }
  0x53   :  { %p7766_p11 = pnand %p7765_p10, %p7759_p7 }
  0x55   :  { %7769 = shalt.err (!%p7766_p11)
}
  0x56   :  { %51 = dma.hbm_to_vmem [thread:$0]  %s8144_s3, 64, %s49_s26, [#allocation6]  }
  0x57   :  { %s7857_s21 = smov [#allocation10]   ;;  %s7858_s23 = smov [#allocation13]  }
  0x58   :  { %s70_s22 = sshll.u32 %s7857_s21, 4  ;;  %s92_s24 = sshll.u32 %s7858_s23, 4  ;;  %s71_s22 = int_to_ptr.vmem [resolvable:$true] %s70_s22  ;;  %s93_s24 = int_to_ptr.vmem [resolvable:$true] %s92_s24 }
  0x59   :  { %s7770_s29 = scalar_lea.hbm %s8146_s5, 128 }
  0x5a   :  { %p7771_p12 = scmp.ne.s32.totalorder %s8146_s5, %s7770_s29  ;;  %p7774_p13 = scmp.lt.u32.totalorder %s7770_s29, %s8146_s5 }
  0x5c   :  { %p7776_p0 = pnand %p7774_p13, %p7771_p12 }
  0x5e   :  { %7779 = shalt.err (!%p7776_p0)
}
  0x5f   :  { %s7780_s3 = scalar_lea.vmem %s71_s22, 128  ;;  %p7785_p2 = scmp.lt.s32.totalorder %s71_s22, %s71_s22 }
  0x60   :  { %p7781_p1 = scmp.ne.s32.totalorder %s71_s22, %s7780_s3  ;;  %p7786_p3 = scmp.lt.s32.totalorder %s7780_s3, %s7780_s3 }
  0x62   :  { %p7787_p4 = por %p7786_p3, %p7785_p2 }
  0x64   :  { %p7788_p5 = pnand %p7787_p4, %p7781_p1 }
  0x66   :  { %7791 = shalt.err (!%p7788_p5)
}
  0x67   :  { %73 = dma.hbm_to_vmem [thread:$0]  %s8146_s5, 128, %s71_s22, [#allocation9]  }
  0x68   :  { %s7792_s12 = scalar_lea.hbm %s8148_s7, 112 }
  0x69   :  { %p7793_p6 = scmp.ne.s32.totalorder %s8148_s7, %s7792_s12  ;;  %p7796_p7 = scmp.lt.u32.totalorder %s7792_s12, %s8148_s7 }
  0x6b   :  { %p7798_p8 = pnand %p7796_p7, %p7793_p6 }
  0x6d   :  { %7801 = shalt.err (!%p7798_p8)
}
  0x6e   :  { %s7802_s17 = scalar_lea.vmem %s93_s24, 112  ;;  %s7806_s18 = scalar_lea.vmem %s93_s24, 128 }
  0x6f   :  { %p7803_p9 = scmp.ne.s32.totalorder %s93_s24, %s7802_s17  ;;  %p7807_p10 = scmp.lt.s32.totalorder %s93_s24, %s93_s24 }
  0x70   :  { %p7808_p11 = scmp.lt.s32.totalorder %s7806_s18, %s7802_s17 }
  0x72   :  { %p7809_p12 = por %p7808_p11, %p7807_p10 }
  0x74   :  { %p7810_p13 = pnand %p7809_p12, %p7803_p9 }
  0x76   :  { %7813 = shalt.err (!%p7810_p13)
}
  0x77   :  { %95 = dma.hbm_to_vmem [thread:$0]  %s8148_s7, 112, %s93_s24, [#allocation12]  }
  0x78   :  { %7836 = dma.done.wait [#allocation3], 128  }
  0x79   :  { %7837 = vsyncadd [#allocation3], 4294967168 }
  0x7a   :  { %7838 = dma.done.wait [#allocation6], 5184  }
  0x7b   :  { %7839 = vsyncadd [#allocation6], 4294962112 }
  0x7c   :  { %7840 = dma.done.wait [#allocation9], 32896  }
  0x7d   :  { %7841 = vsyncadd [#allocation9], 4294934400 }
  0x7e   :  { %7842 = dma.done.wait [#allocation12], 57456  }
  0x7f   :  { %7843 = vsyncadd [#allocation12], 4294909840  ;;  %v7859_v0 = vmov 0   ;;  %v118_v1 = vld [vmem:[%s8141_s0] sm:$0xff]  ;;  %v6931_v2 = vld [vmem:[#allocation5 + $0x4] ss:$16 sps:$4 sm:$0xff]   ;;  %v119_v50 = vlaneseq }
  0x80   :  { %6930 = vset.pattern.permute.xlu0 %v7859_v0  ;;  %v6933_v3 = vld [vmem:[#allocation5 + $0xc] ss:$16 sps:$4 sm:$0xff]   ;;  %v6935_v4 = vld [vmem:[#allocation5] ss:$16 sps:$4 sm:$0xff]   ;;  %v6936_v5 = vld [vmem:[#allocation5 + $0x8] ss:$16 sps:$4 sm:$0xff]   ;;  %404 = vmatprep.subr.bf16.mxu0 %v6931_v2 }
  0x81   :  { %125 = vperm.xlu0 %6930, %v118_v1   ;;  %v6937_v6 = vld [vmem:[#allocation5 + $0x24] ss:$16 sps:$4 sm:$0xff]   ;;  %445 = vmatprep.subr.bf16.mxu1 %v6933_v3  ;;  %v6939_v7 = vld [vmem:[#allocation5 + $0x2c] ss:$16 sps:$4 sm:$0xff]   ;;  %v6941_v8 = vld [vmem:[#allocation5 + $0x20] ss:$16 sps:$4 sm:$0xff]  }
  0x82   :  { %405 = vmatpush1.bf16.msra.mxu0 %v6935_v4  ;;  %446 = vmatpush1.bf16.msra.mxu1 %v6936_v5  ;;  %v6942_v9 = vld [vmem:[#allocation5 + $0x28] ss:$16 sps:$4 sm:$0xff]   ;;  %v6943_v10 = vld [vmem:[#allocation5 + $0x44] ss:$16 sps:$4 sm:$0xff]   ;;  %v6945_v11 = vld [vmem:[#allocation5 + $0x4c] ss:$16 sps:$4 sm:$0xff]  }
  0x83   :  { %406 = vmatprep.subr.bf16.mxu0 %v6937_v6  ;;  %447 = vmatprep.subr.bf16.mxu1 %v6939_v7  ;;  %v6947_v12 = vld [vmem:[#allocation5 + $0x40] ss:$16 sps:$4 sm:$0xff]   ;;  %v6948_v13 = vld [vmem:[#allocation5 + $0x48] ss:$16 sps:$4 sm:$0xff]   ;;  %v6949_v14 = vld [vmem:[#allocation5 + $0x64] ss:$16 sps:$4 sm:$0xff]  }
  0x84   :  { %v6951_v15 = vld [vmem:[#allocation5 + $0x6c] ss:$16 sps:$4 sm:$0xff]   ;;  %v6953_v16 = vld [vmem:[#allocation5 + $0x60] ss:$16 sps:$4 sm:$0xff]   ;;  %v6954_v17 = vld [vmem:[#allocation5 + $0x68] ss:$16 sps:$4 sm:$0xff]  }
  0x85   :  { %v6955_v18 = vld [vmem:[#allocation5 + $0x84] ss:$16 sps:$4 sm:$0xff]   ;;  %v6957_v19 = vld [vmem:[#allocation5 + $0x8c] ss:$16 sps:$4 sm:$0xff]   ;;  %v6959_v20 = vld [vmem:[#allocation5 + $0x80] ss:$16 sps:$4 sm:$0xff]  }
  0x86   :  { %407 = vmatpush1.bf16.msra.mxu0 %v6941_v8  ;;  %448 = vmatpush1.bf16.msra.mxu1 %v6942_v9  ;;  %v6960_v21 = vld [vmem:[#allocation5 + $0x88] ss:$16 sps:$4 sm:$0xff]   ;;  %v6961_v22 = vld [vmem:[#allocation5 + $0xa4] ss:$16 sps:$4 sm:$0xff]   ;;  %v6963_v23 = vld [vmem:[#allocation5 + $0xac] ss:$16 sps:$4 sm:$0xff]  }
  0x87   :  { %408 = vmatprep.subr.bf16.mxu0 %v6943_v10  ;;  %449 = vmatprep.subr.bf16.mxu1 %v6945_v11  ;;  %v6965_v24 = vld [vmem:[#allocation5 + $0xa0] ss:$16 sps:$4 sm:$0xff]   ;;  %v6966_v25 = vld [vmem:[#allocation5 + $0xa8] ss:$16 sps:$4 sm:$0xff]   ;;  %v6967_v26 = vld [vmem:[#allocation5 + $0xc4] ss:$16 sps:$4 sm:$0xff]  }
  0x88   :  { %v6969_v27 = vld [vmem:[#allocation5 + $0xcc] ss:$16 sps:$4 sm:$0xff]   ;;  %v6971_v28 = vld [vmem:[#allocation5 + $0xc0] ss:$16 sps:$4 sm:$0xff]   ;;  %v6972_v29 = vld [vmem:[#allocation5 + $0xc8] ss:$16 sps:$4 sm:$0xff]  }
  0x89   :  { %v6973_v30 = vld [vmem:[#allocation5 + $0xe4] ss:$16 sps:$4 sm:$0xff]   ;;  %v6975_v31 = vld [vmem:[#allocation5 + $0xec] ss:$16 sps:$4 sm:$0xff]   ;;  %v6977_v34 = vld [vmem:[#allocation5 + $0xe0] ss:$16 sps:$4 sm:$0xff]  }
  0x8a   :  { %409 = vmatpush1.bf16.msra.mxu0 %v6947_v12  ;;  %450 = vmatpush1.bf16.msra.mxu1 %v6948_v13  ;;  %v494_v32 = vld [vmem:[#allocation8] sm:$0xff]  ;;  %v6981_v41 = vld [vmem:[#allocation5 + $0x10c] ss:$16 sps:$4 sm:$0xff]   ;;  %v6983_v42 = vld [vmem:[#allocation5 + $0x100] ss:$16 sps:$4 sm:$0xff]   ;;  %v120_v51 = vand.u32 127, %v119_v50 }
  0x8b   :  { %410 = vmatprep.subr.bf16.mxu0 %v6949_v14  ;;  %451 = vmatprep.subr.bf16.mxu1 %v6951_v15  ;;  %v498_v33 = vld [vmem:[#allocation8 + $0x20] sm:$0xff]  ;;  %v6987_v45 = vld [vmem:[#allocation5 + $0x12c] ss:$16 sps:$4 sm:$0xff]   ;;  %v6989_v46 = vld [vmem:[#allocation5 + $0x120] ss:$16 sps:$4 sm:$0xff]   ;;  %vm400_vm3 = vcmask 261120  }
  0x8c   :  { %v6051_v35 = vcombine.low %v494_v32, %v498_v33  ;;  %v622_v36 = vld [vmem:[#allocation8 + $0x400] sm:$0xff]  ;;  %v6052_v49 = vcombine.high %v494_v32, %v498_v33  ;;  %v121_v52 = vadd.s32 128, %v120_v51  ;;  %v122_v53 = vshra.s32 %v120_v51, 4  ;;  %v129_v55 = vld [vmem:[#allocation2] sm:$0xff]  ;;  %s7860_s0 = smov [#allocation14]  }
  0x8d   :  { %v626_v37 = vld [vmem:[#allocation8 + $0x420] sm:$0xff]  ;;  %s5995_s7 = sshll.u32 %s7860_s0, 4  ;;  %s5996_s7 = int_to_ptr.vmem [resolvable:$true] %s5995_s7 }
  0x8e   :  { %411 = vmatpush1.bf16.msra.mxu0 %v6953_v16  ;;  %452 = vmatpush1.bf16.msra.mxu1 %v6954_v17  ;;  %v6978_v38 = vld [vmem:[#allocation5 + $0xe8] ss:$16 sps:$4 sm:$0xff]   ;;  %v6979_v39 = vld [vmem:[#allocation5 + $0x104] ss:$16 sps:$4 sm:$0xff]   ;;  %v6179_v40 = vcombine.low %v622_v36, %v626_v37  ;;  %v6180_v48 = vcombine.high %v622_v36, %v626_v37  ;;  %v123_v54 = vshra.s32 %v121_v52, 4  ;;  %s7814_s20 = scalar_lea.vmem %s5996_s7, 448  ;;  %p7819_p1 = scmp.lt.s32.totalorder %s5996_s7, %s5996_s7 }
  0x8f   :  { %412 = vmatprep.subr.bf16.mxu0 %v6955_v18  ;;  %453 = vmatprep.subr.bf16.mxu1 %v6957_v19  ;;  %v6984_v43 = vld [vmem:[#allocation5 + $0x108] ss:$16 sps:$4 sm:$0xff]   ;;  %v6985_v44 = vld [vmem:[#allocation5 + $0x124] ss:$16 sps:$4 sm:$0xff]   ;;  %p7815_p0 = scmp.ne.s32.totalorder %s5996_s7, %s7814_s20  ;;  %p7820_p2 = scmp.lt.s32.totalorder %s7814_s20, %s7814_s20 }
  0x90   :  { %v6990_v47 = vld [vmem:[#allocation5 + $0x128] ss:$16 sps:$4 sm:$0xff]  }
  0x91   :  { %v502_v57 = vld [vmem:[#allocation8 + $0x40] sm:$0xff]  ;;  %p7821_p3 = por %p7820_p2, %p7819_p1 }
  0x92   :  { %413 = vmatpush1.bf16.msra.mxu0 %v6959_v20  ;;  %454 = vmatpush1.bf16.msra.mxu1 %v6960_v21  ;;  %v506_v58 = vld [vmem:[#allocation8 + $0x60] sm:$0xff] }
  0x93   :  { %414 = vmatprep.subr.bf16.mxu0 %v6961_v22  ;;  %455 = vmatprep.subr.bf16.mxu1 %v6963_v23  ;;  %v630_v59 = vld [vmem:[#allocation8 + $0x440] sm:$0xff]  ;;  %v6060_v4 = vcombine.high %v502_v57, %v506_v58  ;;  %v6059_v6 = vcombine.low %v502_v57, %v506_v58  ;;  %p7822_p4 = pnand %p7821_p3, %p7815_p0 }
  0x94   :  { %v634_v60 = vld [vmem:[#allocation8 + $0x460] sm:$0xff] }
  0x95   :  { %v510_v0 = vld [vmem:[#allocation8 + $0x80] sm:$0xff]  ;;  %v6188_v5 = vcombine.high %v630_v59, %v634_v60  ;;  %v6187_v7 = vcombine.low %v630_v59, %v634_v60 }
  0x96   :  { %415 = vmatpush1.bf16.msra.mxu0 %v6965_v24  ;;  %456 = vmatpush1.bf16.msra.mxu1 %v6966_v25  ;;  %v514_v1 = vld [vmem:[#allocation8 + $0xa0] sm:$0xff] }
  0x97   :  { %416 = vmatprep.subr.bf16.mxu0 %v6967_v26  ;;  %457 = vmatprep.subr.bf16.mxu1 %v6969_v27  ;;  %v638_v2 = vld [vmem:[#allocation8 + $0x480] sm:$0xff]  ;;  %v6068_v12 = vcombine.high %v510_v0, %v514_v1  ;;  %v6067_v14 = vcombine.low %v510_v0, %v514_v1 }
  0x98   :  { %v642_v3 = vld [vmem:[#allocation8 + $0x4a0] sm:$0xff] }
  0x99   :  { %v518_v8 = vld [vmem:[#allocation8 + $0xc0] sm:$0xff]  ;;  %v6196_v13 = vcombine.high %v638_v2, %v642_v3  ;;  %v6195_v15 = vcombine.low %v638_v2, %v642_v3 }
  0x9a   :  { %417 = vmatpush1.bf16.msra.mxu0 %v6971_v28  ;;  %458 = vmatpush1.bf16.msra.mxu1 %v6972_v29  ;;  %v522_v9 = vld [vmem:[#allocation8 + $0xe0] sm:$0xff] }
  0x9b   :  { %418 = vmatprep.subr.bf16.mxu0 %v6973_v30  ;;  %459 = vmatprep.subr.bf16.mxu1 %v6975_v31  ;;  %v646_v10 = vld [vmem:[#allocation8 + $0x4c0] sm:$0xff]  ;;  %v6076_v20 = vcombine.high %v518_v8, %v522_v9  ;;  %v6075_v22 = vcombine.low %v518_v8, %v522_v9 }
  0x9c   :  { %v650_v11 = vld [vmem:[#allocation8 + $0x4e0] sm:$0xff] }
  0x9d   :  { %v526_v16 = vld [vmem:[#allocation8 + $0x100] sm:$0xff]  ;;  %v6204_v21 = vcombine.high %v646_v10, %v650_v11  ;;  %v6203_v23 = vcombine.low %v646_v10, %v650_v11 }
  0x9e   :  { %419 = vmatpush1.bf16.msra.mxu0 %v6977_v34  ;;  %460 = vmatpush1.bf16.msra.mxu1 %v6978_v38  ;;  %v530_v17 = vld [vmem:[#allocation8 + $0x120] sm:$0xff] }
  0x9f   :  { %420 = vmatprep.subr.bf16.mxu0 %v6979_v39  ;;  %461 = vmatprep.subr.bf16.mxu1 %v6981_v41  ;;  %v654_v18 = vld [vmem:[#allocation8 + $0x500] sm:$0xff]  ;;  %v6084_v28 = vcombine.high %v526_v16, %v530_v17  ;;  %v6083_v30 = vcombine.low %v526_v16, %v530_v17 }
  0xa0   :  { %v658_v19 = vld [vmem:[#allocation8 + $0x520] sm:$0xff] }
  0xa1   :  { %v534_v24 = vld [vmem:[#allocation8 + $0x140] sm:$0xff]  ;;  %v6212_v29 = vcombine.high %v654_v18, %v658_v19  ;;  %v6211_v31 = vcombine.low %v654_v18, %v658_v19 }
  0xa2   :  { %421 = vmatpush1.bf16.msra.mxu0 %v6983_v42  ;;  %462 = vmatpush1.bf16.msra.mxu1 %v6984_v43  ;;  %v538_v25 = vld [vmem:[#allocation8 + $0x160] sm:$0xff] }
  0xa3   :  { %422 = vmatprep.subr.bf16.mxu0 %v6985_v44  ;;  %463 = vmatprep.subr.bf16.mxu1 %v6987_v45  ;;  %v662_v26 = vld [vmem:[#allocation8 + $0x540] sm:$0xff]  ;;  %v6092_v36 = vcombine.high %v534_v24, %v538_v25  ;;  %v6091_v38 = vcombine.low %v534_v24, %v538_v25 }
  0xa4   :  { %v666_v27 = vld [vmem:[#allocation8 + $0x560] sm:$0xff] }
  0xa5   :  { %v542_v32 = vld [vmem:[#allocation8 + $0x180] sm:$0xff]  ;;  %v6220_v37 = vcombine.high %v662_v26, %v666_v27  ;;  %v6219_v39 = vcombine.low %v662_v26, %v666_v27 }
  0xa6   :  { %423 = vmatpush1.bf16.msra.mxu0 %v6989_v46  ;;  %464 = vmatpush1.bf16.msra.mxu1 %v6990_v47  ;;  %v546_v33 = vld [vmem:[#allocation8 + $0x1a0] sm:$0xff] }
  0xa7   :  { %2113 = vmatprep.subr.bf16.mxu0 %v6180_v48  ;;  %2072 = vmatprep.subr.bf16.mxu1 %v6052_v49  ;;  %v670_v34 = vld [vmem:[#allocation8 + $0x580] sm:$0xff]  ;;  %v6100_v44 = vcombine.high %v542_v32, %v546_v33  ;;  %v6099_v46 = vcombine.low %v542_v32, %v546_v33 }
  0xa8   :  { %v554_v41 = vld [vmem:[#allocation8 + $0x1e0] sm:$0xff] }
  0xa9   :  { %v678_v42 = vld [vmem:[#allocation8 + $0x5c0] sm:$0xff] }
  0xaa   :  { %v682_v43 = vld [vmem:[#allocation8 + $0x5e0] sm:$0xff] }
  0xab   :  { %v558_v48 = vld [vmem:[#allocation8 + $0x200] sm:$0xff] }
  0xac   :  { %v562_v49 = vld [vmem:[#allocation8 + $0x220] sm:$0xff] }
  0xad   :  { %v686_v51 = vld [vmem:[#allocation8 + $0x600] sm:$0xff] }
  0xae   :  { %v690_v52 = vld [vmem:[#allocation8 + $0x620] sm:$0xff] }
  0xaf   :  { %v566_v57 = vld [vmem:[#allocation8 + $0x240] sm:$0xff]  ;;  %v6243_v0 = vcombine.low %v686_v51, %v690_v52 }
  0xb0   :  { %v570_v58 = vld [vmem:[#allocation8 + $0x260] sm:$0xff] }
  0xb1   :  { %v694_v59 = vld [vmem:[#allocation8 + $0x640] sm:$0xff] }
  0xb2   :  { %v698_v60 = vld [vmem:[#allocation8 + $0x660] sm:$0xff] }
  0xb3   :  { %v574_v1 = vld [vmem:[#allocation8 + $0x280] sm:$0xff]  ;;  %v6251_v8 = vcombine.low %v694_v59, %v698_v60 }
  0xb4   :  { %v578_v2 = vld [vmem:[#allocation8 + $0x2a0] sm:$0xff] }
  0xb5   :  { %v702_v3 = vld [vmem:[#allocation8 + $0x680] sm:$0xff] }
  0xb6   :  { %v582_v9 = vld [vmem:[#allocation8 + $0x2c0] sm:$0xff] }
  0xb7   :  { %v586_v10 = vld [vmem:[#allocation8 + $0x2e0] sm:$0xff] }
  0xb8   :  { %v710_v11 = vld [vmem:[#allocation8 + $0x6c0] sm:$0xff] }
  0xb9   :  { %v590_v17 = vld [vmem:[#allocation8 + $0x300] sm:$0xff] }
  0xba   :  { %v594_v18 = vld [vmem:[#allocation8 + $0x320] sm:$0xff] }
  0xbb   :  { %v718_v19 = vld [vmem:[#allocation8 + $0x700] sm:$0xff] }
  0xbc   :  { %v598_v25 = vld [vmem:[#allocation8 + $0x340] sm:$0xff] }
  0xbd   :  { %v602_v26 = vld [vmem:[#allocation8 + $0x360] sm:$0xff] }
  0xbe   :  { %v726_v27 = vld [vmem:[#allocation8 + $0x740] sm:$0xff]  ;;  %v6156_v33 = vcombine.high %v598_v25, %v602_v26 }
 0x100   :  { %v126_v56 = vpop.permute.xlu0 %125 }
 0x101   :  { %vm127_vm0 = vcmp.eq.s32.totalorder %v122_v53, %v126_v56  ;;  %vm128_vm1 = vcmp.eq.s32.totalorder %v123_v54, %v126_v56  ;;  %v6236_v54 = vcombine.high %v678_v42, %v682_v43  ;;  %v6235_v56 = vcombine.low %v678_v42, %v682_v43 }
 0x102   :  { %vm130_vm2 = vmpackc.low %vm128_vm1, %vm127_vm0 }
 0x103   :  { %v131_v61 = vsel %vm130_vm2, %v129_v55, 0 }
 0x104   :  { %v6007_v62 = vcombine.low %v131_v61, %v131_v61  ;;  %v6008_v63 = vcombine.high %v131_v61, %v131_v61  ;;  %v6116_v61 = vcombine.high %v558_v48, %v562_v49 }
 0x106   :  { %6049 = vmatprep.mubr.msk.bf16.mxu0 %vm400_vm3, %v6008_v63  ;;  %6050 = vmatprep.mubr.msk.bf16.mxu1 %vm400_vm3, %v6008_v63  ;;  %v6115_v63 = vcombine.low %v558_v48, %v562_v49  ;;  %v746_v49 = vld [vmem:[#allocation8 + $0x7e0] sm:$0xff] }
 0x107   :  { %437 = vmatmul.mubr.bf16.vlgmr.msra.gmra.mrb[0].mxu0 %v6007_v62  ;;  %478 = vmatmul.mubr.bf16.vlgmr.msra.gmra.mrb[0].mxu1 %v6007_v62  ;;  %v6244_v62 = vcombine.high %v686_v51, %v690_v52 }
 0x108   :  { %2073 = vmatpush1.bf16.msra.mxu1 %v6051_v35  ;;  %2114 = vmatpush1.bf16.msra.mxu0 %v6179_v40  ;;  %v674_v35 = vld [vmem:[#allocation8 + $0x5a0] sm:$0xff] }
 0x109   :  { %2074 = vmatprep.subr.bf16.mxu1 %v6060_v4  ;;  %2115 = vmatprep.subr.bf16.mxu0 %v6188_v5  ;;  %v550_v40 = vld [vmem:[#allocation8 + $0x1c0] sm:$0xff]  ;;  %v6228_v45 = vcombine.high %v670_v34, %v674_v35  ;;  %v6227_v47 = vcombine.low %v670_v34, %v674_v35  ;;  %v6124_v5 = vcombine.high %v566_v57, %v570_v58 }
 0x10a   :  { %v6108_v53 = vcombine.high %v550_v40, %v554_v41  ;;  %v6107_v55 = vcombine.low %v550_v40, %v554_v41  ;;  %v706_v4 = vld [vmem:[#allocation8 + $0x6a0] sm:$0xff]  ;;  %v6155_v35 = vcombine.low %v598_v25, %v602_v26  ;;  %v504_v25 = vld [vmem:[#allocation8 + $0x50] sm:$0xff] }
 0x10b   :  { %v6259_v16 = vcombine.low %v702_v3, %v706_v4  ;;  %v738_v41 = vld [vmem:[#allocation8 + $0x7a0] sm:$0xff]  ;;  %v508_v26 = vld [vmem:[#allocation8 + $0x70] sm:$0xff] }
 0x10c   :  { %2075 = vmatpush1.bf16.msra.mxu1 %v6059_v6  ;;  %2116 = vmatpush1.bf16.msra.mxu0 %v6187_v7  ;;  %v6252_v6 = vcombine.high %v694_v59, %v698_v60  ;;  %v6123_v7 = vcombine.low %v566_v57, %v570_v58  ;;  %v500_v58 = vld [vmem:[#allocation8 + $0x30] sm:$0xff] }
 0x10d   :  { %2076 = vmatprep.subr.bf16.mxu1 %v6068_v12  ;;  %2117 = vmatprep.subr.bf16.mxu0 %v6196_v13  ;;  %v714_v12 = vld [vmem:[#allocation8 + $0x6e0] sm:$0xff]  ;;  %v6132_v13 = vcombine.high %v574_v1, %v578_v2 }
 0x10e   :  { %v6267_v24 = vcombine.low %v710_v11, %v714_v12 }
 0x110   :  { %2077 = vmatpush1.bf16.msra.mxu1 %v6067_v14  ;;  %2118 = vmatpush1.bf16.msra.mxu0 %v6195_v15  ;;  %v6260_v14 = vcombine.high %v702_v3, %v706_v4  ;;  %v6131_v15 = vcombine.low %v574_v1, %v578_v2  ;;  %v172_v1 = vld [vmem:[#allocation7] sm:$0xf] }
 0x111   :  { %2078 = vmatprep.subr.bf16.mxu1 %v6076_v20  ;;  %2119 = vmatprep.subr.bf16.mxu0 %v6204_v21  ;;  %v722_v20 = vld [vmem:[#allocation8 + $0x720] sm:$0xff]  ;;  %v6140_v21 = vcombine.high %v582_v9, %v586_v10 }
 0x112   :  { %v6275_v32 = vcombine.low %v718_v19, %v722_v20 }
 0x114   :  { %2079 = vmatpush1.bf16.msra.mxu1 %v6075_v22  ;;  %2120 = vmatpush1.bf16.msra.mxu0 %v6203_v23  ;;  %v6268_v22 = vcombine.high %v710_v11, %v714_v12  ;;  %v6139_v23 = vcombine.low %v582_v9, %v586_v10 }
 0x115   :  { %2080 = vmatprep.subr.bf16.mxu1 %v6084_v28  ;;  %2121 = vmatprep.subr.bf16.mxu0 %v6212_v29  ;;  %v730_v28 = vld [vmem:[#allocation8 + $0x760] sm:$0xff]  ;;  %v6148_v29 = vcombine.high %v590_v17, %v594_v18 }
 0x116   :  { %v6284_v34 = vcombine.high %v726_v27, %v730_v28 }
 0x118   :  { %2081 = vmatpush1.bf16.msra.mxu1 %v6083_v30  ;;  %2122 = vmatpush1.bf16.msra.mxu0 %v6211_v31  ;;  %v6276_v30 = vcombine.high %v718_v19, %v722_v20  ;;  %v6147_v31 = vcombine.low %v590_v17, %v594_v18 }
 0x119   :  { %2082 = vmatprep.subr.bf16.mxu1 %v6092_v36  ;;  %2123 = vmatprep.subr.bf16.mxu0 %v6220_v37  ;;  %v6283_v36 = vcombine.low %v726_v27, %v730_v28  ;;  %v606_v37 = vld [vmem:[#allocation8 + $0x380] sm:$0xff] }
 0x11c   :  { %2083 = vmatpush1.bf16.msra.mxu1 %v6091_v38  ;;  %2124 = vmatpush1.bf16.msra.mxu0 %v6219_v39  ;;  %v610_v38 = vld [vmem:[#allocation8 + $0x3a0] sm:$0xff] }
 0x11d   :  { %2084 = vmatprep.subr.bf16.mxu1 %v6100_v44  ;;  %2125 = vmatprep.subr.bf16.mxu0 %v6228_v45  ;;  %v734_v39 = vld [vmem:[#allocation8 + $0x780] sm:$0xff]  ;;  %v6164_v40 = vcombine.high %v606_v37, %v610_v38  ;;  %v6163_v42 = vcombine.low %v606_v37, %v610_v38  ;;  %v6063_v38 = vcombine.low %v504_v25, %v508_v26 }
 0x11e   :  { %v6291_v43 = vcombine.low %v734_v39, %v738_v41  ;;  %v6292_v44 = vcombine.high %v734_v39, %v738_v41  ;;  %v614_v45 = vld [vmem:[#allocation8 + $0x3c0] sm:$0xff]  ;;  %v519_v41 = vld [vmem:[#allocation8 + $0xc8] sm:$0xff] }
 0x120   :  { %2085 = vmatpush1.bf16.msra.mxu1 %v6099_v46  ;;  %2126 = vmatpush1.bf16.msra.mxu0 %v6227_v47  ;;  %v618_v46 = vld [vmem:[#allocation8 + $0x3e0] sm:$0xff] }
 0x121   :  { %2086 = vmatprep.subr.bf16.mxu1 %v6108_v53  ;;  %2127 = vmatprep.subr.bf16.mxu0 %v6236_v54  ;;  %v742_v47 = vld [vmem:[#allocation8 + $0x7c0] sm:$0xff]  ;;  %v6172_v48 = vcombine.high %v614_v45, %v618_v46  ;;  %v6171_v51 = vcombine.low %v614_v45, %v618_v46  ;;  %v495_v54 = vld [vmem:[#allocation8 + $0x8] sm:$0xff] }
 0x122   :  { %v6299_v52 = vcombine.low %v742_v47, %v746_v49  ;;  %v6300_v53 = vcombine.high %v742_v47, %v746_v49  ;;  %v527_v49 = vld [vmem:[#allocation8 + $0x108] sm:$0xff] }
 0x124   :  { %2087 = vmatpush1.bf16.msra.mxu1 %v6107_v55  ;;  %2128 = vmatpush1.bf16.msra.mxu0 %v6235_v56  ;;  %v499_v55 = vld [vmem:[#allocation8 + $0x28] sm:$0xff]  ;;  %v496_v56 = vld [vmem:[#allocation8 + $0x10] sm:$0xff] }
 0x125   :  { %2088 = vmatprep.subr.bf16.mxu1 %v6116_v61  ;;  %2129 = vmatprep.subr.bf16.mxu0 %v6244_v62  ;;  %v6054_v57 = vcombine.high %v495_v54, %v499_v55  ;;  %v6053_v59 = vcombine.low %v495_v54, %v499_v55  ;;  %v6055_v60 = vcombine.low %v496_v56, %v500_v58  ;;  %v7995_v62 = vshrl.u32 %v119_v50, 7 }
 0x126   :  { %v6056_v61 = vcombine.high %v496_v56, %v500_v58  ;;  %v535_v58 = vld [vmem:[#allocation8 + $0x148] sm:$0xff] }
 0x127   :  { %v8004_v2 = vsub.s32 1, %v7995_v62  ;;  %v8007_v3 = vsub.s32 3, %v7995_v62 }
 0x128   :  { %2089 = vmatpush1.bf16.msra.mxu1 %v6115_v63  ;;  %2130 = vmatpush1.bf16.msra.mxu0 %v6243_v0  ;;  %v7998_v63 = vsub.s32 0, %v7995_v62  ;;  %v8001_v0 = vsub.s32 2, %v7995_v62 }
 0x129   :  { %2090 = vmatprep.subr.bf16.mxu1 %v6124_v5  ;;  %2131 = vmatprep.subr.bf16.mxu0 %v6252_v6  ;;  %v181_v50 = vrot.slane %v172_v1, %v8004_v2  ;;  %v189_v6 = vrot.slane %v172_v1, %v8007_v3 }
 0x12a   :  { %v177_v4 = vrot.slane %v172_v1, %v7998_v63  ;;  %v185_v5 = vrot.slane %v172_v1, %v8001_v0 }
 0x12c   :  { %2091 = vmatpush1.bf16.msra.mxu1 %v6123_v7  ;;  %2132 = vmatpush1.bf16.msra.mxu0 %v6251_v8 }
 0x12d   :  { %2092 = vmatprep.subr.bf16.mxu1 %v6132_v13  ;;  %2133 = vmatprep.subr.bf16.mxu0 %v6260_v14 }
 0x130   :  { %2093 = vmatpush1.bf16.msra.mxu1 %v6131_v15  ;;  %2134 = vmatpush1.bf16.msra.mxu0 %v6259_v16 }
 0x131   :  { %2094 = vmatprep.subr.bf16.mxu1 %v6140_v21  ;;  %2135 = vmatprep.subr.bf16.mxu0 %v6268_v22 }
 0x134   :  { %2095 = vmatpush1.bf16.msra.mxu1 %v6139_v23  ;;  %2136 = vmatpush1.bf16.msra.mxu0 %v6267_v24  ;;  %v503_v23 = vld [vmem:[#allocation8 + $0x48] sm:$0xff] }
 0x135   :  { %2096 = vmatprep.subr.bf16.mxu1 %v6148_v29  ;;  %2137 = vmatprep.subr.bf16.mxu0 %v6276_v30  ;;  %v507_v24 = vld [vmem:[#allocation8 + $0x68] sm:$0xff] }
 0x136   :  { %v6061_v37 = vcombine.low %v503_v23, %v507_v24 }
 0x138   :  { %2097 = vmatpush1.bf16.msra.mxu1 %v6147_v31  ;;  %2138 = vmatpush1.bf16.msra.mxu0 %v6275_v32  ;;  %v511_v31 = vld [vmem:[#allocation8 + $0x88] sm:$0xff]  ;;  %v6062_v32 = vcombine.high %v503_v23, %v507_v24  ;;  %v560_v24 = vld [vmem:[#allocation8 + $0x210] sm:$0xff] }
 0x139   :  { %2098 = vmatprep.subr.bf16.mxu1 %v6156_v33  ;;  %2139 = vmatprep.subr.bf16.mxu0 %v6284_v34  ;;  %v6064_v33 = vcombine.high %v504_v25, %v508_v26  ;;  %v515_v34 = vld [vmem:[#allocation8 + $0xa8] sm:$0xff]  ;;  %v564_v25 = vld [vmem:[#allocation8 + $0x230] sm:$0xff] }
 0x13a   :  { %v6070_v39 = vcombine.high %v511_v31, %v515_v34  ;;  %v6069_v45 = vcombine.low %v511_v31, %v515_v34  ;;  %v563_v23 = vld [vmem:[#allocation8 + $0x228] sm:$0xff] }
 0x13b   :  { %v567_v34 = vld [vmem:[#allocation8 + $0x248] sm:$0xff] }
 0x13c   :  { %2099 = vmatpush1.bf16.msra.mxu1 %v6155_v35  ;;  %2140 = vmatpush1.bf16.msra.mxu0 %v6283_v36  ;;  %v512_v35 = vld [vmem:[#allocation8 + $0x90] sm:$0xff] }
 0x13d   :  { %2100 = vmatprep.subr.bf16.mxu1 %v6164_v40  ;;  %2141 = vmatprep.subr.bf16.mxu0 %v6292_v44  ;;  %v516_v36 = vld [vmem:[#allocation8 + $0xb0] sm:$0xff] }
 0x13e   :  { %v6072_v40 = vcombine.high %v512_v35, %v516_v36  ;;  %v524_v44 = vld [vmem:[#allocation8 + $0xf0] sm:$0xff]  ;;  %v6071_v46 = vcombine.low %v512_v35, %v516_v36  ;;  %v571_v35 = vld [vmem:[#allocation8 + $0x268] sm:$0xff] }
 0x13f   :  { %v568_v36 = vld [vmem:[#allocation8 + $0x250] sm:$0xff] }
 0x140   :  { %2101 = vmatpush1.bf16.msra.mxu1 %v6163_v42  ;;  %2142 = vmatpush1.bf16.msra.mxu0 %v6291_v43  ;;  %v523_v42 = vld [vmem:[#allocation8 + $0xe8] sm:$0xff]  ;;  %v520_v43 = vld [vmem:[#allocation8 + $0xd0] sm:$0xff] }
 0x141   :  { %2102 = vmatprep.subr.bf16.mxu1 %v6172_v48  ;;  %2143 = vmatprep.subr.bf16.mxu0 %v6300_v53  ;;  %v6078_v47 = vcombine.high %v519_v41, %v523_v42  ;;  %v6080_v48 = vcombine.high %v520_v43, %v524_v44  ;;  %v532_v53 = vld [vmem:[#allocation8 + $0x130] sm:$0xff]  ;;  %v6077_v54 = vcombine.low %v519_v41, %v523_v42  ;;  %v575_v42 = vld [vmem:[#allocation8 + $0x288] sm:$0xff] }
 0x142   :  { %v6079_v55 = vcombine.low %v520_v43, %v524_v44  ;;  %v579_v43 = vld [vmem:[#allocation8 + $0x2a8] sm:$0xff]  ;;  %v576_v44 = vld [vmem:[#allocation8 + $0x290] sm:$0xff] }
 0x144   :  { %2103 = vmatpush1.bf16.msra.mxu1 %v6171_v51  ;;  %2144 = vmatpush1.bf16.msra.mxu0 %v6299_v52  ;;  %v531_v51 = vld [vmem:[#allocation8 + $0x128] sm:$0xff]  ;;  %v528_v52 = vld [vmem:[#allocation8 + $0x110] sm:$0xff] }
 0x145   :  { %2154 = vmatprep.subr.bf16.mxu1 %v6054_v57  ;;  %2236 = vmatprep.subr.bf16.mxu0 %v6056_v61  ;;  %v6086_v56 = vcombine.high %v527_v49, %v531_v51  ;;  %v6088_v57 = vcombine.high %v528_v52, %v532_v53  ;;  %v540_v61 = vld [vmem:[#allocation8 + $0x170] sm:$0xff]  ;;  %v6085_v1 = vcombine.low %v527_v49, %v531_v51  ;;  %v583_v51 = vld [vmem:[#allocation8 + $0x2c8] sm:$0xff] }
 0x1da   :  { %v438_v7 = vpop.f32.mrb[0].mxu0  ;;  %v479_v8 = vpop.f32.mrb[0].mxu1 }
 0x1db   :  { %v439_v9 = vadd.f32 %v438_v7, %v177_v4  ;;  %v480_v10 = vadd.f32 %v479_v8, %v185_v5  ;;  %v440_v11 = vpop.f32.mrb[1].mxu0  ;;  %v481_v12 = vpop.f32.mrb[1].mxu1  ;;  %v6087_v4 = vcombine.low %v528_v52, %v532_v53  ;;  %v547_v7 = vld [vmem:[#allocation8 + $0x1a8] sm:$0xff]  ;;  %v544_v8 = vld [vmem:[#allocation8 + $0x190] sm:$0xff] }
 0x1dc   :  { %v441_v13 = vadd.f32 %v440_v11, %v181_v50  ;;  %v482_v14 = vadd.f32 %v481_v12, %v189_v6  ;;  %v442_v15 = vpop.f32.mrb[2].mxu0  ;;  %v483_v16 = vpop.f32.mrb[2].mxu1  ;;  %v543_v6 = vld [vmem:[#allocation8 + $0x188] sm:$0xff]  ;;  %v584_v53 = vld [vmem:[#allocation8 + $0x2d0] sm:$0xff] }
 0x1dd   :  { %v486_v17 = vmax.f32 %v439_v9, 0.0  ;;  %v488_v18 = vmax.f32 %v480_v10, 0.0  ;;  %v443_v19 = vpop.f32.mrb[3].mxu0  ;;  %v484_v20 = vpop.f32.mrb[3].mxu1  ;;  %v548_v9 = vld [vmem:[#allocation8 + $0x1b0] sm:$0xff]  ;;  %v6102_v12 = vcombine.high %v543_v6, %v547_v7  ;;  %v555_v15 = vld [vmem:[#allocation8 + $0x1e8] sm:$0xff] }
 0x1de   :  { %v487_v21 = vmax.f32 %v441_v13, 0.0  ;;  %v489_v22 = vmax.f32 %v482_v14, 0.0  ;;  %v6104_v13 = vcombine.high %v544_v8, %v548_v9  ;;  %v551_v14 = vld [vmem:[#allocation8 + $0x1c8] sm:$0xff]  ;;  %v552_v16 = vld [vmem:[#allocation8 + $0x1d0] sm:$0xff]  ;;  %v6103_v19 = vcombine.low %v544_v8, %v548_v9 }
 0x1df   :  { %v8017_v29 = vpack.c.bf16 %v486_v17, %v486_v17  ;;  %v8019_v30 = vpack.c.bf16 %v488_v18, %v488_v18  ;;  %v556_v17 = vld [vmem:[#allocation8 + $0x1f0] sm:$0xff]  ;;  %v6101_v18 = vcombine.low %v543_v6, %v547_v7  ;;  %v6110_v20 = vcombine.high %v551_v14, %v555_v15  ;;  %v587_v52 = vld [vmem:[#allocation8 + $0x2e8] sm:$0xff] }
 0x1e0   :  { %v8013_v27 = vpack.c.bf16 %v487_v21, %v487_v21  ;;  %v8015_v28 = vpack.c.bf16 %v489_v22, %v489_v22  ;;  %v6112_v21 = vcombine.high %v552_v16, %v556_v17  ;;  %v559_v22 = vld [vmem:[#allocation8 + $0x208] sm:$0xff]  ;;  %v6109_v26 = vcombine.low %v551_v14, %v555_v15  ;;  %v600_v9 = vld [vmem:[#allocation8 + $0x350] sm:$0xff] }
 0x1e1   :  { %v6111_v31 = vcombine.low %v552_v16, %v556_v17  ;;  %v599_v7 = vld [vmem:[#allocation8 + $0x348] sm:$0xff]  ;;  %v608_v17 = vld [vmem:[#allocation8 + $0x390] sm:$0xff] }
 0x1e2   :  { %2104 = vmatprep.mubr.bf16.mxu1 %v8013_v27  ;;  %2145 = vmatprep.mubr.bf16.mxu0 %v8015_v28  ;;  %v603_v8 = vld [vmem:[#allocation8 + $0x368] sm:$0xff] }
 0x1e3   :  { %2105 = vmatmul.mubr.bf16.vlgmr.msra.gmra.mrb[4].mxu1 %v8017_v29  ;;  %2146 = vmatmul.mubr.bf16.vlgmr.msra.gmra.mrb[4].mxu0 %v8019_v30  ;;  %v607_v15 = vld [vmem:[#allocation8 + $0x388] sm:$0xff] }
 0x1e4   :  { %2155 = vmatpush1.bf16.msra.mxu1 %v6053_v59  ;;  %2237 = vmatpush1.bf16.msra.mxu0 %v6055_v60  ;;  %v539_v59 = vld [vmem:[#allocation8 + $0x168] sm:$0xff]  ;;  %v536_v60 = vld [vmem:[#allocation8 + $0x150] sm:$0xff] }
 0x1e5   :  { %2186 = vmatprep.mubr.bf16.mxu1 %v8013_v27  ;;  %2268 = vmatprep.mubr.bf16.mxu0 %v8013_v27  ;;  %v6094_v5 = vcombine.high %v535_v58, %v539_v59  ;;  %v6096_v50 = vcombine.high %v536_v60, %v540_v61  ;;  %v6093_v10 = vcombine.low %v535_v58, %v539_v59  ;;  %v591_v59 = vld [vmem:[#allocation8 + $0x308] sm:$0xff] }
 0x1e6   :  { %2156 = vmatprep.subr.bf16.mxu1 %v6062_v32  ;;  %2238 = vmatprep.subr.bf16.mxu0 %v6064_v33  ;;  %v6095_v11 = vcombine.low %v536_v60, %v540_v61  ;;  %v6118_v32 = vcombine.high %v559_v22, %v563_v23  ;;  %v6120_v33 = vcombine.high %v560_v24, %v564_v25  ;;  %v595_v60 = vld [vmem:[#allocation8 + $0x328] sm:$0xff]  ;;  %v592_v61 = vld [vmem:[#allocation8 + $0x310] sm:$0xff] }
 0x1e7   :  { %v611_v16 = vld [vmem:[#allocation8 + $0x3a8] sm:$0xff] }
 0x1e8   :  { %2157 = vmatpush1.bf16.msra.mxu1 %v6061_v37  ;;  %2239 = vmatpush1.bf16.msra.mxu0 %v6063_v38  ;;  %v572_v37 = vld [vmem:[#allocation8 + $0x270] sm:$0xff]  ;;  %v6117_v38 = vcombine.low %v559_v22, %v563_v23  ;;  %v615_v23 = vld [vmem:[#allocation8 + $0x3c8] sm:$0xff] }
 0x1e9   :  { %2158 = vmatprep.subr.bf16.mxu1 %v6070_v39  ;;  %2240 = vmatprep.subr.bf16.mxu0 %v6072_v40  ;;  %v6119_v39 = vcombine.low %v560_v24, %v564_v25  ;;  %v6126_v40 = vcombine.high %v567_v34, %v571_v35  ;;  %v6128_v41 = vcombine.high %v568_v36, %v572_v37  ;;  %v619_v24 = vld [vmem:[#allocation8 + $0x3e8] sm:$0xff]  ;;  %v616_v25 = vld [vmem:[#allocation8 + $0x3d0] sm:$0xff] }
 0x1ec   :  { %2159 = vmatpush1.bf16.msra.mxu1 %v6069_v45  ;;  %2241 = vmatpush1.bf16.msra.mxu0 %v6071_v46  ;;  %v580_v45 = vld [vmem:[#allocation8 + $0x2b0] sm:$0xff]  ;;  %v6125_v46 = vcombine.low %v567_v34, %v571_v35  ;;  %v623_v35 = vld [vmem:[#allocation8 + $0x408] sm:$0xff] }
 0x1ed   :  { %2160 = vmatprep.subr.bf16.mxu1 %v6078_v47  ;;  %2242 = vmatprep.subr.bf16.mxu0 %v6080_v48  ;;  %v6127_v47 = vcombine.low %v568_v36, %v572_v37  ;;  %v6134_v48 = vcombine.high %v575_v42, %v579_v43  ;;  %v6136_v49 = vcombine.high %v576_v44, %v580_v45  ;;  %v627_v36 = vld [vmem:[#allocation8 + $0x428] sm:$0xff]  ;;  %v624_v37 = vld [vmem:[#allocation8 + $0x410] sm:$0xff] }
 0x1f0   :  { %2161 = vmatpush1.bf16.msra.mxu1 %v6077_v54  ;;  %2243 = vmatpush1.bf16.msra.mxu0 %v6079_v55  ;;  %v588_v54 = vld [vmem:[#allocation8 + $0x2f0] sm:$0xff]  ;;  %v6133_v55 = vcombine.low %v575_v42, %v579_v43  ;;  %v631_v43 = vld [vmem:[#allocation8 + $0x448] sm:$0xff] }
 0x1f1   :  { %2162 = vmatprep.subr.bf16.mxu1 %v6086_v56  ;;  %2244 = vmatprep.subr.bf16.mxu0 %v6088_v57  ;;  %v6135_v56 = vcombine.low %v576_v44, %v580_v45  ;;  %v6142_v57 = vcombine.high %v583_v51, %v587_v52  ;;  %v6144_v58 = vcombine.high %v584_v53, %v588_v54  ;;  %v635_v44 = vld [vmem:[#allocation8 + $0x468] sm:$0xff]  ;;  %v632_v45 = vld [vmem:[#allocation8 + $0x450] sm:$0xff] }
 0x1f4   :  { %2163 = vmatpush1.bf16.msra.mxu1 %v6085_v1  ;;  %2245 = vmatpush1.bf16.msra.mxu0 %v6087_v4  ;;  %v596_v1 = vld [vmem:[#allocation8 + $0x330] sm:$0xff]  ;;  %v6141_v4 = vcombine.low %v583_v51, %v587_v52  ;;  %v639_v52 = vld [vmem:[#allocation8 + $0x488] sm:$0xff] }
 0x1f5   :  { %2164 = vmatprep.subr.bf16.mxu1 %v6094_v5  ;;  %2246 = vmatprep.subr.bf16.mxu0 %v6096_v50  ;;  %v6143_v5 = vcombine.low %v584_v53, %v588_v54  ;;  %v6150_v50 = vcombine.high %v591_v59, %v595_v60  ;;  %v6152_v6 = vcombine.high %v592_v61, %v596_v1  ;;  %v643_v53 = vld [vmem:[#allocation8 + $0x4a8] sm:$0xff]  ;;  %v640_v54 = vld [vmem:[#allocation8 + $0x490] sm:$0xff] }
 0x1f8   :  { %2165 = vmatpush1.bf16.msra.mxu1 %v6093_v10  ;;  %2247 = vmatpush1.bf16.msra.mxu0 %v6095_v11  ;;  %v604_v10 = vld [vmem:[#allocation8 + $0x370] sm:$0xff]  ;;  %v6149_v11 = vcombine.low %v591_v59, %v595_v60  ;;  %v647_v60 = vld [vmem:[#allocation8 + $0x4c8] sm:$0xff] }
 0x1f9   :  { %2166 = vmatprep.subr.bf16.mxu1 %v6102_v12  ;;  %2248 = vmatprep.subr.bf16.mxu0 %v6104_v13  ;;  %v6151_v12 = vcombine.low %v592_v61, %v596_v1  ;;  %v6158_v13 = vcombine.high %v599_v7, %v603_v8  ;;  %v6160_v14 = vcombine.high %v600_v9, %v604_v10  ;;  %v651_v61 = vld [vmem:[#allocation8 + $0x4e8] sm:$0xff]  ;;  %v648_v1 = vld [vmem:[#allocation8 + $0x4d0] sm:$0xff] }
 0x1fc   :  { %2167 = vmatpush1.bf16.msra.mxu1 %v6101_v18  ;;  %2249 = vmatpush1.bf16.msra.mxu0 %v6103_v19  ;;  %v612_v18 = vld [vmem:[#allocation8 + $0x3b0] sm:$0xff]  ;;  %v6157_v19 = vcombine.low %v599_v7, %v603_v8  ;;  %v655_v8 = vld [vmem:[#allocation8 + $0x508] sm:$0xff] }
 0x1fd   :  { %2168 = vmatprep.subr.bf16.mxu1 %v6110_v20  ;;  %2250 = vmatprep.subr.bf16.mxu0 %v6112_v21  ;;  %v6159_v20 = vcombine.low %v600_v9, %v604_v10  ;;  %v6166_v21 = vcombine.high %v607_v15, %v611_v16  ;;  %v6168_v22 = vcombine.high %v608_v17, %v612_v18  ;;  %v659_v9 = vld [vmem:[#allocation8 + $0x528] sm:$0xff]  ;;  %v656_v10 = vld [vmem:[#allocation8 + $0x510] sm:$0xff] }
 0x200   :  { %2169 = vmatpush1.bf16.msra.mxu1 %v6109_v26  ;;  %2251 = vmatpush1.bf16.msra.mxu0 %v6111_v31  ;;  %v620_v26 = vld [vmem:[#allocation8 + $0x3f0] sm:$0xff]  ;;  %v6165_v31 = vcombine.low %v607_v15, %v611_v16  ;;  %v663_v16 = vld [vmem:[#allocation8 + $0x548] sm:$0xff] }
 0x201   :  { %2170 = vmatprep.subr.bf16.mxu1 %v6118_v32  ;;  %2252 = vmatprep.subr.bf16.mxu0 %v6120_v33  ;;  %v6167_v32 = vcombine.low %v608_v17, %v612_v18  ;;  %v6174_v33 = vcombine.high %v615_v23, %v619_v24  ;;  %v6176_v34 = vcombine.high %v616_v25, %v620_v26  ;;  %v667_v17 = vld [vmem:[#allocation8 + $0x568] sm:$0xff]  ;;  %v664_v18 = vld [vmem:[#allocation8 + $0x550] sm:$0xff] }
 0x204   :  { %2171 = vmatpush1.bf16.msra.mxu1 %v6117_v38  ;;  %2253 = vmatpush1.bf16.msra.mxu0 %v6119_v39  ;;  %v628_v38 = vld [vmem:[#allocation8 + $0x430] sm:$0xff]  ;;  %v6173_v39 = vcombine.low %v615_v23, %v619_v24  ;;  %v671_v24 = vld [vmem:[#allocation8 + $0x588] sm:$0xff] }
 0x205   :  { %2172 = vmatprep.subr.bf16.mxu1 %v6126_v40  ;;  %2254 = vmatprep.subr.bf16.mxu0 %v6128_v41  ;;  %v6175_v40 = vcombine.low %v616_v25, %v620_v26  ;;  %v6182_v41 = vcombine.high %v623_v35, %v627_v36  ;;  %v6184_v42 = vcombine.high %v624_v37, %v628_v38  ;;  %v675_v25 = vld [vmem:[#allocation8 + $0x5a8] sm:$0xff]  ;;  %v672_v26 = vld [vmem:[#allocation8 + $0x590] sm:$0xff] }
 0x208   :  { %2173 = vmatpush1.bf16.msra.mxu1 %v6125_v46  ;;  %2255 = vmatpush1.bf16.msra.mxu0 %v6127_v47  ;;  %v636_v46 = vld [vmem:[#allocation8 + $0x470] sm:$0xff]  ;;  %v6181_v47 = vcombine.low %v623_v35, %v627_v36  ;;  %v679_v36 = vld [vmem:[#allocation8 + $0x5c8] sm:$0xff] }
 0x209   :  { %2174 = vmatprep.subr.bf16.mxu1 %v6134_v48  ;;  %2256 = vmatprep.subr.bf16.mxu0 %v6136_v49  ;;  %v6183_v48 = vcombine.low %v624_v37, %v628_v38  ;;  %v6190_v49 = vcombine.high %v631_v43, %v635_v44  ;;  %v6192_v51 = vcombine.high %v632_v45, %v636_v46  ;;  %v683_v37 = vld [vmem:[#allocation8 + $0x5e8] sm:$0xff]  ;;  %v680_v38 = vld [vmem:[#allocation8 + $0x5d0] sm:$0xff] }
 0x20c   :  { %2175 = vmatpush1.bf16.msra.mxu1 %v6133_v55  ;;  %2257 = vmatpush1.bf16.msra.mxu0 %v6135_v56  ;;  %v644_v55 = vld [vmem:[#allocation8 + $0x4b0] sm:$0xff]  ;;  %v6189_v56 = vcombine.low %v631_v43, %v635_v44  ;;  %v687_v44 = vld [vmem:[#allocation8 + $0x608] sm:$0xff] }
 0x20d   :  { %2176 = vmatprep.subr.bf16.mxu1 %v6142_v57  ;;  %2258 = vmatprep.subr.bf16.mxu0 %v6144_v58  ;;  %v6191_v57 = vcombine.low %v632_v45, %v636_v46  ;;  %v6198_v58 = vcombine.high %v639_v52, %v643_v53  ;;  %v6200_v59 = vcombine.high %v640_v54, %v644_v55  ;;  %v691_v45 = vld [vmem:[#allocation8 + $0x628] sm:$0xff]  ;;  %v688_v46 = vld [vmem:[#allocation8 + $0x610] sm:$0xff] }
 0x210   :  { %2177 = vmatpush1.bf16.msra.mxu1 %v6141_v4  ;;  %2259 = vmatpush1.bf16.msra.mxu0 %v6143_v5  ;;  %v652_v4 = vld [vmem:[#allocation8 + $0x4f0] sm:$0xff]  ;;  %v6197_v5 = vcombine.low %v639_v52, %v643_v53  ;;  %v695_v53 = vld [vmem:[#allocation8 + $0x648] sm:$0xff] }
 0x211   :  { %2178 = vmatprep.subr.bf16.mxu1 %v6150_v50  ;;  %2260 = vmatprep.subr.bf16.mxu0 %v6152_v6  ;;  %v6199_v50 = vcombine.low %v640_v54, %v644_v55  ;;  %v6206_v6 = vcombine.high %v647_v60, %v651_v61  ;;  %v6208_v7 = vcombine.high %v648_v1, %v652_v4  ;;  %v699_v54 = vld [vmem:[#allocation8 + $0x668] sm:$0xff]  ;;  %v696_v55 = vld [vmem:[#allocation8 + $0x650] sm:$0xff] }
 0x214   :  { %2179 = vmatpush1.bf16.msra.mxu1 %v6149_v11  ;;  %2261 = vmatpush1.bf16.msra.mxu0 %v6151_v12  ;;  %v660_v11 = vld [vmem:[#allocation8 + $0x530] sm:$0xff]  ;;  %v6205_v12 = vcombine.low %v647_v60, %v651_v61  ;;  %v703_v61 = vld [vmem:[#allocation8 + $0x688] sm:$0xff] }
 0x215   :  { %2180 = vmatprep.subr.bf16.mxu1 %v6158_v13  ;;  %2262 = vmatprep.subr.bf16.mxu0 %v6160_v14  ;;  %v6207_v13 = vcombine.low %v648_v1, %v652_v4  ;;  %v6214_v14 = vcombine.high %v655_v8, %v659_v9  ;;  %v6216_v15 = vcombine.high %v656_v10, %v660_v11  ;;  %v707_v1 = vld [vmem:[#allocation8 + $0x6a8] sm:$0xff]  ;;  %v704_v4 = vld [vmem:[#allocation8 + $0x690] sm:$0xff] }
 0x218   :  { %2181 = vmatpush1.bf16.msra.mxu1 %v6157_v19  ;;  %2263 = vmatpush1.bf16.msra.mxu0 %v6159_v20  ;;  %v668_v19 = vld [vmem:[#allocation8 + $0x570] sm:$0xff]  ;;  %v6213_v20 = vcombine.low %v655_v8, %v659_v9  ;;  %v711_v9 = vld [vmem:[#allocation8 + $0x6c8] sm:$0xff] }
 0x219   :  { %2182 = vmatprep.subr.bf16.mxu1 %v6166_v21  ;;  %2264 = vmatprep.subr.bf16.mxu0 %v6168_v22  ;;  %v6215_v21 = vcombine.low %v656_v10, %v660_v11  ;;  %v6222_v22 = vcombine.high %v663_v16, %v667_v17  ;;  %v6224_v23 = vcombine.high %v664_v18, %v668_v19  ;;  %v715_v10 = vld [vmem:[#allocation8 + $0x6e8] sm:$0xff]  ;;  %v712_v11 = vld [vmem:[#allocation8 + $0x6d0] sm:$0xff] }
 0x21c   :  { %2183 = vmatpush1.bf16.msra.mxu1 %v6165_v31  ;;  %2265 = vmatpush1.bf16.msra.mxu0 %v6167_v32  ;;  %v676_v31 = vld [vmem:[#allocation8 + $0x5b0] sm:$0xff]  ;;  %v6221_v32 = vcombine.low %v663_v16, %v667_v17  ;;  %v719_v17 = vld [vmem:[#allocation8 + $0x708] sm:$0xff] }
 0x21d   :  { %2184 = vmatprep.subr.bf16.mxu1 %v6174_v33  ;;  %2266 = vmatprep.subr.bf16.mxu0 %v6176_v34  ;;  %v6223_v33 = vcombine.low %v664_v18, %v668_v19  ;;  %v6230_v34 = vcombine.high %v671_v24, %v675_v25  ;;  %v6232_v35 = vcombine.high %v672_v26, %v676_v31  ;;  %v723_v18 = vld [vmem:[#allocation8 + $0x728] sm:$0xff]  ;;  %v720_v19 = vld [vmem:[#allocation8 + $0x710] sm:$0xff] }
 0x220   :  { %2185 = vmatpush1.bf16.msra.mxu1 %v6173_v39  ;;  %2267 = vmatpush1.bf16.msra.mxu0 %v6175_v40  ;;  %v684_v39 = vld [vmem:[#allocation8 + $0x5f0] sm:$0xff]  ;;  %v6229_v40 = vcombine.low %v671_v24, %v675_v25  ;;  %v727_v25 = vld [vmem:[#allocation8 + $0x748] sm:$0xff] }
 0x221   :  { %2195 = vmatprep.subr.bf16.mxu1 %v6182_v41  ;;  %2277 = vmatprep.subr.bf16.mxu0 %v6184_v42  ;;  %v6231_v41 = vcombine.low %v672_v26, %v676_v31  ;;  %v6238_v42 = vcombine.high %v679_v36, %v683_v37  ;;  %v6240_v43 = vcombine.high %v680_v38, %v684_v39  ;;  %v731_v26 = vld [vmem:[#allocation8 + $0x768] sm:$0xff]  ;;  %v728_v31 = vld [vmem:[#allocation8 + $0x750] sm:$0xff] }
 0x223   :  { %2187 = vmatmul.mubr.bf16.vlgmr.msra.gmra.mrb[8].mxu1 %v8017_v29  ;;  %2269 = vmatmul.mubr.bf16.vlgmr.msra.gmra.mrb[8].mxu0 %v8017_v29 }
 0x224   :  { %2196 = vmatpush1.bf16.msra.mxu1 %v6181_v47  ;;  %2227 = vmatprep.mubr.bf16.mxu1 %v8015_v28  ;;  %v692_v47 = vld [vmem:[#allocation8 + $0x630] sm:$0xff] }
 0x225   :  { %2278 = vmatpush1.bf16.msra.mxu0 %v6183_v48  ;;  %2309 = vmatprep.mubr.bf16.mxu0 %v8015_v28  ;;  %v6237_v48 = vcombine.low %v679_v36, %v683_v37  ;;  %v6248_v52 = vcombine.high %v688_v46, %v692_v47  ;;  %v735_v37 = vld [vmem:[#allocation8 + $0x788] sm:$0xff] }
 0x226   :  { %2197 = vmatprep.subr.bf16.mxu1 %v6190_v49  ;;  %2279 = vmatprep.subr.bf16.mxu0 %v6192_v51  ;;  %v6239_v49 = vcombine.low %v680_v38, %v684_v39  ;;  %v6246_v51 = vcombine.high %v687_v44, %v691_v45  ;;  %v739_v38 = vld [vmem:[#allocation8 + $0x7a8] sm:$0xff]  ;;  %v736_v39 = vld [vmem:[#allocation8 + $0x790] sm:$0xff] }
 0x228   :  { %2198 = vmatpush1.bf16.msra.mxu1 %v6189_v56  ;;  %v700_v56 = vld [vmem:[#allocation8 + $0x670] sm:$0xff] }
 0x229   :  { %2280 = vmatpush1.bf16.msra.mxu0 %v6191_v57  ;;  %2199 = vmatprep.subr.bf16.mxu1 %v6198_v58  ;;  %v6245_v57 = vcombine.low %v687_v44, %v691_v45  ;;  %v6247_v58 = vcombine.low %v688_v46, %v692_v47  ;;  %v6256_v60 = vcombine.high %v696_v55, %v700_v56  ;;  %v743_v45 = vld [vmem:[#allocation8 + $0x7c8] sm:$0xff]  ;;  %v744_v47 = vld [vmem:[#allocation8 + $0x7d0] sm:$0xff] }
 0x22a   :  { %2281 = vmatprep.subr.bf16.mxu0 %v6200_v59  ;;  %v6254_v59 = vcombine.high %v695_v53, %v699_v54  ;;  %v747_v46 = vld [vmem:[#allocation8 + $0x7e8] sm:$0xff] }
 0x22c   :  { %2200 = vmatpush1.bf16.msra.mxu1 %v6197_v5  ;;  %v708_v5 = vld [vmem:[#allocation8 + $0x6b0] sm:$0xff] }
 0x22d   :  { %2282 = vmatpush1.bf16.msra.mxu0 %v6199_v50  ;;  %2201 = vmatprep.subr.bf16.mxu1 %v6206_v6  ;;  %v6253_v50 = vcombine.low %v695_v53, %v699_v54  ;;  %v6255_v6 = vcombine.low %v696_v55, %v700_v56  ;;  %v6264_v8 = vcombine.high %v704_v4, %v708_v5  ;;  %v497_v54 = vld [vmem:[#allocation8 + $0x18] sm:$0xff] }
 0x22e   :  { %2283 = vmatprep.subr.bf16.mxu0 %v6208_v7  ;;  %v6262_v7 = vcombine.high %v703_v61, %v707_v1  ;;  %v501_v55 = vld [vmem:[#allocation8 + $0x38] sm:$0xff]  ;;  %v6301_v56 = vcombine.low %v743_v45, %v747_v46 }
 0x230   :  { %2202 = vmatpush1.bf16.msra.mxu1 %v6205_v12  ;;  %v716_v12 = vld [vmem:[#allocation8 + $0x6f0] sm:$0xff] }
 0x231   :  { %2284 = vmatpush1.bf16.msra.mxu0 %v6207_v13  ;;  %2203 = vmatprep.subr.bf16.mxu1 %v6214_v14  ;;  %v6261_v13 = vcombine.low %v703_v61, %v707_v1  ;;  %v6263_v14 = vcombine.low %v704_v4, %v708_v5  ;;  %v6272_v16 = vcombine.high %v712_v11, %v716_v12  ;;  %v6993_v61 = vld [vmem:[#allocation11 + $0x4] ss:$28 sps:$4 sm:$0xff]   ;;  %v513_v5 = vld [vmem:[#allocation8 + $0x98] sm:$0xff] }
 0x232   :  { %2285 = vmatprep.subr.bf16.mxu0 %v6216_v15  ;;  %v6270_v15 = vcombine.high %v711_v9, %v715_v10  ;;  %v6057_v1 = vcombine.low %v497_v54, %v501_v55 }
 0x234   :  { %2204 = vmatpush1.bf16.msra.mxu1 %v6213_v20  ;;  %v724_v20 = vld [vmem:[#allocation8 + $0x730] sm:$0xff] }
 0x235   :  { %2286 = vmatpush1.bf16.msra.mxu0 %v6215_v21  ;;  %2205 = vmatprep.subr.bf16.mxu1 %v6222_v22  ;;  %v6269_v21 = vcombine.low %v711_v9, %v715_v10  ;;  %v6271_v22 = vcombine.low %v712_v11, %v716_v12  ;;  %v6280_v24 = vcombine.high %v720_v19, %v724_v20  ;;  %v521_v10 = vld [vmem:[#allocation8 + $0xd8] sm:$0xff] }
 0x236   :  { %2287 = vmatprep.subr.bf16.mxu0 %v6224_v23  ;;  %v6278_v23 = vcombine.high %v719_v17, %v723_v18  ;;  %v525_v11 = vld [vmem:[#allocation8 + $0xf8] sm:$0xff] }
 0x237   :  { %v6994_v12 = vld [vmem:[#allocation11 + $0x38] ss:$28 sps:$4 sm:$0xff]  }
 0x238   :  { %2206 = vmatpush1.bf16.msra.mxu1 %v6221_v32  ;;  %v732_v32 = vld [vmem:[#allocation8 + $0x770] sm:$0xff] }
 0x239   :  { %2288 = vmatpush1.bf16.msra.mxu0 %v6223_v33  ;;  %2207 = vmatprep.subr.bf16.mxu1 %v6230_v34  ;;  %v6277_v33 = vcombine.low %v719_v17, %v723_v18  ;;  %v6279_v34 = vcombine.low %v720_v19, %v724_v20  ;;  %v6288_v36 = vcombine.high %v728_v31, %v732_v32  ;;  %v533_v17 = vld [vmem:[#allocation8 + $0x138] sm:$0xff]  ;;  %v7002_v19 = vld [vmem:[#allocation11 + $0xac] ss:$28 sps:$4 sm:$0xff]  }
 0x23a   :  { %2289 = vmatprep.subr.bf16.mxu0 %v6232_v35  ;;  %v6286_v35 = vcombine.high %v727_v25, %v731_v26  ;;  %v6997_v18 = vld [vmem:[#allocation11 + $0x70] ss:$28 sps:$4 sm:$0xff]  }
 0x23c   :  { %2208 = vmatpush1.bf16.msra.mxu1 %v6229_v40  ;;  %v740_v40 = vld [vmem:[#allocation8 + $0x7b0] sm:$0xff] }
 0x23d   :  { %2290 = vmatpush1.bf16.msra.mxu0 %v6231_v41  ;;  %2209 = vmatprep.subr.bf16.mxu1 %v6238_v42  ;;  %v6285_v41 = vcombine.low %v727_v25, %v731_v26  ;;  %v6287_v42 = vcombine.low %v728_v31, %v732_v32  ;;  %v6296_v44 = vcombine.high %v736_v39, %v740_v40  ;;  %v545_v31 = vld [vmem:[#allocation8 + $0x198] sm:$0xff] }
 0x23e   :  { %2291 = vmatprep.subr.bf16.mxu0 %v6240_v43  ;;  %v6294_v43 = vcombine.high %v735_v37, %v739_v38  ;;  %v549_v32 = vld [vmem:[#allocation8 + $0x1b8] sm:$0xff] }
 0x240   :  { %2210 = vmatpush1.bf16.msra.mxu1 %v6237_v48  ;;  %v748_v48 = vld [vmem:[#allocation8 + $0x7f0] sm:$0xff] }
 0x241   :  { %2292 = vmatpush1.bf16.msra.mxu0 %v6239_v49  ;;  %2211 = vmatprep.subr.bf16.mxu1 %v6246_v51  ;;  %v6293_v49 = vcombine.low %v735_v37, %v739_v38  ;;  %v6295_v51 = vcombine.low %v736_v39, %v740_v40  ;;  %v6304_v53 = vcombine.high %v744_v47, %v748_v48  ;;  %v553_v37 = vld [vmem:[#allocation8 + $0x1d8] sm:$0xff] }
 0x242   :  { %2293 = vmatprep.subr.bf16.mxu0 %v6248_v52  ;;  %v6302_v52 = vcombine.high %v743_v45, %v747_v46  ;;  %v557_v38 = vld [vmem:[#allocation8 + $0x1f8] sm:$0xff]  ;;  %v7014_v46 = vld [vmem:[#allocation11 + $0x18c] ss:$28 sps:$4 sm:$0xff]  }
 0x243   :  { %v7006_v39 = vld [vmem:[#allocation11 + $0x118] ss:$28 sps:$4 sm:$0xff]   ;;  %v7009_v45 = vld [vmem:[#allocation11 + $0x150] ss:$28 sps:$4 sm:$0xff]  }
 0x244   :  { %2212 = vmatpush1.bf16.msra.mxu1 %v6245_v57  ;;  %v6303_v57 = vcombine.low %v744_v47, %v748_v48  ;;  %v7011_v40 = vld [vmem:[#allocation11 + $0x154] ss:$28 sps:$4 sm:$0xff]   ;;  %v6113_v47 = vcombine.low %v553_v37, %v557_v38 }
 0x245   :  { %2294 = vmatpush1.bf16.msra.mxu0 %v6247_v58  ;;  %2213 = vmatprep.subr.bf16.mxu1 %v6254_v59  ;;  %v6058_v58 = vcombine.high %v497_v54, %v501_v55  ;;  %v505_v59 = vld [vmem:[#allocation8 + $0x58] sm:$0xff] }
 0x246   :  { %2295 = vmatprep.subr.bf16.mxu0 %v6256_v60  ;;  %v509_v60 = vld [vmem:[#allocation8 + $0x78] sm:$0xff] }
 0x247   :  { %v6066_v4 = vcombine.high %v505_v59, %v509_v60 }
 0x248   :  { %2214 = vmatpush1.bf16.msra.mxu1 %v6253_v50  ;;  %v517_v50 = vld [vmem:[#allocation8 + $0xb8] sm:$0xff] }
 0x249   :  { %2296 = vmatpush1.bf16.msra.mxu0 %v6255_v6  ;;  %2215 = vmatprep.subr.bf16.mxu1 %v6262_v7  ;;  %v6991_v6 = vld [vmem:[#allocation11] ss:$28 sps:$4 sm:$0xff]   ;;  %v6074_v9 = vcombine.high %v513_v5, %v517_v50 }
 0x24a   :  { %2297 = vmatprep.subr.bf16.mxu0 %v6264_v8  ;;  %v6996_v7 = vld [vmem:[#allocation11 + $0x3c] ss:$28 sps:$4 sm:$0xff]   ;;  %v6065_v8 = vcombine.low %v505_v59, %v509_v60 }
 0x24b   :  { %v7020_v59 = vld [vmem:[#allocation11 + $0x1fc] ss:$28 sps:$4 sm:$0xff]  }
 0x24c   :  { %2216 = vmatpush1.bf16.msra.mxu1 %v6261_v13  ;;  %v6999_v13 = vld [vmem:[#allocation11 + $0x74] ss:$28 sps:$4 sm:$0xff]  }
 0x24d   :  { %2298 = vmatpush1.bf16.msra.mxu0 %v6263_v14  ;;  %2217 = vmatprep.subr.bf16.mxu1 %v6270_v15  ;;  %v6073_v14 = vcombine.low %v513_v5, %v517_v50  ;;  %v6082_v15 = vcombine.high %v521_v10, %v525_v11  ;;  %v7018_v5 = vld [vmem:[#allocation11 + $0x1f8] ss:$28 sps:$4 sm:$0xff]  }
 0x24e   :  { %2299 = vmatprep.subr.bf16.mxu0 %v6272_v16  ;;  %v529_v16 = vld [vmem:[#allocation8 + $0x118] sm:$0xff] }
 0x24f   :  { %v6090_v20 = vcombine.high %v529_v16, %v533_v17  ;;  %v6089_v25 = vcombine.low %v529_v16, %v533_v17  ;;  %v7023_v50 = vld [vmem:[#allocation11 + $0x234] ss:$28 sps:$4 sm:$0xff]   ;;  %v7024_v16 = vld [vmem:[#allocation11 + $0x268] ss:$28 sps:$4 sm:$0xff]  }
 0x250   :  { %2218 = vmatpush1.bf16.msra.mxu1 %v6269_v21  ;;  %v537_v21 = vld [vmem:[#allocation8 + $0x158] sm:$0xff]  ;;  %v7029_v17 = vld [vmem:[#allocation11 + $0x2a4] ss:$28 sps:$4 sm:$0xff]  }
 0x251   :  { %2300 = vmatpush1.bf16.msra.mxu0 %v6271_v22  ;;  %2219 = vmatprep.subr.bf16.mxu1 %v6278_v23  ;;  %v541_v22 = vld [vmem:[#allocation8 + $0x178] sm:$0xff]  ;;  %v7000_v23 = vld [vmem:[#allocation11 + $0xa8] ss:$28 sps:$4 sm:$0xff]  }
 0x252   :  { %2301 = vmatprep.subr.bf16.mxu0 %v6280_v24  ;;  %v7005_v24 = vld [vmem:[#allocation11 + $0xe4] ss:$28 sps:$4 sm:$0xff]   ;;  %v6098_v26 = vcombine.high %v537_v21, %v541_v22 }
 0x254   :  { %2220 = vmatpush1.bf16.msra.mxu1 %v6277_v33  ;;  %v7003_v33 = vld [vmem:[#allocation11 + $0xe0] ss:$28 sps:$4 sm:$0xff]  }
 0x255   :  { %2302 = vmatpush1.bf16.msra.mxu0 %v6279_v34  ;;  %2221 = vmatprep.subr.bf16.mxu1 %v6286_v35  ;;  %v7008_v34 = vld [vmem:[#allocation11 + $0x11c] ss:$28 sps:$4 sm:$0xff]   ;;  %v6097_v35 = vcombine.low %v537_v21, %v541_v22 }
 0x256   :  { %2303 = vmatprep.subr.bf16.mxu0 %v6288_v36  ;;  %v6106_v36 = vcombine.high %v545_v31, %v549_v32  ;;  %v7027_v21 = vld [vmem:[#allocation11 + $0x2a0] ss:$28 sps:$4 sm:$0xff]  }
 0x257   :  { %v7032_v22 = vld [vmem:[#allocation11 + $0x2dc] ss:$28 sps:$4 sm:$0xff]  }
 0x258   :  { %2222 = vmatpush1.bf16.msra.mxu1 %v6285_v41  ;;  %v6105_v41 = vcombine.low %v545_v31, %v549_v32  ;;  %v7030_v31 = vld [vmem:[#allocation11 + $0x2d8] ss:$28 sps:$4 sm:$0xff]  }
 0x259   :  { %2304 = vmatpush1.bf16.msra.mxu0 %v6287_v42  ;;  %2223 = vmatprep.subr.bf16.mxu1 %v6294_v43  ;;  %v6114_v42 = vcombine.high %v553_v37, %v557_v38  ;;  %v561_v43 = vld [vmem:[#allocation8 + $0x218] sm:$0xff]  ;;  %v7038_v38 = vld [vmem:[#allocation11 + $0x34c] ss:$28 sps:$4 sm:$0xff]  }
 0x25a   :  { %2305 = vmatprep.subr.bf16.mxu0 %v6296_v44  ;;  %v565_v44 = vld [vmem:[#allocation8 + $0x238] sm:$0xff] }
 0x25b   :  { %v6122_v48 = vcombine.high %v561_v43, %v565_v44  ;;  %v6121_v54 = vcombine.low %v561_v43, %v565_v44  ;;  %v7035_v32 = vld [vmem:[#allocation11 + $0x314] ss:$28 sps:$4 sm:$0xff]   ;;  %v7036_v43 = vld [vmem:[#allocation11 + $0x348] ss:$28 sps:$4 sm:$0xff]  }
 0x25c   :  { %2224 = vmatpush1.bf16.msra.mxu1 %v6293_v49  ;;  %v569_v49 = vld [vmem:[#allocation8 + $0x258] sm:$0xff]  ;;  %v7062_v44 = vld [vmem:[#allocation11 + $0x384] ss:$28 sps:$4 sm:$0xff]  }
 0x25d   :  { %2306 = vmatpush1.bf16.msra.mxu0 %v6295_v51  ;;  %2225 = vmatprep.subr.bf16.mxu1 %v6302_v52  ;;  %v573_v51 = vld [vmem:[#allocation8 + $0x278] sm:$0xff]  ;;  %v7012_v52 = vld [vmem:[#allocation11 + $0x188] ss:$28 sps:$4 sm:$0xff]  }
 0x25e   :  { %2307 = vmatprep.subr.bf16.mxu0 %v6304_v53  ;;  %v7017_v53 = vld [vmem:[#allocation11 + $0x1c4] ss:$28 sps:$4 sm:$0xff]   ;;  %v6130_v55 = vcombine.high %v569_v49, %v573_v51  ;;  %v6129_v60 = vcombine.low %v569_v49, %v573_v51  ;;  %v7033_v37 = vld [vmem:[#allocation11 + $0x310] ss:$28 sps:$4 sm:$0xff]  }
 0x260   :  { %2226 = vmatpush1.bf16.msra.mxu1 %v6301_v56  ;;  %v577_v56 = vld [vmem:[#allocation8 + $0x298] sm:$0xff] }
 0x261   :  { %2308 = vmatpush1.bf16.msra.mxu0 %v6303_v57  ;;  %2318 = vmatprep.subr.bf16.mxu1 %v6058_v58  ;;  %v581_v57 = vld [vmem:[#allocation8 + $0x2b8] sm:$0xff]  ;;  %v7015_v58 = vld [vmem:[#allocation11 + $0x1c0] ss:$28 sps:$4 sm:$0xff]  }
 0x262   :  { %5269 = vmatprep.subr.bf16.mxu0 %v6993_v61  ;;  %v6138_v61 = vcombine.high %v577_v56, %v581_v57 }
 0x263   :  { %2228 = vmatmul.mubr.bf16.vlgmr.msra.gmra.mrb[8].mxu1 %v8019_v30 }
 0x264   :  { %2310 = vmatmul.mubr.bf16.vlgmr.msra.gmra.mrb[8].mxu0 %v8019_v30  ;;  %2319 = vmatpush1.bf16.msra.mxu1 %v6057_v1  ;;  %v585_v1 = vld [vmem:[#allocation8 + $0x2d8] sm:$0xff] }
 0x265   :  { %2350 = vmatprep.mubr.bf16.mxu1 %v8013_v27  ;;  %2320 = vmatprep.subr.bf16.mxu1 %v6066_v4  ;;  %v6081_v27 = vcombine.low %v521_v10, %v525_v11  ;;  %v589_v4 = vld [vmem:[#allocation8 + $0x2f8] sm:$0xff]  ;;  %v7026_v11 = vld [vmem:[#allocation11 + $0x26c] ss:$28 sps:$4 sm:$0xff]  }
 0x266   :  { %5270 = vmatpush1.bf16.msra.mxu0 %v6991_v6  ;;  %v6137_v6 = vcombine.low %v577_v56, %v581_v57  ;;  %v7021_v10 = vld [vmem:[#allocation11 + $0x230] ss:$28 sps:$4 sm:$0xff]  }
 0x267   :  { %5271 = vmatprep.subr.bf16.mxu0 %v6996_v7  ;;  %v6146_v7 = vcombine.high %v585_v1, %v589_v4  ;;  %v657_v56 = vld [vmem:[#allocation8 + $0x518] sm:$0xff] }
 0x268   :  { %2321 = vmatpush1.bf16.msra.mxu1 %v6065_v8  ;;  %v593_v8 = vld [vmem:[#allocation8 + $0x318] sm:$0xff] }
 0x269   :  { %2322 = vmatprep.subr.bf16.mxu1 %v6074_v9  ;;  %v597_v9 = vld [vmem:[#allocation8 + $0x338] sm:$0xff] }
 0x26a   :  { %5272 = vmatpush1.bf16.msra.mxu0 %v6994_v12  ;;  %v6145_v12 = vcombine.low %v585_v1, %v589_v4  ;;  %v661_v57 = vld [vmem:[#allocation8 + $0x538] sm:$0xff] }
 0x26b   :  { %5273 = vmatprep.subr.bf16.mxu0 %v6999_v13  ;;  %v6154_v13 = vcombine.high %v593_v8, %v597_v9  ;;  %v673_v4 = vld [vmem:[#allocation8 + $0x598] sm:$0xff] }
 0x26c   :  { %2323 = vmatpush1.bf16.msra.mxu1 %v6073_v14  ;;  %v601_v14 = vld [vmem:[#allocation8 + $0x358] sm:$0xff] }
 0x26d   :  { %2324 = vmatprep.subr.bf16.mxu1 %v6082_v15  ;;  %v605_v15 = vld [vmem:[#allocation8 + $0x378] sm:$0xff] }
 0x26e   :  { %5274 = vmatpush1.bf16.msra.mxu0 %v6997_v18  ;;  %v6153_v18 = vcombine.low %v593_v8, %v597_v9 }
 0x26f   :  { %5275 = vmatprep.subr.bf16.mxu0 %v7002_v19  ;;  %v6162_v19 = vcombine.high %v601_v14, %v605_v15 }
 0x270   :  { %2325 = vmatpush1.bf16.msra.mxu1 %v6081_v27  ;;  %v609_v27 = vld [vmem:[#allocation8 + $0x398] sm:$0xff] }
 0x271   :  { %2326 = vmatprep.subr.bf16.mxu1 %v6090_v20  ;;  %v613_v20 = vld [vmem:[#allocation8 + $0x3b8] sm:$0xff] }
 0x272   :  { %5276 = vmatpush1.bf16.msra.mxu0 %v7000_v23  ;;  %v6161_v23 = vcombine.low %v601_v14, %v605_v15 }
 0x273   :  { %5277 = vmatprep.subr.bf16.mxu0 %v7005_v24  ;;  %v6170_v24 = vcombine.high %v609_v27, %v613_v20 }
 0x274   :  { %2327 = vmatpush1.bf16.msra.mxu1 %v6089_v25  ;;  %v617_v25 = vld [vmem:[#allocation8 + $0x3d8] sm:$0xff] }
 0x275   :  { %2328 = vmatprep.subr.bf16.mxu1 %v6098_v26  ;;  %v621_v26 = vld [vmem:[#allocation8 + $0x3f8] sm:$0xff] }
 0x276   :  { %5278 = vmatpush1.bf16.msra.mxu0 %v7003_v33  ;;  %v6169_v33 = vcombine.low %v609_v27, %v613_v20 }
 0x277   :  { %5279 = vmatprep.subr.bf16.mxu0 %v7008_v34  ;;  %v6178_v34 = vcombine.high %v617_v25, %v621_v26 }
 0x278   :  { %2329 = vmatpush1.bf16.msra.mxu1 %v6097_v35  ;;  %v625_v35 = vld [vmem:[#allocation8 + $0x418] sm:$0xff] }
 0x279   :  { %2330 = vmatprep.subr.bf16.mxu1 %v6106_v36  ;;  %v629_v36 = vld [vmem:[#allocation8 + $0x438] sm:$0xff] }
 0x27a   :  { %5280 = vmatpush1.bf16.msra.mxu0 %v7006_v39  ;;  %v6177_v39 = vcombine.low %v617_v25, %v621_v26  ;;  %v693_v25 = vld [vmem:[#allocation8 + $0x638] sm:$0xff] }
 0x27b   :  { %5281 = vmatprep.subr.bf16.mxu0 %v7011_v40  ;;  %v6186_v40 = vcombine.high %v625_v35, %v629_v36 }
 0x27c   :  { %2331 = vmatpush1.bf16.msra.mxu1 %v6105_v41  ;;  %v633_v41 = vld [vmem:[#allocation8 + $0x458] sm:$0xff] }
 0x27d   :  { %2332 = vmatprep.subr.bf16.mxu1 %v6114_v42  ;;  %v637_v42 = vld [vmem:[#allocation8 + $0x478] sm:$0xff] }
 0x27e   :  { %5282 = vmatpush1.bf16.msra.mxu0 %v7009_v45  ;;  %v6185_v45 = vcombine.low %v625_v35, %v629_v36  ;;  %v6193_v49 = vcombine.low %v633_v41, %v637_v42  ;;  %v697_v35 = vld [vmem:[#allocation8 + $0x658] sm:$0xff] }
 0x27f   :  { %5283 = vmatprep.subr.bf16.mxu0 %v7014_v46  ;;  %v6194_v46 = vcombine.high %v633_v41, %v637_v42  ;;  %v701_v36 = vld [vmem:[#allocation8 + $0x678] sm:$0xff] }
 0x280   :  { %2333 = vmatpush1.bf16.msra.mxu1 %v6113_v47  ;;  %v641_v47 = vld [vmem:[#allocation8 + $0x498] sm:$0xff]  ;;  %v6258_v41 = vcombine.high %v697_v35, %v701_v36 }
 0x281   :  { %2334 = vmatprep.subr.bf16.mxu1 %v6122_v48  ;;  %v645_v48 = vld [vmem:[#allocation8 + $0x4b8] sm:$0xff] }
 0x282   :  { %5284 = vmatpush1.bf16.msra.mxu0 %v7012_v52  ;;  %v6202_v51 = vcombine.high %v641_v47, %v645_v48  ;;  %v649_v52 = vld [vmem:[#allocation8 + $0x4d8] sm:$0xff] }
 0x283   :  { %5285 = vmatprep.subr.bf16.mxu0 %v7017_v53  ;;  %v653_v53 = vld [vmem:[#allocation8 + $0x4f8] sm:$0xff] }
 0x284   :  { %2335 = vmatpush1.bf16.msra.mxu1 %v6121_v54  ;;  %v6201_v54 = vcombine.low %v641_v47, %v645_v48  ;;  %v705_v42 = vld [vmem:[#allocation8 + $0x698] sm:$0xff] }
 0x285   :  { %2336 = vmatprep.subr.bf16.mxu1 %v6130_v55  ;;  %v6210_v55 = vcombine.high %v649_v52, %v653_v53  ;;  %v713_v48 = vld [vmem:[#allocation8 + $0x6d8] sm:$0xff] }
 0x286   :  { %5286 = vmatpush1.bf16.msra.mxu0 %v7015_v58  ;;  %v6209_v58 = vcombine.low %v649_v52, %v653_v53  ;;  %v7080_v52 = vld [vmem:[#allocation11 + $0x42c] ss:$28 sps:$4 sm:$0xff]  }
 0x287   :  { %5287 = vmatprep.subr.bf16.mxu0 %v7020_v59  ;;  %v6218_v59 = vcombine.high %v657_v56, %v661_v57 }
 0x288   :  { %2337 = vmatpush1.bf16.msra.mxu1 %v6129_v60  ;;  %v669_v60 = vld [vmem:[#allocation8 + $0x578] sm:$0xff] }
 0x289   :  { %2338 = vmatprep.subr.bf16.mxu1 %v6138_v61  ;;  %v6217_v61 = vcombine.low %v657_v56, %v661_v57  ;;  %v725_v56 = vld [vmem:[#allocation8 + $0x738] sm:$0xff]  ;;  %v7078_v57 = vld [vmem:[#allocation11 + $0x428] ss:$28 sps:$4 sm:$0xff]  }
 0x28a   :  { %5288 = vmatpush1.bf16.msra.mxu0 %v7018_v5  ;;  %v677_v5 = vld [vmem:[#allocation8 + $0x5b8] sm:$0xff] }
 0x28b   :  { %5289 = vmatprep.subr.bf16.mxu0 %v7023_v50  ;;  %v6234_v8 = vcombine.high %v673_v4, %v677_v5 }
 0x28c   :  { %2339 = vmatpush1.bf16.msra.mxu1 %v6137_v6 }
 0x28d   :  { %2340 = vmatprep.subr.bf16.mxu1 %v6146_v7 }
 0x28e   :  { %5290 = vmatpush1.bf16.msra.mxu0 %v7021_v10 }
 0x28f   :  { %5291 = vmatprep.subr.bf16.mxu0 %v7026_v11  ;;  %v681_v11 = vld [vmem:[#allocation8 + $0x5d8] sm:$0xff] }
 0x290   :  { %2341 = vmatpush1.bf16.msra.mxu1 %v6145_v12  ;;  %v685_v12 = vld [vmem:[#allocation8 + $0x5f8] sm:$0xff] }
 0x291   :  { %2342 = vmatprep.subr.bf16.mxu1 %v6154_v13 }
 0x292   :  { %5292 = vmatpush1.bf16.msra.mxu0 %v7024_v16 }
 0x293   :  { %5293 = vmatprep.subr.bf16.mxu0 %v7029_v17 }
 0x294   :  { %2343 = vmatpush1.bf16.msra.mxu1 %v6153_v18 }
 0x295   :  { %2344 = vmatprep.subr.bf16.mxu1 %v6162_v19  ;;  %v6233_v19 = vcombine.low %v673_v4, %v677_v5  ;;  %v7092_v4 = vld [vmem:[#allocation11 + $0x49c] ss:$28 sps:$4 sm:$0xff]  }
 0x296   :  { %5294 = vmatpush1.bf16.msra.mxu0 %v7027_v21 }
 0x297   :  { %5295 = vmatprep.subr.bf16.mxu0 %v7032_v22  ;;  %v6242_v22 = vcombine.high %v681_v11, %v685_v12 }
 0x298   :  { %2345 = vmatpush1.bf16.msra.mxu1 %v6161_v23 }
 0x299   :  { %2346 = vmatprep.subr.bf16.mxu1 %v6170_v24  ;;  %v689_v24 = vld [vmem:[#allocation8 + $0x618] sm:$0xff] }
 0x29a   :  { %5296 = vmatpush1.bf16.msra.mxu0 %v7030_v31 }
 0x29b   :  { %5297 = vmatprep.subr.bf16.mxu0 %v7035_v32  ;;  %v6241_v32 = vcombine.low %v681_v11, %v685_v12  ;;  %v745_v12 = vld [vmem:[#allocation8 + $0x7d8] sm:$0xff] }
 0x29c   :  { %2347 = vmatpush1.bf16.msra.mxu1 %v6169_v33  ;;  %v6250_v33 = vcombine.high %v689_v24, %v693_v25 }
 0x29d   :  { %2348 = vmatprep.subr.bf16.mxu1 %v6178_v34 }
 0x29e   :  { %5298 = vmatpush1.bf16.msra.mxu0 %v7033_v37  ;;  %v7060_v37 = vld [vmem:[#allocation11 + $0x380] ss:$28 sps:$4 sm:$0xff]  }
 0x29f   :  { %5299 = vmatprep.subr.bf16.mxu0 %v7038_v38 }
 0x2a0   :  { %2349 = vmatpush1.bf16.msra.mxu1 %v6177_v39  ;;  %v7068_v39 = vld [vmem:[#allocation11 + $0x3bc] ss:$28 sps:$4 sm:$0xff]  }
 0x2a1   :  { %2359 = vmatprep.subr.bf16.mxu1 %v6186_v40  ;;  %v6249_v40 = vcombine.low %v689_v24, %v693_v25  ;;  %v7044_v24 = vld [vmem:[#allocation11 + $0x44] ss:$28 sps:$4 sm:$0xff]   ;;  %v7114_v25 = vld [vmem:[#allocation11 + $0x578] ss:$28 sps:$4 sm:$0xff]  }
 0x2a2   :  { %5300 = vmatpush1.bf16.msra.mxu0 %v7036_v43  ;;  %v709_v43 = vld [vmem:[#allocation8 + $0x6b8] sm:$0xff] }
 0x2a3   :  { %2351 = vmatmul.mubr.bf16.vlgmr.msra.gmra.mrb[12].mxu1 %v8017_v29  ;;  %5310 = vmatprep.subr.bf16.mxu0 %v7062_v44  ;;  %v665_v29 = vld [vmem:[#allocation8 + $0x558] sm:$0xff]  ;;  %v6266_v47 = vcombine.high %v705_v42, %v709_v43  ;;  %v6265_v53 = vcombine.low %v705_v42, %v709_v43  ;;  %v7132_v42 = vld [vmem:[#allocation11 + $0x620] ss:$28 sps:$4 sm:$0xff]  }
 0x2a4   :  { %2360 = vmatpush1.bf16.msra.mxu1 %v6185_v45  ;;  %2391 = vmatprep.mubr.bf16.mxu1 %v8015_v28  ;;  %v8036_v28 = vld [vmem:[#allocation10] sm:$0xff]  ;;  %v6226_v1 = vcombine.high %v665_v29, %v669_v60  ;;  %v6225_v6 = vcombine.low %v665_v29, %v669_v60  ;;  %v7074_v45 = vld [vmem:[#allocation11 + $0x3f4] ss:$28 sps:$4 sm:$0xff]  }
 0x2a5   :  { %2361 = vmatprep.subr.bf16.mxu1 %v6194_v46  ;;  %v755_v50 = vrot.slane %v8036_v28, %v7998_v63  ;;  %v759_v7 = vrot.slane %v8036_v28, %v8004_v2  ;;  %v7066_v44 = vld [vmem:[#allocation11 + $0x3b8] ss:$28 sps:$4 sm:$0xff]   ;;  %v6257_v46 = vcombine.low %v697_v35, %v701_v36  ;;  %v7128_v35 = vld [vmem:[#allocation11 + $0x5ec] ss:$28 sps:$4 sm:$0xff]  }
 0x2a6   :  { %v729_v60 = vld [vmem:[#allocation8 + $0x758] sm:$0xff]  ;;  %v7140_v43 = vld [vmem:[#allocation11 + $0x65c] ss:$28 sps:$4 sm:$0xff]  }
 0x2a7   :  { %v7045_v36 = vld [vmem:[#allocation11 + $0x78] ss:$28 sps:$4 sm:$0xff]  }
 0x2a8   :  { %2362 = vmatpush1.bf16.msra.mxu1 %v6193_v49  ;;  %v717_v49 = vld [vmem:[#allocation8 + $0x6f8] sm:$0xff] }
 0x2a9   :  { %2363 = vmatprep.subr.bf16.mxu1 %v6202_v51  ;;  %v7072_v51 = vld [vmem:[#allocation11 + $0x3f0] ss:$28 sps:$4 sm:$0xff]  }
 0x2ac   :  { %2364 = vmatpush1.bf16.msra.mxu1 %v6201_v54  ;;  %v6274_v54 = vcombine.high %v713_v48, %v717_v49 }
 0x2ad   :  { %2365 = vmatprep.subr.bf16.mxu1 %v6210_v55  ;;  %v721_v55 = vld [vmem:[#allocation8 + $0x718] sm:$0xff] }
 0x2ae   :  { %v6282_v29 = vcombine.high %v721_v55, %v725_v56  ;;  %v6281_v5 = vcombine.low %v721_v55, %v725_v56  ;;  %v7150_v55 = vld [vmem:[#allocation11 + $0x6c8] ss:$28 sps:$4 sm:$0xff]  }
 0x2af   :  { %v7158_v56 = vld [vmem:[#allocation11 + $0x704] ss:$28 sps:$4 sm:$0xff]  }
 0x2b0   :  { %2366 = vmatpush1.bf16.msra.mxu1 %v6209_v58  ;;  %v7086_v58 = vld [vmem:[#allocation11 + $0x464] ss:$28 sps:$4 sm:$0xff]  }
 0x2b1   :  { %2367 = vmatprep.subr.bf16.mxu1 %v6218_v59  ;;  %v6273_v59 = vcombine.low %v713_v48, %v717_v49  ;;  %v7054_v48 = vld [vmem:[#allocation11 + $0x120] ss:$28 sps:$4 sm:$0xff]  }
 0x2b2   :  { %v7059_v49 = vld [vmem:[#allocation11 + $0x15c] ss:$28 sps:$4 sm:$0xff]  }
 0x2b4   :  { %2368 = vmatpush1.bf16.msra.mxu1 %v6217_v61  ;;  %v733_v61 = vld [vmem:[#allocation8 + $0x778] sm:$0xff] }
 0x2b5   :  { %2369 = vmatprep.subr.bf16.mxu1 %v6226_v1  ;;  %v7084_v1 = vld [vmem:[#allocation11 + $0x460] ss:$28 sps:$4 sm:$0xff]  }
 0x2b6   :  { %v2106_v9 = vpop.f32.mrb[4].mxu1  ;;  %v2147_v10 = vpop.f32.mrb[4].mxu0 }
 0x2b7   :  { %v2107_v13 = vadd.f32 %v2106_v9, %v755_v50  ;;  %v2108_v14 = vpop.f32.mrb[5].mxu1  ;;  %v2149_v15 = vpop.f32.mrb[5].mxu0  ;;  %v6290_v50 = vcombine.high %v729_v60, %v733_v61  ;;  %v7098_v9 = vld [vmem:[#allocation11 + $0x4d4] ss:$28 sps:$4 sm:$0xff]  }
 0x2b8   :  { %v2109_v16 = vadd.f32 %v2108_v14, %v759_v7  ;;  %2370 = vmatpush1.bf16.msra.mxu1 %v6225_v6  ;;  %v2110_v17 = vpop.f32.mrb[6].mxu1  ;;  %v2151_v18 = vpop.f32.mrb[6].mxu0  ;;  %v737_v6 = vld [vmem:[#allocation8 + $0x798] sm:$0xff] }
 0x2b9   :  { %v2148_v27 = vadd.f32 %v2147_v10, %v2107_v13  ;;  %v2111_v20 = vpop.f32.mrb[7].mxu1  ;;  %v2152_v21 = vpop.f32.mrb[7].mxu0  ;;  %2371 = vmatprep.subr.bf16.mxu1 %v6234_v8  ;;  %v741_v7 = vld [vmem:[#allocation8 + $0x7b8] sm:$0xff]  ;;  %v6289_v10 = vcombine.low %v729_v60, %v733_v61  ;;  %v7102_v18 = vld [vmem:[#allocation11 + $0x508] ss:$28 sps:$4 sm:$0xff]  }
 0x2ba   :  { %v2150_v23 = vadd.f32 %v2149_v15, %v2109_v16  ;;  %v7090_v8 = vld [vmem:[#allocation11 + $0x498] ss:$28 sps:$4 sm:$0xff]   ;;  %v6298_v11 = vcombine.high %v737_v6, %v741_v7  ;;  %v7096_v14 = vld [vmem:[#allocation11 + $0x4d0] ss:$28 sps:$4 sm:$0xff]   ;;  %v6297_v16 = vcombine.low %v737_v6, %v741_v7  ;;  %v7108_v21 = vld [vmem:[#allocation11 + $0x540] ss:$28 sps:$4 sm:$0xff]  }
 0x2bb   :  { %v2400_v26 = vmax.f32 %v2148_v27, 0.0  ;;  %v749_v13 = vld [vmem:[#allocation8 + $0x7f8] sm:$0xff]  ;;  %v7104_v15 = vld [vmem:[#allocation11 + $0x50c] ss:$28 sps:$4 sm:$0xff]   ;;  %v7075_v60 = vld [vmem:[#allocation11 + $0x200] ss:$28 sps:$4 sm:$0xff]  }
 0x2bc   :  { %v2401_v31 = vmax.f32 %v2150_v23, 0.0  ;;  %2372 = vmatpush1.bf16.msra.mxu1 %v6233_v19  ;;  %v6306_v17 = vcombine.high %v745_v12, %v749_v13  ;;  %v7110_v19 = vld [vmem:[#allocation11 + $0x544] ss:$28 sps:$4 sm:$0xff]   ;;  %v6305_v27 = vcombine.low %v745_v12, %v749_v13  ;;  %v7041_v20 = vld [vmem:[#allocation11 + $0xc] ss:$28 sps:$4 sm:$0xff]  }
 0x2bd   :  { %2373 = vmatprep.subr.bf16.mxu1 %v6242_v22  ;;  %v8044_v38 = vpack.c.bf16 %v2400_v26, %v2400_v26  ;;  %v7116_v22 = vld [vmem:[#allocation11 + $0x57c] ss:$28 sps:$4 sm:$0xff]   ;;  %v7039_v23 = vld [vmem:[#allocation11 + $0x8] ss:$28 sps:$4 sm:$0xff]   ;;  %v7122_v26 = vld [vmem:[#allocation11 + $0x5b4] ss:$28 sps:$4 sm:$0xff]  }
 0x2be   :  { %v8042_v34 = vpack.c.bf16 %v2401_v31, %v2401_v31  ;;  %v7042_v31 = vld [vmem:[#allocation11 + $0x40] ss:$28 sps:$4 sm:$0xff]   ;;  %v7093_v6 = vld [vmem:[#allocation11 + $0x2a8] ss:$28 sps:$4 sm:$0xff]   ;;  %v7111_v12 = vld [vmem:[#allocation11 + $0x350] ss:$28 sps:$4 sm:$0xff]  }
 0x2bf   :  { %v7083_v61 = vld [vmem:[#allocation11 + $0x23c] ss:$28 sps:$4 sm:$0xff]   ;;  %v7101_v7 = vld [vmem:[#allocation11 + $0x2e4] ss:$28 sps:$4 sm:$0xff]   ;;  %v7119_v13 = vld [vmem:[#allocation11 + $0x38c] ss:$28 sps:$4 sm:$0xff]  }
 0x2c0   :  { %2374 = vmatpush1.bf16.msra.mxu1 %v6241_v32  ;;  %5301 = vmatprep.mubr.bf16.mxu0 %v8042_v34  ;;  %v7047_v32 = vld [vmem:[#allocation11 + $0x7c] ss:$28 sps:$4 sm:$0xff]  }
 0x2c1   :  { %5302 = vmatmul.mubr.bf16.vlgmr.msra.gmra.mrb[12].mxu0 %v8044_v38  ;;  %2375 = vmatprep.subr.bf16.mxu1 %v6250_v33  ;;  %v7120_v33 = vld [vmem:[#allocation11 + $0x5b0] ss:$28 sps:$4 sm:$0xff]  }
 0x2c2   :  { %5311 = vmatpush1.bf16.msra.mxu0 %v7060_v37  ;;  %v7050_v37 = vld [vmem:[#allocation11 + $0xb4] ss:$28 sps:$4 sm:$0xff]  }
 0x2c3   :  { %5312 = vmatprep.subr.bf16.mxu0 %v7068_v39  ;;  %v7126_v39 = vld [vmem:[#allocation11 + $0x5e8] ss:$28 sps:$4 sm:$0xff]  }
 0x2c4   :  { %2376 = vmatpush1.bf16.msra.mxu1 %v6249_v40  ;;  %v7048_v40 = vld [vmem:[#allocation11 + $0xb0] ss:$28 sps:$4 sm:$0xff]  }
 0x2c5   :  { %2377 = vmatprep.subr.bf16.mxu1 %v6258_v41  ;;  %v7053_v41 = vld [vmem:[#allocation11 + $0xec] ss:$28 sps:$4 sm:$0xff]  }
 0x2c6   :  { %5313 = vmatpush1.bf16.msra.mxu0 %v7066_v44  ;;  %v7051_v44 = vld [vmem:[#allocation11 + $0xe8] ss:$28 sps:$4 sm:$0xff]  }
 0x2c7   :  { %5314 = vmatprep.subr.bf16.mxu0 %v7074_v45  ;;  %v7056_v45 = vld [vmem:[#allocation11 + $0x124] ss:$28 sps:$4 sm:$0xff]  }
 0x2c8   :  { %2378 = vmatpush1.bf16.msra.mxu1 %v6257_v46  ;;  %v7138_v46 = vld [vmem:[#allocation11 + $0x658] ss:$28 sps:$4 sm:$0xff]  }
 0x2c9   :  { %2379 = vmatprep.subr.bf16.mxu1 %v6266_v47  ;;  %v7146_v47 = vld [vmem:[#allocation11 + $0x694] ss:$28 sps:$4 sm:$0xff]  }
 0x2ca   :  { %5315 = vmatpush1.bf16.msra.mxu0 %v7072_v51  ;;  %v7144_v51 = vld [vmem:[#allocation11 + $0x690] ss:$28 sps:$4 sm:$0xff]  }
 0x2cb   :  { %5316 = vmatprep.subr.bf16.mxu0 %v7080_v52  ;;  %v7152_v52 = vld [vmem:[#allocation11 + $0x6cc] ss:$28 sps:$4 sm:$0xff]  }
 0x2cc   :  { %2380 = vmatpush1.bf16.msra.mxu1 %v6265_v53  ;;  %v7057_v53 = vld [vmem:[#allocation11 + $0x158] ss:$28 sps:$4 sm:$0xff]  }
 0x2cd   :  { %2381 = vmatprep.subr.bf16.mxu1 %v6274_v54  ;;  %v7065_v54 = vld [vmem:[#allocation11 + $0x194] ss:$28 sps:$4 sm:$0xff]  }
 0x2ce   :  { %5317 = vmatpush1.bf16.msra.mxu0 %v7078_v57  ;;  %v7063_v57 = vld [vmem:[#allocation11 + $0x190] ss:$28 sps:$4 sm:$0xff]  }
 0x2cf   :  { %5318 = vmatprep.subr.bf16.mxu0 %v7086_v58  ;;  %v7071_v58 = vld [vmem:[#allocation11 + $0x1cc] ss:$28 sps:$4 sm:$0xff]  }
 0x2d0   :  { %2382 = vmatpush1.bf16.msra.mxu1 %v6273_v59  ;;  %v7069_v59 = vld [vmem:[#allocation11 + $0x1c8] ss:$28 sps:$4 sm:$0xff]  }
 0x2d1   :  { %2383 = vmatprep.subr.bf16.mxu1 %v6282_v29  ;;  %v7077_v29 = vld [vmem:[#allocation11 + $0x204] ss:$28 sps:$4 sm:$0xff]  }
 0x2d2   :  { %5319 = vmatpush1.bf16.msra.mxu0 %v7084_v1  ;;  %v7081_v1 = vld [vmem:[#allocation11 + $0x238] ss:$28 sps:$4 sm:$0xff]  }
 0x2d3   :  { %5320 = vmatprep.subr.bf16.mxu0 %v7092_v4  ;;  %v7089_v4 = vld [vmem:[#allocation11 + $0x274] ss:$28 sps:$4 sm:$0xff]  }
 0x2d4   :  { %2384 = vmatpush1.bf16.msra.mxu1 %v6281_v5  ;;  %v7087_v5 = vld [vmem:[#allocation11 + $0x270] ss:$28 sps:$4 sm:$0xff]  }
 0x2d5   :  { %2385 = vmatprep.subr.bf16.mxu1 %v6290_v50  ;;  %v7095_v50 = vld [vmem:[#allocation11 + $0x2ac] ss:$28 sps:$4 sm:$0xff]  }
 0x2d6   :  { %5321 = vmatpush1.bf16.msra.mxu0 %v7090_v8  ;;  %v7099_v8 = vld [vmem:[#allocation11 + $0x2e0] ss:$28 sps:$4 sm:$0xff]  }
 0x2d7   :  { %5322 = vmatprep.subr.bf16.mxu0 %v7098_v9  ;;  %v7107_v9 = vld [vmem:[#allocation11 + $0x31c] ss:$28 sps:$4 sm:$0xff]  }
 0x2d8   :  { %2386 = vmatpush1.bf16.msra.mxu1 %v6289_v10  ;;  %v7105_v10 = vld [vmem:[#allocation11 + $0x318] ss:$28 sps:$4 sm:$0xff]  }
 0x2d9   :  { %2387 = vmatprep.subr.bf16.mxu1 %v6298_v11  ;;  %v7113_v11 = vld [vmem:[#allocation11 + $0x354] ss:$28 sps:$4 sm:$0xff]  }
 0x2da   :  { %5323 = vmatpush1.bf16.msra.mxu0 %v7096_v14  ;;  %v7117_v14 = vld [vmem:[#allocation11 + $0x388] ss:$28 sps:$4 sm:$0xff]  }
 0x2db   :  { %5324 = vmatprep.subr.bf16.mxu0 %v7104_v15  ;;  %v7125_v15 = vld [vmem:[#allocation11 + $0x3c4] ss:$28 sps:$4 sm:$0xff]  }
 0x2dc   :  { %2388 = vmatpush1.bf16.msra.mxu1 %v6297_v16  ;;  %v7123_v16 = vld [vmem:[#allocation11 + $0x3c0] ss:$28 sps:$4 sm:$0xff]  }
 0x2dd   :  { %2389 = vmatprep.subr.bf16.mxu1 %v6306_v17  ;;  %v7131_v17 = vld [vmem:[#allocation11 + $0x3fc] ss:$28 sps:$4 sm:$0xff]  }
 0x2de   :  { %5325 = vmatpush1.bf16.msra.mxu0 %v7102_v18  ;;  %v7129_v18 = vld [vmem:[#allocation11 + $0x3f8] ss:$28 sps:$4 sm:$0xff]  }
 0x2df   :  { %5326 = vmatprep.subr.bf16.mxu0 %v7110_v19  ;;  %v7137_v19 = vld [vmem:[#allocation11 + $0x434] ss:$28 sps:$4 sm:$0xff]  }
 0x2e0   :  { %2390 = vmatpush1.bf16.msra.mxu1 %v6305_v27  ;;  %v7135_v27 = vld [vmem:[#allocation11 + $0x430] ss:$28 sps:$4 sm:$0xff]  }
 0x2e1   :  { %5433 = vmatprep.subr.bf16.mxu1 %v7041_v20  ;;  %v7143_v20 = vld [vmem:[#allocation11 + $0x46c] ss:$28 sps:$4 sm:$0xff]  }
 0x2e2   :  { %5327 = vmatpush1.bf16.msra.mxu0 %v7108_v21  ;;  %v7141_v21 = vld [vmem:[#allocation11 + $0x468] ss:$28 sps:$4 sm:$0xff]  }
 0x2e3   :  { %2392 = vmatmul.mubr.bf16.vlgmr.msra.gmra.mrb[12].mxu1 %v8019_v30  ;;  %5328 = vmatprep.subr.bf16.mxu0 %v7116_v22  ;;  %v7134_v30 = vld [vmem:[#allocation11 + $0x624] ss:$28 sps:$4 sm:$0xff]   ;;  %v774_v22 = vsub.s32 5, %v7995_v62 }
 0x2e4   :  { %5434 = vmatpush1.bf16.msra.mxu1 %v7039_v23  ;;  %5465 = vmatprep.mubr.bf16.mxu1 %v8042_v34  ;;  %v7149_v23 = vld [vmem:[#allocation11 + $0x4a4] ss:$28 sps:$4 sm:$0xff]  }
 0x2e5   :  { %5435 = vmatprep.subr.bf16.mxu1 %v7044_v24  ;;  %v763_v24 = vrot.slane %v8036_v28, %v8001_v0 }
 0x2e6   :  { %5329 = vmatpush1.bf16.msra.mxu0 %v7114_v25  ;;  %v767_v25 = vrot.slane %v8036_v28, %v8007_v3 }
 0x2e7   :  { %5330 = vmatprep.subr.bf16.mxu0 %v7122_v26  ;;  %v7147_v26 = vld [vmem:[#allocation11 + $0x4a0] ss:$28 sps:$4 sm:$0xff]  }
 0x2e8   :  { %5436 = vmatpush1.bf16.msra.mxu1 %v7042_v31  ;;  %v775_v31 = vrot.slane %v8036_v28, %v774_v22 }
 0x2e9   :  { %5437 = vmatprep.subr.bf16.mxu1 %v7047_v32  ;;  %v7155_v32 = vld [vmem:[#allocation11 + $0x4dc] ss:$28 sps:$4 sm:$0xff]  }
 0x2ea   :  { %5331 = vmatpush1.bf16.msra.mxu0 %v7120_v33 }
 0x2eb   :  { %5332 = vmatprep.subr.bf16.mxu0 %v7128_v35 }
 0x2ec   :  { %5438 = vmatpush1.bf16.msra.mxu1 %v7045_v36 }
 0x2ed   :  { %5439 = vmatprep.subr.bf16.mxu1 %v7050_v37 }
 0x2ee   :  { %5333 = vmatpush1.bf16.msra.mxu0 %v7126_v39 }
 0x2ef   :  { %5334 = vmatprep.subr.bf16.mxu0 %v7134_v30 }
 0x2f0   :  { %5440 = vmatpush1.bf16.msra.mxu1 %v7048_v40 }
 0x2f1   :  { %5441 = vmatprep.subr.bf16.mxu1 %v7053_v41  ;;  %v7153_v41 = vld [vmem:[#allocation11 + $0x4d8] ss:$28 sps:$4 sm:$0xff]  }
 0x2f2   :  { %5335 = vmatpush1.bf16.msra.mxu0 %v7132_v42 }
 0x2f3   :  { %5336 = vmatprep.subr.bf16.mxu0 %v7140_v43 }
 0x2f4   :  { %5442 = vmatpush1.bf16.msra.mxu1 %v7051_v44 }
 0x2f5   :  { %5443 = vmatprep.subr.bf16.mxu1 %v7056_v45 }
 0x2f6   :  { %5337 = vmatpush1.bf16.msra.mxu0 %v7138_v46  ;;  %v7161_v46 = vld [vmem:[#allocation11 + $0x514] ss:$28 sps:$4 sm:$0xff]  }
 0x2f7   :  { %5338 = vmatprep.subr.bf16.mxu0 %v7146_v47 }
 0x2f8   :  { %5444 = vmatpush1.bf16.msra.mxu1 %v7054_v48 }
 0x2f9   :  { %5445 = vmatprep.subr.bf16.mxu1 %v7059_v49 }
 0x2fa   :  { %5339 = vmatpush1.bf16.msra.mxu0 %v7144_v51 }
 0x2fb   :  { %5340 = vmatprep.subr.bf16.mxu0 %v7152_v52  ;;  %v7156_v52 = vld [vmem:[#allocation11 + $0x700] ss:$28 sps:$4 sm:$0xff]  }
 0x2fc   :  { %5446 = vmatpush1.bf16.msra.mxu1 %v7057_v53 }
 0x2fd   :  { %5447 = vmatprep.subr.bf16.mxu1 %v7065_v54  ;;  %v7159_v54 = vld [vmem:[#allocation11 + $0x510] ss:$28 sps:$4 sm:$0xff]  }
 0x2fe   :  { %5341 = vmatpush1.bf16.msra.mxu0 %v7150_v55  ;;  %v7164_v55 = vld [vmem:[#allocation11 + $0x73c] ss:$28 sps:$4 sm:$0xff]  }
 0x2ff   :  { %5351 = vmatprep.subr.bf16.mxu0 %v7158_v56 }
 0x300   :  { %5448 = vmatpush1.bf16.msra.mxu1 %v7063_v57  ;;  %v7167_v57 = vld [vmem:[#allocation11 + $0x54c] ss:$28 sps:$4 sm:$0xff]  }
 0x301   :  { %5449 = vmatprep.subr.bf16.mxu1 %v7071_v58  ;;  %v7162_v58 = vld [vmem:[#allocation11 + $0x738] ss:$28 sps:$4 sm:$0xff]  }
 0x304   :  { %5450 = vmatpush1.bf16.msra.mxu1 %v7069_v59  ;;  %v7165_v59 = vld [vmem:[#allocation11 + $0x548] ss:$28 sps:$4 sm:$0xff]  }
 0x305   :  { %5451 = vmatprep.subr.bf16.mxu1 %v7077_v29  ;;  %v7170_v29 = vld [vmem:[#allocation11 + $0x774] ss:$28 sps:$4 sm:$0xff]  }
 0x308   :  { %5452 = vmatpush1.bf16.msra.mxu1 %v7075_v60  ;;  %v7173_v60 = vld [vmem:[#allocation11 + $0x584] ss:$28 sps:$4 sm:$0xff]  }
 0x309   :  { %5453 = vmatprep.subr.bf16.mxu1 %v7083_v61  ;;  %v7168_v61 = vld [vmem:[#allocation11 + $0x770] ss:$28 sps:$4 sm:$0xff]  }
 0x30c   :  { %5454 = vmatpush1.bf16.msra.mxu1 %v7081_v1  ;;  %v7171_v1 = vld [vmem:[#allocation11 + $0x580] ss:$28 sps:$4 sm:$0xff]  }
 0x30d   :  { %5455 = vmatprep.subr.bf16.mxu1 %v7089_v4  ;;  %v7176_v4 = vld [vmem:[#allocation11 + $0x7ac] ss:$28 sps:$4 sm:$0xff]  }
 0x310   :  { %5456 = vmatpush1.bf16.msra.mxu1 %v7087_v5  ;;  %v7179_v5 = vld [vmem:[#allocation11 + $0x5bc] ss:$28 sps:$4 sm:$0xff]  }
 0x311   :  { %5457 = vmatprep.subr.bf16.mxu1 %v7095_v50  ;;  %v7174_v50 = vld [vmem:[#allocation11 + $0x7a8] ss:$28 sps:$4 sm:$0xff]  }
 0x314   :  { %5458 = vmatpush1.bf16.msra.mxu1 %v7093_v6  ;;  %v7177_v6 = vld [vmem:[#allocation11 + $0x5b8] ss:$28 sps:$4 sm:$0xff]  }
 0x315   :  { %5459 = vmatprep.subr.bf16.mxu1 %v7101_v7  ;;  %v7182_v7 = vld [vmem:[#allocation11 + $0x7e4] ss:$28 sps:$4 sm:$0xff]  }
 0x318   :  { %5460 = vmatpush1.bf16.msra.mxu1 %v7099_v8  ;;  %v7185_v8 = vld [vmem:[#allocation11 + $0x5f4] ss:$28 sps:$4 sm:$0xff]  }
 0x319   :  { %5461 = vmatprep.subr.bf16.mxu1 %v7107_v9  ;;  %v7180_v9 = vld [vmem:[#allocation11 + $0x7e0] ss:$28 sps:$4 sm:$0xff]  }
 0x31c   :  { %5462 = vmatpush1.bf16.msra.mxu1 %v7105_v10  ;;  %v7183_v10 = vld [vmem:[#allocation11 + $0x5f0] ss:$28 sps:$4 sm:$0xff]  }
 0x31d   :  { %5463 = vmatprep.subr.bf16.mxu1 %v7113_v11  ;;  %v7188_v11 = vld [vmem:[#allocation11 + $0x81c] ss:$28 sps:$4 sm:$0xff]  }
 0x320   :  { %5464 = vmatpush1.bf16.msra.mxu1 %v7111_v12  ;;  %v7191_v12 = vld [vmem:[#allocation11 + $0x62c] ss:$28 sps:$4 sm:$0xff]  }
 0x321   :  { %5474 = vmatprep.subr.bf16.mxu1 %v7119_v13  ;;  %v7186_v13 = vld [vmem:[#allocation11 + $0x818] ss:$28 sps:$4 sm:$0xff]  }
 0x323   :  { %5466 = vmatmul.mubr.bf16.vlgmr.msra.gmra.mrb[16].mxu1 %v8044_v38 }
 0x324   :  { %5475 = vmatpush1.bf16.msra.mxu1 %v7117_v14  ;;  %v7189_v14 = vld [vmem:[#allocation11 + $0x628] ss:$28 sps:$4 sm:$0xff]  }
 0x325   :  { %5476 = vmatprep.subr.bf16.mxu1 %v7125_v15  ;;  %v7194_v15 = vld [vmem:[#allocation11 + $0x854] ss:$28 sps:$4 sm:$0xff]  }
 0x328   :  { %5477 = vmatpush1.bf16.msra.mxu1 %v7123_v16  ;;  %v7197_v16 = vld [vmem:[#allocation11 + $0x664] ss:$28 sps:$4 sm:$0xff]  }
 0x329   :  { %5478 = vmatprep.subr.bf16.mxu1 %v7131_v17  ;;  %v7192_v17 = vld [vmem:[#allocation11 + $0x850] ss:$28 sps:$4 sm:$0xff]  }
 0x32c   :  { %5479 = vmatpush1.bf16.msra.mxu1 %v7129_v18  ;;  %v7195_v18 = vld [vmem:[#allocation11 + $0x660] ss:$28 sps:$4 sm:$0xff]  }
 0x32d   :  { %5480 = vmatprep.subr.bf16.mxu1 %v7137_v19  ;;  %v7200_v19 = vld [vmem:[#allocation11 + $0x88c] ss:$28 sps:$4 sm:$0xff]  }
 0x330   :  { %5481 = vmatpush1.bf16.msra.mxu1 %v7135_v27  ;;  %v7203_v27 = vld [vmem:[#allocation11 + $0x69c] ss:$28 sps:$4 sm:$0xff]  }
 0x331   :  { %5482 = vmatprep.subr.bf16.mxu1 %v7143_v20  ;;  %v7198_v20 = vld [vmem:[#allocation11 + $0x888] ss:$28 sps:$4 sm:$0xff]  }
 0x334   :  { %5483 = vmatpush1.bf16.msra.mxu1 %v7141_v21  ;;  %v7201_v21 = vld [vmem:[#allocation11 + $0x698] ss:$28 sps:$4 sm:$0xff]  }
 0x335   :  { %5484 = vmatprep.subr.bf16.mxu1 %v7149_v23  ;;  %v7206_v23 = vld [vmem:[#allocation11 + $0x8c4] ss:$28 sps:$4 sm:$0xff]  }
 0x336   :  { %v2229_v33 = vpop.f32.mrb[8].mxu1 }
 0x337   :  { %v6855_v35 = vadd.f32 %v2229_v33, %v763_v24  ;;  %v8059_v36 = vpop.f32.mrb[8].mxu0  ;;  %v2231_v37 = vpop.f32.mrb[9].mxu1  ;;  %v7209_v24 = vld [vmem:[#allocation11 + $0x6d4] ss:$28 sps:$4 sm:$0xff]  }
 0x338   :  { %v6856_v39 = vadd.f32 %v2231_v37, %v767_v25  ;;  %v2313_v30 = vpop.f32.mrb[9].mxu0  ;;  %v2233_v40 = vpop.f32.mrb[10].mxu1  ;;  %5485 = vmatpush1.bf16.msra.mxu1 %v7147_v26  ;;  %v7204_v25 = vld [vmem:[#allocation11 + $0x8c0] ss:$28 sps:$4 sm:$0xff]   ;;  %v7207_v26 = vld [vmem:[#allocation11 + $0x6d0] ss:$28 sps:$4 sm:$0xff]  }
 0x339   :  { %v2402_v42 = vmax.f32 %v6855_v35, 0.0  ;;  %v6858_v43 = vadd.f32 %v2313_v30, %v775_v31  ;;  %v2315_v44 = vpop.f32.mrb[10].mxu0  ;;  %v2234_v45 = vpop.f32.mrb[11].mxu1  ;;  %5486 = vmatprep.subr.bf16.mxu1 %v7155_v32  ;;  %v7212_v31 = vld [vmem:[#allocation11 + $0x8fc] ss:$28 sps:$4 sm:$0xff]  }
 0x33a   :  { %v2403_v47 = vmax.f32 %v6856_v39, 0.0  ;;  %v2316_v48 = vpop.f32.mrb[11].mxu0  ;;  %v7215_v32 = vld [vmem:[#allocation11 + $0x70c] ss:$28 sps:$4 sm:$0xff]   ;;  %v7210_v33 = vld [vmem:[#allocation11 + $0x8f8] ss:$28 sps:$4 sm:$0xff]  }
 0x33b   :  { %v2405_v49 = vmax.f32 %v6858_v43, 0.0  ;;  %v8063_v53 = vpack.c.bf16 %v2402_v42, %v2402_v42  ;;  %v7213_v35 = vld [vmem:[#allocation11 + $0x708] ss:$28 sps:$4 sm:$0xff]   ;;  %v7218_v37 = vld [vmem:[#allocation11 + $0x934] ss:$28 sps:$4 sm:$0xff]   ;;  %v770_v48 = vsub.s32 4, %v7995_v62 }
 0x33c   :  { %v8061_v51 = vpack.c.bf16 %v2403_v47, %v2403_v47  ;;  %5487 = vmatpush1.bf16.msra.mxu1 %v7153_v41  ;;  %v7221_v39 = vld [vmem:[#allocation11 + $0x744] ss:$28 sps:$4 sm:$0xff]   ;;  %v7216_v30 = vld [vmem:[#allocation11 + $0x930] ss:$28 sps:$4 sm:$0xff]   ;;  %v7227_v42 = vld [vmem:[#allocation11 + $0x77c] ss:$28 sps:$4 sm:$0xff]  }
 0x33d   :  { %5488 = vmatprep.subr.bf16.mxu1 %v7161_v46  ;;  %v8065_v56 = vpack.c.bf16 %v2405_v49, %v2405_v49  ;;  %v7219_v40 = vld [vmem:[#allocation11 + $0x740] ss:$28 sps:$4 sm:$0xff]   ;;  %v7224_v41 = vld [vmem:[#allocation11 + $0x96c] ss:$28 sps:$4 sm:$0xff]   ;;  %v7225_v44 = vld [vmem:[#allocation11 + $0x778] ss:$28 sps:$4 sm:$0xff]  }
 0x33e   :  { %5342 = vmatprep.mubr.bf16.mxu0 %v8061_v51  ;;  %5506 = vmatprep.mubr.bf16.mxu1 %v8061_v51  ;;  %v7222_v43 = vld [vmem:[#allocation11 + $0x968] ss:$28 sps:$4 sm:$0xff]   ;;  %v7233_v46 = vld [vmem:[#allocation11 + $0x7b4] ss:$28 sps:$4 sm:$0xff]   ;;  %v7228_v47 = vld [vmem:[#allocation11 + $0x9a0] ss:$28 sps:$4 sm:$0xff]  }
 0x33f   :  { %5343 = vmatmul.mubr.bf16.vlgmr.msra.gmra.mrb[12].mxu0 %v8063_v53  ;;  %v7230_v45 = vld [vmem:[#allocation11 + $0x9a4] ss:$28 sps:$4 sm:$0xff]   ;;  %v7231_v49 = vld [vmem:[#allocation11 + $0x7b0] ss:$28 sps:$4 sm:$0xff]  }
 0x340   :  { %5352 = vmatpush1.bf16.msra.mxu0 %v7156_v52  ;;  %5383 = vmatprep.mubr.bf16.mxu0 %v8065_v56  ;;  %v7236_v52 = vld [vmem:[#allocation11 + $0x9dc] ss:$28 sps:$4 sm:$0xff]  }
 0x341   :  { %5489 = vmatpush1.bf16.msra.mxu1 %v7159_v54  ;;  %5353 = vmatprep.subr.bf16.mxu0 %v7164_v55  ;;  %v7239_v54 = vld [vmem:[#allocation11 + $0x7ec] ss:$28 sps:$4 sm:$0xff]   ;;  %v7234_v55 = vld [vmem:[#allocation11 + $0x9d8] ss:$28 sps:$4 sm:$0xff]  }
 0x342   :  { %5490 = vmatprep.subr.bf16.mxu1 %v7167_v57  ;;  %v771_v57 = vrot.slane %v8036_v28, %v770_v48  ;;  %v7249_v28 = vld [vmem:[#allocation11 + $0x858] ss:$28 sps:$4 sm:$0xff]  }
 0x344   :  { %5354 = vmatpush1.bf16.msra.mxu0 %v7162_v58  ;;  %v7237_v58 = vld [vmem:[#allocation11 + $0x7e8] ss:$28 sps:$4 sm:$0xff]  }
 0x345   :  { %5491 = vmatpush1.bf16.msra.mxu1 %v7165_v59  ;;  %5355 = vmatprep.subr.bf16.mxu0 %v7170_v29  ;;  %v7242_v59 = vld [vmem:[#allocation11 + $0xa14] ss:$28 sps:$4 sm:$0xff]   ;;  %v7245_v29 = vld [vmem:[#allocation11 + $0x824] ss:$28 sps:$4 sm:$0xff]  }
 0x346   :  { %5492 = vmatprep.subr.bf16.mxu1 %v7173_v60  ;;  %v7240_v60 = vld [vmem:[#allocation11 + $0xa10] ss:$28 sps:$4 sm:$0xff]  }
 0x348   :  { %5356 = vmatpush1.bf16.msra.mxu0 %v7168_v61  ;;  %v6857_v61 = vadd.f32 %v8059_v36, %v771_v57  ;;  %v7255_v36 = vld [vmem:[#allocation11 + $0x890] ss:$28 sps:$4 sm:$0xff]   ;;  %v7309_v57 = vld [vmem:[#allocation11 + $0xa88] ss:$28 sps:$4 sm:$0xff]  }
 0x349   :  { %5493 = vmatpush1.bf16.msra.mxu1 %v7171_v1  ;;  %5357 = vmatprep.subr.bf16.mxu0 %v7176_v4  ;;  %v7243_v1 = vld [vmem:[#allocation11 + $0x820] ss:$28 sps:$4 sm:$0xff]   ;;  %v7248_v4 = vld [vmem:[#allocation11 + $0xa4c] ss:$28 sps:$4 sm:$0xff]  }
 0x34a   :  { %5494 = vmatprep.subr.bf16.mxu1 %v7179_v5  ;;  %v7251_v5 = vld [vmem:[#allocation11 + $0x85c] ss:$28 sps:$4 sm:$0xff]  }
 0x34c   :  { %5358 = vmatpush1.bf16.msra.mxu0 %v7174_v50  ;;  %v7246_v50 = vld [vmem:[#allocation11 + $0xa48] ss:$28 sps:$4 sm:$0xff]  }
 0x34d   :  { %5495 = vmatpush1.bf16.msra.mxu1 %v7177_v6  ;;  %5359 = vmatprep.subr.bf16.mxu0 %v7182_v7  ;;  %v2404_v6 = vmax.f32 %v6857_v61, 0.0  ;;  %v7254_v7 = vld [vmem:[#allocation11 + $0xa84] ss:$28 sps:$4 sm:$0xff]   ;;  %v7320_v61 = vld [vmem:[#allocation11 + $0xcec] ss:$28 sps:$4 sm:$0xff]  }
 0x34e   :  { %5496 = vmatprep.subr.bf16.mxu1 %v7185_v8  ;;  %v7257_v8 = vld [vmem:[#allocation11 + $0x894] ss:$28 sps:$4 sm:$0xff]  }
 0x350   :  { %5360 = vmatpush1.bf16.msra.mxu0 %v7180_v9  ;;  %v7252_v9 = vld [vmem:[#allocation11 + $0xa80] ss:$28 sps:$4 sm:$0xff]  }
 0x351   :  { %5497 = vmatpush1.bf16.msra.mxu1 %v7183_v10  ;;  %5361 = vmatprep.subr.bf16.mxu0 %v7188_v11  ;;  %v8078_v10 = vpack.c.bf16 %v2404_v6, %v2404_v6  ;;  %v7260_v11 = vld [vmem:[#allocation11 + $0xabc] ss:$28 sps:$4 sm:$0xff]   ;;  %v7329_v6 = vld [vmem:[#allocation11 + $0xb34] ss:$28 sps:$4 sm:$0xff]  }
 0x352   :  { %5498 = vmatprep.subr.bf16.mxu1 %v7191_v12  ;;  %v7263_v12 = vld [vmem:[#allocation11 + $0x8cc] ss:$28 sps:$4 sm:$0xff]  }
 0x354   :  { %5362 = vmatpush1.bf16.msra.mxu0 %v7186_v13  ;;  %v7258_v13 = vld [vmem:[#allocation11 + $0xab8] ss:$28 sps:$4 sm:$0xff]  }
 0x355   :  { %5499 = vmatpush1.bf16.msra.mxu1 %v7189_v14  ;;  %5363 = vmatprep.subr.bf16.mxu0 %v7194_v15  ;;  %v7261_v14 = vld [vmem:[#allocation11 + $0x8c8] ss:$28 sps:$4 sm:$0xff]   ;;  %v7266_v15 = vld [vmem:[#allocation11 + $0xaf4] ss:$28 sps:$4 sm:$0xff]  }
 0x356   :  { %5500 = vmatprep.subr.bf16.mxu1 %v7197_v16  ;;  %v7269_v16 = vld [vmem:[#allocation11 + $0x904] ss:$28 sps:$4 sm:$0xff]  }
 0x358   :  { %5364 = vmatpush1.bf16.msra.mxu0 %v7192_v17  ;;  %v7264_v17 = vld [vmem:[#allocation11 + $0xaf0] ss:$28 sps:$4 sm:$0xff]  }
 0x359   :  { %5501 = vmatpush1.bf16.msra.mxu1 %v7195_v18  ;;  %5365 = vmatprep.subr.bf16.mxu0 %v7200_v19  ;;  %v7267_v18 = vld [vmem:[#allocation11 + $0x900] ss:$28 sps:$4 sm:$0xff]   ;;  %v7272_v19 = vld [vmem:[#allocation11 + $0xb2c] ss:$28 sps:$4 sm:$0xff]  }
 0x35a   :  { %5502 = vmatprep.subr.bf16.mxu1 %v7203_v27  ;;  %v7275_v27 = vld [vmem:[#allocation11 + $0x93c] ss:$28 sps:$4 sm:$0xff]  }
 0x35c   :  { %5366 = vmatpush1.bf16.msra.mxu0 %v7198_v20  ;;  %v7270_v20 = vld [vmem:[#allocation11 + $0xb28] ss:$28 sps:$4 sm:$0xff]  }
 0x35d   :  { %5503 = vmatpush1.bf16.msra.mxu1 %v7201_v21  ;;  %5367 = vmatprep.subr.bf16.mxu0 %v7206_v23  ;;  %v7273_v21 = vld [vmem:[#allocation11 + $0x938] ss:$28 sps:$4 sm:$0xff]   ;;  %v7278_v23 = vld [vmem:[#allocation11 + $0xb64] ss:$28 sps:$4 sm:$0xff]  }
 0x35e   :  { %5504 = vmatprep.subr.bf16.mxu1 %v7209_v24  ;;  %v7281_v24 = vld [vmem:[#allocation11 + $0x974] ss:$28 sps:$4 sm:$0xff]  }
 0x360   :  { %5368 = vmatpush1.bf16.msra.mxu0 %v7204_v25  ;;  %v7276_v25 = vld [vmem:[#allocation11 + $0xb60] ss:$28 sps:$4 sm:$0xff]  }
 0x361   :  { %5505 = vmatpush1.bf16.msra.mxu1 %v7207_v26  ;;  %5369 = vmatprep.subr.bf16.mxu0 %v7212_v31  ;;  %v7279_v26 = vld [vmem:[#allocation11 + $0x970] ss:$28 sps:$4 sm:$0xff]   ;;  %v7284_v31 = vld [vmem:[#allocation11 + $0xb9c] ss:$28 sps:$4 sm:$0xff]  }
 0x362   :  { %5515 = vmatprep.subr.bf16.mxu1 %v7215_v32  ;;  %v7287_v32 = vld [vmem:[#allocation11 + $0x9ac] ss:$28 sps:$4 sm:$0xff]  }
 0x364   :  { %5370 = vmatpush1.bf16.msra.mxu0 %v7210_v33  ;;  %5507 = vmatmul.mubr.bf16.vlgmr.msra.gmra.mrb[16].mxu1 %v8063_v53  ;;  %v7282_v33 = vld [vmem:[#allocation11 + $0xb98] ss:$28 sps:$4 sm:$0xff]  }
 0x365   :  { %5516 = vmatpush1.bf16.msra.mxu1 %v7213_v35  ;;  %5547 = vmatprep.mubr.bf16.mxu1 %v8065_v56  ;;  %v7285_v35 = vld [vmem:[#allocation11 + $0x9a8] ss:$28 sps:$4 sm:$0xff]  }
 0x366   :  { %5371 = vmatprep.subr.bf16.mxu0 %v7218_v37  ;;  %5517 = vmatprep.subr.bf16.mxu1 %v7221_v39  ;;  %v7290_v37 = vld [vmem:[#allocation11 + $0xbd4] ss:$28 sps:$4 sm:$0xff]   ;;  %v7293_v39 = vld [vmem:[#allocation11 + $0x9e4] ss:$28 sps:$4 sm:$0xff]  }
 0x368   :  { %5372 = vmatpush1.bf16.msra.mxu0 %v7216_v30  ;;  %v7288_v30 = vld [vmem:[#allocation11 + $0xbd0] ss:$28 sps:$4 sm:$0xff]  }
 0x369   :  { %5518 = vmatpush1.bf16.msra.mxu1 %v7219_v40  ;;  %5373 = vmatprep.subr.bf16.mxu0 %v7224_v41  ;;  %v7291_v40 = vld [vmem:[#allocation11 + $0x9e0] ss:$28 sps:$4 sm:$0xff]   ;;  %v7296_v41 = vld [vmem:[#allocation11 + $0xc0c] ss:$28 sps:$4 sm:$0xff]  }
 0x36a   :  { %5519 = vmatprep.subr.bf16.mxu1 %v7227_v42  ;;  %v7299_v42 = vld [vmem:[#allocation11 + $0xa1c] ss:$28 sps:$4 sm:$0xff]  }
 0x36c   :  { %5374 = vmatpush1.bf16.msra.mxu0 %v7222_v43  ;;  %v7294_v43 = vld [vmem:[#allocation11 + $0xc08] ss:$28 sps:$4 sm:$0xff]  }
 0x36d   :  { %5520 = vmatpush1.bf16.msra.mxu1 %v7225_v44  ;;  %5375 = vmatprep.subr.bf16.mxu0 %v7230_v45  ;;  %v7297_v44 = vld [vmem:[#allocation11 + $0xa18] ss:$28 sps:$4 sm:$0xff]   ;;  %v7302_v45 = vld [vmem:[#allocation11 + $0xc44] ss:$28 sps:$4 sm:$0xff]  }
 0x36e   :  { %5521 = vmatprep.subr.bf16.mxu1 %v7233_v46  ;;  %v7305_v46 = vld [vmem:[#allocation11 + $0xa54] ss:$28 sps:$4 sm:$0xff]  }
 0x370   :  { %5376 = vmatpush1.bf16.msra.mxu0 %v7228_v47  ;;  %v7300_v47 = vld [vmem:[#allocation11 + $0xc40] ss:$28 sps:$4 sm:$0xff]  }
 0x371   :  { %5522 = vmatpush1.bf16.msra.mxu1 %v7231_v49  ;;  %5377 = vmatprep.subr.bf16.mxu0 %v7236_v52  ;;  %v7303_v49 = vld [vmem:[#allocation11 + $0xa50] ss:$28 sps:$4 sm:$0xff]   ;;  %v7308_v52 = vld [vmem:[#allocation11 + $0xc7c] ss:$28 sps:$4 sm:$0xff]  }
 0x372   :  { %5523 = vmatprep.subr.bf16.mxu1 %v7239_v54  ;;  %v7311_v54 = vld [vmem:[#allocation11 + $0xa8c] ss:$28 sps:$4 sm:$0xff]  }
 0x374   :  { %5378 = vmatpush1.bf16.msra.mxu0 %v7234_v55  ;;  %v7306_v55 = vld [vmem:[#allocation11 + $0xc78] ss:$28 sps:$4 sm:$0xff]  }
 0x375   :  { %5524 = vmatpush1.bf16.msra.mxu1 %v7237_v58  ;;  %5379 = vmatprep.subr.bf16.mxu0 %v7242_v59  ;;  %v7314_v58 = vld [vmem:[#allocation11 + $0xcb4] ss:$28 sps:$4 sm:$0xff]   ;;  %v7317_v59 = vld [vmem:[#allocation11 + $0xac4] ss:$28 sps:$4 sm:$0xff]  }
 0x376   :  { %5525 = vmatprep.subr.bf16.mxu1 %v7245_v29  ;;  %v7312_v29 = vld [vmem:[#allocation11 + $0xcb0] ss:$28 sps:$4 sm:$0xff]  }
 0x378   :  { %5380 = vmatpush1.bf16.msra.mxu0 %v7240_v60  ;;  %v7315_v60 = vld [vmem:[#allocation11 + $0xac0] ss:$28 sps:$4 sm:$0xff]  }
 0x379   :  { %5526 = vmatpush1.bf16.msra.mxu1 %v7243_v1  ;;  %5381 = vmatprep.subr.bf16.mxu0 %v7248_v4  ;;  %v7323_v1 = vld [vmem:[#allocation11 + $0xafc] ss:$28 sps:$4 sm:$0xff]   ;;  %v7318_v4 = vld [vmem:[#allocation11 + $0xce8] ss:$28 sps:$4 sm:$0xff]  }
 0x37a   :  { %5527 = vmatprep.subr.bf16.mxu1 %v7251_v5  ;;  %v7321_v5 = vld [vmem:[#allocation11 + $0xaf8] ss:$28 sps:$4 sm:$0xff]  }
 0x37c   :  { %5382 = vmatpush1.bf16.msra.mxu0 %v7246_v50  ;;  %v7326_v50 = vld [vmem:[#allocation11 + $0xd24] ss:$28 sps:$4 sm:$0xff]  }
 0x37d   :  { %5528 = vmatpush1.bf16.msra.mxu1 %v7249_v28  ;;  %5392 = vmatprep.subr.bf16.mxu0 %v7254_v7  ;;  %v7324_v28 = vld [vmem:[#allocation11 + $0xd20] ss:$28 sps:$4 sm:$0xff]   ;;  %v7327_v7 = vld [vmem:[#allocation11 + $0xb30] ss:$28 sps:$4 sm:$0xff]  }
 0x37e   :  { %5529 = vmatprep.subr.bf16.mxu1 %v7257_v8  ;;  %v7332_v8 = vld [vmem:[#allocation11 + $0xd5c] ss:$28 sps:$4 sm:$0xff]  }
 0x37f   :  { %5384 = vmatmul.mubr.bf16.vlgmr.msra.gmra.mrb[12].mxu0 %v8078_v10 }
 0x380   :  { %5393 = vmatpush1.bf16.msra.mxu0 %v7252_v9  ;;  %v7335_v9 = vld [vmem:[#allocation11 + $0xb6c] ss:$28 sps:$4 sm:$0xff]  }
 0x381   :  { %5530 = vmatpush1.bf16.msra.mxu1 %v7255_v36  ;;  %5394 = vmatprep.subr.bf16.mxu0 %v7260_v11  ;;  %v778_v36 = vsub.s32 6, %v7995_v62  ;;  %v7330_v11 = vld [vmem:[#allocation11 + $0xd58] ss:$28 sps:$4 sm:$0xff]  }
 0x382   :  { %5531 = vmatprep.subr.bf16.mxu1 %v7263_v12  ;;  %v782_v12 = vsub.s32 7, %v7995_v62 }
 0x384   :  { %5395 = vmatpush1.bf16.msra.mxu0 %v7258_v13  ;;  %v7333_v13 = vld [vmem:[#allocation11 + $0xb68] ss:$28 sps:$4 sm:$0xff]  }
 0x385   :  { %5532 = vmatpush1.bf16.msra.mxu1 %v7261_v14  ;;  %5396 = vmatprep.subr.bf16.mxu0 %v7266_v15  ;;  %v7338_v14 = vld [vmem:[#allocation11 + $0xd94] ss:$28 sps:$4 sm:$0xff]   ;;  %v7341_v15 = vld [vmem:[#allocation11 + $0xba4] ss:$28 sps:$4 sm:$0xff]  }
 0x386   :  { %5533 = vmatprep.subr.bf16.mxu1 %v7269_v16  ;;  %v7659_v16 = vld [vmem:[#allocation10] sm:$0xff] }
 0x388   :  { %5397 = vmatpush1.bf16.msra.mxu0 %v7264_v17  ;;  %v779_v17 = vrot.slane %v7659_v16, %v778_v36 }
 0x389   :  { %5534 = vmatpush1.bf16.msra.mxu1 %v7267_v18  ;;  %5398 = vmatprep.subr.bf16.mxu0 %v7272_v19  ;;  %v7336_v18 = vld [vmem:[#allocation11 + $0xd90] ss:$28 sps:$4 sm:$0xff]   ;;  %v783_v19 = vrot.slane %v7659_v16, %v782_v12  ;;  %v7387_v12 = vld [vmem:[#allocation11 + $0xd60] ss:$28 sps:$4 sm:$0xff]   ;;  %v7393_v16 = vld [vmem:[#allocation11 + $0xd98] ss:$28 sps:$4 sm:$0xff]  }
 0x38a   :  { %5535 = vmatprep.subr.bf16.mxu1 %v7275_v27  ;;  %v7339_v27 = vld [vmem:[#allocation11 + $0xba0] ss:$28 sps:$4 sm:$0xff]  }
 0x38c   :  { %5399 = vmatpush1.bf16.msra.mxu0 %v7270_v20  ;;  %v7344_v20 = vld [vmem:[#allocation11 + $0xdcc] ss:$28 sps:$4 sm:$0xff]  }
 0x38d   :  { %5536 = vmatpush1.bf16.msra.mxu1 %v7273_v21  ;;  %5400 = vmatprep.subr.bf16.mxu0 %v7278_v23  ;;  %v7347_v23 = vld [vmem:[#allocation11 + $0xbdc] ss:$28 sps:$4 sm:$0xff]  }
 0x38e   :  { %5537 = vmatprep.subr.bf16.mxu1 %v7281_v24 }
 0x390   :  { %5401 = vmatpush1.bf16.msra.mxu0 %v7276_v25 }
 0x391   :  { %5538 = vmatpush1.bf16.msra.mxu1 %v7279_v26  ;;  %5402 = vmatprep.subr.bf16.mxu0 %v7284_v31 }
 0x392   :  { %5539 = vmatprep.subr.bf16.mxu1 %v7287_v32  ;;  %v7342_v32 = vld [vmem:[#allocation11 + $0xdc8] ss:$28 sps:$4 sm:$0xff]  }
 0x394   :  { %5403 = vmatpush1.bf16.msra.mxu0 %v7282_v33 }
 0x395   :  { %5540 = vmatpush1.bf16.msra.mxu1 %v7285_v35  ;;  %5404 = vmatprep.subr.bf16.mxu0 %v7290_v37  ;;  %v7345_v37 = vld [vmem:[#allocation11 + $0xbd8] ss:$28 sps:$4 sm:$0xff]  }
 0x396   :  { %5541 = vmatprep.subr.bf16.mxu1 %v7293_v39  ;;  %v7350_v39 = vld [vmem:[#allocation11 + $0x14] ss:$28 sps:$4 sm:$0xff]  }
 0x398   :  { %5405 = vmatpush1.bf16.msra.mxu0 %v7288_v30 }
 0x399   :  { %5542 = vmatpush1.bf16.msra.mxu1 %v7291_v40  ;;  %5406 = vmatprep.subr.bf16.mxu0 %v7296_v41  ;;  %v7353_v40 = vld [vmem:[#allocation11 + $0xc14] ss:$28 sps:$4 sm:$0xff]  }
 0x39a   :  { %5543 = vmatprep.subr.bf16.mxu1 %v7299_v42  ;;  %v7348_v42 = vld [vmem:[#allocation11 + $0x10] ss:$28 sps:$4 sm:$0xff]  }
 0x39c   :  { %5407 = vmatpush1.bf16.msra.mxu0 %v7294_v43 }
 0x39d   :  { %5544 = vmatpush1.bf16.msra.mxu1 %v7297_v44  ;;  %5408 = vmatprep.subr.bf16.mxu0 %v7302_v45  ;;  %v7351_v44 = vld [vmem:[#allocation11 + $0xc10] ss:$28 sps:$4 sm:$0xff]  }
 0x39e   :  { %5545 = vmatprep.subr.bf16.mxu1 %v7305_v46  ;;  %v7356_v45 = vld [vmem:[#allocation11 + $0x4c] ss:$28 sps:$4 sm:$0xff]  }
 0x39f   :  { %v7359_v46 = vld [vmem:[#allocation11 + $0xc4c] ss:$28 sps:$4 sm:$0xff]  }
 0x3a0   :  { %5409 = vmatpush1.bf16.msra.mxu0 %v7300_v47  ;;  %v7354_v47 = vld [vmem:[#allocation11 + $0x48] ss:$28 sps:$4 sm:$0xff]  }
 0x3a1   :  { %5546 = vmatpush1.bf16.msra.mxu1 %v7303_v49  ;;  %5410 = vmatprep.subr.bf16.mxu0 %v7308_v52  ;;  %v7357_v49 = vld [vmem:[#allocation11 + $0xc48] ss:$28 sps:$4 sm:$0xff]  }
 0x3a2   :  { %5556 = vmatprep.subr.bf16.mxu1 %v7311_v54  ;;  %v7362_v52 = vld [vmem:[#allocation11 + $0x84] ss:$28 sps:$4 sm:$0xff]  }
 0x3a3   :  { %v7365_v54 = vld [vmem:[#allocation11 + $0xc84] ss:$28 sps:$4 sm:$0xff]  }
 0x3a4   :  { %5411 = vmatpush1.bf16.msra.mxu0 %v7306_v55  ;;  %5548 = vmatmul.mubr.bf16.vlgmr.msra.gmra.mrb[16].mxu1 %v8078_v10  ;;  %v7360_v55 = vld [vmem:[#allocation11 + $0x80] ss:$28 sps:$4 sm:$0xff]  }
 0x3a5   :  { %5557 = vmatpush1.bf16.msra.mxu1 %v7309_v57  ;;  %5412 = vmatprep.subr.bf16.mxu0 %v7314_v58  ;;  %v7363_v57 = vld [vmem:[#allocation11 + $0xc80] ss:$28 sps:$4 sm:$0xff]  }
 0x3a6   :  { %5558 = vmatprep.subr.bf16.mxu1 %v7317_v59  ;;  %v7368_v58 = vld [vmem:[#allocation11 + $0xbc] ss:$28 sps:$4 sm:$0xff]  }
 0x3a7   :  { %v7371_v59 = vld [vmem:[#allocation11 + $0xcbc] ss:$28 sps:$4 sm:$0xff]  }
 0x3a8   :  { %5413 = vmatpush1.bf16.msra.mxu0 %v7312_v29  ;;  %v7366_v29 = vld [vmem:[#allocation11 + $0xb8] ss:$28 sps:$4 sm:$0xff]  }
 0x3a9   :  { %5559 = vmatpush1.bf16.msra.mxu1 %v7315_v60  ;;  %5414 = vmatprep.subr.bf16.mxu0 %v7320_v61  ;;  %v7369_v60 = vld [vmem:[#allocation11 + $0xcb8] ss:$28 sps:$4 sm:$0xff]  }
 0x3aa   :  { %5560 = vmatprep.subr.bf16.mxu1 %v7323_v1  ;;  %v7374_v61 = vld [vmem:[#allocation11 + $0xf4] ss:$28 sps:$4 sm:$0xff]  }
 0x3ab   :  { %v7377_v1 = vld [vmem:[#allocation11 + $0xcf4] ss:$28 sps:$4 sm:$0xff]  }
 0x3ac   :  { %5415 = vmatpush1.bf16.msra.mxu0 %v7318_v4  ;;  %v7372_v4 = vld [vmem:[#allocation11 + $0xf0] ss:$28 sps:$4 sm:$0xff]  }
 0x3ad   :  { %5561 = vmatpush1.bf16.msra.mxu1 %v7321_v5  ;;  %5416 = vmatprep.subr.bf16.mxu0 %v7326_v50  ;;  %v7375_v5 = vld [vmem:[#allocation11 + $0xcf0] ss:$28 sps:$4 sm:$0xff]  }
 0x3ae   :  { %5562 = vmatprep.subr.bf16.mxu1 %v7329_v6  ;;  %v7380_v50 = vld [vmem:[#allocation11 + $0x12c] ss:$28 sps:$4 sm:$0xff]  }
 0x3af   :  { %v7383_v6 = vld [vmem:[#allocation11 + $0xd2c] ss:$28 sps:$4 sm:$0xff]  }
 0x3b0   :  { %5417 = vmatpush1.bf16.msra.mxu0 %v7324_v28  ;;  %v7378_v28 = vld [vmem:[#allocation11 + $0x128] ss:$28 sps:$4 sm:$0xff]  }
 0x3b1   :  { %5563 = vmatpush1.bf16.msra.mxu1 %v7327_v7  ;;  %5418 = vmatprep.subr.bf16.mxu0 %v7332_v8  ;;  %v7381_v7 = vld [vmem:[#allocation11 + $0xd28] ss:$28 sps:$4 sm:$0xff]  }
 0x3b2   :  { %5564 = vmatprep.subr.bf16.mxu1 %v7335_v9  ;;  %v7386_v8 = vld [vmem:[#allocation11 + $0x164] ss:$28 sps:$4 sm:$0xff]  }
 0x3b3   :  { %v7389_v9 = vld [vmem:[#allocation11 + $0xd64] ss:$28 sps:$4 sm:$0xff]  }
 0x3b4   :  { %5419 = vmatpush1.bf16.msra.mxu0 %v7330_v11  ;;  %v7384_v11 = vld [vmem:[#allocation11 + $0x160] ss:$28 sps:$4 sm:$0xff]  }
 0x3b5   :  { %5565 = vmatpush1.bf16.msra.mxu1 %v7333_v13  ;;  %5420 = vmatprep.subr.bf16.mxu0 %v7338_v14  ;;  %v7392_v13 = vld [vmem:[#allocation11 + $0x19c] ss:$28 sps:$4 sm:$0xff]  }
 0x3b6   :  { %v2393_v21 = vpop.f32.mrb[12].mxu1  ;;  %5566 = vmatprep.subr.bf16.mxu1 %v7341_v15  ;;  %v7395_v14 = vld [vmem:[#allocation11 + $0xd9c] ss:$28 sps:$4 sm:$0xff]  }
 0x3b7   :  { %v6859_v24 = vadd.f32 %v2393_v21, %v779_v17  ;;  %v2395_v25 = vpop.f32.mrb[13].mxu1  ;;  %v7390_v15 = vld [vmem:[#allocation11 + $0x198] ss:$28 sps:$4 sm:$0xff]  }
 0x3b8   :  { %v6860_v26 = vadd.f32 %v2395_v25, %v783_v19  ;;  %5421 = vmatpush1.bf16.msra.mxu0 %v7336_v18  ;;  %v2397_v31 = vpop.f32.mrb[14].mxu1  ;;  %v7398_v17 = vld [vmem:[#allocation11 + $0x1d4] ss:$28 sps:$4 sm:$0xff]   ;;  %v7409_v25 = vld [vmem:[#allocation11 + $0x244] ss:$28 sps:$4 sm:$0xff]  }
 0x3b9   :  { %v2406_v33 = vmax.f32 %v6859_v24, 0.0  ;;  %5567 = vmatpush1.bf16.msra.mxu1 %v7339_v27  ;;  %v2398_v35 = vpop.f32.mrb[15].mxu1  ;;  %5422 = vmatprep.subr.bf16.mxu0 %v7344_v20  ;;  %v7401_v18 = vld [vmem:[#allocation11 + $0xdd4] ss:$28 sps:$4 sm:$0xff]   ;;  %v7404_v20 = vld [vmem:[#allocation11 + $0x20c] ss:$28 sps:$4 sm:$0xff]  }
 0x3ba   :  { %v2407_v30 = vmax.f32 %v6860_v26, 0.0  ;;  %5568 = vmatprep.subr.bf16.mxu1 %v7347_v23  ;;  %v7396_v19 = vld [vmem:[#allocation11 + $0x1d0] ss:$28 sps:$4 sm:$0xff]   ;;  %v7405_v21 = vld [vmem:[#allocation11 + $0x1d8] ss:$28 sps:$4 sm:$0xff]  }
 0x3bb   :  { %v8088_v43 = vpack.c.bf16 %v2406_v33, %v2406_v33  ;;  %v7399_v27 = vld [vmem:[#allocation11 + $0xdd0] ss:$28 sps:$4 sm:$0xff]   ;;  %v7402_v23 = vld [vmem:[#allocation11 + $0x208] ss:$28 sps:$4 sm:$0xff]   ;;  %v7406_v24 = vld [vmem:[#allocation11 + $0x18] ss:$28 sps:$4 sm:$0xff]  }
 0x3bc   :  { %v8086_v41 = vpack.c.bf16 %v2407_v30, %v2407_v30  ;;  %5423 = vmatpush1.bf16.msra.mxu0 %v7342_v32  ;;  %v7410_v26 = vld [vmem:[#allocation11 + $0x210] ss:$28 sps:$4 sm:$0xff]   ;;  %v7407_v31 = vld [vmem:[#allocation11 + $0x240] ss:$28 sps:$4 sm:$0xff]   ;;  %v7415_v35 = vld [vmem:[#allocation11 + $0x248] ss:$28 sps:$4 sm:$0xff]  }
 0x3bd   :  { %5569 = vmatpush1.bf16.msra.mxu1 %v7345_v37  ;;  %5597 = vmatprep.subr.bf16.mxu0 %v7350_v39  ;;  %v7411_v32 = vld [vmem:[#allocation11 + $0x50] ss:$28 sps:$4 sm:$0xff]   ;;  %v7414_v33 = vld [vmem:[#allocation11 + $0x27c] ss:$28 sps:$4 sm:$0xff]   ;;  %v7416_v39 = vld [vmem:[#allocation11 + $0x88] ss:$28 sps:$4 sm:$0xff]  }
 0x3be   :  { %5424 = vmatprep.mubr.bf16.mxu0 %v8086_v41  ;;  %5588 = vmatprep.mubr.bf16.mxu1 %v8086_v41  ;;  %v7412_v37 = vld [vmem:[#allocation11 + $0x278] ss:$28 sps:$4 sm:$0xff]  }
 0x3bf   :  { %5425 = vmatmul.mubr.bf16.vlgmr.msra.gmra.mrb[12].mxu0 %v8088_v43  ;;  %5570 = vmatprep.subr.bf16.mxu1 %v7353_v40  ;;  %v7419_v30 = vld [vmem:[#allocation11 + $0x2b4] ss:$28 sps:$4 sm:$0xff]   ;;  %v7420_v40 = vld [vmem:[#allocation11 + $0x280] ss:$28 sps:$4 sm:$0xff]  }
 0x3c0   :  { %5598 = vmatpush1.bf16.msra.mxu0 %v7348_v42  ;;  %5629 = vmatprep.mubr.bf16.mxu0 %v8042_v34  ;;  %v7417_v42 = vld [vmem:[#allocation11 + $0x2b0] ss:$28 sps:$4 sm:$0xff]  }
 0x3c1   :  { %5571 = vmatpush1.bf16.msra.mxu1 %v7351_v44  ;;  %5599 = vmatprep.subr.bf16.mxu0 %v7356_v45  ;;  %v7421_v44 = vld [vmem:[#allocation11 + $0xc0] ss:$28 sps:$4 sm:$0xff]   ;;  %v7424_v45 = vld [vmem:[#allocation11 + $0x2ec] ss:$28 sps:$4 sm:$0xff]  }
 0x3c2   :  { %5572 = vmatprep.subr.bf16.mxu1 %v7359_v46  ;;  %v7422_v46 = vld [vmem:[#allocation11 + $0x2e8] ss:$28 sps:$4 sm:$0xff]  }
 0x3c4   :  { %5600 = vmatpush1.bf16.msra.mxu0 %v7354_v47  ;;  %v7426_v47 = vld [vmem:[#allocation11 + $0xf8] ss:$28 sps:$4 sm:$0xff]  }
 0x3c5   :  { %5573 = vmatpush1.bf16.msra.mxu1 %v7357_v49  ;;  %5601 = vmatprep.subr.bf16.mxu0 %v7362_v52  ;;  %v7429_v49 = vld [vmem:[#allocation11 + $0x324] ss:$28 sps:$4 sm:$0xff]   ;;  %v7430_v52 = vld [vmem:[#allocation11 + $0x2f0] ss:$28 sps:$4 sm:$0xff]  }
 0x3c6   :  { %5574 = vmatprep.subr.bf16.mxu1 %v7365_v54  ;;  %v7427_v54 = vld [vmem:[#allocation11 + $0x320] ss:$28 sps:$4 sm:$0xff]  }
 0x3c8   :  { %5602 = vmatpush1.bf16.msra.mxu0 %v7360_v55  ;;  %v7431_v55 = vld [vmem:[#allocation11 + $0x130] ss:$28 sps:$4 sm:$0xff]  }
 0x3c9   :  { %5575 = vmatpush1.bf16.msra.mxu1 %v7363_v57  ;;  %5603 = vmatprep.subr.bf16.mxu0 %v7368_v58  ;;  %v7434_v57 = vld [vmem:[#allocation11 + $0x35c] ss:$28 sps:$4 sm:$0xff]   ;;  %v7435_v58 = vld [vmem:[#allocation11 + $0x328] ss:$28 sps:$4 sm:$0xff]  }
 0x3ca   :  { %5576 = vmatprep.subr.bf16.mxu1 %v7371_v59  ;;  %v7432_v59 = vld [vmem:[#allocation11 + $0x358] ss:$28 sps:$4 sm:$0xff]  }
 0x3cc   :  { %5604 = vmatpush1.bf16.msra.mxu0 %v7366_v29  ;;  %v7436_v29 = vld [vmem:[#allocation11 + $0x168] ss:$28 sps:$4 sm:$0xff]  }
 0x3cd   :  { %5577 = vmatpush1.bf16.msra.mxu1 %v7369_v60  ;;  %5605 = vmatprep.subr.bf16.mxu0 %v7374_v61  ;;  %v7439_v60 = vld [vmem:[#allocation11 + $0x394] ss:$28 sps:$4 sm:$0xff]   ;;  %v7440_v61 = vld [vmem:[#allocation11 + $0x360] ss:$28 sps:$4 sm:$0xff]  }
 0x3ce   :  { %5578 = vmatprep.subr.bf16.mxu1 %v7377_v1  ;;  %v7437_v1 = vld [vmem:[#allocation11 + $0x390] ss:$28 sps:$4 sm:$0xff]  }
 0x3d0   :  { %5606 = vmatpush1.bf16.msra.mxu0 %v7372_v4  ;;  %v7441_v4 = vld [vmem:[#allocation11 + $0x1a0] ss:$28 sps:$4 sm:$0xff]  }
 0x3d1   :  { %5579 = vmatpush1.bf16.msra.mxu1 %v7375_v5  ;;  %5607 = vmatprep.subr.bf16.mxu0 %v7380_v50  ;;  %v7444_v5 = vld [vmem:[#allocation11 + $0x3cc] ss:$28 sps:$4 sm:$0xff]   ;;  %v7445_v50 = vld [vmem:[#allocation11 + $0x558] ss:$28 sps:$4 sm:$0xff]  }
 0x3d2   :  { %5580 = vmatprep.subr.bf16.mxu1 %v7383_v6  ;;  %v7442_v6 = vld [vmem:[#allocation11 + $0x3c8] ss:$28 sps:$4 sm:$0xff]  }
 0x3d4   :  { %5608 = vmatpush1.bf16.msra.mxu0 %v7378_v28  ;;  %v7446_v28 = vld [vmem:[#allocation11 + $0x398] ss:$28 sps:$4 sm:$0xff]  }
 0x3d5   :  { %5581 = vmatpush1.bf16.msra.mxu1 %v7381_v7  ;;  %5609 = vmatprep.subr.bf16.mxu0 %v7386_v8  ;;  %v7449_v7 = vld [vmem:[#allocation11 + $0x404] ss:$28 sps:$4 sm:$0xff]   ;;  %v7450_v8 = vld [vmem:[#allocation11 + $0x590] ss:$28 sps:$4 sm:$0xff]  }
 0x3d6   :  { %5582 = vmatprep.subr.bf16.mxu1 %v7389_v9  ;;  %v7447_v9 = vld [vmem:[#allocation11 + $0x400] ss:$28 sps:$4 sm:$0xff]  }
 0x3d8   :  { %5610 = vmatpush1.bf16.msra.mxu0 %v7384_v11  ;;  %v7451_v11 = vld [vmem:[#allocation11 + $0x3d0] ss:$28 sps:$4 sm:$0xff]  }
 0x3d9   :  { %5583 = vmatpush1.bf16.msra.mxu1 %v7387_v12  ;;  %5611 = vmatprep.subr.bf16.mxu0 %v7392_v13  ;;  %v7454_v12 = vld [vmem:[#allocation11 + $0x43c] ss:$28 sps:$4 sm:$0xff]   ;;  %v7455_v13 = vld [vmem:[#allocation11 + $0x5c8] ss:$28 sps:$4 sm:$0xff]  }
 0x3da   :  { %5584 = vmatprep.subr.bf16.mxu1 %v7395_v14  ;;  %v7452_v14 = vld [vmem:[#allocation11 + $0x438] ss:$28 sps:$4 sm:$0xff]  }
 0x3dc   :  { %5612 = vmatpush1.bf16.msra.mxu0 %v7390_v15  ;;  %v7456_v15 = vld [vmem:[#allocation11 + $0x408] ss:$28 sps:$4 sm:$0xff]  }
 0x3dd   :  { %5585 = vmatpush1.bf16.msra.mxu1 %v7393_v16  ;;  %5613 = vmatprep.subr.bf16.mxu0 %v7398_v17  ;;  %v7459_v16 = vld [vmem:[#allocation11 + $0x474] ss:$28 sps:$4 sm:$0xff]   ;;  %v7460_v17 = vld [vmem:[#allocation11 + $0x600] ss:$28 sps:$4 sm:$0xff]  }
 0x3de   :  { %5586 = vmatprep.subr.bf16.mxu1 %v7401_v18  ;;  %v7457_v18 = vld [vmem:[#allocation11 + $0x470] ss:$28 sps:$4 sm:$0xff]  }
 0x3e0   :  { %5614 = vmatpush1.bf16.msra.mxu0 %v7396_v19  ;;  %v7464_v19 = vld [vmem:[#allocation11 + $0x4ac] ss:$28 sps:$4 sm:$0xff]  }
 0x3e1   :  { %5587 = vmatpush1.bf16.msra.mxu1 %v7399_v27  ;;  %5615 = vmatprep.subr.bf16.mxu0 %v7404_v20  ;;  %v7462_v27 = vld [vmem:[#allocation11 + $0x4a8] ss:$28 sps:$4 sm:$0xff]   ;;  %v7466_v20 = vld [vmem:[#allocation11 + $0x478] ss:$28 sps:$4 sm:$0xff]  }
 0x3e2   :  { %6763 = vmatprep.subr.bf16.mxu1 %v7405_v21  ;;  %v7469_v21 = vld [vmem:[#allocation11 + $0x4e4] ss:$28 sps:$4 sm:$0xff]  }
 0x3e4   :  { %5589 = vmatmul.mubr.bf16.vlgmr.msra.gmra.mrb[16].mxu1 %v8088_v43  ;;  %5616 = vmatpush1.bf16.msra.mxu0 %v7402_v23  ;;  %v7470_v23 = vld [vmem:[#allocation11 + $0x670] ss:$28 sps:$4 sm:$0xff]  }
 0x3e5   :  { %6764 = vmatpush3.bf16.msra.mxu1 %v7406_v24  ;;  %5793 = vmatprep.mubr.bf16.mxu1 %v8042_v34  ;;  %v7425_v34 = vld [vmem:[#allocation11 + $0x2b8] ss:$28 sps:$4 sm:$0xff]   ;;  %v7467_v24 = vld [vmem:[#allocation11 + $0x4e0] ss:$28 sps:$4 sm:$0xff]  }
 0x3e6   :  { %5617 = vmatprep.subr.bf16.mxu0 %v7409_v25  ;;  %6765 = vmatprep.subr.bf16.mxu1 %v7410_v26  ;;  %v7471_v25 = vld [vmem:[#allocation11 + $0x4b0] ss:$28 sps:$4 sm:$0xff]   ;;  %v7474_v26 = vld [vmem:[#allocation11 + $0x51c] ss:$28 sps:$4 sm:$0xff]  }
 0x3e8   :  { %5618 = vmatpush1.bf16.msra.mxu0 %v7407_v31  ;;  %v7475_v31 = vld [vmem:[#allocation11 + $0x6a8] ss:$28 sps:$4 sm:$0xff]  }
 0x3e9   :  { %6766 = vmatpush3.bf16.msra.mxu1 %v7411_v32  ;;  %5619 = vmatprep.subr.bf16.mxu0 %v7414_v33  ;;  %v7472_v32 = vld [vmem:[#allocation11 + $0x518] ss:$28 sps:$4 sm:$0xff]   ;;  %v7476_v33 = vld [vmem:[#allocation11 + $0x4e8] ss:$28 sps:$4 sm:$0xff]  }
 0x3ea   :  { %6767 = vmatprep.subr.bf16.mxu1 %v7415_v35  ;;  %v7479_v35 = vld [vmem:[#allocation11 + $0x554] ss:$28 sps:$4 sm:$0xff]  }
 0x3ec   :  { %5620 = vmatpush1.bf16.msra.mxu0 %v7412_v37  ;;  %v7480_v37 = vld [vmem:[#allocation11 + $0x6e0] ss:$28 sps:$4 sm:$0xff]  }
 0x3ed   :  { %6768 = vmatpush3.bf16.msra.mxu1 %v7416_v39  ;;  %5621 = vmatprep.subr.bf16.mxu0 %v7419_v30  ;;  %v7477_v39 = vld [vmem:[#allocation11 + $0x550] ss:$28 sps:$4 sm:$0xff]   ;;  %v7481_v30 = vld [vmem:[#allocation11 + $0x520] ss:$28 sps:$4 sm:$0xff]  }
 0x3ee   :  { %6769 = vmatprep.subr.bf16.mxu1 %v7420_v40  ;;  %v7484_v40 = vld [vmem:[#allocation11 + $0x58c] ss:$28 sps:$4 sm:$0xff]  }
 0x3f0   :  { %5622 = vmatpush1.bf16.msra.mxu0 %v7417_v42  ;;  %v7485_v42 = vld [vmem:[#allocation11 + $0x8d8] ss:$28 sps:$4 sm:$0xff]  }
 0x3f1   :  { %6770 = vmatpush3.bf16.msra.mxu1 %v7421_v44  ;;  %5623 = vmatprep.subr.bf16.mxu0 %v7424_v45  ;;  %v7482_v44 = vld [vmem:[#allocation11 + $0x588] ss:$28 sps:$4 sm:$0xff]   ;;  %v7486_v45 = vld [vmem:[#allocation11 + $0x718] ss:$28 sps:$4 sm:$0xff]  }
 0x3f2   :  { %6771 = vmatprep.subr.bf16.mxu1 %v7425_v34  ;;  %v7489_v34 = vld [vmem:[#allocation11 + $0x5c4] ss:$28 sps:$4 sm:$0xff]  }
 0x3f4   :  { %5624 = vmatpush1.bf16.msra.mxu0 %v7422_v46  ;;  %v7490_v46 = vld [vmem:[#allocation11 + $0x910] ss:$28 sps:$4 sm:$0xff]  }
 0x3f5   :  { %6772 = vmatpush3.bf16.msra.mxu1 %v7426_v47  ;;  %5625 = vmatprep.subr.bf16.mxu0 %v7429_v49  ;;  %v7487_v47 = vld [vmem:[#allocation11 + $0x5c0] ss:$28 sps:$4 sm:$0xff]   ;;  %v7491_v49 = vld [vmem:[#allocation11 + $0x750] ss:$28 sps:$4 sm:$0xff]  }
 0x3f6   :  { %6773 = vmatprep.subr.bf16.mxu1 %v7430_v52  ;;  %v7494_v52 = vld [vmem:[#allocation11 + $0x5fc] ss:$28 sps:$4 sm:$0xff]  }
 0x3f8   :  { %5626 = vmatpush1.bf16.msra.mxu0 %v7427_v54  ;;  %v7495_v54 = vld [vmem:[#allocation11 + $0x948] ss:$28 sps:$4 sm:$0xff]  }
 0x3f9   :  { %6774 = vmatpush3.bf16.msra.mxu1 %v7431_v55  ;;  %5627 = vmatprep.subr.bf16.mxu0 %v7434_v57  ;;  %v7492_v55 = vld [vmem:[#allocation11 + $0x5f8] ss:$28 sps:$4 sm:$0xff]   ;;  %v7496_v57 = vld [vmem:[#allocation11 + $0x788] ss:$28 sps:$4 sm:$0xff]  }
 0x3fa   :  { %6775 = vmatprep.subr.bf16.mxu1 %v7435_v58  ;;  %v7499_v58 = vld [vmem:[#allocation11 + $0x634] ss:$28 sps:$4 sm:$0xff]  }
 0x3fc   :  { %5628 = vmatpush1.bf16.msra.mxu0 %v7432_v59  ;;  %v7500_v59 = vld [vmem:[#allocation11 + $0x980] ss:$28 sps:$4 sm:$0xff]  }
 0x3fd   :  { %6776 = vmatpush3.bf16.msra.mxu1 %v7436_v29  ;;  %5638 = vmatprep.subr.bf16.mxu0 %v7439_v60  ;;  %v7497_v29 = vld [vmem:[#allocation11 + $0x630] ss:$28 sps:$4 sm:$0xff]   ;;  %v7501_v60 = vld [vmem:[#allocation11 + $0x7c0] ss:$28 sps:$4 sm:$0xff]  }
 0x3fe   :  { %6777 = vmatprep.subr.bf16.mxu1 %v7440_v61  ;;  %v7504_v61 = vld [vmem:[#allocation11 + $0x66c] ss:$28 sps:$4 sm:$0xff]  }
 0x3ff   :  { %5630 = vmatmul.mubr.bf16.vlgmr.msra.gmra.mrb[16].mxu0 %v8044_v38 }
 0x400   :  { %5639 = vmatpush1.bf16.msra.mxu0 %v7437_v1  ;;  %5670 = vmatprep.mubr.bf16.mxu0 %v8061_v51  ;;  %v7505_v1 = vld [vmem:[#allocation11 + $0x9b8] ss:$28 sps:$4 sm:$0xff]  }
 0x401   :  { %6778 = vmatpush3.bf16.msra.mxu1 %v7441_v4  ;;  %5640 = vmatprep.subr.bf16.mxu0 %v7444_v5  ;;  %v7502_v4 = vld [vmem:[#allocation11 + $0x668] ss:$28 sps:$4 sm:$0xff]   ;;  %v7506_v5 = vld [vmem:[#allocation11 + $0x7f8] ss:$28 sps:$4 sm:$0xff]  }
 0x402   :  { %6785 = vmatprep.subr.bf16.mxu1 %v7445_v50  ;;  %v7509_v50 = vld [vmem:[#allocation11 + $0x6a4] ss:$28 sps:$4 sm:$0xff]  }
 0x404   :  { %5641 = vmatpush1.bf16.msra.mxu0 %v7442_v6  ;;  %5794 = vmatmul.mubr.bf16.vlgmr.msra.gmra.mrb[20].mxu1 %v8044_v38  ;;  %v7461_v38 = vld [vmem:[#allocation11 + $0x440] ss:$28 sps:$4 sm:$0xff]   ;;  %v7510_v6 = vld [vmem:[#allocation11 + $0x9f0] ss:$28 sps:$4 sm:$0xff]  }
 0x405   :  { %6786 = vmatpush3.bf16.msra.mxu1 %v7446_v28  ;;  %5833 = vmatprep.mubr.bf16.mxu1 %v8061_v51  ;;  %v7465_v51 = vld [vmem:[#allocation11 + $0x638] ss:$28 sps:$4 sm:$0xff]   ;;  %v7507_v28 = vld [vmem:[#allocation11 + $0x6a0] ss:$28 sps:$4 sm:$0xff]  }
 0x406   :  { %5642 = vmatprep.subr.bf16.mxu0 %v7449_v7  ;;  %6787 = vmatprep.subr.bf16.mxu1 %v7450_v8  ;;  %v7511_v7 = vld [vmem:[#allocation11 + $0x830] ss:$28 sps:$4 sm:$0xff]   ;;  %v7514_v8 = vld [vmem:[#allocation11 + $0x6dc] ss:$28 sps:$4 sm:$0xff]  }
 0x408   :  { %5643 = vmatpush1.bf16.msra.mxu0 %v7447_v9  ;;  %v7515_v9 = vld [vmem:[#allocation11 + $0xa28] ss:$28 sps:$4 sm:$0xff]  }
 0x409   :  { %6788 = vmatpush3.bf16.msra.mxu1 %v7451_v11  ;;  %5644 = vmatprep.subr.bf16.mxu0 %v7454_v12  ;;  %v7512_v11 = vld [vmem:[#allocation11 + $0x6d8] ss:$28 sps:$4 sm:$0xff]   ;;  %v7516_v12 = vld [vmem:[#allocation11 + $0x868] ss:$28 sps:$4 sm:$0xff]  }
 0x40a   :  { %6789 = vmatprep.subr.bf16.mxu1 %v7455_v13  ;;  %v7519_v13 = vld [vmem:[#allocation11 + $0x714] ss:$28 sps:$4 sm:$0xff]  }
 0x40c   :  { %5645 = vmatpush1.bf16.msra.mxu0 %v7452_v14  ;;  %v7520_v14 = vld [vmem:[#allocation11 + $0xa60] ss:$28 sps:$4 sm:$0xff]  }
 0x40d   :  { %6790 = vmatpush3.bf16.msra.mxu1 %v7456_v15  ;;  %5646 = vmatprep.subr.bf16.mxu0 %v7459_v16  ;;  %v7517_v15 = vld [vmem:[#allocation11 + $0x710] ss:$28 sps:$4 sm:$0xff]   ;;  %v7521_v16 = vld [vmem:[#allocation11 + $0x8a0] ss:$28 sps:$4 sm:$0xff]  }
 0x40e   :  { %6791 = vmatprep.subr.bf16.mxu1 %v7460_v17  ;;  %v7524_v17 = vld [vmem:[#allocation11 + $0x74c] ss:$28 sps:$4 sm:$0xff]  }
 0x410   :  { %5647 = vmatpush1.bf16.msra.mxu0 %v7457_v18  ;;  %v7525_v18 = vld [vmem:[#allocation11 + $0xc58] ss:$28 sps:$4 sm:$0xff]  }
 0x411   :  { %6792 = vmatpush3.bf16.msra.mxu1 %v7461_v38  ;;  %5648 = vmatprep.subr.bf16.mxu0 %v7464_v19  ;;  %v7522_v38 = vld [vmem:[#allocation11 + $0x748] ss:$28 sps:$4 sm:$0xff]   ;;  %v7526_v19 = vld [vmem:[#allocation11 + $0xa98] ss:$28 sps:$4 sm:$0xff]  }
 0x412   :  { %6793 = vmatprep.subr.bf16.mxu1 %v7465_v51  ;;  %v7529_v51 = vld [vmem:[#allocation11 + $0x784] ss:$28 sps:$4 sm:$0xff]  }
 0x414   :  { %5649 = vmatpush1.bf16.msra.mxu0 %v7462_v27  ;;  %v7530_v27 = vld [vmem:[#allocation11 + $0xc90] ss:$28 sps:$4 sm:$0xff]  }
 0x415   :  { %6794 = vmatpush3.bf16.msra.mxu1 %v7466_v20  ;;  %5650 = vmatprep.subr.bf16.mxu0 %v7469_v21  ;;  %v7527_v20 = vld [vmem:[#allocation11 + $0x780] ss:$28 sps:$4 sm:$0xff]   ;;  %v7531_v21 = vld [vmem:[#allocation11 + $0xad0] ss:$28 sps:$4 sm:$0xff]  }
 0x416   :  { %6795 = vmatprep.subr.bf16.mxu1 %v7470_v23  ;;  %v7534_v23 = vld [vmem:[#allocation11 + $0x7bc] ss:$28 sps:$4 sm:$0xff]  }
 0x418   :  { %5651 = vmatpush1.bf16.msra.mxu0 %v7467_v24  ;;  %v7536_v24 = vld [vmem:[#allocation11 + $0xb08] ss:$28 sps:$4 sm:$0xff]  }
 0x419   :  { %6796 = vmatpush3.bf16.msra.mxu1 %v7471_v25  ;;  %5652 = vmatprep.subr.bf16.mxu0 %v7474_v26  ;;  %v7539_v25 = vld [vmem:[#allocation11 + $0x7f4] ss:$28 sps:$4 sm:$0xff]   ;;  %v7540_v26 = vld [vmem:[#allocation11 + $0xd00] ss:$28 sps:$4 sm:$0xff]  }
 0x41a   :  { %6797 = vmatprep.subr.bf16.mxu1 %v7475_v31  ;;  %v7537_v31 = vld [vmem:[#allocation11 + $0x7f0] ss:$28 sps:$4 sm:$0xff]  }
 0x41c   :  { %5653 = vmatpush1.bf16.msra.mxu0 %v7472_v32  ;;  %v7541_v32 = vld [vmem:[#allocation11 + $0xb40] ss:$28 sps:$4 sm:$0xff]  }
 0x41d   :  { %6798 = vmatpush3.bf16.msra.mxu1 %v7476_v33  ;;  %5654 = vmatprep.subr.bf16.mxu0 %v7479_v35  ;;  %v7544_v33 = vld [vmem:[#allocation11 + $0x82c] ss:$28 sps:$4 sm:$0xff]   ;;  %v7545_v35 = vld [vmem:[#allocation11 + $0xd38] ss:$28 sps:$4 sm:$0xff]  }
 0x41e   :  { %6799 = vmatprep.subr.bf16.mxu1 %v7480_v37  ;;  %v7542_v37 = vld [vmem:[#allocation11 + $0x828] ss:$28 sps:$4 sm:$0xff]  }
 0x420   :  { %5655 = vmatpush1.bf16.msra.mxu0 %v7477_v39  ;;  %v7546_v39 = vld [vmem:[#allocation11 + $0xb78] ss:$28 sps:$4 sm:$0xff]  }
 0x421   :  { %6800 = vmatpush3.bf16.msra.mxu1 %v7481_v30  ;;  %5656 = vmatprep.subr.bf16.mxu0 %v7484_v40  ;;  %v7549_v30 = vld [vmem:[#allocation11 + $0x864] ss:$28 sps:$4 sm:$0xff]   ;;  %v7550_v40 = vld [vmem:[#allocation11 + $0xd70] ss:$28 sps:$4 sm:$0xff]  }
 0x422   :  { %6807 = vmatprep.subr.bf16.mxu1 %v7485_v42  ;;  %v7547_v42 = vld [vmem:[#allocation11 + $0x860] ss:$28 sps:$4 sm:$0xff]  }
 0x424   :  { %5657 = vmatpush1.bf16.msra.mxu0 %v7482_v44  ;;  %5834 = vmatmul.mubr.bf16.vlgmr.msra.gmra.mrb[24].mxu1 %v8063_v53  ;;  %v7551_v44 = vld [vmem:[#allocation11 + $0xbb0] ss:$28 sps:$4 sm:$0xff]  }
 0x425   :  { %6808 = vmatpush3.bf16.msra.mxu1 %v7486_v45  ;;  %5873 = vmatprep.mubr.bf16.mxu1 %v8065_v56  ;;  %v7554_v45 = vld [vmem:[#allocation11 + $0x89c] ss:$28 sps:$4 sm:$0xff]  }
 0x426   :  { %5658 = vmatprep.subr.bf16.mxu0 %v7489_v34  ;;  %6809 = vmatprep.subr.bf16.mxu1 %v7490_v46  ;;  %v7555_v34 = vld [vmem:[#allocation11 + $0xda8] ss:$28 sps:$4 sm:$0xff]   ;;  %v7552_v46 = vld [vmem:[#allocation11 + $0x898] ss:$28 sps:$4 sm:$0xff]  }
 0x428   :  { %5659 = vmatpush1.bf16.msra.mxu0 %v7487_v47  ;;  %v7556_v47 = vld [vmem:[#allocation11 + $0xbe8] ss:$28 sps:$4 sm:$0xff]  }
 0x429   :  { %6810 = vmatpush3.bf16.msra.mxu1 %v7491_v49  ;;  %5660 = vmatprep.subr.bf16.mxu0 %v7494_v52  ;;  %v7559_v49 = vld [vmem:[#allocation11 + $0x8d4] ss:$28 sps:$4 sm:$0xff]   ;;  %v7560_v52 = vld [vmem:[#allocation11 + $0xde0] ss:$28 sps:$4 sm:$0xff]  }
 0x42a   :  { %6811 = vmatprep.subr.bf16.mxu1 %v7495_v54  ;;  %v7557_v54 = vld [vmem:[#allocation11 + $0x8d0] ss:$28 sps:$4 sm:$0xff]  }
 0x42c   :  { %5661 = vmatpush1.bf16.msra.mxu0 %v7492_v55  ;;  %v7561_v55 = vld [vmem:[#allocation11 + $0xc20] ss:$28 sps:$4 sm:$0xff]  }
 0x42d   :  { %6812 = vmatpush3.bf16.msra.mxu1 %v7496_v57  ;;  %5662 = vmatprep.subr.bf16.mxu0 %v7499_v58  ;;  %v7564_v57 = vld [vmem:[#allocation11 + $0x90c] ss:$28 sps:$4 sm:$0xff]  }
 0x42e   :  { %6813 = vmatprep.subr.bf16.mxu1 %v7500_v59  ;;  %v7562_v58 = vld [vmem:[#allocation11 + $0x908] ss:$28 sps:$4 sm:$0xff]  }
 0x42f   :  { %v7567_v59 = vld [vmem:[#allocation11 + $0x944] ss:$28 sps:$4 sm:$0xff]  }
 0x430   :  { %5663 = vmatpush1.bf16.msra.mxu0 %v7497_v29  ;;  %v7565_v29 = vld [vmem:[#allocation11 + $0x940] ss:$28 sps:$4 sm:$0xff]  }
 0x431   :  { %6814 = vmatpush3.bf16.msra.mxu1 %v7501_v60  ;;  %5664 = vmatprep.subr.bf16.mxu0 %v7504_v61  ;;  %v7570_v60 = vld [vmem:[#allocation11 + $0x97c] ss:$28 sps:$4 sm:$0xff]  }
 0x432   :  { %6815 = vmatprep.subr.bf16.mxu1 %v7505_v1  ;;  %v7568_v61 = vld [vmem:[#allocation11 + $0x978] ss:$28 sps:$4 sm:$0xff]  }
 0x433   :  { %v7573_v1 = vld [vmem:[#allocation11 + $0x9b4] ss:$28 sps:$4 sm:$0xff]  }
 0x434   :  { %5665 = vmatpush1.bf16.msra.mxu0 %v7502_v4  ;;  %v7571_v4 = vld [vmem:[#allocation11 + $0x9b0] ss:$28 sps:$4 sm:$0xff]  }
 0x435   :  { %6816 = vmatpush3.bf16.msra.mxu1 %v7506_v5  ;;  %5666 = vmatprep.subr.bf16.mxu0 %v7509_v50  ;;  %v7576_v5 = vld [vmem:[#allocation11 + $0x9ec] ss:$28 sps:$4 sm:$0xff]  }
 0x436   :  { %6817 = vmatprep.subr.bf16.mxu1 %v7510_v6  ;;  %v7574_v50 = vld [vmem:[#allocation11 + $0x9e8] ss:$28 sps:$4 sm:$0xff]  }
 0x437   :  { %v7579_v6 = vld [vmem:[#allocation11 + $0xa24] ss:$28 sps:$4 sm:$0xff]  }
 0x438   :  { %5667 = vmatpush1.bf16.msra.mxu0 %v7507_v28  ;;  %v7577_v28 = vld [vmem:[#allocation11 + $0xa20] ss:$28 sps:$4 sm:$0xff]  }
 0x439   :  { %6818 = vmatpush3.bf16.msra.mxu1 %v7511_v7  ;;  %5668 = vmatprep.subr.bf16.mxu0 %v7514_v8  ;;  %v7582_v7 = vld [vmem:[#allocation11 + $0xa5c] ss:$28 sps:$4 sm:$0xff]  }
 0x43a   :  { %6819 = vmatprep.subr.bf16.mxu1 %v7515_v9  ;;  %v7580_v8 = vld [vmem:[#allocation11 + $0xa58] ss:$28 sps:$4 sm:$0xff]  }
 0x43b   :  { %v7585_v9 = vld [vmem:[#allocation11 + $0xa94] ss:$28 sps:$4 sm:$0xff]  }
 0x43c   :  { %5669 = vmatpush1.bf16.msra.mxu0 %v7512_v11  ;;  %v7583_v11 = vld [vmem:[#allocation11 + $0xa90] ss:$28 sps:$4 sm:$0xff]  }
 0x43d   :  { %6820 = vmatpush3.bf16.msra.mxu1 %v7516_v12  ;;  %5679 = vmatprep.subr.bf16.mxu0 %v7519_v13  ;;  %v7588_v12 = vld [vmem:[#allocation11 + $0xacc] ss:$28 sps:$4 sm:$0xff]  }
 0x43e   :  { %6821 = vmatprep.subr.bf16.mxu1 %v7520_v14  ;;  %v7586_v13 = vld [vmem:[#allocation11 + $0xac8] ss:$28 sps:$4 sm:$0xff]  }
 0x43f   :  { %5671 = vmatmul.mubr.bf16.vlgmr.msra.gmra.mrb[16].mxu0 %v8063_v53  ;;  %v7535_v53 = vld [vmem:[#allocation11 + $0xcc8] ss:$28 sps:$4 sm:$0xff]  }
 0x440   :  { %5680 = vmatpush1.bf16.msra.mxu0 %v7517_v15  ;;  %5711 = vmatprep.mubr.bf16.mxu0 %v8065_v56  ;;  %v7532_v56 = vld [vmem:[#allocation11 + $0x7b8] ss:$28 sps:$4 sm:$0xff]   ;;  %v7591_v14 = vld [vmem:[#allocation11 + $0xb04] ss:$28 sps:$4 sm:$0xff]  }
 0x441   :  { %6822 = vmatpush3.bf16.msra.mxu1 %v7521_v16  ;;  %5681 = vmatprep.subr.bf16.mxu0 %v7524_v17  ;;  %v7589_v15 = vld [vmem:[#allocation11 + $0xb00] ss:$28 sps:$4 sm:$0xff]   ;;  %v7592_v17 = vld [vmem:[#allocation11 + $0xb38] ss:$28 sps:$4 sm:$0xff]  }
 0x442   :  { %6829 = vmatprep.subr.bf16.mxu1 %v7525_v18  ;;  %v7594_v16 = vld [vmem:[#allocation11 + $0xb3c] ss:$28 sps:$4 sm:$0xff]   ;;  %v7597_v18 = vld [vmem:[#allocation11 + $0xb74] ss:$28 sps:$4 sm:$0xff]  }
 0x444   :  { %5682 = vmatpush1.bf16.msra.mxu0 %v7522_v38  ;;  %5874 = vmatmul.mubr.bf16.vlgmr.msra.gmra.mrb[28].mxu1 %v8078_v10  ;;  %v7595_v38 = vld [vmem:[#allocation11 + $0xb70] ss:$28 sps:$4 sm:$0xff]  }
 0x445   :  { %6830 = vmatpush3.bf16.msra.mxu1 %v7526_v19  ;;  %5913 = vmatprep.mubr.bf16.mxu1 %v8086_v41  ;;  %v8109_v19 = vld [vmem:[#allocation13] sm:$0xff] }
 0x446   :  { %5683 = vmatprep.subr.bf16.mxu0 %v7529_v51  ;;  %6831 = vmatprep.subr.bf16.mxu1 %v7530_v27  ;;  %v7598_v51 = vld [vmem:[#allocation11 + $0xba8] ss:$28 sps:$4 sm:$0xff]   ;;  %v2937_v27 = vrot.slane %v8109_v19, %v8004_v2  ;;  %v7609_v2 = vld [vmem:[#allocation11 + $0xc54] ss:$28 sps:$4 sm:$0xff]  }
 0x448   :  { %5684 = vmatpush1.bf16.msra.mxu0 %v7527_v20  ;;  %v7603_v20 = vld [vmem:[#allocation11 + $0xbe4] ss:$28 sps:$4 sm:$0xff]  }
 0x449   :  { %6832 = vmatpush3.bf16.msra.mxu1 %v7531_v21  ;;  %5685 = vmatprep.subr.bf16.mxu0 %v7534_v23 }
 0x44a   :  { %6833 = vmatprep.subr.bf16.mxu1 %v7535_v53 }
 0x44c   :  { %5686 = vmatpush1.bf16.msra.mxu0 %v7532_v56 }
 0x44d   :  { %6834 = vmatpush3.bf16.msra.mxu1 %v7536_v24  ;;  %5687 = vmatprep.subr.bf16.mxu0 %v7539_v25  ;;  %v7601_v25 = vld [vmem:[#allocation11 + $0xbe0] ss:$28 sps:$4 sm:$0xff]  }
 0x44e   :  { %6835 = vmatprep.subr.bf16.mxu1 %v7540_v26 }
 0x450   :  { %5688 = vmatpush1.bf16.msra.mxu0 %v7537_v31 }
 0x451   :  { %6836 = vmatpush3.bf16.msra.mxu1 %v7541_v32  ;;  %5689 = vmatprep.subr.bf16.mxu0 %v7544_v33  ;;  %v7606_v32 = vld [vmem:[#allocation11 + $0xc1c] ss:$28 sps:$4 sm:$0xff]  }
 0x452   :  { %6837 = vmatprep.subr.bf16.mxu1 %v7545_v35 }
 0x454   :  { %5690 = vmatpush1.bf16.msra.mxu0 %v7542_v37  ;;  %v7604_v37 = vld [vmem:[#allocation11 + $0xc18] ss:$28 sps:$4 sm:$0xff]  }
 0x455   :  { %6838 = vmatpush3.bf16.msra.mxu1 %v7546_v39  ;;  %5691 = vmatprep.subr.bf16.mxu0 %v7549_v30  ;;  %v7607_v39 = vld [vmem:[#allocation11 + $0xc50] ss:$28 sps:$4 sm:$0xff]  }
 0x456   :  { %6839 = vmatprep.subr.bf16.mxu1 %v7550_v40  ;;  %v7612_v30 = vld [vmem:[#allocation11 + $0xc8c] ss:$28 sps:$4 sm:$0xff]  }
 0x457   :  { %v7610_v40 = vld [vmem:[#allocation11 + $0xc88] ss:$28 sps:$4 sm:$0xff]  }
 0x458   :  { %5692 = vmatpush1.bf16.msra.mxu0 %v7547_v42  ;;  %v7615_v42 = vld [vmem:[#allocation11 + $0xcc4] ss:$28 sps:$4 sm:$0xff]  }
 0x459   :  { %6840 = vmatpush3.bf16.msra.mxu1 %v7551_v44  ;;  %5693 = vmatprep.subr.bf16.mxu0 %v7554_v45 }
 0x45a   :  { %6841 = vmatprep.subr.bf16.mxu1 %v7555_v34 }
 0x45c   :  { %5694 = vmatpush1.bf16.msra.mxu0 %v7552_v46  ;;  %v7613_v46 = vld [vmem:[#allocation11 + $0xcc0] ss:$28 sps:$4 sm:$0xff]  }
 0x45d   :  { %6842 = vmatpush3.bf16.msra.mxu1 %v7556_v47  ;;  %5695 = vmatprep.subr.bf16.mxu0 %v7559_v49  ;;  %v7618_v49 = vld [vmem:[#allocation11 + $0xcfc] ss:$28 sps:$4 sm:$0xff]  }
 0x45e   :  { %6843 = vmatprep.subr.bf16.mxu1 %v7560_v52  ;;  %v7616_v52 = vld [vmem:[#allocation11 + $0xcf8] ss:$28 sps:$4 sm:$0xff]  }
 0x460   :  { %5696 = vmatpush1.bf16.msra.mxu0 %v7557_v54  ;;  %v7621_v54 = vld [vmem:[#allocation11 + $0xd34] ss:$28 sps:$4 sm:$0xff]  }
 0x461   :  { %6844 = vmatpush3.bf16.msra.mxu1 %v7561_v55  ;;  %5697 = vmatprep.subr.bf16.mxu0 %v7564_v57  ;;  %v7619_v55 = vld [vmem:[#allocation11 + $0xd30] ss:$28 sps:$4 sm:$0xff]  }
 0x462   :  { %v7624_v57 = vld [vmem:[#allocation11 + $0xd6c] ss:$28 sps:$4 sm:$0xff]  }
 0x464   :  { %5698 = vmatpush1.bf16.msra.mxu0 %v7562_v58  ;;  %5914 = vmatmul.mubr.bf16.vlgmr.msra.gmra.mrb[32].mxu1 %v8088_v43 }
 0x465   :  { %5699 = vmatprep.subr.bf16.mxu0 %v7567_v59  ;;  %v7622_v59 = vld [vmem:[#allocation11 + $0xd68] ss:$28 sps:$4 sm:$0xff]  }
 0x468   :  { %5700 = vmatpush1.bf16.msra.mxu0 %v7565_v29 }
 0x469   :  { %5701 = vmatprep.subr.bf16.mxu0 %v7570_v60  ;;  %v7627_v60 = vld [vmem:[#allocation11 + $0xda4] ss:$28 sps:$4 sm:$0xff]  }
 0x46c   :  { %5702 = vmatpush1.bf16.msra.mxu0 %v7568_v61 }
 0x46d   :  { %5703 = vmatprep.subr.bf16.mxu0 %v7573_v1  ;;  %v2941_v1 = vrot.slane %v8109_v19, %v8001_v0 }
 0x470   :  { %5704 = vmatpush1.bf16.msra.mxu0 %v7571_v4  ;;  %v7625_v4 = vld [vmem:[#allocation11 + $0xda0] ss:$28 sps:$4 sm:$0xff]  }
 0x471   :  { %5705 = vmatprep.subr.bf16.mxu0 %v7576_v5  ;;  %v2945_v5 = vrot.slane %v8109_v19, %v8007_v3 }
 0x474   :  { %5706 = vmatpush1.bf16.msra.mxu0 %v7574_v50  ;;  %v7630_v50 = vld [vmem:[#allocation11 + $0xddc] ss:$28 sps:$4 sm:$0xff]  }
 0x475   :  { %5707 = vmatprep.subr.bf16.mxu0 %v7579_v6 }
 0x478   :  { %5708 = vmatpush1.bf16.msra.mxu0 %v7577_v28 }
 0x479   :  { %5709 = vmatprep.subr.bf16.mxu0 %v7582_v7 }
 0x47c   :  { %5710 = vmatpush1.bf16.msra.mxu0 %v7580_v8  ;;  %v7628_v8 = vld [vmem:[#allocation11 + $0xdd8] ss:$28 sps:$4 sm:$0xff]  }
 0x47d   :  { %5720 = vmatprep.subr.bf16.mxu0 %v7585_v9 }
 0x47f   :  { %5712 = vmatmul.mubr.bf16.vlgmr.msra.gmra.mrb[16].mxu0 %v8078_v10  ;;  %v7600_v10 = vld [vmem:[#allocation11 + $0xbac] ss:$28 sps:$4 sm:$0xff]  }
 0x480   :  { %5721 = vmatpush1.bf16.msra.mxu0 %v7583_v11  ;;  %5752 = vmatprep.mubr.bf16.mxu0 %v8086_v41  ;;  %v2933_v41 = vrot.slane %v8109_v19, %v7998_v63 }
 0x481   :  { %5722 = vmatprep.subr.bf16.mxu0 %v7588_v12 }
 0x484   :  { %5723 = vmatpush1.bf16.msra.mxu0 %v7586_v13 }
 0x485   :  { %5724 = vmatprep.subr.bf16.mxu0 %v7591_v14 }
 0x488   :  { %5725 = vmatpush1.bf16.msra.mxu0 %v7589_v15 }
 0x489   :  { %5726 = vmatprep.subr.bf16.mxu0 %v7594_v16 }
 0x48c   :  { %5727 = vmatpush1.bf16.msra.mxu0 %v7592_v17 }
 0x48d   :  { %5728 = vmatprep.subr.bf16.mxu0 %v7597_v18 }
 0x490   :  { %5729 = vmatpush1.bf16.msra.mxu0 %v7595_v38 }
 0x491   :  { %5730 = vmatprep.subr.bf16.mxu0 %v7600_v10 }
 0x492   :  { %v5426_v21 = vpop.f32.mrb[12].mxu0 }
 0x493   :  { %v6861_v23 = vadd.f32 %v5426_v21, %v2933_v41  ;;  %v5428_v53 = vpop.f32.mrb[13].mxu0 }
 0x494   :  { %v6862_v56 = vadd.f32 %v5428_v53, %v2937_v27  ;;  %5731 = vmatpush1.bf16.msra.mxu0 %v7598_v51  ;;  %v5430_v24 = vpop.f32.mrb[14].mxu0  ;;  %v2957_v53 = vrot.slane %v8109_v19, %v778_v36 }
 0x495   :  { %v5921_v26 = vsub.f32 0.0, %v6861_v23  ;;  %v5431_v31 = vpop.f32.mrb[15].mxu0  ;;  %5732 = vmatprep.subr.bf16.mxu0 %v7603_v20 }
 0x496   :  { %v5922_v33 = vsub.f32 0.0, %v6862_v56 }
 0x497   :  { %v5928_v63 = vmul.f32 1.442695, %v5921_v26 }
 0x498   :  { %v5930_v35 = vmul.f32 1.442695, %v5922_v33  ;;  %5733 = vmatpush1.bf16.msra.mxu0 %v7601_v25 }
 0x499   :  { %7631 = vpow2.f32 %v5928_v63  ;;  %5734 = vmatprep.subr.bf16.mxu0 %v7606_v32 }
 0x49a   :  { %7633 = vpow2.f32 %v5930_v35 }
 0x49c   :  { %5735 = vmatpush1.bf16.msra.mxu0 %v7604_v37 }
 0x49d   :  { %5736 = vmatprep.subr.bf16.mxu0 %v7609_v2 }
 0x4a0   :  { %5737 = vmatpush1.bf16.msra.mxu0 %v7607_v39 }
 0x4a1   :  { %5738 = vmatprep.subr.bf16.mxu0 %v7612_v30 }
 0x4a3   :  { %v7632_v44 = vpop.eup %7631 }
 0x4a4   :  { %v7634_v45 = vpop.eup %7633  ;;  %v5942_v34 = vadd.f32 1.0, %v7632_v44  ;;  %5739 = vmatpush1.bf16.msra.mxu0 %v7610_v40 }
 0x4a5   :  { %v5943_v47 = vadd.f32 1.0, %v7634_v45  ;;  %5740 = vmatprep.subr.bf16.mxu0 %v7615_v42 }
 0x4a6   :  { %7635 = vrcp.f32 %v5942_v34 }
 0x4a7   :  { %7637 = vrcp.f32 %v5943_v47 }
 0x4a8   :  { %5741 = vmatpush1.bf16.msra.mxu0 %v7613_v46 }
 0x4a9   :  { %5742 = vmatprep.subr.bf16.mxu0 %v7618_v49 }
 0x4ac   :  { %5743 = vmatpush1.bf16.msra.mxu0 %v7616_v52 }
 0x4ad   :  { %5744 = vmatprep.subr.bf16.mxu0 %v7621_v54 }
 0x4b0   :  { %v7636_v58 = vpop.eup %7635  ;;  %5745 = vmatpush1.bf16.msra.mxu0 %v7619_v55  ;;  %v2949_v55 = vrot.slane %v8109_v19, %v770_v48 }
 0x4b1   :  { %v7638_v29 = vpop.eup %7637  ;;  %5746 = vmatprep.subr.bf16.mxu0 %v7624_v57  ;;  %v2953_v57 = vrot.slane %v8109_v19, %v774_v22 }
 0x4b2   :  { %v6759_v61 = vpack.c.bf16 %v7638_v29, %v7636_v58 }
 0x4b4   :  { %5747 = vmatpush1.bf16.msra.mxu0 %v7622_v59  ;;  %5985 = vst [vmem:[#allocation14] sm:$0xff] %v6759_v61 }
 0x4b5   :  { %5748 = vmatprep.subr.bf16.mxu0 %v7627_v60 }
 0x4b7   :  { %v5590_v6 = vpop.f32.mrb[16].mxu1 }
 0x4b8   :  { %v6863_v28 = vadd.f32 %v5590_v6, %v2941_v1  ;;  %v5592_v7 = vpop.f32.mrb[17].mxu1  ;;  %5749 = vmatpush1.bf16.msra.mxu0 %v7625_v4 }
 0x4b9   :  { %v6864_v9 = vadd.f32 %v5592_v7, %v2945_v5  ;;  %v5594_v11 = vpop.f32.mrb[18].mxu1  ;;  %5750 = vmatprep.subr.bf16.mxu0 %v7630_v50 }
 0x4ba   :  { %v5923_v12 = vsub.f32 0.0, %v6863_v28  ;;  %v5595_v13 = vpop.f32.mrb[19].mxu1 }
 0x4bb   :  { %v5924_v14 = vsub.f32 0.0, %v6864_v9 }
 0x4bc   :  { %v5932_v15 = vmul.f32 1.442695, %v5923_v12  ;;  %5751 = vmatpush1.bf16.msra.mxu0 %v7628_v8 }
 0x4bd   :  { %v5934_v0 = vmul.f32 1.442695, %v5924_v14 }
 0x4be   :  { %7639 = vpow2.f32 %v5932_v15 }
 0x4bf   :  { %7641 = vpow2.f32 %v5934_v0  ;;  %5753 = vmatmul.mubr.bf16.vlgmr.msra.gmra.mrb[16].mxu0 %v8088_v43 }
 0x4c8   :  { %v7640_v3 = vpop.eup %7639 }
 0x4c9   :  { %v7642_v16 = vpop.eup %7641  ;;  %v5944_v17 = vadd.f32 1.0, %v7640_v3 }
 0x4ca   :  { %v5945_v18 = vadd.f32 1.0, %v7642_v16 }
 0x4cb   :  { %7643 = vrcp.f32 %v5944_v17 }
 0x4cc   :  { %7645 = vrcp.f32 %v5945_v18 }
 0x4d5   :  { %v7644_v38 = vpop.eup %7643 }
 0x4d6   :  { %v7646_v10 = vpop.eup %7645 }
 0x4d7   :  { %v6779_v41 = vpop.f32.mrb[20].mxu1  ;;  %v6760_v51 = vpack.c.bf16 %v7646_v10, %v7644_v38 }
 0x4d8   :  { %v6780_v27 = vpop.f32.mrb[21].mxu1 }
 0x4d9   :  { %v6781_v20 = vadd.f32 %v6780_v27, %v6779_v41  ;;  %v6782_v21 = vpop.f32.mrb[22].mxu1  ;;  %5986 = vst [vmem:[#allocation14 + $0x8] sm:$0xff] %v6760_v51 }
 0x4da   :  { %v6783_v23 = vpop.f32.mrb[23].mxu1 }
 0x4db   :  { %v5796_v24 = vadd.f32 %v6781_v20, %v2957_v53 }
 0x4f7   :  { %v6801_v43 = vpop.f32.mrb[24].mxu1 }
 0x4f8   :  { %v6802_v56 = vpop.f32.mrb[25].mxu1 }
 0x4f9   :  { %v6803_v25 = vadd.f32 %v6802_v56, %v6801_v43  ;;  %v6804_v26 = vpop.f32.mrb[26].mxu1 }
 0x4fa   :  { %v6805_v31 = vpop.f32.mrb[27].mxu1 }
 0x4fb   :  { %v5836_v32 = vadd.f32 %v6803_v25, %v5796_v24 }
 0x517   :  { %v6823_v33 = vpop.f32.mrb[28].mxu1 }
 0x518   :  { %v6824_v63 = vpop.f32.mrb[29].mxu1 }
 0x519   :  { %v6825_v35 = vadd.f32 %v6824_v63, %v6823_v33  ;;  %v6826_v37 = vpop.f32.mrb[30].mxu1 }
 0x51a   :  { %v6827_v2 = vpop.f32.mrb[31].mxu1 }
 0x51b   :  { %v5876_v39 = vadd.f32 %v6825_v35, %v5836_v32 }
 0x537   :  { %v6845_v30 = vpop.f32.mrb[32].mxu1 }
 0x538   :  { %v6846_v40 = vpop.f32.mrb[33].mxu1 }
 0x539   :  { %v6847_v42 = vadd.f32 %v6846_v40, %v6845_v30  ;;  %v6848_v44 = vpop.f32.mrb[34].mxu1 }
 0x53a   :  { %v6849_v45 = vpop.f32.mrb[35].mxu1 }
 0x53b   :  { %v5916_v34 = vadd.f32 %v6847_v42, %v5876_v39 }
 0x53d   :  { %v5927_v36 = vsub.f32 0.0, %v5916_v34 }
 0x53f   :  { %v5940_v46 = vmul.f32 1.442695, %v5927_v36 }
 0x541   :  { %7647 = vpow2.f32 %v5940_v46 }
 0x54b   :  { %v7648_v47 = vpop.eup %7647 }
 0x54c   :  { %v5948_v49 = vadd.f32 1.0, %v7648_v47 }
 0x54e   :  { %7649 = vrcp.f32 %v5948_v49 }
 0x558   :  { %v7650_v52 = vpop.eup %7649 }
 0x559   :  { %v6762_v54 = vpack.c.bf16 %v7650_v52, %v7650_v52 }
 0x55b   :  { %5988 = vst [vmem:[#allocation14 + $0x18] sm:$0xf] %v6762_v54 }
 0x592   :  { %v5754_v58 = vpop.f32.mrb[16].mxu0 }
 0x593   :  { %v6865_v59 = vadd.f32 %v5754_v58, %v2949_v55  ;;  %v5756_v29 = vpop.f32.mrb[17].mxu0 }
 0x594   :  { %v6866_v60 = vadd.f32 %v5756_v29, %v2953_v57  ;;  %v5758_v61 = vpop.f32.mrb[18].mxu0 }
 0x595   :  { %v5925_v1 = vsub.f32 0.0, %v6865_v59  ;;  %v5759_v4 = vpop.f32.mrb[19].mxu0 }
 0x596   :  { %v5926_v5 = vsub.f32 0.0, %v6866_v60 }
 0x597   :  { %v5936_v50 = vmul.f32 1.442695, %v5925_v1 }
 0x598   :  { %v5938_v6 = vmul.f32 1.442695, %v5926_v5 }
 0x599   :  { %7651 = vpow2.f32 %v5936_v50 }
 0x59a   :  { %7653 = vpow2.f32 %v5938_v6 }
 0x5a3   :  { %v7652_v28 = vpop.eup %7651 }
 0x5a4   :  { %v7654_v7 = vpop.eup %7653  ;;  %v5946_v8 = vadd.f32 1.0, %v7652_v28 }
 0x5a5   :  { %v5947_v48 = vadd.f32 1.0, %v7654_v7 }
 0x5a6   :  { %7655 = vrcp.f32 %v5946_v8 }
 0x5a7   :  { %7657 = vrcp.f32 %v5947_v48 }
 0x5b0   :  { %v7656_v62 = vpop.eup %7655 }
 0x5b1   :  { %v7658_v22 = vpop.eup %7657 }
 0x5b2   :  { %v6761_v19 = vpack.c.bf16 %v7658_v22, %v7656_v62 }
 0x5b4   :  { %5987 = vst [vmem:[#allocation14 + $0x10] sm:$0xff] %v6761_v19 }
 0x5b5   :  { %7825 = shalt.err (!%p7822_p4)
}
 0x5b6   :  { %s7826_s23 = scalar_lea.hbm %s8149_s8, 448 }
 0x5b7   :  { %p7827_p5 = scmp.ne.s32.totalorder %s8149_s8, %s7826_s23  ;;  %p7830_p6 = scmp.lt.u32.totalorder %s7826_s23, %s8149_s8 }
 0x5b9   :  { %p7832_p7 = pnand %p7830_p6, %p7827_p5 }
 0x5bb   :  { %7835 = shalt.err (!%p7832_p7)
}
 0x5bc   :  { %5998 = dma.vmem_to_hbm [thread:$0]  %s5996_s7, 448, %s8149_s8, [#allocation4]  }
 0x5bd   :  { %7844 = dma.done.wait [#allocation4], 448  }
 0x5be   :  { %7845 = vsyncadd [#allocation4], 4294966848 }
 0x5bf   :  { %6002 = vsyncpa [#allocation3], 1 }
 0x5c0   :  { %6003 = vsyncpa [#allocation6], 1 }
 0x5c1   :  { %6004 = vsyncpa [#allocation9], 1 }
 0x5c2   :  { %6005 = vsyncpa [#allocation12], 1 }
 0x5c3   :  { %6006 = vsyncpa [#allocation4], 1 }

// kernel: tpu_custom_call.1
= control target key start
LH: loop header
LB: loop body
LE: loop exit
PB: predicated region body
PF: predicated region fallthrough
CT: control target
= control target key end

     0   :  { %13 = vsyncpa [#allocation3], 0  ;;  %s8141_s0 = inlined_call_operand.vmem [shape: s32[8,1], index: 0, kind: input, shape index: {}]   ;;  %s8142_s1 = inlined_call_operand.hbm [shape: bf16[8,160], index: 1, kind: input, shape index: {}]   ;;  %s8143_s2 = inlined_call_operand.hbm [shape: bf16[160,512], index: 2, kind: input, shape index: {}]   ;;  %s8144_s3 = inlined_call_operand.hbm [shape: f32[1,512], index: 3, kind: input, shape index: {}]   ;;  %s8145_s4 = inlined_call_operand.hbm [shape: bf16[512,1024], index: 4, kind: input, shape index: {}]   ;;  %s8146_s5 = inlined_call_operand.hbm [shape: f32[1,1024], index: 5, kind: input, shape index: {}]   ;;  %s8147_s6 = inlined_call_operand.hbm [shape: bf16[1024,896], index: 6, kind: input, shape index: {}]   ;;  %s8148_s7 = inlined_call_operand.hbm [shape: f32[1,896], index: 7, kind: input, shape index: {}]   ;;  %s8149_s8 = inlined_call_operand.hbm [shape: bf16[8,896], index: 8, kind: output, shape index: {}]  }
   0x1   :  { %14 = vsyncpa [#allocation6], 0 }
   0x2   :  { %15 = vsyncpa [#allocation9], 0 }
   0x3   :  { %16 = vsyncpa [#allocation12], 0 }
   0x4   :  { %17 = vsyncpa [#allocation4], 0  ;;  %s7846_s27 = smov [#allocation5]   ;;  %s7660_s9 = scalar_lea.hbm %s8143_s2, 5120 }
   0x5   :  { %s35_s28 = sshll.u32 %s7846_s27, 4  ;;  %p7661_p0 = scmp.ne.s32.totalorder %s8143_s2, %s7660_s9  ;;  %s36_s28 = int_to_ptr.vmem [resolvable:$true] %s35_s28 }
   0x6   :  { %p7664_p1 = scmp.lt.u32.totalorder %s7660_s9, %s8143_s2 }
   0x8   :  { %p7666_p2 = pnand %p7664_p1, %p7661_p0 }
   0xa   :  { %7669 = shalt.err (!%p7666_p2)
}
   0xb   :  { %s7670_s14 = scalar_lea.vmem %s36_s28, 5120  ;;  %p7675_p4 = scmp.lt.s32.totalorder %s36_s28, %s36_s28 }
   0xc   :  { %p7671_p3 = scmp.ne.s32.totalorder %s36_s28, %s7670_s14  ;;  %p7676_p5 = scmp.lt.s32.totalorder %s7670_s14, %s7670_s14 }
   0xe   :  { %p7677_p6 = por %p7676_p5, %p7675_p4 }
  0x10   :  { %p7678_p7 = pnand %p7677_p6, %p7671_p3 }
  0x12   :  { %7681 = shalt.err (!%p7678_p7)
}
  0x13   :  { %s7847_s15 = smov 256   ;;  %s7848_s16 = smov 16  }
  0x14   :  { %41 = dma.hbm_to_vmem [thread:$0]  %s8143_s2, 5120, %s36_s28, [#allocation6], %s7847_s15, %s7847_s15, %s7848_s16  }
  0x15   :  { %s7849_s19 = smov [#allocation8]   ;;  %s7682_s23 = scalar_lea.hbm %s8145_s4, 32768 }
  0x16   :  { %s57_s20 = sshll.u32 %s7849_s19, 4  ;;  %p7683_p8 = scmp.ne.s32.totalorder %s8145_s4, %s7682_s23  ;;  %s58_s20 = int_to_ptr.vmem [resolvable:$true] %s57_s20 }
  0x17   :  { %p7686_p9 = scmp.lt.u32.totalorder %s7682_s23, %s8145_s4 }
  0x19   :  { %p7688_p10 = pnand %p7686_p9, %p7683_p8 }
  0x1b   :  { %7691 = shalt.err (!%p7688_p10)
}
  0x1c   :  { %s7692_s29 = scalar_lea.vmem %s58_s20, 32768  ;;  %p7697_p12 = scmp.lt.s32.totalorder %s58_s20, %s58_s20 }
  0x1d   :  { %p7693_p11 = scmp.ne.s32.totalorder %s58_s20, %s7692_s29  ;;  %p7698_p13 = scmp.lt.s32.totalorder %s7692_s29, %s7692_s29 }
  0x1f   :  { %p7699_p0 = por %p7698_p13, %p7697_p12 }
  0x21   :  { %p7700_p1 = pnand %p7699_p0, %p7693_p11 }
  0x23   :  { %7703 = shalt.err (!%p7700_p1)
}
  0x24   :  { %s7850_s2 = smov 512   ;;  %s7851_s28 = smov 32  }
  0x25   :  { %63 = dma.hbm_to_vmem [thread:$0]  %s8145_s4, 32768, %s58_s20, [#allocation9], %s7850_s2, %s7850_s2, %s7851_s28  }
  0x26   :  { %s7852_s10 = smov [#allocation11]   ;;  %s7704_s14 = scalar_lea.hbm %s8147_s6, 57344 }
  0x27   :  { %s79_s11 = sshll.u32 %s7852_s10, 4  ;;  %p7705_p2 = scmp.ne.s32.totalorder %s8147_s6, %s7704_s14  ;;  %s80_s11 = int_to_ptr.vmem [resolvable:$true] %s79_s11 }
  0x28   :  { %p7708_p3 = scmp.lt.u32.totalorder %s7704_s14, %s8147_s6 }
  0x2a   :  { %p7710_p4 = pnand %p7708_p3, %p7705_p2 }
  0x2c   :  { %7713 = shalt.err (!%p7710_p4)
}
  0x2d   :  { %s7714_s19 = scalar_lea.vmem %s80_s11, 57344  ;;  %p7719_p6 = scmp.lt.s32.totalorder %s80_s11, %s80_s11 }
  0x2e   :  { %p7715_p5 = scmp.ne.s32.totalorder %s80_s11, %s7714_s19  ;;  %p7720_p7 = scmp.lt.s32.totalorder %s7714_s19, %s7714_s19 }
  0x30   :  { %p7721_p8 = por %p7720_p7, %p7719_p6 }
  0x32   :  { %p7722_p9 = pnand %p7721_p8, %p7715_p5 }
  0x34   :  { %7725 = shalt.err (!%p7722_p9)
}
  0x35   :  { %s7853_s4 = smov 448   ;;  %s7854_s20 = smov 28  }
  0x36   :  { %85 = dma.hbm_to_vmem [thread:$0]  %s8147_s6, 57344, %s80_s11, [#allocation12], %s7853_s4, %s7853_s4, %s7854_s20  }
  0x37   :  { %s7855_s23 = smov [#allocation2]   ;;  %s7856_s25 = smov [#allocation7]  }
  0x38   :  { %s26_s24 = sshll.u32 %s7855_s23, 4  ;;  %s48_s26 = sshll.u32 %s7856_s25, 4  ;;  %s27_s24 = int_to_ptr.vmem [resolvable:$true] %s26_s24  ;;  %s49_s26 = int_to_ptr.vmem [resolvable:$true] %s48_s26 }
  0x39   :  { %s7726_s2 = scalar_lea.hbm %s8142_s1, 128 }
  0x3a   :  { %p7727_p10 = scmp.ne.s32.totalorder %s8142_s1, %s7726_s2  ;;  %p7730_p11 = scmp.lt.u32.totalorder %s7726_s2, %s8142_s1 }
  0x3c   :  { %p7732_p12 = pnand %p7730_p11, %p7727_p10 }
  0x3e   :  { %7735 = shalt.err (!%p7732_p12)
}
  0x3f   :  { %s7736_s6 = scalar_lea.vmem %s27_s24, 128  ;;  %p7741_p0 = scmp.lt.s32.totalorder %s27_s24, %s27_s24 }
  0x40   :  { %p7737_p13 = scmp.ne.s32.totalorder %s27_s24, %s7736_s6  ;;  %p7742_p1 = scmp.lt.s32.totalorder %s7736_s6, %s7736_s6 }
  0x42   :  { %p7743_p2 = por %p7742_p1, %p7741_p0 }
  0x44   :  { %p7744_p3 = pnand %p7743_p2, %p7737_p13 }
  0x46   :  { %7747 = shalt.err (!%p7744_p3)
}
  0x47   :  { %29 = dma.hbm_to_vmem [thread:$0]  %s8142_s1, 128, %s27_s24, [#allocation3]  }
  0x48   :  { %s7748_s15 = scalar_lea.hbm %s8144_s3, 64 }
  0x49   :  { %p7749_p4 = scmp.ne.s32.totalorder %s8144_s3, %s7748_s15  ;;  %p7752_p5 = scmp.lt.u32.totalorder %s7748_s15, %s8144_s3 }
  0x4b   :  { %p7754_p6 = pnand %p7752_p5, %p7749_p4 }
  0x4d   :  { %7757 = shalt.err (!%p7754_p6)
}
  0x4e   :  { %s7758_s4 = scalar_lea.vmem %s49_s26, 64  ;;  %p7763_p8 = scmp.lt.s32.totalorder %s49_s26, %s49_s26 }
  0x4f   :  { %p7759_p7 = scmp.ne.s32.totalorder %s49_s26, %s7758_s4  ;;  %p7764_p9 = scmp.lt.s32.totalorder %s7758_s4, %s7758_s4 }
  0x51   :  { %p7765_p10 = por %p7764_p9, %p7763_p8 }
  0x53   :  { %p7766_p11 = pnand %p7765_p10, %p7759_p7 }
  0x55   :  { %7769 = shalt.err (!%p7766_p11)
}
  0x56   :  { %51 = dma.hbm_to_vmem [thread:$0]  %s8144_s3, 64, %s49_s26, [#allocation6]  }
  0x57   :  { %s7857_s21 = smov [#allocation10]   ;;  %s7858_s23 = smov [#allocation13]  }
  0x58   :  { %s70_s22 = sshll.u32 %s7857_s21, 4  ;;  %s92_s24 = sshll.u32 %s7858_s23, 4  ;;  %s71_s22 = int_to_ptr.vmem [resolvable:$true] %s70_s22  ;;  %s93_s24 = int_to_ptr.vmem [resolvable:$true] %s92_s24 }
  0x59   :  { %s7770_s29 = scalar_lea.hbm %s8146_s5, 128 }
  0x5a   :  { %p7771_p12 = scmp.ne.s32.totalorder %s8146_s5, %s7770_s29  ;;  %p7774_p13 = scmp.lt.u32.totalorder %s7770_s29, %s8146_s5 }
  0x5c   :  { %p7776_p0 = pnand %p7774_p13, %p7771_p12 }
  0x5e   :  { %7779 = shalt.err (!%p7776_p0)
}
  0x5f   :  { %s7780_s3 = scalar_lea.vmem %s71_s22, 128  ;;  %p7785_p2 = scmp.lt.s32.totalorder %s71_s22, %s71_s22 }
  0x60   :  { %p7781_p1 = scmp.ne.s32.totalorder %s71_s22, %s7780_s3  ;;  %p7786_p3 = scmp.lt.s32.totalorder %s7780_s3, %s7780_s3 }
  0x62   :  { %p7787_p4 = por %p7786_p3, %p7785_p2 }
  0x64   :  { %p7788_p5 = pnand %p7787_p4, %p7781_p1 }
  0x66   :  { %7791 = shalt.err (!%p7788_p5)
}
  0x67   :  { %73 = dma.hbm_to_vmem [thread:$0]  %s8146_s5, 128, %s71_s22, [#allocation9]  }
  0x68   :  { %s7792_s12 = scalar_lea.hbm %s8148_s7, 112 }
  0x69   :  { %p7793_p6 = scmp.ne.s32.totalorder %s8148_s7, %s7792_s12  ;;  %p7796_p7 = scmp.lt.u32.totalorder %s7792_s12, %s8148_s7 }
  0x6b   :  { %p7798_p8 = pnand %p7796_p7, %p7793_p6 }
  0x6d   :  { %7801 = shalt.err (!%p7798_p8)
}
  0x6e   :  { %s7802_s17 = scalar_lea.vmem %s93_s24, 112  ;;  %s7806_s18 = scalar_lea.vmem %s93_s24, 128 }
  0x6f   :  { %p7803_p9 = scmp.ne.s32.totalorder %s93_s24, %s7802_s17  ;;  %p7807_p10 = scmp.lt.s32.totalorder %s93_s24, %s93_s24 }
  0x70   :  { %p7808_p11 = scmp.lt.s32.totalorder %s7806_s18, %s7802_s17 }
  0x72   :  { %p7809_p12 = por %p7808_p11, %p7807_p10 }
  0x74   :  { %p7810_p13 = pnand %p7809_p12, %p7803_p9 }
  0x76   :  { %7813 = shalt.err (!%p7810_p13)
}
  0x77   :  { %95 = dma.hbm_to_vmem [thread:$0]  %s8148_s7, 112, %s93_s24, [#allocation12]  }
  0x78   :  { %7836 = dma.done.wait [#allocation3], 128  }
  0x79   :  { %7837 = vsyncadd [#allocation3], 4294967168 }
  0x7a   :  { %7838 = dma.done.wait [#allocation6], 5184  }
  0x7b   :  { %7839 = vsyncadd [#allocation6], 4294962112 }
  0x7c   :  { %7840 = dma.done.wait [#allocation9], 32896  }
  0x7d   :  { %7841 = vsyncadd [#allocation9], 4294934400 }
  0x7e   :  { %7842 = dma.done.wait [#allocation12], 57456  }
  0x7f   :  { %7843 = vsyncadd [#allocation12], 4294909840  ;;  %v7859_v0 = vmov 0   ;;  %v118_v1 = vld [vmem:[%s8141_s0] sm:$0xff]  ;;  %v6931_v2 = vld [vmem:[#allocation5 + $0x4] ss:$16 sps:$4 sm:$0xff]   ;;  %v119_v50 = vlaneseq }
  0x80   :  { %6930 = vset.pattern.permute.xlu0 %v7859_v0  ;;  %v6933_v3 = vld [vmem:[#allocation5 + $0xc] ss:$16 sps:$4 sm:$0xff]   ;;  %v6935_v4 = vld [vmem:[#allocation5] ss:$16 sps:$4 sm:$0xff]   ;;  %v6936_v5 = vld [vmem:[#allocation5 + $0x8] ss:$16 sps:$4 sm:$0xff]   ;;  %404 = vmatprep.subr.bf16.mxu0 %v6931_v2 }
  0x81   :  { %125 = vperm.xlu0 %6930, %v118_v1   ;;  %v6937_v6 = vld [vmem:[#allocation5 + $0x24] ss:$16 sps:$4 sm:$0xff]   ;;  %445 = vmatprep.subr.bf16.mxu1 %v6933_v3  ;;  %v6939_v7 = vld [vmem:[#allocation5 + $0x2c] ss:$16 sps:$4 sm:$0xff]   ;;  %v6941_v8 = vld [vmem:[#allocation5 + $0x20] ss:$16 sps:$4 sm:$0xff]  }
  0x82   :  { %405 = vmatpush1.bf16.msra.mxu0 %v6935_v4  ;;  %446 = vmatpush1.bf16.msra.mxu1 %v6936_v5  ;;  %v6942_v9 = vld [vmem:[#allocation5 + $0x28] ss:$16 sps:$4 sm:$0xff]   ;;  %v6943_v10 = vld [vmem:[#allocation5 + $0x44] ss:$16 sps:$4 sm:$0xff]   ;;  %v6945_v11 = vld [vmem:[#allocation5 + $0x4c] ss:$16 sps:$4 sm:$0xff]  }
  0x83   :  { %406 = vmatprep.subr.bf16.mxu0 %v6937_v6  ;;  %447 = vmatprep.subr.bf16.mxu1 %v6939_v7  ;;  %v6947_v12 = vld [vmem:[#allocation5 + $0x40] ss:$16 sps:$4 sm:$0xff]   ;;  %v6948_v13 = vld [vmem:[#allocation5 + $0x48] ss:$16 sps:$4 sm:$0xff]   ;;  %v6949_v14 = vld [vmem:[#allocation5 + $0x64] ss:$16 sps:$4 sm:$0xff]  }
  0x84   :  { %v6951_v15 = vld [vmem:[#allocation5 + $0x6c] ss:$16 sps:$4 sm:$0xff]   ;;  %v6953_v16 = vld [vmem:[#allocation5 + $0x60] ss:$16 sps:$4 sm:$0xff]   ;;  %v6954_v17 = vld [vmem:[#allocation5 + $0x68] ss:$16 sps:$4 sm:$0xff]  }
  0x85   :  { %v6955_v18 = vld [vmem:[#allocation5 + $0x84] ss:$16 sps:$4 sm:$0xff]   ;;  %v6957_v19 = vld [vmem:[#allocation5 + $0x8c] ss:$16 sps:$4 sm:$0xff]   ;;  %v6959_v20 = vld [vmem:[#allocation5 + $0x80] ss:$16 sps:$4 sm:$0xff]  }
  0x86   :  { %407 = vmatpush1.bf16.msra.mxu0 %v6941_v8  ;;  %448 = vmatpush1.bf16.msra.mxu1 %v6942_v9  ;;  %v6960_v21 = vld [vmem:[#allocation5 + $0x88] ss:$16 sps:$4 sm:$0xff]   ;;  %v6961_v22 = vld [vmem:[#allocation5 + $0xa4] ss:$16 sps:$4 sm:$0xff]   ;;  %v6963_v23 = vld [vmem:[#allocation5 + $0xac] ss:$16 sps:$4 sm:$0xff]  }
  0x87   :  { %408 = vmatprep.subr.bf16.mxu0 %v6943_v10  ;;  %449 = vmatprep.subr.bf16.mxu1 %v6945_v11  ;;  %v6965_v24 = vld [vmem:[#allocation5 + $0xa0] ss:$16 sps:$4 sm:$0xff]   ;;  %v6966_v25 = vld [vmem:[#allocation5 + $0xa8] ss:$16 sps:$4 sm:$0xff]   ;;  %v6967_v26 = vld [vmem:[#allocation5 + $0xc4] ss:$16 sps:$4 sm:$0xff]  }
  0x88   :  { %v6969_v27 = vld [vmem:[#allocation5 + $0xcc] ss:$16 sps:$4 sm:$0xff]   ;;  %v6971_v28 = vld [vmem:[#allocation5 + $0xc0] ss:$16 sps:$4 sm:$0xff]   ;;  %v6972_v29 = vld [vmem:[#allocation5 + $0xc8] ss:$16 sps:$4 sm:$0xff]  }
  0x89   :  { %v6973_v30 = vld [vmem:[#allocation5 + $0xe4] ss:$16 sps:$4 sm:$0xff]   ;;  %v6975_v31 = vld [vmem:[#allocation5 + $0xec] ss:$16 sps:$4 sm:$0xff]   ;;  %v6977_v34 = vld [vmem:[#allocation5 + $0xe0] ss:$16 sps:$4 sm:$0xff]  }
  0x8a   :  { %409 = vmatpush1.bf16.msra.mxu0 %v6947_v12  ;;  %450 = vmatpush1.bf16.msra.mxu1 %v6948_v13  ;;  %v494_v32 = vld [vmem:[#allocation8] sm:$0xff]  ;;  %v6981_v41 = vld [vmem:[#allocation5 + $0x10c] ss:$16 sps:$4 sm:$0xff]   ;;  %v6983_v42 = vld [vmem:[#allocation5 + $0x100] ss:$16 sps:$4 sm:$0xff]   ;;  %v120_v51 = vand.u32 127, %v119_v50 }
  0x8b   :  { %410 = vmatprep.subr.bf16.mxu0 %v6949_v14  ;;  %451 = vmatprep.subr.bf16.mxu1 %v6951_v15  ;;  %v498_v33 = vld [vmem:[#allocation8 + $0x20] sm:$0xff]  ;;  %v6987_v45 = vld [vmem:[#allocation5 + $0x12c] ss:$16 sps:$4 sm:$0xff]   ;;  %v6989_v46 = vld [vmem:[#allocation5 + $0x120] ss:$16 sps:$4 sm:$0xff]   ;;  %vm400_vm3 = vcmask 261120  }
  0x8c   :  { %v6051_v35 = vcombine.low %v494_v32, %v498_v33  ;;  %v622_v36 = vld [vmem:[#allocation8 + $0x400] sm:$0xff]  ;;  %v6052_v49 = vcombine.high %v494_v32, %v498_v33  ;;  %v121_v52 = vadd.s32 128, %v120_v51  ;;  %v122_v53 = vshra.s32 %v120_v51, 4  ;;  %v129_v55 = vld [vmem:[#allocation2] sm:$0xff]  ;;  %s7860_s0 = smov [#allocation14]  }
  0x8d   :  { %v626_v37 = vld [vmem:[#allocation8 + $0x420] sm:$0xff]  ;;  %s5995_s7 = sshll.u32 %s7860_s0, 4  ;;  %s5996_s7 = int_to_ptr.vmem [resolvable:$true] %s5995_s7 }
  0x8e   :  { %411 = vmatpush1.bf16.msra.mxu0 %v6953_v16  ;;  %452 = vmatpush1.bf16.msra.mxu1 %v6954_v17  ;;  %v6978_v38 = vld [vmem:[#allocation5 + $0xe8] ss:$16 sps:$4 sm:$0xff]   ;;  %v6979_v39 = vld [vmem:[#allocation5 + $0x104] ss:$16 sps:$4 sm:$0xff]   ;;  %v6179_v40 = vcombine.low %v622_v36, %v626_v37  ;;  %v6180_v48 = vcombine.high %v622_v36, %v626_v37  ;;  %v123_v54 = vshra.s32 %v121_v52, 4  ;;  %s7814_s20 = scalar_lea.vmem %s5996_s7, 448  ;;  %p7819_p1 = scmp.lt.s32.totalorder %s5996_s7, %s5996_s7 }
  0x8f   :  { %412 = vmatprep.subr.bf16.mxu0 %v6955_v18  ;;  %453 = vmatprep.subr.bf16.mxu1 %v6957_v19  ;;  %v6984_v43 = vld [vmem:[#allocation5 + $0x108] ss:$16 sps:$4 sm:$0xff]   ;;  %v6985_v44 = vld [vmem:[#allocation5 + $0x124] ss:$16 sps:$4 sm:$0xff]   ;;  %p7815_p0 = scmp.ne.s32.totalorder %s5996_s7, %s7814_s20  ;;  %p7820_p2 = scmp.lt.s32.totalorder %s7814_s20, %s7814_s20 }
  0x90   :  { %v6990_v47 = vld [vmem:[#allocation5 + $0x128] ss:$16 sps:$4 sm:$0xff]  }
  0x91   :  { %v502_v57 = vld [vmem:[#allocation8 + $0x40] sm:$0xff]  ;;  %p7821_p3 = por %p7820_p2, %p7819_p1 }
  0x92   :  { %413 = vmatpush1.bf16.msra.mxu0 %v6959_v20  ;;  %454 = vmatpush1.bf16.msra.mxu1 %v6960_v21  ;;  %v506_v58 = vld [vmem:[#allocation8 + $0x60] sm:$0xff] }
  0x93   :  { %414 = vmatprep.subr.bf16.mxu0 %v6961_v22  ;;  %455 = vmatprep.subr.bf16.mxu1 %v6963_v23  ;;  %v630_v59 = vld [vmem:[#allocation8 + $0x440] sm:$0xff]  ;;  %v6060_v4 = vcombine.high %v502_v57, %v506_v58  ;;  %v6059_v6 = vcombine.low %v502_v57, %v506_v58  ;;  %p7822_p4 = pnand %p7821_p3, %p7815_p0 }
  0x94   :  { %v634_v60 = vld [vmem:[#allocation8 + $0x460] sm:$0xff] }
  0x95   :  { %v510_v0 = vld [vmem:[#allocation8 + $0x80] sm:$0xff]  ;;  %v6188_v5 = vcombine.high %v630_v59, %v634_v60  ;;  %v6187_v7 = vcombine.low %v630_v59, %v634_v60 }
  0x96   :  { %415 = vmatpush1.bf16.msra.mxu0 %v6965_v24  ;;  %456 = vmatpush1.bf16.msra.mxu1 %v6966_v25  ;;  %v514_v1 = vld [vmem:[#allocation8 + $0xa0] sm:$0xff] }
  0x97   :  { %416 = vmatprep.subr.bf16.mxu0 %v6967_v26  ;;  %457 = vmatprep.subr.bf16.mxu1 %v6969_v27  ;;  %v638_v2 = vld [vmem:[#allocation8 + $0x480] sm:$0xff]  ;;  %v6068_v12 = vcombine.high %v510_v0, %v514_v1  ;;  %v6067_v14 = vcombine.low %v510_v0, %v514_v1 }
  0x98   :  { %v642_v3 = vld [vmem:[#allocation8 + $0x4a0] sm:$0xff] }
  0x99   :  { %v518_v8 = vld [vmem:[#allocation8 + $0xc0] sm:$0xff]  ;;  %v6196_v13 = vcombine.high %v638_v2, %v642_v3  ;;  %v6195_v15 = vcombine.low %v638_v2, %v642_v3 }
  0x9a   :  { %417 = vmatpush1.bf16.msra.mxu0 %v6971_v28  ;;  %458 = vmatpush1.bf16.msra.mxu1 %v6972_v29  ;;  %v522_v9 = vld [vmem:[#allocation8 + $0xe0] sm:$0xff] }
  0x9b   :  { %418 = vmatprep.subr.bf16.mxu0 %v6973_v30  ;;  %459 = vmatprep.subr.bf16.mxu1 %v6975_v31  ;;  %v646_v10 = vld [vmem:[#allocation8 + $0x4c0] sm:$0xff]  ;;  %v6076_v20 = vcombine.high %v518_v8, %v522_v9  ;;  %v6075_v22 = vcombine.low %v518_v8, %v522_v9 }
  0x9c   :  { %v650_v11 = vld [vmem:[#allocation8 + $0x4e0] sm:$0xff] }
  0x9d   :  { %v526_v16 = vld [vmem:[#allocation8 + $0x100] sm:$0xff]  ;;  %v6204_v21 = vcombine.high %v646_v10, %v650_v11  ;;  %v6203_v23 = vcombine.low %v646_v10, %v650_v11 }
  0x9e   :  { %419 = vmatpush1.bf16.msra.mxu0 %v6977_v34  ;;  %460 = vmatpush1.bf16.msra.mxu1 %v6978_v38  ;;  %v530_v17 = vld [vmem:[#allocation8 + $0x120] sm:$0xff] }
  0x9f   :  { %420 = vmatprep.subr.bf16.mxu0 %v6979_v39  ;;  %461 = vmatprep.subr.bf16.mxu1 %v6981_v41  ;;  %v654_v18 = vld [vmem:[#allocation8 + $0x500] sm:$0xff]  ;;  %v6084_v28 = vcombine.high %v526_v16, %v530_v17  ;;  %v6083_v30 = vcombine.low %v526_v16, %v530_v17 }
  0xa0   :  { %v658_v19 = vld [vmem:[#allocation8 + $0x520] sm:$0xff] }
  0xa1   :  { %v534_v24 = vld [vmem:[#allocation8 + $0x140] sm:$0xff]  ;;  %v6212_v29 = vcombine.high %v654_v18, %v658_v19  ;;  %v6211_v31 = vcombine.low %v654_v18, %v658_v19 }
  0xa2   :  { %421 = vmatpush1.bf16.msra.mxu0 %v6983_v42  ;;  %462 = vmatpush1.bf16.msra.mxu1 %v6984_v43  ;;  %v538_v25 = vld [vmem:[#allocation8 + $0x160] sm:$0xff] }
  0xa3   :  { %422 = vmatprep.subr.bf16.mxu0 %v6985_v44  ;;  %463 = vmatprep.subr.bf16.mxu1 %v6987_v45  ;;  %v662_v26 = vld [vmem:[#allocation8 + $0x540] sm:$0xff]  ;;  %v6092_v36 = vcombine.high %v534_v24, %v538_v25  ;;  %v6091_v38 = vcombine.low %v534_v24, %v538_v25 }
  0xa4   :  { %v666_v27 = vld [vmem:[#allocation8 + $0x560] sm:$0xff] }
  0xa5   :  { %v542_v32 = vld [vmem:[#allocation8 + $0x180] sm:$0xff]  ;;  %v6220_v37 = vcombine.high %v662_v26, %v666_v27  ;;  %v6219_v39 = vcombine.low %v662_v26, %v666_v27 }
  0xa6   :  { %423 = vmatpush1.bf16.msra.mxu0 %v6989_v46  ;;  %464 = vmatpush1.bf16.msra.mxu1 %v6990_v47  ;;  %v546_v33 = vld [vmem:[#allocation8 + $0x1a0] sm:$0xff] }
  0xa7   :  { %2113 = vmatprep.subr.bf16.mxu0 %v6180_v48  ;;  %2072 = vmatprep.subr.bf16.mxu1 %v6052_v49  ;;  %v670_v34 = vld [vmem:[#allocation8 + $0x580] sm:$0xff]  ;;  %v6100_v44 = vcombine.high %v542_v32, %v546_v33  ;;  %v6099_v46 = vcombine.low %v542_v32, %v546_v33 }
  0xa8   :  { %v554_v41 = vld [vmem:[#allocation8 + $0x1e0] sm:$0xff] }
  0xa9   :  { %v678_v42 = vld [vmem:[#allocation8 + $0x5c0] sm:$0xff] }
  0xaa   :  { %v682_v43 = vld [vmem:[#allocation8 + $0x5e0] sm:$0xff] }
  0xab   :  { %v558_v48 = vld [vmem:[#allocation8 + $0x200] sm:$0xff] }
  0xac   :  { %v562_v49 = vld [vmem:[#allocation8 + $0x220] sm:$0xff] }
  0xad   :  { %v686_v51 = vld [vmem:[#allocation8 + $0x600] sm:$0xff] }
  0xae   :  { %v690_v52 = vld [vmem:[#allocation8 + $0x620] sm:$0xff] }
  0xaf   :  { %v566_v57 = vld [vmem:[#allocation8 + $0x240] sm:$0xff]  ;;  %v6243_v0 = vcombine.low %v686_v51, %v690_v52 }
  0xb0   :  { %v570_v58 = vld [vmem:[#allocation8 + $0x260] sm:$0xff] }
  0xb1   :  { %v694_v59 = vld [vmem:[#allocation8 + $0x640] sm:$0xff] }
  0xb2   :  { %v698_v60 = vld [vmem:[#allocation8 + $0x660] sm:$0xff] }
  0xb3   :  { %v574_v1 = vld [vmem:[#allocation8 + $0x280] sm:$0xff]  ;;  %v6251_v8 = vcombine.low %v694_v59, %v698_v60 }
  0xb4   :  { %v578_v2 = vld [vmem:[#allocation8 + $0x2a0] sm:$0xff] }
  0xb5   :  { %v702_v3 = vld [vmem:[#allocation8 + $0x680] sm:$0xff] }
  0xb6   :  { %v582_v9 = vld [vmem:[#allocation8 + $0x2c0] sm:$0xff] }
  0xb7   :  { %v586_v10 = vld [vmem:[#allocation8 + $0x2e0] sm:$0xff] }
  0xb8   :  { %v710_v11 = vld [vmem:[#allocation8 + $0x6c0] sm:$0xff] }
  0xb9   :  { %v590_v17 = vld [vmem:[#allocation8 + $0x300] sm:$0xff] }
  0xba   :  { %v594_v18 = vld [vmem:[#allocation8 + $0x320] sm:$0xff] }
  0xbb   :  { %v718_v19 = vld [vmem:[#allocation8 + $0x700] sm:$0xff] }
  0xbc   :  { %v598_v25 = vld [vmem:[#allocation8 + $0x340] sm:$0xff] }
  0xbd   :  { %v602_v26 = vld [vmem:[#allocation8 + $0x360] sm:$0xff] }
  0xbe   :  { %v726_v27 = vld [vmem:[#allocation8 + $0x740] sm:$0xff]  ;;  %v6156_v33 = vcombine.high %v598_v25, %v602_v26 }
 0x100   :  { %v126_v56 = vpop.permute.xlu0 %125 }
 0x101   :  { %vm127_vm0 = vcmp.eq.s32.totalorder %v122_v53, %v126_v56  ;;  %vm128_vm1 = vcmp.eq.s32.totalorder %v123_v54, %v126_v56  ;;  %v6236_v54 = vcombine.high %v678_v42, %v682_v43  ;;  %v6235_v56 = vcombine.low %v678_v42, %v682_v43 }
 0x102   :  { %vm130_vm2 = vmpackc.low %vm128_vm1, %vm127_vm0 }
 0x103   :  { %v131_v61 = vsel %vm130_vm2, %v129_v55, 0 }
 0x104   :  { %v6007_v62 = vcombine.low %v131_v61, %v131_v61  ;;  %v6008_v63 = vcombine.high %v131_v61, %v131_v61  ;;  %v6116_v61 = vcombine.high %v558_v48, %v562_v49 }
 0x106   :  { %6049 = vmatprep.mubr.msk.bf16.mxu0 %vm400_vm3, %v6008_v63  ;;  %6050 = vmatprep.mubr.msk.bf16.mxu1 %vm400_vm3, %v6008_v63  ;;  %v6115_v63 = vcombine.low %v558_v48, %v562_v49  ;;  %v746_v49 = vld [vmem:[#allocation8 + $0x7e0] sm:$0xff] }
 0x107   :  { %437 = vmatmul.mubr.bf16.vlgmr.msra.gmra.mrb[0].mxu0 %v6007_v62  ;;  %478 = vmatmul.mubr.bf16.vlgmr.msra.gmra.mrb[0].mxu1 %v6007_v62  ;;  %v6244_v62 = vcombine.high %v686_v51, %v690_v52 }
 0x108   :  { %2073 = vmatpush1.bf16.msra.mxu1 %v6051_v35  ;;  %2114 = vmatpush1.bf16.msra.mxu0 %v6179_v40  ;;  %v674_v35 = vld [vmem:[#allocation8 + $0x5a0] sm:$0xff] }
 0x109   :  { %2074 = vmatprep.subr.bf16.mxu1 %v6060_v4  ;;  %2115 = vmatprep.subr.bf16.mxu0 %v6188_v5  ;;  %v550_v40 = vld [vmem:[#allocation8 + $0x1c0] sm:$0xff]  ;;  %v6228_v45 = vcombine.high %v670_v34, %v674_v35  ;;  %v6227_v47 = vcombine.low %v670_v34, %v674_v35  ;;  %v6124_v5 = vcombine.high %v566_v57, %v570_v58 }
 0x10a   :  { %v6108_v53 = vcombine.high %v550_v40, %v554_v41  ;;  %v6107_v55 = vcombine.low %v550_v40, %v554_v41  ;;  %v706_v4 = vld [vmem:[#allocation8 + $0x6a0] sm:$0xff]  ;;  %v6155_v35 = vcombine.low %v598_v25, %v602_v26  ;;  %v504_v25 = vld [vmem:[#allocation8 + $0x50] sm:$0xff] }
 0x10b   :  { %v6259_v16 = vcombine.low %v702_v3, %v706_v4  ;;  %v738_v41 = vld [vmem:[#allocation8 + $0x7a0] sm:$0xff]  ;;  %v508_v26 = vld [vmem:[#allocation8 + $0x70] sm:$0xff] }
 0x10c   :  { %2075 = vmatpush1.bf16.msra.mxu1 %v6059_v6  ;;  %2116 = vmatpush1.bf16.msra.mxu0 %v6187_v7  ;;  %v6252_v6 = vcombine.high %v694_v59, %v698_v60  ;;  %v6123_v7 = vcombine.low %v566_v57, %v570_v58  ;;  %v500_v58 = vld [vmem:[#allocation8 + $0x30] sm:$0xff] }
 0x10d   :  { %2076 = vmatprep.subr.bf16.mxu1 %v6068_v12  ;;  %2117 = vmatprep.subr.bf16.mxu0 %v6196_v13  ;;  %v714_v12 = vld [vmem:[#allocation8 + $0x6e0] sm:$0xff]  ;;  %v6132_v13 = vcombine.high %v574_v1, %v578_v2 }
 0x10e   :  { %v6267_v24 = vcombine.low %v710_v11, %v714_v12 }
 0x110   :  { %2077 = vmatpush1.bf16.msra.mxu1 %v6067_v14  ;;  %2118 = vmatpush1.bf16.msra.mxu0 %v6195_v15  ;;  %v6260_v14 = vcombine.high %v702_v3, %v706_v4  ;;  %v6131_v15 = vcombine.low %v574_v1, %v578_v2  ;;  %v172_v1 = vld [vmem:[#allocation7] sm:$0xf] }
 0x111   :  { %2078 = vmatprep.subr.bf16.mxu1 %v6076_v20  ;;  %2119 = vmatprep.subr.bf16.mxu0 %v6204_v21  ;;  %v722_v20 = vld [vmem:[#allocation8 + $0x720] sm:$0xff]  ;;  %v6140_v21 = vcombine.high %v582_v9, %v586_v10 }
 0x112   :  { %v6275_v32 = vcombine.low %v718_v19, %v722_v20 }
 0x114   :  { %2079 = vmatpush1.bf16.msra.mxu1 %v6075_v22  ;;  %2120 = vmatpush1.bf16.msra.mxu0 %v6203_v23  ;;  %v6268_v22 = vcombine.high %v710_v11, %v714_v12  ;;  %v6139_v23 = vcombine.low %v582_v9, %v586_v10 }
 0x115   :  { %2080 = vmatprep.subr.bf16.mxu1 %v6084_v28  ;;  %2121 = vmatprep.subr.bf16.mxu0 %v6212_v29  ;;  %v730_v28 = vld [vmem:[#allocation8 + $0x760] sm:$0xff]  ;;  %v6148_v29 = vcombine.high %v590_v17, %v594_v18 }
 0x116   :  { %v6284_v34 = vcombine.high %v726_v27, %v730_v28 }
 0x118   :  { %2081 = vmatpush1.bf16.msra.mxu1 %v6083_v30  ;;  %2122 = vmatpush1.bf16.msra.mxu0 %v6211_v31  ;;  %v6276_v30 = vcombine.high %v718_v19, %v722_v20  ;;  %v6147_v31 = vcombine.low %v590_v17, %v594_v18 }
 0x119   :  { %2082 = vmatprep.subr.bf16.mxu1 %v6092_v36  ;;  %2123 = vmatprep.subr.bf16.mxu0 %v6220_v37  ;;  %v6283_v36 = vcombine.low %v726_v27, %v730_v28  ;;  %v606_v37 = vld [vmem:[#allocation8 + $0x380] sm:$0xff] }
 0x11c   :  { %2083 = vmatpush1.bf16.msra.mxu1 %v6091_v38  ;;  %2124 = vmatpush1.bf16.msra.mxu0 %v6219_v39  ;;  %v610_v38 = vld [vmem:[#allocation8 + $0x3a0] sm:$0xff] }
 0x11d   :  { %2084 = vmatprep.subr.bf16.mxu1 %v6100_v44  ;;  %2125 = vmatprep.subr.bf16.mxu0 %v6228_v45  ;;  %v734_v39 = vld [vmem:[#allocation8 + $0x780] sm:$0xff]  ;;  %v6164_v40 = vcombine.high %v606_v37, %v610_v38  ;;  %v6163_v42 = vcombine.low %v606_v37, %v610_v38  ;;  %v6063_v38 = vcombine.low %v504_v25, %v508_v26 }
 0x11e   :  { %v6291_v43 = vcombine.low %v734_v39, %v738_v41  ;;  %v6292_v44 = vcombine.high %v734_v39, %v738_v41  ;;  %v614_v45 = vld [vmem:[#allocation8 + $0x3c0] sm:$0xff]  ;;  %v519_v41 = vld [vmem:[#allocation8 + $0xc8] sm:$0xff] }
 0x120   :  { %2085 = vmatpush1.bf16.msra.mxu1 %v6099_v46  ;;  %2126 = vmatpush1.bf16.msra.mxu0 %v6227_v47  ;;  %v618_v46 = vld [vmem:[#allocation8 + $0x3e0] sm:$0xff] }
 0x121   :  { %2086 = vmatprep.subr.bf16.mxu1 %v6108_v53  ;;  %2127 = vmatprep.subr.bf16.mxu0 %v6236_v54  ;;  %v742_v47 = vld [vmem:[#allocation8 + $0x7c0] sm:$0xff]  ;;  %v6172_v48 = vcombine.high %v614_v45, %v618_v46  ;;  %v6171_v51 = vcombine.low %v614_v45, %v618_v46  ;;  %v495_v54 = vld [vmem:[#allocation8 + $0x8] sm:$0xff] }
 0x122   :  { %v6299_v52 = vcombine.low %v742_v47, %v746_v49  ;;  %v6300_v53 = vcombine.high %v742_v47, %v746_v49  ;;  %v527_v49 = vld [vmem:[#allocation8 + $0x108] sm:$0xff] }
 0x124   :  { %2087 = vmatpush1.bf16.msra.mxu1 %v6107_v55  ;;  %2128 = vmatpush1.bf16.msra.mxu0 %v6235_v56  ;;  %v499_v55 = vld [vmem:[#allocation8 + $0x28] sm:$0xff]  ;;  %v496_v56 = vld [vmem:[#allocation8 + $0x10] sm:$0xff] }
 0x125   :  { %2088 = vmatprep.subr.bf16.mxu1 %v6116_v61  ;;  %2129 = vmatprep.subr.bf16.mxu0 %v6244_v62  ;;  %v6054_v57 = vcombine.high %v495_v54, %v499_v55  ;;  %v6053_v59 = vcombine.low %v495_v54, %v499_v55  ;;  %v6055_v60 = vcombine.low %v496_v56, %v500_v58  ;;  %v7995_v62 = vshrl.u32 %v119_v50, 7 }
 0x126   :  { %v6056_v61 = vcombine.high %v496_v56, %v500_v58  ;;  %v535_v58 = vld [vmem:[#allocation8 + $0x148] sm:$0xff] }
 0x127   :  { %v8004_v2 = vsub.s32 1, %v7995_v62  ;;  %v8007_v3 = vsub.s32 3, %v7995_v62 }
 0x128   :  { %2089 = vmatpush1.bf16.msra.mxu1 %v6115_v63  ;;  %2130 = vmatpush1.bf16.msra.mxu0 %v6243_v0  ;;  %v7998_v63 = vsub.s32 0, %v7995_v62  ;;  %v8001_v0 = vsub.s32 2, %v7995_v62 }
 0x129   :  { %2090 = vmatprep.subr.bf16.mxu1 %v6124_v5  ;;  %2131 = vmatprep.subr.bf16.mxu0 %v6252_v6  ;;  %v181_v50 = vrot.slane %v172_v1, %v8004_v2  ;;  %v189_v6 = vrot.slane %v172_v1, %v8007_v3 }
 0x12a   :  { %v177_v4 = vrot.slane %v172_v1, %v7998_v63  ;;  %v185_v5 = vrot.slane %v172_v1, %v8001_v0 }
 0x12c   :  { %2091 = vmatpush1.bf16.msra.mxu1 %v6123_v7  ;;  %2132 = vmatpush1.bf16.msra.mxu0 %v6251_v8 }
 0x12d   :  { %2092 = vmatprep.subr.bf16.mxu1 %v6132_v13  ;;  %2133 = vmatprep.subr.bf16.mxu0 %v6260_v14 }
 0x130   :  { %2093 = vmatpush1.bf16.msra.mxu1 %v6131_v15  ;;  %2134 = vmatpush1.bf16.msra.mxu0 %v6259_v16 }
 0x131   :  { %2094 = vmatprep.subr.bf16.mxu1 %v6140_v21  ;;  %2135 = vmatprep.subr.bf16.mxu0 %v6268_v22 }
 0x134   :  { %2095 = vmatpush1.bf16.msra.mxu1 %v6139_v23  ;;  %2136 = vmatpush1.bf16.msra.mxu0 %v6267_v24  ;;  %v503_v23 = vld [vmem:[#allocation8 + $0x48] sm:$0xff] }
 0x135   :  { %2096 = vmatprep.subr.bf16.mxu1 %v6148_v29  ;;  %2137 = vmatprep.subr.bf16.mxu0 %v6276_v30  ;;  %v507_v24 = vld [vmem:[#allocation8 + $0x68] sm:$0xff] }
 0x136   :  { %v6061_v37 = vcombine.low %v503_v23, %v507_v24 }
 0x138   :  { %2097 = vmatpush1.bf16.msra.mxu1 %v6147_v31  ;;  %2138 = vmatpush1.bf16.msra.mxu0 %v6275_v32  ;;  %v511_v31 = vld [vmem:[#allocation8 + $0x88] sm:$0xff]  ;;  %v6062_v32 = vcombine.high %v503_v23, %v507_v24  ;;  %v560_v24 = vld [vmem:[#allocation8 + $0x210] sm:$0xff] }
 0x139   :  { %2098 = vmatprep.subr.bf16.mxu1 %v6156_v33  ;;  %2139 = vmatprep.subr.bf16.mxu0 %v6284_v34  ;;  %v6064_v33 = vcombine.high %v504_v25, %v508_v26  ;;  %v515_v34 = vld [vmem:[#allocation8 + $0xa8] sm:$0xff]  ;;  %v564_v25 = vld [vmem:[#allocation8 + $0x230] sm:$0xff] }
 0x13a   :  { %v6070_v39 = vcombine.high %v511_v31, %v515_v34  ;;  %v6069_v45 = vcombine.low %v511_v31, %v515_v34  ;;  %v563_v23 = vld [vmem:[#allocation8 + $0x228] sm:$0xff] }
 0x13b   :  { %v567_v34 = vld [vmem:[#allocation8 + $0x248] sm:$0xff] }
 0x13c   :  { %2099 = vmatpush1.bf16.msra.mxu1 %v6155_v35  ;;  %2140 = vmatpush1.bf16.msra.mxu0 %v6283_v36  ;;  %v512_v35 = vld [vmem:[#allocation8 + $0x90] sm:$0xff] }
 0x13d   :  { %2100 = vmatprep.subr.bf16.mxu1 %v6164_v40  ;;  %2141 = vmatprep.subr.bf16.mxu0 %v6292_v44  ;;  %v516_v36 = vld [vmem:[#allocation8 + $0xb0] sm:$0xff] }
 0x13e   :  { %v6072_v40 = vcombine.high %v512_v35, %v516_v36  ;;  %v524_v44 = vld [vmem:[#allocation8 + $0xf0] sm:$0xff]  ;;  %v6071_v46 = vcombine.low %v512_v35, %v516_v36  ;;  %v571_v35 = vld [vmem:[#allocation8 + $0x268] sm:$0xff] }
 0x13f   :  { %v568_v36 = vld [vmem:[#allocation8 + $0x250] sm:$0xff] }
 0x140   :  { %2101 = vmatpush1.bf16.msra.mxu1 %v6163_v42  ;;  %2142 = vmatpush1.bf16.msra.mxu0 %v6291_v43  ;;  %v523_v42 = vld [vmem:[#allocation8 + $0xe8] sm:$0xff]  ;;  %v520_v43 = vld [vmem:[#allocation8 + $0xd0] sm:$0xff] }
 0x141   :  { %2102 = vmatprep.subr.bf16.mxu1 %v6172_v48  ;;  %2143 = vmatprep.subr.bf16.mxu0 %v6300_v53  ;;  %v6078_v47 = vcombine.high %v519_v41, %v523_v42  ;;  %v6080_v48 = vcombine.high %v520_v43, %v524_v44  ;;  %v532_v53 = vld [vmem:[#allocation8 + $0x130] sm:$0xff]  ;;  %v6077_v54 = vcombine.low %v519_v41, %v523_v42  ;;  %v575_v42 = vld [vmem:[#allocation8 + $0x288] sm:$0xff] }
 0x142   :  { %v6079_v55 = vcombine.low %v520_v43, %v524_v44  ;;  %v579_v43 = vld [vmem:[#allocation8 + $0x2a8] sm:$0xff]  ;;  %v576_v44 = vld [vmem:[#allocation8 + $0x290] sm:$0xff] }
 0x144   :  { %2103 = vmatpush1.bf16.msra.mxu1 %v6171_v51  ;;  %2144 = vmatpush1.bf16.msra.mxu0 %v6299_v52  ;;  %v531_v51 = vld [vmem:[#allocation8 + $0x128] sm:$0xff]  ;;  %v528_v52 = vld [vmem:[#allocation8 + $0x110] sm:$0xff] }
 0x145   :  { %2154 = vmatprep.subr.bf16.mxu1 %v6054_v57  ;;  %2236 = vmatprep.subr.bf16.mxu0 %v6056_v61  ;;  %v6086_v56 = vcombine.high %v527_v49, %v531_v51  ;;  %v6088_v57 = vcombine.high %v528_v52, %v532_v53  ;;  %v540_v61 = vld [vmem:[#allocation8 + $0x170] sm:$0xff]  ;;  %v6085_v1 = vcombine.low %v527_v49, %v531_v51  ;;  %v583_v51 = vld [vmem:[#allocation8 + $0x2c8] sm:$0xff] }
 0x1da   :  { %v438_v7 = vpop.f32.mrb[0].mxu0  ;;  %v479_v8 = vpop.f32.mrb[0].mxu1 }
 0x1db   :  { %v439_v9 = vadd.f32 %v438_v7, %v177_v4  ;;  %v480_v10 = vadd.f32 %v479_v8, %v185_v5  ;;  %v440_v11 = vpop.f32.mrb[1].mxu0  ;;  %v481_v12 = vpop.f32.mrb[1].mxu1  ;;  %v6087_v4 = vcombine.low %v528_v52, %v532_v53  ;;  %v547_v7 = vld [vmem:[#allocation8 + $0x1a8] sm:$0xff]  ;;  %v544_v8 = vld [vmem:[#allocation8 + $0x190] sm:$0xff] }
 0x1dc   :  { %v441_v13 = vadd.f32 %v440_v11, %v181_v50  ;;  %v482_v14 = vadd.f32 %v481_v12, %v189_v6  ;;  %v442_v15 = vpop.f32.mrb[2].mxu0  ;;  %v483_v16 = vpop.f32.mrb[2].mxu1  ;;  %v543_v6 = vld [vmem:[#allocation8 + $0x188] sm:$0xff]  ;;  %v584_v53 = vld [vmem:[#allocation8 + $0x2d0] sm:$0xff] }
 0x1dd   :  { %v486_v17 = vmax.f32 %v439_v9, 0.0  ;;  %v488_v18 = vmax.f32 %v480_v10, 0.0  ;;  %v443_v19 = vpop.f32.mrb[3].mxu0  ;;  %v484_v20 = vpop.f32.mrb[3].mxu1  ;;  %v548_v9 = vld [vmem:[#allocation8 + $0x1b0] sm:$0xff]  ;;  %v6102_v12 = vcombine.high %v543_v6, %v547_v7  ;;  %v555_v15 = vld [vmem:[#allocation8 + $0x1e8] sm:$0xff] }
 0x1de   :  { %v487_v21 = vmax.f32 %v441_v13, 0.0  ;;  %v489_v22 = vmax.f32 %v482_v14, 0.0  ;;  %v6104_v13 = vcombine.high %v544_v8, %v548_v9  ;;  %v551_v14 = vld [vmem:[#allocation8 + $0x1c8] sm:$0xff]  ;;  %v552_v16 = vld [vmem:[#allocation8 + $0x1d0] sm:$0xff]  ;;  %v6103_v19 = vcombine.low %v544_v8, %v548_v9 }
 0x1df   :  { %v8017_v29 = vpack.c.bf16 %v486_v17, %v486_v17  ;;  %v8019_v30 = vpack.c.bf16 %v488_v18, %v488_v18  ;;  %v556_v17 = vld [vmem:[#allocation8 + $0x1f0] sm:$0xff]  ;;  %v6101_v18 = vcombine.low %v543_v6, %v547_v7  ;;  %v6110_v20 = vcombine.high %v551_v14, %v555_v15  ;;  %v587_v52 = vld [vmem:[#allocation8 + $0x2e8] sm:$0xff] }
 0x1e0   :  { %v8013_v27 = vpack.c.bf16 %v487_v21, %v487_v21  ;;  %v8015_v28 = vpack.c.bf16 %v489_v22, %v489_v22  ;;  %v6112_v21 = vcombine.high %v552_v16, %v556_v17  ;;  %v559_v22 = vld [vmem:[#allocation8 + $0x208] sm:$0xff]  ;;  %v6109_v26 = vcombine.low %v551_v14, %v555_v15  ;;  %v600_v9 = vld [vmem:[#allocation8 + $0x350] sm:$0xff] }
 0x1e1   :  { %v6111_v31 = vcombine.low %v552_v16, %v556_v17  ;;  %v599_v7 = vld [vmem:[#allocation8 + $0x348] sm:$0xff]  ;;  %v608_v17 = vld [vmem:[#allocation8 + $0x390] sm:$0xff] }
 0x1e2   :  { %2104 = vmatprep.mubr.bf16.mxu1 %v8013_v27  ;;  %2145 = vmatprep.mubr.bf16.mxu0 %v8015_v28  ;;  %v603_v8 = vld [vmem:[#allocation8 + $0x368] sm:$0xff] }
 0x1e3   :  { %2105 = vmatmul.mubr.bf16.vlgmr.msra.gmra.mrb[4].mxu1 %v8017_v29  ;;  %2146 = vmatmul.mubr.bf16.vlgmr.msra.gmra.mrb[4].mxu0 %v8019_v30  ;;  %v607_v15 = vld [vmem:[#allocation8 + $0x388] sm:$0xff] }
 0x1e4   :  { %2155 = vmatpush1.bf16.msra.mxu1 %v6053_v59  ;;  %2237 = vmatpush1.bf16.msra.mxu0 %v6055_v60  ;;  %v539_v59 = vld [vmem:[#allocation8 + $0x168] sm:$0xff]  ;;  %v536_v60 = vld [vmem:[#allocation8 + $0x150] sm:$0xff] }
 0x1e5   :  { %2186 = vmatprep.mubr.bf16.mxu1 %v8013_v27  ;;  %2268 = vmatprep.mubr.bf16.mxu0 %v8013_v27  ;;  %v6094_v5 = vcombine.high %v535_v58, %v539_v59  ;;  %v6096_v50 = vcombine.high %v536_v60, %v540_v61  ;;  %v6093_v10 = vcombine.low %v535_v58, %v539_v59  ;;  %v591_v59 = vld [vmem:[#allocation8 + $0x308] sm:$0xff] }
 0x1e6   :  { %2156 = vmatprep.subr.bf16.mxu1 %v6062_v32  ;;  %2238 = vmatprep.subr.bf16.mxu0 %v6064_v33  ;;  %v6095_v11 = vcombine.low %v536_v60, %v540_v61  ;;  %v6118_v32 = vcombine.high %v559_v22, %v563_v23  ;;  %v6120_v33 = vcombine.high %v560_v24, %v564_v25  ;;  %v595_v60 = vld [vmem:[#allocation8 + $0x328] sm:$0xff]  ;;  %v592_v61 = vld [vmem:[#allocation8 + $0x310] sm:$0xff] }
 0x1e7   :  { %v611_v16 = vld [vmem:[#allocation8 + $0x3a8] sm:$0xff] }
 0x1e8   :  { %2157 = vmatpush1.bf16.msra.mxu1 %v6061_v37  ;;  %2239 = vmatpush1.bf16.msra.mxu0 %v6063_v38  ;;  %v572_v37 = vld [vmem:[#allocation8 + $0x270] sm:$0xff]  ;;  %v6117_v38 = vcombine.low %v559_v22, %v563_v23  ;;  %v615_v23 = vld [vmem:[#allocation8 + $0x3c8] sm:$0xff] }
 0x1e9   :  { %2158 = vmatprep.subr.bf16.mxu1 %v6070_v39  ;;  %2240 = vmatprep.subr.bf16.mxu0 %v6072_v40  ;;  %v6119_v39 = vcombine.low %v560_v24, %v564_v25  ;;  %v6126_v40 = vcombine.high %v567_v34, %v571_v35  ;;  %v6128_v41 = vcombine.high %v568_v36, %v572_v37  ;;  %v619_v24 = vld [vmem:[#allocation8 + $0x3e8] sm:$0xff]  ;;  %v616_v25 = vld [vmem:[#allocation8 + $0x3d0] sm:$0xff] }
 0x1ec   :  { %2159 = vmatpush1.bf16.msra.mxu1 %v6069_v45  ;;  %2241 = vmatpush1.bf16.msra.mxu0 %v6071_v46  ;;  %v580_v45 = vld [vmem:[#allocation8 + $0x2b0] sm:$0xff]  ;;  %v6125_v46 = vcombine.low %v567_v34, %v571_v35  ;;  %v623_v35 = vld [vmem:[#allocation8 + $0x408] sm:$0xff] }
 0x1ed   :  { %2160 = vmatprep.subr.bf16.mxu1 %v6078_v47  ;;  %2242 = vmatprep.subr.bf16.mxu0 %v6080_v48  ;;  %v6127_v47 = vcombine.low %v568_v36, %v572_v37  ;;  %v6134_v48 = vcombine.high %v575_v42, %v579_v43  ;;  %v6136_v49 = vcombine.high %v576_v44, %v580_v45  ;;  %v627_v36 = vld [vmem:[#allocation8 + $0x428] sm:$0xff]  ;;  %v624_v37 = vld [vmem:[#allocation8 + $0x410] sm:$0xff] }
 0x1f0   :  { %2161 = vmatpush1.bf16.msra.mxu1 %v6077_v54  ;;  %2243 = vmatpush1.bf16.msra.mxu0 %v6079_v55  ;;  %v588_v54 = vld [vmem:[#allocation8 + $0x2f0] sm:$0xff]  ;;  %v6133_v55 = vcombine.low %v575_v42, %v579_v43  ;;  %v631_v43 = vld [vmem:[#allocation8 + $0x448] sm:$0xff] }
 0x1f1   :  { %2162 = vmatprep.subr.bf16.mxu1 %v6086_v56  ;;  %2244 = vmatprep.subr.bf16.mxu0 %v6088_v57  ;;  %v6135_v56 = vcombine.low %v576_v44, %v580_v45  ;;  %v6142_v57 = vcombine.high %v583_v51, %v587_v52  ;;  %v6144_v58 = vcombine.high %v584_v53, %v588_v54  ;;  %v635_v44 = vld [vmem:[#allocation8 + $0x468] sm:$0xff]  ;;  %v632_v45 = vld [vmem:[#allocation8 + $0x450] sm:$0xff] }
 0x1f4   :  { %2163 = vmatpush1.bf16.msra.mxu1 %v6085_v1  ;;  %2245 = vmatpush1.bf16.msra.mxu0 %v6087_v4  ;;  %v596_v1 = vld [vmem:[#allocation8 + $0x330] sm:$0xff]  ;;  %v6141_v4 = vcombine.low %v583_v51, %v587_v52  ;;  %v639_v52 = vld [vmem:[#allocation8 + $0x488] sm:$0xff] }
 0x1f5   :  { %2164 = vmatprep.subr.bf16.mxu1 %v6094_v5  ;;  %2246 = vmatprep.subr.bf16.mxu0 %v6096_v50  ;;  %v6143_v5 = vcombine.low %v584_v53, %v588_v54  ;;  %v6150_v50 = vcombine.high %v591_v59, %v595_v60  ;;  %v6152_v6 = vcombine.high %v592_v61, %v596_v1  ;;  %v643_v53 = vld [vmem:[#allocation8 + $0x4a8] sm:$0xff]  ;;  %v640_v54 = vld [vmem:[#allocation8 + $0x490] sm:$0xff] }
 0x1f8   :  { %2165 = vmatpush1.bf16.msra.mxu1 %v6093_v10  ;;  %2247 = vmatpush1.bf16.msra.mxu0 %v6095_v11  ;;  %v604_v10 = vld [vmem:[#allocation8 + $0x370] sm:$0xff]  ;;  %v6149_v11 = vcombine.low %v591_v59, %v595_v60  ;;  %v647_v60 = vld [vmem:[#allocation8 + $0x4c8] sm:$0xff] }
 0x1f9   :  { %2166 = vmatprep.subr.bf16.mxu1 %v6102_v12  ;;  %2248 = vmatprep.subr.bf16.mxu0 %v6104_v13  ;;  %v6151_v12 = vcombine.low %v592_v61, %v596_v1  ;;  %v6158_v13 = vcombine.high %v599_v7, %v603_v8  ;;  %v6160_v14 = vcombine.high %v600_v9, %v604_v10  ;;  %v651_v61 = vld [vmem:[#allocation8 + $0x4e8] sm:$0xff]  ;;  %v648_v1 = vld [vmem:[#allocation8 + $0x4d0] sm:$0xff] }
 0x1fc   :  { %2167 = vmatpush1.bf16.msra.mxu1 %v6101_v18  ;;  %2249 = vmatpush1.bf16.msra.mxu0 %v6103_v19  ;;  %v612_v18 = vld [vmem:[#allocation8 + $0x3b0] sm:$0xff]  ;;  %v6157_v19 = vcombine.low %v599_v7, %v603_v8  ;;  %v655_v8 = vld [vmem:[#allocation8 + $0x508] sm:$0xff] }
 0x1fd   :  { %2168 = vmatprep.subr.bf16.mxu1 %v6110_v20  ;;  %2250 = vmatprep.subr.bf16.mxu0 %v6112_v21  ;;  %v6159_v20 = vcombine.low %v600_v9, %v604_v10  ;;  %v6166_v21 = vcombine.high %v607_v15, %v611_v16  ;;  %v6168_v22 = vcombine.high %v608_v17, %v612_v18  ;;  %v659_v9 = vld [vmem:[#allocation8 + $0x528] sm:$0xff]  ;;  %v656_v10 = vld [vmem:[#allocation8 + $0x510] sm:$0xff] }
 0x200   :  { %2169 = vmatpush1.bf16.msra.mxu1 %v6109_v26  ;;  %2251 = vmatpush1.bf16.msra.mxu0 %v6111_v31  ;;  %v620_v26 = vld [vmem:[#allocation8 + $0x3f0] sm:$0xff]  ;;  %v6165_v31 = vcombine.low %v607_v15, %v611_v16  ;;  %v663_v16 = vld [vmem:[#allocation8 + $0x548] sm:$0xff] }
 0x201   :  { %2170 = vmatprep.subr.bf16.mxu1 %v6118_v32  ;;  %2252 = vmatprep.subr.bf16.mxu0 %v6120_v33  ;;  %v6167_v32 = vcombine.low %v608_v17, %v612_v18  ;;  %v6174_v33 = vcombine.high %v615_v23, %v619_v24  ;;  %v6176_v34 = vcombine.high %v616_v25, %v620_v26  ;;  %v667_v17 = vld [vmem:[#allocation8 + $0x568] sm:$0xff]  ;;  %v664_v18 = vld [vmem:[#allocation8 + $0x550] sm:$0xff] }
 0x204   :  { %2171 = vmatpush1.bf16.msra.mxu1 %v6117_v38  ;;  %2253 = vmatpush1.bf16.msra.mxu0 %v6119_v39  ;;  %v628_v38 = vld [vmem:[#allocation8 + $0x430] sm:$0xff]  ;;  %v6173_v39 = vcombine.low %v615_v23, %v619_v24  ;;  %v671_v24 = vld [vmem:[#allocation8 + $0x588] sm:$0xff] }
 0x205   :  { %2172 = vmatprep.subr.bf16.mxu1 %v6126_v40  ;;  %2254 = vmatprep.subr.bf16.mxu0 %v6128_v41  ;;  %v6175_v40 = vcombine.low %v616_v25, %v620_v26  ;;  %v6182_v41 = vcombine.high %v623_v35, %v627_v36  ;;  %v6184_v42 = vcombine.high %v624_v37, %v628_v38  ;;  %v675_v25 = vld [vmem:[#allocation8 + $0x5a8] sm:$0xff]  ;;  %v672_v26 = vld [vmem:[#allocation8 + $0x590] sm:$0xff] }
 0x208   :  { %2173 = vmatpush1.bf16.msra.mxu1 %v6125_v46  ;;  %2255 = vmatpush1.bf16.msra.mxu0 %v6127_v47  ;;  %v636_v46 = vld [vmem:[#allocation8 + $0x470] sm:$0xff]  ;;  %v6181_v47 = vcombine.low %v623_v35, %v627_v36  ;;  %v679_v36 = vld [vmem:[#allocation8 + $0x5c8] sm:$0xff] }
 0x209   :  { %2174 = vmatprep.subr.bf16.mxu1 %v6134_v48  ;;  %2256 = vmatprep.subr.bf16.mxu0 %v6136_v49  ;;  %v6183_v48 = vcombine.low %v624_v37, %v628_v38  ;;  %v6190_v49 = vcombine.high %v631_v43, %v635_v44  ;;  %v6192_v51 = vcombine.high %v632_v45, %v636_v46  ;;  %v683_v37 = vld [vmem:[#allocation8 + $0x5e8] sm:$0xff]  ;;  %v680_v38 = vld [vmem:[#allocation8 + $0x5d0] sm:$0xff] }
 0x20c   :  { %2175 = vmatpush1.bf16.msra.mxu1 %v6133_v55  ;;  %2257 = vmatpush1.bf16.msra.mxu0 %v6135_v56  ;;  %v644_v55 = vld [vmem:[#allocation8 + $0x4b0] sm:$0xff]  ;;  %v6189_v56 = vcombine.low %v631_v43, %v635_v44  ;;  %v687_v44 = vld [vmem:[#allocation8 + $0x608] sm:$0xff] }
 0x20d   :  { %2176 = vmatprep.subr.bf16.mxu1 %v6142_v57  ;;  %2258 = vmatprep.subr.bf16.mxu0 %v6144_v58  ;;  %v6191_v57 = vcombine.low %v632_v45, %v636_v46  ;;  %v6198_v58 = vcombine.high %v639_v52, %v643_v53  ;;  %v6200_v59 = vcombine.high %v640_v54, %v644_v55  ;;  %v691_v45 = vld [vmem:[#allocation8 + $0x628] sm:$0xff]  ;;  %v688_v46 = vld [vmem:[#allocation8 + $0x610] sm:$0xff] }
 0x210   :  { %2177 = vmatpush1.bf16.msra.mxu1 %v6141_v4  ;;  %2259 = vmatpush1.bf16.msra.mxu0 %v6143_v5  ;;  %v652_v4 = vld [vmem:[#allocation8 + $0x4f0] sm:$0xff]  ;;  %v6197_v5 = vcombine.low %v639_v52, %v643_v53  ;;  %v695_v53 = vld [vmem:[#allocation8 + $0x648] sm:$0xff] }
 0x211   :  { %2178 = vmatprep.subr.bf16.mxu1 %v6150_v50  ;;  %2260 = vmatprep.subr.bf16.mxu0 %v6152_v6  ;;  %v6199_v50 = vcombine.low %v640_v54, %v644_v55  ;;  %v6206_v6 = vcombine.high %v647_v60, %v651_v61  ;;  %v6208_v7 = vcombine.high %v648_v1, %v652_v4  ;;  %v699_v54 = vld [vmem:[#allocation8 + $0x668] sm:$0xff]  ;;  %v696_v55 = vld [vmem:[#allocation8 + $0x650] sm:$0xff] }
 0x214   :  { %2179 = vmatpush1.bf16.msra.mxu1 %v6149_v11  ;;  %2261 = vmatpush1.bf16.msra.mxu0 %v6151_v12  ;;  %v660_v11 = vld [vmem:[#allocation8 + $0x530] sm:$0xff]  ;;  %v6205_v12 = vcombine.low %v647_v60, %v651_v61  ;;  %v703_v61 = vld [vmem:[#allocation8 + $0x688] sm:$0xff] }
 0x215   :  { %2180 = vmatprep.subr.bf16.mxu1 %v6158_v13  ;;  %2262 = vmatprep.subr.bf16.mxu0 %v6160_v14  ;;  %v6207_v13 = vcombine.low %v648_v1, %v652_v4  ;;  %v6214_v14 = vcombine.high %v655_v8, %v659_v9  ;;  %v6216_v15 = vcombine.high %v656_v10, %v660_v11  ;;  %v707_v1 = vld [vmem:[#allocation8 + $0x6a8] sm:$0xff]  ;;  %v704_v4 = vld [vmem:[#allocation8 + $0x690] sm:$0xff] }
 0x218   :  { %2181 = vmatpush1.bf16.msra.mxu1 %v6157_v19  ;;  %2263 = vmatpush1.bf16.msra.mxu0 %v6159_v20  ;;  %v668_v19 = vld [vmem:[#allocation8 + $0x570] sm:$0xff]  ;;  %v6213_v20 = vcombine.low %v655_v8, %v659_v9  ;;  %v711_v9 = vld [vmem:[#allocation8 + $0x6c8] sm:$0xff] }
 0x219   :  { %2182 = vmatprep.subr.bf16.mxu1 %v6166_v21  ;;  %2264 = vmatprep.subr.bf16.mxu0 %v6168_v22  ;;  %v6215_v21 = vcombine.low %v656_v10, %v660_v11  ;;  %v6222_v22 = vcombine.high %v663_v16, %v667_v17  ;;  %v6224_v23 = vcombine.high %v664_v18, %v668_v19  ;;  %v715_v10 = vld [vmem:[#allocation8 + $0x6e8] sm:$0xff]  ;;  %v712_v11 = vld [vmem:[#allocation8 + $0x6d0] sm:$0xff] }
 0x21c   :  { %2183 = vmatpush1.bf16.msra.mxu1 %v6165_v31  ;;  %2265 = vmatpush1.bf16.msra.mxu0 %v6167_v32  ;;  %v676_v31 = vld [vmem:[#allocation8 + $0x5b0] sm:$0xff]  ;;  %v6221_v32 = vcombine.low %v663_v16, %v667_v17  ;;  %v719_v17 = vld [vmem:[#allocation8 + $0x708] sm:$0xff] }
 0x21d   :  { %2184 = vmatprep.subr.bf16.mxu1 %v6174_v33  ;;  %2266 = vmatprep.subr.bf16.mxu0 %v6176_v34  ;;  %v6223_v33 = vcombine.low %v664_v18, %v668_v19  ;;  %v6230_v34 = vcombine.high %v671_v24, %v675_v25  ;;  %v6232_v35 = vcombine.high %v672_v26, %v676_v31  ;;  %v723_v18 = vld [vmem:[#allocation8 + $0x728] sm:$0xff]  ;;  %v720_v19 = vld [vmem:[#allocation8 + $0x710] sm:$0xff] }
 0x220   :  { %2185 = vmatpush1.bf16.msra.mxu1 %v6173_v39  ;;  %2267 = vmatpush1.bf16.msra.mxu0 %v6175_v40  ;;  %v684_v39 = vld [vmem:[#allocation8 + $0x5f0] sm:$0xff]  ;;  %v6229_v40 = vcombine.low %v671_v24, %v675_v25  ;;  %v727_v25 = vld [vmem:[#allocation8 + $0x748] sm:$0xff] }
 0x221   :  { %2195 = vmatprep.subr.bf16.mxu1 %v6182_v41  ;;  %2277 = vmatprep.subr.bf16.mxu0 %v6184_v42  ;;  %v6231_v41 = vcombine.low %v672_v26, %v676_v31  ;;  %v6238_v42 = vcombine.high %v679_v36, %v683_v37  ;;  %v6240_v43 = vcombine.high %v680_v38, %v684_v39  ;;  %v731_v26 = vld [vmem:[#allocation8 + $0x768] sm:$0xff]  ;;  %v728_v31 = vld [vmem:[#allocation8 + $0x750] sm:$0xff] }
 0x223   :  { %2187 = vmatmul.mubr.bf16.vlgmr.msra.gmra.mrb[8].mxu1 %v8017_v29  ;;  %2269 = vmatmul.mubr.bf16.vlgmr.msra.gmra.mrb[8].mxu0 %v8017_v29 }
 0x224   :  { %2196 = vmatpush1.bf16.msra.mxu1 %v6181_v47  ;;  %2227 = vmatprep.mubr.bf16.mxu1 %v8015_v28  ;;  %v692_v47 = vld [vmem:[#allocation8 + $0x630] sm:$0xff] }
 0x225   :  { %2278 = vmatpush1.bf16.msra.mxu0 %v6183_v48  ;;  %2309 = vmatprep.mubr.bf16.mxu0 %v8015_v28  ;;  %v6237_v48 = vcombine.low %v679_v36, %v683_v37  ;;  %v6248_v52 = vcombine.high %v688_v46, %v692_v47  ;;  %v735_v37 = vld [vmem:[#allocation8 + $0x788] sm:$0xff] }
 0x226   :  { %2197 = vmatprep.subr.bf16.mxu1 %v6190_v49  ;;  %2279 = vmatprep.subr.bf16.mxu0 %v6192_v51  ;;  %v6239_v49 = vcombine.low %v680_v38, %v684_v39  ;;  %v6246_v51 = vcombine.high %v687_v44, %v691_v45  ;;  %v739_v38 = vld [vmem:[#allocation8 + $0x7a8] sm:$0xff]  ;;  %v736_v39 = vld [vmem:[#allocation8 + $0x790] sm:$0xff] }
 0x228   :  { %2198 = vmatpush1.bf16.msra.mxu1 %v6189_v56  ;;  %v700_v56 = vld [vmem:[#allocation8 + $0x670] sm:$0xff] }
 0x229   :  { %2280 = vmatpush1.bf16.msra.mxu0 %v6191_v57  ;;  %2199 = vmatprep.subr.bf16.mxu1 %v6198_v58  ;;  %v6245_v57 = vcombine.low %v687_v44, %v691_v45  ;;  %v6247_v58 = vcombine.low %v688_v46, %v692_v47  ;;  %v6256_v60 = vcombine.high %v696_v55, %v700_v56  ;;  %v743_v45 = vld [vmem:[#allocation8 + $0x7c8] sm:$0xff]  ;;  %v744_v47 = vld [vmem:[#allocation8 + $0x7d0] sm:$0xff] }
 0x22a   :  { %2281 = vmatprep.subr.bf16.mxu0 %v6200_v59  ;;  %v6254_v59 = vcombine.high %v695_v53, %v699_v54  ;;  %v747_v46 = vld [vmem:[#allocation8 + $0x7e8] sm:$0xff] }
 0x22c   :  { %2200 = vmatpush1.bf16.msra.mxu1 %v6197_v5  ;;  %v708_v5 = vld [vmem:[#allocation8 + $0x6b0] sm:$0xff] }
 0x22d   :  { %2282 = vmatpush1.bf16.msra.mxu0 %v6199_v50  ;;  %2201 = vmatprep.subr.bf16.mxu1 %v6206_v6  ;;  %v6253_v50 = vcombine.low %v695_v53, %v699_v54  ;;  %v6255_v6 = vcombine.low %v696_v55, %v700_v56  ;;  %v6264_v8 = vcombine.high %v704_v4, %v708_v5  ;;  %v497_v54 = vld [vmem:[#allocation8 + $0x18] sm:$0xff] }
 0x22e   :  { %2283 = vmatprep.subr.bf16.mxu0 %v6208_v7  ;;  %v6262_v7 = vcombine.high %v703_v61, %v707_v1  ;;  %v501_v55 = vld [vmem:[#allocation8 + $0x38] sm:$0xff]  ;;  %v6301_v56 = vcombine.low %v743_v45, %v747_v46 }
 0x230   :  { %2202 = vmatpush1.bf16.msra.mxu1 %v6205_v12  ;;  %v716_v12 = vld [vmem:[#allocation8 + $0x6f0] sm:$0xff] }
 0x231   :  { %2284 = vmatpush1.bf16.msra.mxu0 %v6207_v13  ;;  %2203 = vmatprep.subr.bf16.mxu1 %v6214_v14  ;;  %v6261_v13 = vcombine.low %v703_v61, %v707_v1  ;;  %v6263_v14 = vcombine.low %v704_v4, %v708_v5  ;;  %v6272_v16 = vcombine.high %v712_v11, %v716_v12  ;;  %v6993_v61 = vld [vmem:[#allocation11 + $0x4] ss:$28 sps:$4 sm:$0xff]   ;;  %v513_v5 = vld [vmem:[#allocation8 + $0x98] sm:$0xff] }
 0x232   :  { %2285 = vmatprep.subr.bf16.mxu0 %v6216_v15  ;;  %v6270_v15 = vcombine.high %v711_v9, %v715_v10  ;;  %v6057_v1 = vcombine.low %v497_v54, %v501_v55 }
 0x234   :  { %2204 = vmatpush1.bf16.msra.mxu1 %v6213_v20  ;;  %v724_v20 = vld [vmem:[#allocation8 + $0x730] sm:$0xff] }
 0x235   :  { %2286 = vmatpush1.bf16.msra.mxu0 %v6215_v21  ;;  %2205 = vmatprep.subr.bf16.mxu1 %v6222_v22  ;;  %v6269_v21 = vcombine.low %v711_v9, %v715_v10  ;;  %v6271_v22 = vcombine.low %v712_v11, %v716_v12  ;;  %v6280_v24 = vcombine.high %v720_v19, %v724_v20  ;;  %v521_v10 = vld [vmem:[#allocation8 + $0xd8] sm:$0xff] }
 0x236   :  { %2287 = vmatprep.subr.bf16.mxu0 %v6224_v23  ;;  %v6278_v23 = vcombine.high %v719_v17, %v723_v18  ;;  %v525_v11 = vld [vmem:[#allocation8 + $0xf8] sm:$0xff] }
 0x237   :  { %v6994_v12 = vld [vmem:[#allocation11 + $0x38] ss:$28 sps:$4 sm:$0xff]  }
 0x238   :  { %2206 = vmatpush1.bf16.msra.mxu1 %v6221_v32  ;;  %v732_v32 = vld [vmem:[#allocation8 + $0x770] sm:$0xff] }
 0x239   :  { %2288 = vmatpush1.bf16.msra.mxu0 %v6223_v33  ;;  %2207 = vmatprep.subr.bf16.mxu1 %v6230_v34  ;;  %v6277_v33 = vcombine.low %v719_v17, %v723_v18  ;;  %v6279_v34 = vcombine.low %v720_v19, %v724_v20  ;;  %v6288_v36 = vcombine.high %v728_v31, %v732_v32  ;;  %v533_v17 = vld [vmem:[#allocation8 + $0x138] sm:$0xff]  ;;  %v7002_v19 = vld [vmem:[#allocation11 + $0xac] ss:$28 sps:$4 sm:$0xff]  }
 0x23a   :  { %2289 = vmatprep.subr.bf16.mxu0 %v6232_v35  ;;  %v6286_v35 = vcombine.high %v727_v25, %v731_v26  ;;  %v6997_v18 = vld [vmem:[#allocation11 + $0x70] ss:$28 sps:$4 sm:$0xff]  }
 0x23c   :  { %2208 = vmatpush1.bf16.msra.mxu1 %v6229_v40  ;;  %v740_v40 = vld [vmem:[#allocation8 + $0x7b0] sm:$0xff] }
 0x23d   :  { %2290 = vmatpush1.bf16.msra.mxu0 %v6231_v41  ;;  %2209 = vmatprep.subr.bf16.mxu1 %v6238_v42  ;;  %v6285_v41 = vcombine.low %v727_v25, %v731_v26  ;;  %v6287_v42 = vcombine.low %v728_v31, %v732_v32  ;;  %v6296_v44 = vcombine.high %v736_v39, %v740_v40  ;;  %v545_v31 = vld [vmem:[#allocation8 + $0x198] sm:$0xff] }
 0x23e   :  { %2291 = vmatprep.subr.bf16.mxu0 %v6240_v43  ;;  %v6294_v43 = vcombine.high %v735_v37, %v739_v38  ;;  %v549_v32 = vld [vmem:[#allocation8 + $0x1b8] sm:$0xff] }
 0x240   :  { %2210 = vmatpush1.bf16.msra.mxu1 %v6237_v48  ;;  %v748_v48 = vld [vmem:[#allocation8 + $0x7f0] sm:$0xff] }
 0x241   :  { %2292 = vmatpush1.bf16.msra.mxu0 %v6239_v49  ;;  %2211 = vmatprep.subr.bf16.mxu1 %v6246_v51  ;;  %v6293_v49 = vcombine.low %v735_v37, %v739_v38  ;;  %v6295_v51 = vcombine.low %v736_v39, %v740_v40  ;;  %v6304_v53 = vcombine.high %v744_v47, %v748_v48  ;;  %v553_v37 = vld [vmem:[#allocation8 + $0x1d8] sm:$0xff] }
 0x242   :  { %2293 = vmatprep.subr.bf16.mxu0 %v6248_v52  ;;  %v6302_v52 = vcombine.high %v743_v45, %v747_v46  ;;  %v557_v38 = vld [vmem:[#allocation8 + $0x1f8] sm:$0xff]  ;;  %v7014_v46 = vld [vmem:[#allocation11 + $0x18c] ss:$28 sps:$4 sm:$0xff]  }
 0x243   :  { %v7006_v39 = vld [vmem:[#allocation11 + $0x118] ss:$28 sps:$4 sm:$0xff]   ;;  %v7009_v45 = vld [vmem:[#allocation11 + $0x150] ss:$28 sps:$4 sm:$0xff]  }
 0x244   :  { %2212 = vmatpush1.bf16.msra.mxu1 %v6245_v57  ;;  %v6303_v57 = vcombine.low %v744_v47, %v748_v48  ;;  %v7011_v40 = vld [vmem:[#allocation11 + $0x154] ss:$28 sps:$4 sm:$0xff]   ;;  %v6113_v47 = vcombine.low %v553_v37, %v557_v38 }
 0x245   :  { %2294 = vmatpush1.bf16.msra.mxu0 %v6247_v58  ;;  %2213 = vmatprep.subr.bf16.mxu1 %v6254_v59  ;;  %v6058_v58 = vcombine.high %v497_v54, %v501_v55  ;;  %v505_v59 = vld [vmem:[#allocation8 + $0x58] sm:$0xff] }
 0x246   :  { %2295 = vmatprep.subr.bf16.mxu0 %v6256_v60  ;;  %v509_v60 = vld [vmem:[#allocation8 + $0x78] sm:$0xff] }
 0x247   :  { %v6066_v4 = vcombine.high %v505_v59, %v509_v60 }
 0x248   :  { %2214 = vmatpush1.bf16.msra.mxu1 %v6253_v50  ;;  %v517_v50 = vld [vmem:[#allocation8 + $0xb8] sm:$0xff] }
 0x249   :  { %2296 = vmatpush1.bf16.msra.mxu0 %v6255_v6  ;;  %2215 = vmatprep.subr.bf16.mxu1 %v6262_v7  ;;  %v6991_v6 = vld [vmem:[#allocation11] ss:$28 sps:$4 sm:$0xff]   ;;  %v6074_v9 = vcombine.high %v513_v5, %v517_v50 }
 0x24a   :  { %2297 = vmatprep.subr.bf16.mxu0 %v6264_v8  ;;  %v6996_v7 = vld [vmem:[#allocation11 + $0x3c] ss:$28 sps:$4 sm:$0xff]   ;;  %v6065_v8 = vcombine.low %v505_v59, %v509_v60 }
 0x24b   :  { %v7020_v59 = vld [vmem:[#allocation11 + $0x1fc] ss:$28 sps:$4 sm:$0xff]  }
 0x24c   :  { %2216 = vmatpush1.bf16.msra.mxu1 %v6261_v13  ;;  %v6999_v13 = vld [vmem:[#allocation11 + $0x74] ss:$28 sps:$4 sm:$0xff]  }
 0x24d   :  { %2298 = vmatpush1.bf16.msra.mxu0 %v6263_v14  ;;  %2217 = vmatprep.subr.bf16.mxu1 %v6270_v15  ;;  %v6073_v14 = vcombine.low %v513_v5, %v517_v50  ;;  %v6082_v15 = vcombine.high %v521_v10, %v525_v11  ;;  %v7018_v5 = vld [vmem:[#allocation11 + $0x1f8] ss:$28 sps:$4 sm:$0xff]  }
 0x24e   :  { %2299 = vmatprep.subr.bf16.mxu0 %v6272_v16  ;;  %v529_v16 = vld [vmem:[#allocation8 + $0x118] sm:$0xff] }
 0x24f   :  { %v6090_v20 = vcombine.high %v529_v16, %v533_v17  ;;  %v6089_v25 = vcombine.low %v529_v16, %v533_v17  ;;  %v7023_v50 = vld [vmem:[#allocation11 + $0x234] ss:$28 sps:$4 sm:$0xff]   ;;  %v7024_v16 = vld [vmem:[#allocation11 + $0x268] ss:$28 sps:$4 sm:$0xff]  }
 0x250   :  { %2218 = vmatpush1.bf16.msra.mxu1 %v6269_v21  ;;  %v537_v21 = vld [vmem:[#allocation8 + $0x158] sm:$0xff]  ;;  %v7029_v17 = vld [vmem:[#allocation11 + $0x2a4] ss:$28 sps:$4 sm:$0xff]  }
 0x251   :  { %2300 = vmatpush1.bf16.msra.mxu0 %v6271_v22  ;;  %2219 = vmatprep.subr.bf16.mxu1 %v6278_v23  ;;  %v541_v22 = vld [vmem:[#allocation8 + $0x178] sm:$0xff]  ;;  %v7000_v23 = vld [vmem:[#allocation11 + $0xa8] ss:$28 sps:$4 sm:$0xff]  }
 0x252   :  { %2301 = vmatprep.subr.bf16.mxu0 %v6280_v24  ;;  %v7005_v24 = vld [vmem:[#allocation11 + $0xe4] ss:$28 sps:$4 sm:$0xff]   ;;  %v6098_v26 = vcombine.high %v537_v21, %v541_v22 }
 0x254   :  { %2220 = vmatpush1.bf16.msra.mxu1 %v6277_v33  ;;  %v7003_v33 = vld [vmem:[#allocation11 + $0xe0] ss:$28 sps:$4 sm:$0xff]  }
 0x255   :  { %2302 = vmatpush1.bf16.msra.mxu0 %v6279_v34  ;;  %2221 = vmatprep.subr.bf16.mxu1 %v6286_v35  ;;  %v7008_v34 = vld [vmem:[#allocation11 + $0x11c] ss:$28 sps:$4 sm:$0xff]   ;;  %v6097_v35 = vcombine.low %v537_v21, %v541_v22 }
 0x256   :  { %2303 = vmatprep.subr.bf16.mxu0 %v6288_v36  ;;  %v6106_v36 = vcombine.high %v545_v31, %v549_v32  ;;  %v7027_v21 = vld [vmem:[#allocation11 + $0x2a0] ss:$28 sps:$4 sm:$0xff]  }
 0x257   :  { %v7032_v22 = vld [vmem:[#allocation11 + $0x2dc] ss:$28 sps:$4 sm:$0xff]  }
 0x258   :  { %2222 = vmatpush1.bf16.msra.mxu1 %v6285_v41  ;;  %v6105_v41 = vcombine.low %v545_v31, %v549_v32  ;;  %v7030_v31 = vld [vmem:[#allocation11 + $0x2d8] ss:$28 sps:$4 sm:$0xff]  }
 0x259   :  { %2304 = vmatpush1.bf16.msra.mxu0 %v6287_v42  ;;  %2223 = vmatprep.subr.bf16.mxu1 %v6294_v43  ;;  %v6114_v42 = vcombine.high %v553_v37, %v557_v38  ;;  %v561_v43 = vld [vmem:[#allocation8 + $0x218] sm:$0xff]  ;;  %v7038_v38 = vld [vmem:[#allocation11 + $0x34c] ss:$28 sps:$4 sm:$0xff]  }
 0x25a   :  { %2305 = vmatprep.subr.bf16.mxu0 %v6296_v44  ;;  %v565_v44 = vld [vmem:[#allocation8 + $0x238] sm:$0xff] }
 0x25b   :  { %v6122_v48 = vcombine.high %v561_v43, %v565_v44  ;;  %v6121_v54 = vcombine.low %v561_v43, %v565_v44  ;;  %v7035_v32 = vld [vmem:[#allocation11 + $0x314] ss:$28 sps:$4 sm:$0xff]   ;;  %v7036_v43 = vld [vmem:[#allocation11 + $0x348] ss:$28 sps:$4 sm:$0xff]  }
 0x25c   :  { %2224 = vmatpush1.bf16.msra.mxu1 %v6293_v49  ;;  %v569_v49 = vld [vmem:[#allocation8 + $0x258] sm:$0xff]  ;;  %v7062_v44 = vld [vmem:[#allocation11 + $0x384] ss:$28 sps:$4 sm:$0xff]  }
 0x25d   :  { %2306 = vmatpush1.bf16.msra.mxu0 %v6295_v51  ;;  %2225 = vmatprep.subr.bf16.mxu1 %v6302_v52  ;;  %v573_v51 = vld [vmem:[#allocation8 + $0x278] sm:$0xff]  ;;  %v7012_v52 = vld [vmem:[#allocation11 + $0x188] ss:$28 sps:$4 sm:$0xff]  }
 0x25e   :  { %2307 = vmatprep.subr.bf16.mxu0 %v6304_v53  ;;  %v7017_v53 = vld [vmem:[#allocation11 + $0x1c4] ss:$28 sps:$4 sm:$0xff]   ;;  %v6130_v55 = vcombine.high %v569_v49, %v573_v51  ;;  %v6129_v60 = vcombine.low %v569_v49, %v573_v51  ;;  %v7033_v37 = vld [vmem:[#allocation11 + $0x310] ss:$28 sps:$4 sm:$0xff]  }
 0x260   :  { %2226 = vmatpush1.bf16.msra.mxu1 %v6301_v56  ;;  %v577_v56 = vld [vmem:[#allocation8 + $0x298] sm:$0xff] }
 0x261   :  { %2308 = vmatpush1.bf16.msra.mxu0 %v6303_v57  ;;  %2318 = vmatprep.subr.bf16.mxu1 %v6058_v58  ;;  %v581_v57 = vld [vmem:[#allocation8 + $0x2b8] sm:$0xff]  ;;  %v7015_v58 = vld [vmem:[#allocation11 + $0x1c0] ss:$28 sps:$4 sm:$0xff]  }
 0x262   :  { %5269 = vmatprep.subr.bf16.mxu0 %v6993_v61  ;;  %v6138_v61 = vcombine.high %v577_v56, %v581_v57 }
 0x263   :  { %2228 = vmatmul.mubr.bf16.vlgmr.msra.gmra.mrb[8].mxu1 %v8019_v30 }
 0x264   :  { %2310 = vmatmul.mubr.bf16.vlgmr.msra.gmra.mrb[8].mxu0 %v8019_v30  ;;  %2319 = vmatpush1.bf16.msra.mxu1 %v6057_v1  ;;  %v585_v1 = vld [vmem:[#allocation8 + $0x2d8] sm:$0xff] }
 0x265   :  { %2350 = vmatprep.mubr.bf16.mxu1 %v8013_v27  ;;  %2320 = vmatprep.subr.bf16.mxu1 %v6066_v4  ;;  %v6081_v27 = vcombine.low %v521_v10, %v525_v11  ;;  %v589_v4 = vld [vmem:[#allocation8 + $0x2f8] sm:$0xff]  ;;  %v7026_v11 = vld [vmem:[#allocation11 + $0x26c] ss:$28 sps:$4 sm:$0xff]  }
 0x266   :  { %5270 = vmatpush1.bf16.msra.mxu0 %v6991_v6  ;;  %v6137_v6 = vcombine.low %v577_v56, %v581_v57  ;;  %v7021_v10 = vld [vmem:[#allocation11 + $0x230] ss:$28 sps:$4 sm:$0xff]  }
 0x267   :  { %5271 = vmatprep.subr.bf16.mxu0 %v6996_v7  ;;  %v6146_v7 = vcombine.high %v585_v1, %v589_v4  ;;  %v657_v56 = vld [vmem:[#allocation8 + $0x518] sm:$0xff] }
 0x268   :  { %2321 = vmatpush1.bf16.msra.mxu1 %v6065_v8  ;;  %v593_v8 = vld [vmem:[#allocation8 + $0x318] sm:$0xff] }
 0x269   :  { %2322 = vmatprep.subr.bf16.mxu1 %v6074_v9  ;;  %v597_v9 = vld [vmem:[#allocation8 + $0x338] sm:$0xff] }
 0x26a   :  { %5272 = vmatpush1.bf16.msra.mxu0 %v6994_v12  ;;  %v6145_v12 = vcombine.low %v585_v1, %v589_v4  ;;  %v661_v57 = vld [vmem:[#allocation8 + $0x538] sm:$0xff] }
 0x26b   :  { %5273 = vmatprep.subr.bf16.mxu0 %v6999_v13  ;;  %v6154_v13 = vcombine.high %v593_v8, %v597_v9  ;;  %v673_v4 = vld [vmem:[#allocation8 + $0x598] sm:$0xff] }
 0x26c   :  { %2323 = vmatpush1.bf16.msra.mxu1 %v6073_v14  ;;  %v601_v14 = vld [vmem:[#allocation8 + $0x358] sm:$0xff] }
 0x26d   :  { %2324 = vmatprep.subr.bf16.mxu1 %v6082_v15  ;;  %v605_v15 = vld [vmem:[#allocation8 + $0x378] sm:$0xff] }
 0x26e   :  { %5274 = vmatpush1.bf16.msra.mxu0 %v6997_v18  ;;  %v6153_v18 = vcombine.low %v593_v8, %v597_v9 }
 0x26f   :  { %5275 = vmatprep.subr.bf16.mxu0 %v7002_v19  ;;  %v6162_v19 = vcombine.high %v601_v14, %v605_v15 }
 0x270   :  { %2325 = vmatpush1.bf16.msra.mxu1 %v6081_v27  ;;  %v609_v27 = vld [vmem:[#allocation8 + $0x398] sm:$0xff] }
 0x271   :  { %2326 = vmatprep.subr.bf16.mxu1 %v6090_v20  ;;  %v613_v20 = vld [vmem:[#allocation8 + $0x3b8] sm:$0xff] }
 0x272   :  { %5276 = vmatpush1.bf16.msra.mxu0 %v7000_v23  ;;  %v6161_v23 = vcombine.low %v601_v14, %v605_v15 }
 0x273   :  { %5277 = vmatprep.subr.bf16.mxu0 %v7005_v24  ;;  %v6170_v24 = vcombine.high %v609_v27, %v613_v20 }
 0x274   :  { %2327 = vmatpush1.bf16.msra.mxu1 %v6089_v25  ;;  %v617_v25 = vld [vmem:[#allocation8 + $0x3d8] sm:$0xff] }
 0x275   :  { %2328 = vmatprep.subr.bf16.mxu1 %v6098_v26  ;;  %v621_v26 = vld [vmem:[#allocation8 + $0x3f8] sm:$0xff] }
 0x276   :  { %5278 = vmatpush1.bf16.msra.mxu0 %v7003_v33  ;;  %v6169_v33 = vcombine.low %v609_v27, %v613_v20 }
 0x277   :  { %5279 = vmatprep.subr.bf16.mxu0 %v7008_v34  ;;  %v6178_v34 = vcombine.high %v617_v25, %v621_v26 }
 0x278   :  { %2329 = vmatpush1.bf16.msra.mxu1 %v6097_v35  ;;  %v625_v35 = vld [vmem:[#allocation8 + $0x418] sm:$0xff] }
 0x279   :  { %2330 = vmatprep.subr.bf16.mxu1 %v6106_v36  ;;  %v629_v36 = vld [vmem:[#allocation8 + $0x438] sm:$0xff] }
 0x27a   :  { %5280 = vmatpush1.bf16.msra.mxu0 %v7006_v39  ;;  %v6177_v39 = vcombine.low %v617_v25, %v621_v26  ;;  %v693_v25 = vld [vmem:[#allocation8 + $0x638] sm:$0xff] }
 0x27b   :  { %5281 = vmatprep.subr.bf16.mxu0 %v7011_v40  ;;  %v6186_v40 = vcombine.high %v625_v35, %v629_v36 }
 0x27c   :  { %2331 = vmatpush1.bf16.msra.mxu1 %v6105_v41  ;;  %v633_v41 = vld [vmem:[#allocation8 + $0x458] sm:$0xff] }
 0x27d   :  { %2332 = vmatprep.subr.bf16.mxu1 %v6114_v42  ;;  %v637_v42 = vld [vmem:[#allocation8 + $0x478] sm:$0xff] }
 0x27e   :  { %5282 = vmatpush1.bf16.msra.mxu0 %v7009_v45  ;;  %v6185_v45 = vcombine.low %v625_v35, %v629_v36  ;;  %v6193_v49 = vcombine.low %v633_v41, %v637_v42  ;;  %v697_v35 = vld [vmem:[#allocation8 + $0x658] sm:$0xff] }
 0x27f   :  { %5283 = vmatprep.subr.bf16.mxu0 %v7014_v46  ;;  %v6194_v46 = vcombine.high %v633_v41, %v637_v42  ;;  %v701_v36 = vld [vmem:[#allocation8 + $0x678] sm:$0xff] }
 0x280   :  { %2333 = vmatpush1.bf16.msra.mxu1 %v6113_v47  ;;  %v641_v47 = vld [vmem:[#allocation8 + $0x498] sm:$0xff]  ;;  %v6258_v41 = vcombine.high %v697_v35, %v701_v36 }
 0x281   :  { %2334 = vmatprep.subr.bf16.mxu1 %v6122_v48  ;;  %v645_v48 = vld [vmem:[#allocation8 + $0x4b8] sm:$0xff] }
 0x282   :  { %5284 = vmatpush1.bf16.msra.mxu0 %v7012_v52  ;;  %v6202_v51 = vcombine.high %v641_v47, %v645_v48  ;;  %v649_v52 = vld [vmem:[#allocation8 + $0x4d8] sm:$0xff] }
 0x283   :  { %5285 = vmatprep.subr.bf16.mxu0 %v7017_v53  ;;  %v653_v53 = vld [vmem:[#allocation8 + $0x4f8] sm:$0xff] }
 0x284   :  { %2335 = vmatpush1.bf16.msra.mxu1 %v6121_v54  ;;  %v6201_v54 = vcombine.low %v641_v47, %v645_v48  ;;  %v705_v42 = vld [vmem:[#allocation8 + $0x698] sm:$0xff] }
 0x285   :  { %2336 = vmatprep.subr.bf16.mxu1 %v6130_v55  ;;  %v6210_v55 = vcombine.high %v649_v52, %v653_v53  ;;  %v713_v48 = vld [vmem:[#allocation8 + $0x6d8] sm:$0xff] }
 0x286   :  { %5286 = vmatpush1.bf16.msra.mxu0 %v7015_v58  ;;  %v6209_v58 = vcombine.low %v649_v52, %v653_v53  ;;  %v7080_v52 = vld [vmem:[#allocation11 + $0x42c] ss:$28 sps:$4 sm:$0xff]  }
 0x287   :  { %5287 = vmatprep.subr.bf16.mxu0 %v7020_v59  ;;  %v6218_v59 = vcombine.high %v657_v56, %v661_v57 }
 0x288   :  { %2337 = vmatpush1.bf16.msra.mxu1 %v6129_v60  ;;  %v669_v60 = vld [vmem:[#allocation8 + $0x578] sm:$0xff] }
 0x289   :  { %2338 = vmatprep.subr.bf16.mxu1 %v6138_v61  ;;  %v6217_v61 = vcombine.low %v657_v56, %v661_v57  ;;  %v725_v56 = vld [vmem:[#allocation8 + $0x738] sm:$0xff]  ;;  %v7078_v57 = vld [vmem:[#allocation11 + $0x428] ss:$28 sps:$4 sm:$0xff]  }
 0x28a   :  { %5288 = vmatpush1.bf16.msra.mxu0 %v7018_v5  ;;  %v677_v5 = vld [vmem:[#allocation8 + $0x5b8] sm:$0xff] }
 0x28b   :  { %5289 = vmatprep.subr.bf16.mxu0 %v7023_v50  ;;  %v6234_v8 = vcombine.high %v673_v4, %v677_v5 }
 0x28c   :  { %2339 = vmatpush1.bf16.msra.mxu1 %v6137_v6 }
 0x28d   :  { %2340 = vmatprep.subr.bf16.mxu1 %v6146_v7 }
 0x28e   :  { %5290 = vmatpush1.bf16.msra.mxu0 %v7021_v10 }
 0x28f   :  { %5291 = vmatprep.subr.bf16.mxu0 %v7026_v11  ;;  %v681_v11 = vld [vmem:[#allocation8 + $0x5d8] sm:$0xff] }
 0x290   :  { %2341 = vmatpush1.bf16.msra.mxu1 %v6145_v12  ;;  %v685_v12 = vld [vmem:[#allocation8 + $0x5f8] sm:$0xff] }
 0x291   :  { %2342 = vmatprep.subr.bf16.mxu1 %v6154_v13 }
 0x292   :  { %5292 = vmatpush1.bf16.msra.mxu0 %v7024_v16 }
 0x293   :  { %5293 = vmatprep.subr.bf16.mxu0 %v7029_v17 }
 0x294   :  { %2343 = vmatpush1.bf16.msra.mxu1 %v6153_v18 }
 0x295   :  { %2344 = vmatprep.subr.bf16.mxu1 %v6162_v19  ;;  %v6233_v19 = vcombine.low %v673_v4, %v677_v5  ;;  %v7092_v4 = vld [vmem:[#allocation11 + $0x49c] ss:$28 sps:$4 sm:$0xff]  }
 0x296   :  { %5294 = vmatpush1.bf16.msra.mxu0 %v7027_v21 }
 0x297   :  { %5295 = vmatprep.subr.bf16.mxu0 %v7032_v22  ;;  %v6242_v22 = vcombine.high %v681_v11, %v685_v12 }
 0x298   :  { %2345 = vmatpush1.bf16.msra.mxu1 %v6161_v23 }
 0x299   :  { %2346 = vmatprep.subr.bf16.mxu1 %v6170_v24  ;;  %v689_v24 = vld [vmem:[#allocation8 + $0x618] sm:$0xff] }
 0x29a   :  { %5296 = vmatpush1.bf16.msra.mxu0 %v7030_v31 }
 0x29b   :  { %5297 = vmatprep.subr.bf16.mxu0 %v7035_v32  ;;  %v6241_v32 = vcombine.low %v681_v11, %v685_v12  ;;  %v745_v12 = vld [vmem:[#allocation8 + $0x7d8] sm:$0xff] }
 0x29c   :  { %2347 = vmatpush1.bf16.msra.mxu1 %v6169_v33  ;;  %v6250_v33 = vcombine.high %v689_v24, %v693_v25 }
 0x29d   :  { %2348 = vmatprep.subr.bf16.mxu1 %v6178_v34 }
 0x29e   :  { %5298 = vmatpush1.bf16.msra.mxu0 %v7033_v37  ;;  %v7060_v37 = vld [vmem:[#allocation11 + $0x380] ss:$28 sps:$4 sm:$0xff]  }
 0x29f   :  { %5299 = vmatprep.subr.bf16.mxu0 %v7038_v38 }
 0x2a0   :  { %2349 = vmatpush1.bf16.msra.mxu1 %v6177_v39  ;;  %v7068_v39 = vld [vmem:[#allocation11 + $0x3bc] ss:$28 sps:$4 sm:$0xff]  }
 0x2a1   :  { %2359 = vmatprep.subr.bf16.mxu1 %v6186_v40  ;;  %v6249_v40 = vcombine.low %v689_v24, %v693_v25  ;;  %v7044_v24 = vld [vmem:[#allocation11 + $0x44] ss:$28 sps:$4 sm:$0xff]   ;;  %v7114_v25 = vld [vmem:[#allocation11 + $0x578] ss:$28 sps:$4 sm:$0xff]  }
 0x2a2   :  { %5300 = vmatpush1.bf16.msra.mxu0 %v7036_v43  ;;  %v709_v43 = vld [vmem:[#allocation8 + $0x6b8] sm:$0xff] }
 0x2a3   :  { %2351 = vmatmul.mubr.bf16.vlgmr.msra.gmra.mrb[12].mxu1 %v8017_v29  ;;  %5310 = vmatprep.subr.bf16.mxu0 %v7062_v44  ;;  %v665_v29 = vld [vmem:[#allocation8 + $0x558] sm:$0xff]  ;;  %v6266_v47 = vcombine.high %v705_v42, %v709_v43  ;;  %v6265_v53 = vcombine.low %v705_v42, %v709_v43  ;;  %v7132_v42 = vld [vmem:[#allocation11 + $0x620] ss:$28 sps:$4 sm:$0xff]  }
 0x2a4   :  { %2360 = vmatpush1.bf16.msra.mxu1 %v6185_v45  ;;  %2391 = vmatprep.mubr.bf16.mxu1 %v8015_v28  ;;  %v8036_v28 = vld [vmem:[#allocation10] sm:$0xff]  ;;  %v6226_v1 = vcombine.high %v665_v29, %v669_v60  ;;  %v6225_v6 = vcombine.low %v665_v29, %v669_v60  ;;  %v7074_v45 = vld [vmem:[#allocation11 + $0x3f4] ss:$28 sps:$4 sm:$0xff]  }
 0x2a5   :  { %2361 = vmatprep.subr.bf16.mxu1 %v6194_v46  ;;  %v755_v50 = vrot.slane %v8036_v28, %v7998_v63  ;;  %v759_v7 = vrot.slane %v8036_v28, %v8004_v2  ;;  %v7066_v44 = vld [vmem:[#allocation11 + $0x3b8] ss:$28 sps:$4 sm:$0xff]   ;;  %v6257_v46 = vcombine.low %v697_v35, %v701_v36  ;;  %v7128_v35 = vld [vmem:[#allocation11 + $0x5ec] ss:$28 sps:$4 sm:$0xff]  }
 0x2a6   :  { %v729_v60 = vld [vmem:[#allocation8 + $0x758] sm:$0xff]  ;;  %v7140_v43 = vld [vmem:[#allocation11 + $0x65c] ss:$28 sps:$4 sm:$0xff]  }
 0x2a7   :  { %v7045_v36 = vld [vmem:[#allocation11 + $0x78] ss:$28 sps:$4 sm:$0xff]  }
 0x2a8   :  { %2362 = vmatpush1.bf16.msra.mxu1 %v6193_v49  ;;  %v717_v49 = vld [vmem:[#allocation8 + $0x6f8] sm:$0xff] }
 0x2a9   :  { %2363 = vmatprep.subr.bf16.mxu1 %v6202_v51  ;;  %v7072_v51 = vld [vmem:[#allocation11 + $0x3f0] ss:$28 sps:$4 sm:$0xff]  }
 0x2ac   :  { %2364 = vmatpush1.bf16.msra.mxu1 %v6201_v54  ;;  %v6274_v54 = vcombine.high %v713_v48, %v717_v49 }
 0x2ad   :  { %2365 = vmatprep.subr.bf16.mxu1 %v6210_v55  ;;  %v721_v55 = vld [vmem:[#allocation8 + $0x718] sm:$0xff] }
 0x2ae   :  { %v6282_v29 = vcombine.high %v721_v55, %v725_v56  ;;  %v6281_v5 = vcombine.low %v721_v55, %v725_v56  ;;  %v7150_v55 = vld [vmem:[#allocation11 + $0x6c8] ss:$28 sps:$4 sm:$0xff]  }
 0x2af   :  { %v7158_v56 = vld [vmem:[#allocation11 + $0x704] ss:$28 sps:$4 sm:$0xff]  }
 0x2b0   :  { %2366 = vmatpush1.bf16.msra.mxu1 %v6209_v58  ;;  %v7086_v58 = vld [vmem:[#allocation11 + $0x464] ss:$28 sps:$4 sm:$0xff]  }
 0x2b1   :  { %2367 = vmatprep.subr.bf16.mxu1 %v6218_v59  ;;  %v6273_v59 = vcombine.low %v713_v48, %v717_v49  ;;  %v7054_v48 = vld [vmem:[#allocation11 + $0x120] ss:$28 sps:$4 sm:$0xff]  }
 0x2b2   :  { %v7059_v49 = vld [vmem:[#allocation11 + $0x15c] ss:$28 sps:$4 sm:$0xff]  }
 0x2b4   :  { %2368 = vmatpush1.bf16.msra.mxu1 %v6217_v61  ;;  %v733_v61 = vld [vmem:[#allocation8 + $0x778] sm:$0xff] }
 0x2b5   :  { %2369 = vmatprep.subr.bf16.mxu1 %v6226_v1  ;;  %v7084_v1 = vld [vmem:[#allocation11 + $0x460] ss:$28 sps:$4 sm:$0xff]  }
 0x2b6   :  { %v2106_v9 = vpop.f32.mrb[4].mxu1  ;;  %v2147_v10 = vpop.f32.mrb[4].mxu0 }
 0x2b7   :  { %v2107_v13 = vadd.f32 %v2106_v9, %v755_v50  ;;  %v2108_v14 = vpop.f32.mrb[5].mxu1  ;;  %v2149_v15 = vpop.f32.mrb[5].mxu0  ;;  %v6290_v50 = vcombine.high %v729_v60, %v733_v61  ;;  %v7098_v9 = vld [vmem:[#allocation11 + $0x4d4] ss:$28 sps:$4 sm:$0xff]  }
 0x2b8   :  { %v2109_v16 = vadd.f32 %v2108_v14, %v759_v7  ;;  %2370 = vmatpush1.bf16.msra.mxu1 %v6225_v6  ;;  %v2110_v17 = vpop.f32.mrb[6].mxu1  ;;  %v2151_v18 = vpop.f32.mrb[6].mxu0  ;;  %v737_v6 = vld [vmem:[#allocation8 + $0x798] sm:$0xff] }
 0x2b9   :  { %v2148_v27 = vadd.f32 %v2147_v10, %v2107_v13  ;;  %v2111_v20 = vpop.f32.mrb[7].mxu1  ;;  %v2152_v21 = vpop.f32.mrb[7].mxu0  ;;  %2371 = vmatprep.subr.bf16.mxu1 %v6234_v8  ;;  %v741_v7 = vld [vmem:[#allocation8 + $0x7b8] sm:$0xff]  ;;  %v6289_v10 = vcombine.low %v729_v60, %v733_v61  ;;  %v7102_v18 = vld [vmem:[#allocation11 + $0x508] ss:$28 sps:$4 sm:$0xff]  }
 0x2ba   :  { %v2150_v23 = vadd.f32 %v2149_v15, %v2109_v16  ;;  %v7090_v8 = vld [vmem:[#allocation11 + $0x498] ss:$28 sps:$4 sm:$0xff]   ;;  %v6298_v11 = vcombine.high %v737_v6, %v741_v7  ;;  %v7096_v14 = vld [vmem:[#allocation11 + $0x4d0] ss:$28 sps:$4 sm:$0xff]   ;;  %v6297_v16 = vcombine.low %v737_v6, %v741_v7  ;;  %v7108_v21 = vld [vmem:[#allocation11 + $0x540] ss:$28 sps:$4 sm:$0xff]  }
 0x2bb   :  { %v2400_v26 = vmax.f32 %v2148_v27, 0.0  ;;  %v749_v13 = vld [vmem:[#allocation8 + $0x7f8] sm:$0xff]  ;;  %v7104_v15 = vld [vmem:[#allocation11 + $0x50c] ss:$28 sps:$4 sm:$0xff]   ;;  %v7075_v60 = vld [vmem:[#allocation11 + $0x200] ss:$28 sps:$4 sm:$0xff]  }
 0x2bc   :  { %v2401_v31 = vmax.f32 %v2150_v23, 0.0  ;;  %2372 = vmatpush1.bf16.msra.mxu1 %v6233_v19  ;;  %v6306_v17 = vcombine.high %v745_v12, %v749_v13  ;;  %v7110_v19 = vld [vmem:[#allocation11 + $0x544] ss:$28 sps:$4 sm:$0xff]   ;;  %v6305_v27 = vcombine.low %v745_v12, %v749_v13  ;;  %v7041_v20 = vld [vmem:[#allocation11 + $0xc] ss:$28 sps:$4 sm:$0xff]  }
 0x2bd   :  { %2373 = vmatprep.subr.bf16.mxu1 %v6242_v22  ;;  %v8044_v38 = vpack.c.bf16 %v2400_v26, %v2400_v26  ;;  %v7116_v22 = vld [vmem:[#allocation11 + $0x57c] ss:$28 sps:$4 sm:$0xff]   ;;  %v7039_v23 = vld [vmem:[#allocation11 + $0x8] ss:$28 sps:$4 sm:$0xff]   ;;  %v7122_v26 = vld [vmem:[#allocation11 + $0x5b4] ss:$28 sps:$4 sm:$0xff]  }
 0x2be   :  { %v8042_v34 = vpack.c.bf16 %v2401_v31, %v2401_v31  ;;  %v7042_v31 = vld [vmem:[#allocation11 + $0x40] ss:$28 sps:$4 sm:$0xff]   ;;  %v7093_v6 = vld [vmem:[#allocation11 + $0x2a8] ss:$28 sps:$4 sm:$0xff]   ;;  %v7111_v12 = vld [vmem:[#allocation11 + $0x350] ss:$28 sps:$4 sm:$0xff]  }
 0x2bf   :  { %v7083_v61 = vld [vmem:[#allocation11 + $0x23c] ss:$28 sps:$4 sm:$0xff]   ;;  %v7101_v7 = vld [vmem:[#allocation11 + $0x2e4] ss:$28 sps:$4 sm:$0xff]   ;;  %v7119_v13 = vld [vmem:[#allocation11 + $0x38c] ss:$28 sps:$4 sm:$0xff]  }
 0x2c0   :  { %2374 = vmatpush1.bf16.msra.mxu1 %v6241_v32  ;;  %5301 = vmatprep.mubr.bf16.mxu0 %v8042_v34  ;;  %v7047_v32 = vld [vmem:[#allocation11 + $0x7c] ss:$28 sps:$4 sm:$0xff]  }
 0x2c1   :  { %5302 = vmatmul.mubr.bf16.vlgmr.msra.gmra.mrb[12].mxu0 %v8044_v38  ;;  %2375 = vmatprep.subr.bf16.mxu1 %v6250_v33  ;;  %v7120_v33 = vld [vmem:[#allocation11 + $0x5b0] ss:$28 sps:$4 sm:$0xff]  }
 0x2c2   :  { %5311 = vmatpush1.bf16.msra.mxu0 %v7060_v37  ;;  %v7050_v37 = vld [vmem:[#allocation11 + $0xb4] ss:$28 sps:$4 sm:$0xff]  }
 0x2c3   :  { %5312 = vmatprep.subr.bf16.mxu0 %v7068_v39  ;;  %v7126_v39 = vld [vmem:[#allocation11 + $0x5e8] ss:$28 sps:$4 sm:$0xff]  }
 0x2c4   :  { %2376 = vmatpush1.bf16.msra.mxu1 %v6249_v40  ;;  %v7048_v40 = vld [vmem:[#allocation11 + $0xb0] ss:$28 sps:$4 sm:$0xff]  }
 0x2c5   :  { %2377 = vmatprep.subr.bf16.mxu1 %v6258_v41  ;;  %v7053_v41 = vld [vmem:[#allocation11 + $0xec] ss:$28 sps:$4 sm:$0xff]  }
 0x2c6   :  { %5313 = vmatpush1.bf16.msra.mxu0 %v7066_v44  ;;  %v7051_v44 = vld [vmem:[#allocation11 + $0xe8] ss:$28 sps:$4 sm:$0xff]  }
 0x2c7   :  { %5314 = vmatprep.subr.bf16.mxu0 %v7074_v45  ;;  %v7056_v45 = vld [vmem:[#allocation11 + $0x124] ss:$28 sps:$4 sm:$0xff]  }
 0x2c8   :  { %2378 = vmatpush1.bf16.msra.mxu1 %v6257_v46  ;;  %v7138_v46 = vld [vmem:[#allocation11 + $0x658] ss:$28 sps:$4 sm:$0xff]  }
 0x2c9   :  { %2379 = vmatprep.subr.bf16.mxu1 %v6266_v47  ;;  %v7146_v47 = vld [vmem:[#allocation11 + $0x694] ss:$28 sps:$4 sm:$0xff]  }
 0x2ca   :  { %5315 = vmatpush1.bf16.msra.mxu0 %v7072_v51  ;;  %v7144_v51 = vld [vmem:[#allocation11 + $0x690] ss:$28 sps:$4 sm:$0xff]  }
 0x2cb   :  { %5316 = vmatprep.subr.bf16.mxu0 %v7080_v52  ;;  %v7152_v52 = vld [vmem:[#allocation11 + $0x6cc] ss:$28 sps:$4 sm:$0xff]  }
 0x2cc   :  { %2380 = vmatpush1.bf16.msra.mxu1 %v6265_v53  ;;  %v7057_v53 = vld [vmem:[#allocation11 + $0x158] ss:$28 sps:$4 sm:$0xff]  }
 0x2cd   :  { %2381 = vmatprep.subr.bf16.mxu1 %v6274_v54  ;;  %v7065_v54 = vld [vmem:[#allocation11 + $0x194] ss:$28 sps:$4 sm:$0xff]  }
 0x2ce   :  { %5317 = vmatpush1.bf16.msra.mxu0 %v7078_v57  ;;  %v7063_v57 = vld [vmem:[#allocation11 + $0x190] ss:$28 sps:$4 sm:$0xff]  }
 0x2cf   :  { %5318 = vmatprep.subr.bf16.mxu0 %v7086_v58  ;;  %v7071_v58 = vld [vmem:[#allocation11 + $0x1cc] ss:$28 sps:$4 sm:$0xff]  }
 0x2d0   :  { %2382 = vmatpush1.bf16.msra.mxu1 %v6273_v59  ;;  %v7069_v59 = vld [vmem:[#allocation11 + $0x1c8] ss:$28 sps:$4 sm:$0xff]  }
 0x2d1   :  { %2383 = vmatprep.subr.bf16.mxu1 %v6282_v29  ;;  %v7077_v29 = vld [vmem:[#allocation11 + $0x204] ss:$28 sps:$4 sm:$0xff]  }
 0x2d2   :  { %5319 = vmatpush1.bf16.msra.mxu0 %v7084_v1  ;;  %v7081_v1 = vld [vmem:[#allocation11 + $0x238] ss:$28 sps:$4 sm:$0xff]  }
 0x2d3   :  { %5320 = vmatprep.subr.bf16.mxu0 %v7092_v4  ;;  %v7089_v4 = vld [vmem:[#allocation11 + $0x274] ss:$28 sps:$4 sm:$0xff]  }
 0x2d4   :  { %2384 = vmatpush1.bf16.msra.mxu1 %v6281_v5  ;;  %v7087_v5 = vld [vmem:[#allocation11 + $0x270] ss:$28 sps:$4 sm:$0xff]  }
 0x2d5   :  { %2385 = vmatprep.subr.bf16.mxu1 %v6290_v50  ;;  %v7095_v50 = vld [vmem:[#allocation11 + $0x2ac] ss:$28 sps:$4 sm:$0xff]  }
 0x2d6   :  { %5321 = vmatpush1.bf16.msra.mxu0 %v7090_v8  ;;  %v7099_v8 = vld [vmem:[#allocation11 + $0x2e0] ss:$28 sps:$4 sm:$0xff]  }
 0x2d7   :  { %5322 = vmatprep.subr.bf16.mxu0 %v7098_v9  ;;  %v7107_v9 = vld [vmem:[#allocation11 + $0x31c] ss:$28 sps:$4 sm:$0xff]  }
 0x2d8   :  { %2386 = vmatpush1.bf16.msra.mxu1 %v6289_v10  ;;  %v7105_v10 = vld [vmem:[#allocation11 + $0x318] ss:$28 sps:$4 sm:$0xff]  }
 0x2d9   :  { %2387 = vmatprep.subr.bf16.mxu1 %v6298_v11  ;;  %v7113_v11 = vld [vmem:[#allocation11 + $0x354] ss:$28 sps:$4 sm:$0xff]  }
 0x2da   :  { %5323 = vmatpush1.bf16.msra.mxu0 %v7096_v14  ;;  %v7117_v14 = vld [vmem:[#allocation11 + $0x388] ss:$28 sps:$4 sm:$0xff]  }
 0x2db   :  { %5324 = vmatprep.subr.bf16.mxu0 %v7104_v15  ;;  %v7125_v15 = vld [vmem:[#allocation11 + $0x3c4] ss:$28 sps:$4 sm:$0xff]  }
 0x2dc   :  { %2388 = vmatpush1.bf16.msra.mxu1 %v6297_v16  ;;  %v7123_v16 = vld [vmem:[#allocation11 + $0x3c0] ss:$28 sps:$4 sm:$0xff]  }
 0x2dd   :  { %2389 = vmatprep.subr.bf16.mxu1 %v6306_v17  ;;  %v7131_v17 = vld [vmem:[#allocation11 + $0x3fc] ss:$28 sps:$4 sm:$0xff]  }
 0x2de   :  { %5325 = vmatpush1.bf16.msra.mxu0 %v7102_v18  ;;  %v7129_v18 = vld [vmem:[#allocation11 + $0x3f8] ss:$28 sps:$4 sm:$0xff]  }
 0x2df   :  { %5326 = vmatprep.subr.bf16.mxu0 %v7110_v19  ;;  %v7137_v19 = vld [vmem:[#allocation11 + $0x434] ss:$28 sps:$4 sm:$0xff]  }
 0x2e0   :  { %2390 = vmatpush1.bf16.msra.mxu1 %v6305_v27  ;;  %v7135_v27 = vld [vmem:[#allocation11 + $0x430] ss:$28 sps:$4 sm:$0xff]  }
 0x2e1   :  { %5433 = vmatprep.subr.bf16.mxu1 %v7041_v20  ;;  %v7143_v20 = vld [vmem:[#allocation11 + $0x46c] ss:$28 sps:$4 sm:$0xff]  }
 0x2e2   :  { %5327 = vmatpush1.bf16.msra.mxu0 %v7108_v21  ;;  %v7141_v21 = vld [vmem:[#allocation11 + $0x468] ss:$28 sps:$4 sm:$0xff]  }
 0x2e3   :  { %2392 = vmatmul.mubr.bf16.vlgmr.msra.gmra.mrb[12].mxu1 %v8019_v30  ;;  %5328 = vmatprep.subr.bf16.mxu0 %v7116_v22  ;;  %v7134_v30 = vld [vmem:[#allocation11 + $0x624] ss:$28 sps:$4 sm:$0xff]   ;;  %v774_v22 = vsub.s32 5, %v7995_v62 }
 0x2e4   :  { %5434 = vmatpush1.bf16.msra.mxu1 %v7039_v23  ;;  %5465 = vmatprep.mubr.bf16.mxu1 %v8042_v34  ;;  %v7149_v23 = vld [vmem:[#allocation11 + $0x4a4] ss:$28 sps:$4 sm:$0xff]  }
 0x2e5   :  { %5435 = vmatprep.subr.bf16.mxu1 %v7044_v24  ;;  %v763_v24 = vrot.slane %v8036_v28, %v8001_v0 }
 0x2e6   :  { %5329 = vmatpush1.bf16.msra.mxu0 %v7114_v25  ;;  %v767_v25 = vrot.slane %v8036_v28, %v8007_v3 }
 0x2e7   :  { %5330 = vmatprep.subr.bf16.mxu0 %v7122_v26  ;;  %v7147_v26 = vld [vmem:[#allocation11 + $0x4a0] ss:$28 sps:$4 sm:$0xff]  }
 0x2e8   :  { %5436 = vmatpush1.bf16.msra.mxu1 %v7042_v31  ;;  %v775_v31 = vrot.slane %v8036_v28, %v774_v22 }
 0x2e9   :  { %5437 = vmatprep.subr.bf16.mxu1 %v7047_v32  ;;  %v7155_v32 = vld [vmem:[#allocation11 + $0x4dc] ss:$28 sps:$4 sm:$0xff]  }
 0x2ea   :  { %5331 = vmatpush1.bf16.msra.mxu0 %v7120_v33 }
 0x2eb   :  { %5332 = vmatprep.subr.bf16.mxu0 %v7128_v35 }
 0x2ec   :  { %5438 = vmatpush1.bf16.msra.mxu1 %v7045_v36 }
 0x2ed   :  { %5439 = vmatprep.subr.bf16.mxu1 %v7050_v37 }
 0x2ee   :  { %5333 = vmatpush1.bf16.msra.mxu0 %v7126_v39 }
 0x2ef   :  { %5334 = vmatprep.subr.bf16.mxu0 %v7134_v30 }
 0x2f0   :  { %5440 = vmatpush1.bf16.msra.mxu1 %v7048_v40 }
 0x2f1   :  { %5441 = vmatprep.subr.bf16.mxu1 %v7053_v41  ;;  %v7153_v41 = vld [vmem:[#allocation11 + $0x4d8] ss:$28 sps:$4 sm:$0xff]  }
 0x2f2   :  { %5335 = vmatpush1.bf16.msra.mxu0 %v7132_v42 }
 0x2f3   :  { %5336 = vmatprep.subr.bf16.mxu0 %v7140_v43 }
 0x2f4   :  { %5442 = vmatpush1.bf16.msra.mxu1 %v7051_v44 }
 0x2f5   :  { %5443 = vmatprep.subr.bf16.mxu1 %v7056_v45 }
 0x2f6   :  { %5337 = vmatpush1.bf16.msra.mxu0 %v7138_v46  ;;  %v7161_v46 = vld [vmem:[#allocation11 + $0x514] ss:$28 sps:$4 sm:$0xff]  }
 0x2f7   :  { %5338 = vmatprep.subr.bf16.mxu0 %v7146_v47 }
 0x2f8   :  { %5444 = vmatpush1.bf16.msra.mxu1 %v7054_v48 }
 0x2f9   :  { %5445 = vmatprep.subr.bf16.mxu1 %v7059_v49 }
 0x2fa   :  { %5339 = vmatpush1.bf16.msra.mxu0 %v7144_v51 }
 0x2fb   :  { %5340 = vmatprep.subr.bf16.mxu0 %v7152_v52  ;;  %v7156_v52 = vld [vmem:[#allocation11 + $0x700] ss:$28 sps:$4 sm:$0xff]  }
 0x2fc   :  { %5446 = vmatpush1.bf16.msra.mxu1 %v7057_v53 }
 0x2fd   :  { %5447 = vmatprep.subr.bf16.mxu1 %v7065_v54  ;;  %v7159_v54 = vld [vmem:[#allocation11 + $0x510] ss:$28 sps:$4 sm:$0xff]  }
 0x2fe   :  { %5341 = vmatpush1.bf16.msra.mxu0 %v7150_v55  ;;  %v7164_v55 = vld [vmem:[#allocation11 + $0x73c] ss:$28 sps:$4 sm:$0xff]  }
 0x2ff   :  { %5351 = vmatprep.subr.bf16.mxu0 %v7158_v56 }
 0x300   :  { %5448 = vmatpush1.bf16.msra.mxu1 %v7063_v57  ;;  %v7167_v57 = vld [vmem:[#allocation11 + $0x54c] ss:$28 sps:$4 sm:$0xff]  }
 0x301   :  { %5449 = vmatprep.subr.bf16.mxu1 %v7071_v58  ;;  %v7162_v58 = vld [vmem:[#allocation11 + $0x738] ss:$28 sps:$4 sm:$0xff]  }
 0x304   :  { %5450 = vmatpush1.bf16.msra.mxu1 %v7069_v59  ;;  %v7165_v59 = vld [vmem:[#allocation11 + $0x548] ss:$28 sps:$4 sm:$0xff]  }
 0x305   :  { %5451 = vmatprep.subr.bf16.mxu1 %v7077_v29  ;;  %v7170_v29 = vld [vmem:[#allocation11 + $0x774] ss:$28 sps:$4 sm:$0xff]  }
 0x308   :  { %5452 = vmatpush1.bf16.msra.mxu1 %v7075_v60  ;;  %v7173_v60 = vld [vmem:[#allocation11 + $0x584] ss:$28 sps:$4 sm:$0xff]  }
 0x309   :  { %5453 = vmatprep.subr.bf16.mxu1 %v7083_v61  ;;  %v7168_v61 = vld [vmem:[#allocation11 + $0x770] ss:$28 sps:$4 sm:$0xff]  }
 0x30c   :  { %5454 = vmatpush1.bf16.msra.mxu1 %v7081_v1  ;;  %v7171_v1 = vld [vmem:[#allocation11 + $0x580] ss:$28 sps:$4 sm:$0xff]  }
 0x30d   :  { %5455 = vmatprep.subr.bf16.mxu1 %v7089_v4  ;;  %v7176_v4 = vld [vmem:[#allocation11 + $0x7ac] ss:$28 sps:$4 sm:$0xff]  }
 0x310   :  { %5456 = vmatpush1.bf16.msra.mxu1 %v7087_v5  ;;  %v7179_v5 = vld [vmem:[#allocation11 + $0x5bc] ss:$28 sps:$4 sm:$0xff]  }
 0x311   :  { %5457 = vmatprep.subr.bf16.mxu1 %v7095_v50  ;;  %v7174_v50 = vld [vmem:[#allocation11 + $0x7a8] ss:$28 sps:$4 sm:$0xff]  }
 0x314   :  { %5458 = vmatpush1.bf16.msra.mxu1 %v7093_v6  ;;  %v7177_v6 = vld [vmem:[#allocation11 + $0x5b8] ss:$28 sps:$4 sm:$0xff]  }
 0x315   :  { %5459 = vmatprep.subr.bf16.mxu1 %v7101_v7  ;;  %v7182_v7 = vld [vmem:[#allocation11 + $0x7e4] ss:$28 sps:$4 sm:$0xff]  }
 0x318   :  { %5460 = vmatpush1.bf16.msra.mxu1 %v7099_v8  ;;  %v7185_v8 = vld [vmem:[#allocation11 + $0x5f4] ss:$28 sps:$4 sm:$0xff]  }
 0x319   :  { %5461 = vmatprep.subr.bf16.mxu1 %v7107_v9  ;;  %v7180_v9 = vld [vmem:[#allocation11 + $0x7e0] ss:$28 sps:$4 sm:$0xff]  }
 0x31c   :  { %5462 = vmatpush1.bf16.msra.mxu1 %v7105_v10  ;;  %v7183_v10 = vld [vmem:[#allocation11 + $0x5f0] ss:$28 sps:$4 sm:$0xff]  }
 0x31d   :  { %5463 = vmatprep.subr.bf16.mxu1 %v7113_v11  ;;  %v7188_v11 = vld [vmem:[#allocation11 + $0x81c] ss:$28 sps:$4 sm:$0xff]  }
 0x320   :  { %5464 = vmatpush1.bf16.msra.mxu1 %v7111_v12  ;;  %v7191_v12 = vld [vmem:[#allocation11 + $0x62c] ss:$28 sps:$4 sm:$0xff]  }
 0x321   :  { %5474 = vmatprep.subr.bf16.mxu1 %v7119_v13  ;;  %v7186_v13 = vld [vmem:[#allocation11 + $0x818] ss:$28 sps:$4 sm:$0xff]  }
 0x323   :  { %5466 = vmatmul.mubr.bf16.vlgmr.msra.gmra.mrb[16].mxu1 %v8044_v38 }
 0x324   :  { %5475 = vmatpush1.bf16.msra.mxu1 %v7117_v14  ;;  %v7189_v14 = vld [vmem:[#allocation11 + $0x628] ss:$28 sps:$4 sm:$0xff]  }
 0x325   :  { %5476 = vmatprep.subr.bf16.mxu1 %v7125_v15  ;;  %v7194_v15 = vld [vmem:[#allocation11 + $0x854] ss:$28 sps:$4 sm:$0xff]  }
 0x328   :  { %5477 = vmatpush1.bf16.msra.mxu1 %v7123_v16  ;;  %v7197_v16 = vld [vmem:[#allocation11 + $0x664] ss:$28 sps:$4 sm:$0xff]  }
 0x329   :  { %5478 = vmatprep.subr.bf16.mxu1 %v7131_v17  ;;  %v7192_v17 = vld [vmem:[#allocation11 + $0x850] ss:$28 sps:$4 sm:$0xff]  }
 0x32c   :  { %5479 = vmatpush1.bf16.msra.mxu1 %v7129_v18  ;;  %v7195_v18 = vld [vmem:[#allocation11 + $0x660] ss:$28 sps:$4 sm:$0xff]  }
 0x32d   :  { %5480 = vmatprep.subr.bf16.mxu1 %v7137_v19  ;;  %v7200_v19 = vld [vmem:[#allocation11 + $0x88c] ss:$28 sps:$4 sm:$0xff]  }
 0x330   :  { %5481 = vmatpush1.bf16.msra.mxu1 %v7135_v27  ;;  %v7203_v27 = vld [vmem:[#allocation11 + $0x69c] ss:$28 sps:$4 sm:$0xff]  }
 0x331   :  { %5482 = vmatprep.subr.bf16.mxu1 %v7143_v20  ;;  %v7198_v20 = vld [vmem:[#allocation11 + $0x888] ss:$28 sps:$4 sm:$0xff]  }
 0x334   :  { %5483 = vmatpush1.bf16.msra.mxu1 %v7141_v21  ;;  %v7201_v21 = vld [vmem:[#allocation11 + $0x698] ss:$28 sps:$4 sm:$0xff]  }
 0x335   :  { %5484 = vmatprep.subr.bf16.mxu1 %v7149_v23  ;;  %v7206_v23 = vld [vmem:[#allocation11 + $0x8c4] ss:$28 sps:$4 sm:$0xff]  }
 0x336   :  { %v2229_v33 = vpop.f32.mrb[8].mxu1 }
 0x337   :  { %v6855_v35 = vadd.f32 %v2229_v33, %v763_v24  ;;  %v8059_v36 = vpop.f32.mrb[8].mxu0  ;;  %v2231_v37 = vpop.f32.mrb[9].mxu1  ;;  %v7209_v24 = vld [vmem:[#allocation11 + $0x6d4] ss:$28 sps:$4 sm:$0xff]  }
 0x338   :  { %v6856_v39 = vadd.f32 %v2231_v37, %v767_v25  ;;  %v2313_v30 = vpop.f32.mrb[9].mxu0  ;;  %v2233_v40 = vpop.f32.mrb[10].mxu1  ;;  %5485 = vmatpush1.bf16.msra.mxu1 %v7147_v26  ;;  %v7204_v25 = vld [vmem:[#allocation11 + $0x8c0] ss:$28 sps:$4 sm:$0xff]   ;;  %v7207_v26 = vld [vmem:[#allocation11 + $0x6d0] ss:$28 sps:$4 sm:$0xff]  }
 0x339   :  { %v2402_v42 = vmax.f32 %v6855_v35, 0.0  ;;  %v6858_v43 = vadd.f32 %v2313_v30, %v775_v31  ;;  %v2315_v44 = vpop.f32.mrb[10].mxu0  ;;  %v2234_v45 = vpop.f32.mrb[11].mxu1  ;;  %5486 = vmatprep.subr.bf16.mxu1 %v7155_v32  ;;  %v7212_v31 = vld [vmem:[#allocation11 + $0x8fc] ss:$28 sps:$4 sm:$0xff]  }
 0x33a   :  { %v2403_v47 = vmax.f32 %v6856_v39, 0.0  ;;  %v2316_v48 = vpop.f32.mrb[11].mxu0  ;;  %v7215_v32 = vld [vmem:[#allocation11 + $0x70c] ss:$28 sps:$4 sm:$0xff]   ;;  %v7210_v33 = vld [vmem:[#allocation11 + $0x8f8] ss:$28 sps:$4 sm:$0xff]  }
 0x33b   :  { %v2405_v49 = vmax.f32 %v6858_v43, 0.0  ;;  %v8063_v53 = vpack.c.bf16 %v2402_v42, %v2402_v42  ;;  %v7213_v35 = vld [vmem:[#allocation11 + $0x708] ss:$28 sps:$4 sm:$0xff]   ;;  %v7218_v37 = vld [vmem:[#allocation11 + $0x934] ss:$28 sps:$4 sm:$0xff]   ;;  %v770_v48 = vsub.s32 4, %v7995_v62 }
 0x33c   :  { %v8061_v51 = vpack.c.bf16 %v2403_v47, %v2403_v47  ;;  %5487 = vmatpush1.bf16.msra.mxu1 %v7153_v41  ;;  %v7221_v39 = vld [vmem:[#allocation11 + $0x744] ss:$28 sps:$4 sm:$0xff]   ;;  %v7216_v30 = vld [vmem:[#allocation11 + $0x930] ss:$28 sps:$4 sm:$0xff]   ;;  %v7227_v42 = vld [vmem:[#allocation11 + $0x77c] ss:$28 sps:$4 sm:$0xff]  }
 0x33d   :  { %5488 = vmatprep.subr.bf16.mxu1 %v7161_v46  ;;  %v8065_v56 = vpack.c.bf16 %v2405_v49, %v2405_v49  ;;  %v7219_v40 = vld [vmem:[#allocation11 + $0x740] ss:$28 sps:$4 sm:$0xff]   ;;  %v7224_v41 = vld [vmem:[#allocation11 + $0x96c] ss:$28 sps:$4 sm:$0xff]   ;;  %v7225_v44 = vld [vmem:[#allocation11 + $0x778] ss:$28 sps:$4 sm:$0xff]  }
 0x33e   :  { %5342 = vmatprep.mubr.bf16.mxu0 %v8061_v51  ;;  %5506 = vmatprep.mubr.bf16.mxu1 %v8061_v51  ;;  %v7222_v43 = vld [vmem:[#allocation11 + $0x968] ss:$28 sps:$4 sm:$0xff]   ;;  %v7233_v46 = vld [vmem:[#allocation11 + $0x7b4] ss:$28 sps:$4 sm:$0xff]   ;;  %v7228_v47 = vld [vmem:[#allocation11 + $0x9a0] ss:$28 sps:$4 sm:$0xff]  }
 0x33f   :  { %5343 = vmatmul.mubr.bf16.vlgmr.msra.gmra.mrb[12].mxu0 %v8063_v53  ;;  %v7230_v45 = vld [vmem:[#allocation11 + $0x9a4] ss:$28 sps:$4 sm:$0xff]   ;;  %v7231_v49 = vld [vmem:[#allocation11 + $0x7b0] ss:$28 sps:$4 sm:$0xff]  }
 0x340   :  { %5352 = vmatpush1.bf16.msra.mxu0 %v7156_v52  ;;  %5383 = vmatprep.mubr.bf16.mxu0 %v8065_v56  ;;  %v7236_v52 = vld [vmem:[#allocation11 + $0x9dc] ss:$28 sps:$4 sm:$0xff]  }
 0x341   :  { %5489 = vmatpush1.bf16.msra.mxu1 %v7159_v54  ;;  %5353 = vmatprep.subr.bf16.mxu0 %v7164_v55  ;;  %v7239_v54 = vld [vmem:[#allocation11 + $0x7ec] ss:$28 sps:$4 sm:$0xff]   ;;  %v7234_v55 = vld [vmem:[#allocation11 + $0x9d8] ss:$28 sps:$4 sm:$0xff]  }
 0x342   :  { %5490 = vmatprep.subr.bf16.mxu1 %v7167_v57  ;;  %v771_v57 = vrot.slane %v8036_v28, %v770_v48  ;;  %v7249_v28 = vld [vmem:[#allocation11 + $0x858] ss:$28 sps:$4 sm:$0xff]  }
 0x344   :  { %5354 = vmatpush1.bf16.msra.mxu0 %v7162_v58  ;;  %v7237_v58 = vld [vmem:[#allocation11 + $0x7e8] ss:$28 sps:$4 sm:$0xff]  }
 0x345   :  { %5491 = vmatpush1.bf16.msra.mxu1 %v7165_v59  ;;  %5355 = vmatprep.subr.bf16.mxu0 %v7170_v29  ;;  %v7242_v59 = vld [vmem:[#allocation11 + $0xa14] ss:$28 sps:$4 sm:$0xff]   ;;  %v7245_v29 = vld [vmem:[#allocation11 + $0x824] ss:$28 sps:$4 sm:$0xff]  }
 0x346   :  { %5492 = vmatprep.subr.bf16.mxu1 %v7173_v60  ;;  %v7240_v60 = vld [vmem:[#allocation11 + $0xa10] ss:$28 sps:$4 sm:$0xff]  }
 0x348   :  { %5356 = vmatpush1.bf16.msra.mxu0 %v7168_v61  ;;  %v6857_v61 = vadd.f32 %v8059_v36, %v771_v57  ;;  %v7255_v36 = vld [vmem:[#allocation11 + $0x890] ss:$28 sps:$4 sm:$0xff]   ;;  %v7309_v57 = vld [vmem:[#allocation11 + $0xa88] ss:$28 sps:$4 sm:$0xff]  }
 0x349   :  { %5493 = vmatpush1.bf16.msra.mxu1 %v7171_v1  ;;  %5357 = vmatprep.subr.bf16.mxu0 %v7176_v4  ;;  %v7243_v1 = vld [vmem:[#allocation11 + $0x820] ss:$28 sps:$4 sm:$0xff]   ;;  %v7248_v4 = vld [vmem:[#allocation11 + $0xa4c] ss:$28 sps:$4 sm:$0xff]  }
 0x34a   :  { %5494 = vmatprep.subr.bf16.mxu1 %v7179_v5  ;;  %v7251_v5 = vld [vmem:[#allocation11 + $0x85c] ss:$28 sps:$4 sm:$0xff]  }
 0x34c   :  { %5358 = vmatpush1.bf16.msra.mxu0 %v7174_v50  ;;  %v7246_v50 = vld [vmem:[#allocation11 + $0xa48] ss:$28 sps:$4 sm:$0xff]  }
 0x34d   :  { %5495 = vmatpush1.bf16.msra.mxu1 %v7177_v6  ;;  %5359 = vmatprep.subr.bf16.mxu0 %v7182_v7  ;;  %v2404_v6 = vmax.f32 %v6857_v61, 0.0  ;;  %v7254_v7 = vld [vmem:[#allocation11 + $0xa84] ss:$28 sps:$4 sm:$0xff]   ;;  %v7320_v61 = vld [vmem:[#allocation11 + $0xcec] ss:$28 sps:$4 sm:$0xff]  }
 0x34e   :  { %5496 = vmatprep.subr.bf16.mxu1 %v7185_v8  ;;  %v7257_v8 = vld [vmem:[#allocation11 + $0x894] ss:$28 sps:$4 sm:$0xff]  }
 0x350   :  { %5360 = vmatpush1.bf16.msra.mxu0 %v7180_v9  ;;  %v7252_v9 = vld [vmem:[#allocation11 + $0xa80] ss:$28 sps:$4 sm:$0xff]  }
 0x351   :  { %5497 = vmatpush1.bf16.msra.mxu1 %v7183_v10  ;;  %5361 = vmatprep.subr.bf16.mxu0 %v7188_v11  ;;  %v8078_v10 = vpack.c.bf16 %v2404_v6, %v2404_v6  ;;  %v7260_v11 = vld [vmem:[#allocation11 + $0xabc] ss:$28 sps:$4 sm:$0xff]   ;;  %v7329_v6 = vld [vmem:[#allocation11 + $0xb34] ss:$28 sps:$4 sm:$0xff]  }
 0x352   :  { %5498 = vmatprep.subr.bf16.mxu1 %v7191_v12  ;;  %v7263_v12 = vld [vmem:[#allocation11 + $0x8cc] ss:$28 sps:$4 sm:$0xff]  }
 0x354   :  { %5362 = vmatpush1.bf16.msra.mxu0 %v7186_v13  ;;  %v7258_v13 = vld [vmem:[#allocation11 + $0xab8] ss:$28 sps:$4 sm:$0xff]  }
 0x355   :  { %5499 = vmatpush1.bf16.msra.mxu1 %v7189_v14  ;;  %5363 = vmatprep.subr.bf16.mxu0 %v7194_v15  ;;  %v7261_v14 = vld [vmem:[#allocation11 + $0x8c8] ss:$28 sps:$4 sm:$0xff]   ;;  %v7266_v15 = vld [vmem:[#allocation11 + $0xaf4] ss:$28 sps:$4 sm:$0xff]  }
 0x356   :  { %5500 = vmatprep.subr.bf16.mxu1 %v7197_v16  ;;  %v7269_v16 = vld [vmem:[#allocation11 + $0x904] ss:$28 sps:$4 sm:$0xff]  }
 0x358   :  { %5364 = vmatpush1.bf16.msra.mxu0 %v7192_v17  ;;  %v7264_v17 = vld [vmem:[#allocation11 + $0xaf0] ss:$28 sps:$4 sm:$0xff]  }
 0x359   :  { %5501 = vmatpush1.bf16.msra.mxu1 %v7195_v18  ;;  %5365 = vmatprep.subr.bf16.mxu0 %v7200_v19  ;;  %v7267_v18 = vld [vmem:[#allocation11 + $0x900] ss:$28 sps:$4 sm:$0xff]   ;;  %v7272_v19 = vld [vmem:[#allocation11 + $0xb2c] ss:$28 sps:$4 sm:$0xff]  }
 0x35a   :  { %5502 = vmatprep.subr.bf16.mxu1 %v7203_v27  ;;  %v7275_v27 = vld [vmem:[#allocation11 + $0x93c] ss:$28 sps:$4 sm:$0xff]  }
 0x35c   :  { %5366 = vmatpush1.bf16.msra.mxu0 %v7198_v20  ;;  %v7270_v20 = vld [vmem:[#allocation11 + $0xb28] ss:$28 sps:$4 sm:$0xff]  }
 0x35d   :  { %5503 = vmatpush1.bf16.msra.mxu1 %v7201_v21  ;;  %5367 = vmatprep.subr.bf16.mxu0 %v7206_v23  ;;  %v7273_v21 = vld [vmem:[#allocation11 + $0x938] ss:$28 sps:$4 sm:$0xff]   ;;  %v7278_v23 = vld [vmem:[#allocation11 + $0xb64] ss:$28 sps:$4 sm:$0xff]  }
 0x35e   :  { %5504 = vmatprep.subr.bf16.mxu1 %v7209_v24  ;;  %v7281_v24 = vld [vmem:[#allocation11 + $0x974] ss:$28 sps:$4 sm:$0xff]  }
 0x360   :  { %5368 = vmatpush1.bf16.msra.mxu0 %v7204_v25  ;;  %v7276_v25 = vld [vmem:[#allocation11 + $0xb60] ss:$28 sps:$4 sm:$0xff]  }
 0x361   :  { %5505 = vmatpush1.bf16.msra.mxu1 %v7207_v26  ;;  %5369 = vmatprep.subr.bf16.mxu0 %v7212_v31  ;;  %v7279_v26 = vld [vmem:[#allocation11 + $0x970] ss:$28 sps:$4 sm:$0xff]   ;;  %v7284_v31 = vld [vmem:[#allocation11 + $0xb9c] ss:$28 sps:$4 sm:$0xff]  }
 0x362   :  { %5515 = vmatprep.subr.bf16.mxu1 %v7215_v32  ;;  %v7287_v32 = vld [vmem:[#allocation11 + $0x9ac] ss:$28 sps:$4 sm:$0xff]  }
 0x364   :  { %5370 = vmatpush1.bf16.msra.mxu0 %v7210_v33  ;;  %5507 = vmatmul.mubr.bf16.vlgmr.msra.gmra.mrb[16].mxu1 %v8063_v53  ;;  %v7282_v33 = vld [vmem:[#allocation11 + $0xb98] ss:$28 sps:$4 sm:$0xff]  }
 0x365   :  { %5516 = vmatpush1.bf16.msra.mxu1 %v7213_v35  ;;  %5547 = vmatprep.mubr.bf16.mxu1 %v8065_v56  ;;  %v7285_v35 = vld [vmem:[#allocation11 + $0x9a8] ss:$28 sps:$4 sm:$0xff]  }
 0x366   :  { %5371 = vmatprep.subr.bf16.mxu0 %v7218_v37  ;;  %5517 = vmatprep.subr.bf16.mxu1 %v7221_v39  ;;  %v7290_v37 = vld [vmem:[#allocation11 + $0xbd4] ss:$28 sps:$4 sm:$0xff]   ;;  %v7293_v39 = vld [vmem:[#allocation11 + $0x9e4] ss:$28 sps:$4 sm:$0xff]  }
 0x368   :  { %5372 = vmatpush1.bf16.msra.mxu0 %v7216_v30  ;;  %v7288_v30 = vld [vmem:[#allocation11 + $0xbd0] ss:$28 sps:$4 sm:$0xff]  }
 0x369   :  { %5518 = vmatpush1.bf16.msra.mxu1 %v7219_v40  ;;  %5373 = vmatprep.subr.bf16.mxu0 %v7224_v41  ;;  %v7291_v40 = vld [vmem:[#allocation11 + $0x9e0] ss:$28 sps:$4 sm:$0xff]   ;;  %v7296_v41 = vld [vmem:[#allocation11 + $0xc0c] ss:$28 sps:$4 sm:$0xff]  }
 0x36a   :  { %5519 = vmatprep.subr.bf16.mxu1 %v7227_v42  ;;  %v7299_v42 = vld [vmem:[#allocation11 + $0xa1c] ss:$28 sps:$4 sm:$0xff]  }
 0x36c   :  { %5374 = vmatpush1.bf16.msra.mxu0 %v7222_v43  ;;  %v7294_v43 = vld [vmem:[#allocation11 + $0xc08] ss:$28 sps:$4 sm:$0xff]  }
 0x36d   :  { %5520 = vmatpush1.bf16.msra.mxu1 %v7225_v44  ;;  %5375 = vmatprep.subr.bf16.mxu0 %v7230_v45  ;;  %v7297_v44 = vld [vmem:[#allocation11 + $0xa18] ss:$28 sps:$4 sm:$0xff]   ;;  %v7302_v45 = vld [vmem:[#allocation11 + $0xc44] ss:$28 sps:$4 sm:$0xff]  }
 0x36e   :  { %5521 = vmatprep.subr.bf16.mxu1 %v7233_v46  ;;  %v7305_v46 = vld [vmem:[#allocation11 + $0xa54] ss:$28 sps:$4 sm:$0xff]  }
 0x370   :  { %5376 = vmatpush1.bf16.msra.mxu0 %v7228_v47  ;;  %v7300_v47 = vld [vmem:[#allocation11 + $0xc40] ss:$28 sps:$4 sm:$0xff]  }
 0x371   :  { %5522 = vmatpush1.bf16.msra.mxu1 %v7231_v49  ;;  %5377 = vmatprep.subr.bf16.mxu0 %v7236_v52  ;;  %v7303_v49 = vld [vmem:[#allocation11 + $0xa50] ss:$28 sps:$4 sm:$0xff]   ;;  %v7308_v52 = vld [vmem:[#allocation11 + $0xc7c] ss:$28 sps:$4 sm:$0xff]  }
 0x372   :  { %5523 = vmatprep.subr.bf16.mxu1 %v7239_v54  ;;  %v7311_v54 = vld [vmem:[#allocation11 + $0xa8c] ss:$28 sps:$4 sm:$0xff]  }
 0x374   :  { %5378 = vmatpush1.bf16.msra.mxu0 %v7234_v55  ;;  %v7306_v55 = vld [vmem:[#allocation11 + $0xc78] ss:$28 sps:$4 sm:$0xff]  }
 0x375   :  { %5524 = vmatpush1.bf16.msra.mxu1 %v7237_v58  ;;  %5379 = vmatprep.subr.bf16.mxu0 %v7242_v59  ;;  %v7314_v58 = vld [vmem:[#allocation11 + $0xcb4] ss:$28 sps:$4 sm:$0xff]   ;;  %v7317_v59 = vld [vmem:[#allocation11 + $0xac4] ss:$28 sps:$4 sm:$0xff]  }
 0x376   :  { %5525 = vmatprep.subr.bf16.mxu1 %v7245_v29  ;;  %v7312_v29 = vld [vmem:[#allocation11 + $0xcb0] ss:$28 sps:$4 sm:$0xff]  }
 0x378   :  { %5380 = vmatpush1.bf16.msra.mxu0 %v7240_v60  ;;  %v7315_v60 = vld [vmem:[#allocation11 + $0xac0] ss:$28 sps:$4 sm:$0xff]  }
 0x379   :  { %5526 = vmatpush1.bf16.msra.mxu1 %v7243_v1  ;;  %5381 = vmatprep.subr.bf16.mxu0 %v7248_v4  ;;  %v7323_v1 = vld [vmem:[#allocation11 + $0xafc] ss:$28 sps:$4 sm:$0xff]   ;;  %v7318_v4 = vld [vmem:[#allocation11 + $0xce8] ss:$28 sps:$4 sm:$0xff]  }
 0x37a   :  { %5527 = vmatprep.subr.bf16.mxu1 %v7251_v5  ;;  %v7321_v5 = vld [vmem:[#allocation11 + $0xaf8] ss:$28 sps:$4 sm:$0xff]  }
 0x37c   :  { %5382 = vmatpush1.bf16.msra.mxu0 %v7246_v50  ;;  %v7326_v50 = vld [vmem:[#allocation11 + $0xd24] ss:$28 sps:$4 sm:$0xff]  }
 0x37d   :  { %5528 = vmatpush1.bf16.msra.mxu1 %v7249_v28  ;;  %5392 = vmatprep.subr.bf16.mxu0 %v7254_v7  ;;  %v7324_v28 = vld [vmem:[#allocation11 + $0xd20] ss:$28 sps:$4 sm:$0xff]   ;;  %v7327_v7 = vld [vmem:[#allocation11 + $0xb30] ss:$28 sps:$4 sm:$0xff]  }
 0x37e   :  { %5529 = vmatprep.subr.bf16.mxu1 %v7257_v8  ;;  %v7332_v8 = vld [vmem:[#allocation11 + $0xd5c] ss:$28 sps:$4 sm:$0xff]  }
 0x37f   :  { %5384 = vmatmul.mubr.bf16.vlgmr.msra.gmra.mrb[12].mxu0 %v8078_v10 }
 0x380   :  { %5393 = vmatpush1.bf16.msra.mxu0 %v7252_v9  ;;  %v7335_v9 = vld [vmem:[#allocation11 + $0xb6c] ss:$28 sps:$4 sm:$0xff]  }
 0x381   :  { %5530 = vmatpush1.bf16.msra.mxu1 %v7255_v36  ;;  %5394 = vmatprep.subr.bf16.mxu0 %v7260_v11  ;;  %v778_v36 = vsub.s32 6, %v7995_v62  ;;  %v7330_v11 = vld [vmem:[#allocation11 + $0xd58] ss:$28 sps:$4 sm:$0xff]  }
 0x382   :  { %5531 = vmatprep.subr.bf16.mxu1 %v7263_v12  ;;  %v782_v12 = vsub.s32 7, %v7995_v62 }
 0x384   :  { %5395 = vmatpush1.bf16.msra.mxu0 %v7258_v13  ;;  %v7333_v13 = vld [vmem:[#allocation11 + $0xb68] ss:$28 sps:$4 sm:$0xff]  }
 0x385   :  { %5532 = vmatpush1.bf16.msra.mxu1 %v7261_v14  ;;  %5396 = vmatprep.subr.bf16.mxu0 %v7266_v15  ;;  %v7338_v14 = vld [vmem:[#allocation11 + $0xd94] ss:$28 sps:$4 sm:$0xff]   ;;  %v7341_v15 = vld [vmem:[#allocation11 + $0xba4] ss:$28 sps:$4 sm:$0xff]  }
 0x386   :  { %5533 = vmatprep.subr.bf16.mxu1 %v7269_v16  ;;  %v7659_v16 = vld [vmem:[#allocation10] sm:$0xff] }
 0x388   :  { %5397 = vmatpush1.bf16.msra.mxu0 %v7264_v17  ;;  %v779_v17 = vrot.slane %v7659_v16, %v778_v36 }
 0x389   :  { %5534 = vmatpush1.bf16.msra.mxu1 %v7267_v18  ;;  %5398 = vmatprep.subr.bf16.mxu0 %v7272_v19  ;;  %v7336_v18 = vld [vmem:[#allocation11 + $0xd90] ss:$28 sps:$4 sm:$0xff]   ;;  %v783_v19 = vrot.slane %v7659_v16, %v782_v12  ;;  %v7387_v12 = vld [vmem:[#allocation11 + $0xd60] ss:$28 sps:$4 sm:$0xff]   ;;  %v7393_v16 = vld [vmem:[#allocation11 + $0xd98] ss:$28 sps:$4 sm:$0xff]  }
 0x38a   :  { %5535 = vmatprep.subr.bf16.mxu1 %v7275_v27  ;;  %v7339_v27 = vld [vmem:[#allocation11 + $0xba0] ss:$28 sps:$4 sm:$0xff]  }
 0x38c   :  { %5399 = vmatpush1.bf16.msra.mxu0 %v7270_v20  ;;  %v7344_v20 = vld [vmem:[#allocation11 + $0xdcc] ss:$28 sps:$4 sm:$0xff]  }
 0x38d   :  { %5536 = vmatpush1.bf16.msra.mxu1 %v7273_v21  ;;  %5400 = vmatprep.subr.bf16.mxu0 %v7278_v23  ;;  %v7347_v23 = vld [vmem:[#allocation11 + $0xbdc] ss:$28 sps:$4 sm:$0xff]  }
 0x38e   :  { %5537 = vmatprep.subr.bf16.mxu1 %v7281_v24 }
 0x390   :  { %5401 = vmatpush1.bf16.msra.mxu0 %v7276_v25 }
 0x391   :  { %5538 = vmatpush1.bf16.msra.mxu1 %v7279_v26  ;;  %5402 = vmatprep.subr.bf16.mxu0 %v7284_v31 }
 0x392   :  { %5539 = vmatprep.subr.bf16.mxu1 %v7287_v32  ;;  %v7342_v32 = vld [vmem:[#allocation11 + $0xdc8] ss:$28 sps:$4 sm:$0xff]  }
 0x394   :  { %5403 = vmatpush1.bf16.msra.mxu0 %v7282_v33 }
 0x395   :  { %5540 = vmatpush1.bf16.msra.mxu1 %v7285_v35  ;;  %5404 = vmatprep.subr.bf16.mxu0 %v7290_v37  ;;  %v7345_v37 = vld [vmem:[#allocation11 + $0xbd8] ss:$28 sps:$4 sm:$0xff]  }
 0x396   :  { %5541 = vmatprep.subr.bf16.mxu1 %v7293_v39  ;;  %v7350_v39 = vld [vmem:[#allocation11 + $0x14] ss:$28 sps:$4 sm:$0xff]  }
 0x398   :  { %5405 = vmatpush1.bf16.msra.mxu0 %v7288_v30 }
 0x399   :  { %5542 = vmatpush1.bf16.msra.mxu1 %v7291_v40  ;;  %5406 = vmatprep.subr.bf16.mxu0 %v7296_v41  ;;  %v7353_v40 = vld [vmem:[#allocation11 + $0xc14] ss:$28 sps:$4 sm:$0xff]  }
 0x39a   :  { %5543 = vmatprep.subr.bf16.mxu1 %v7299_v42  ;;  %v7348_v42 = vld [vmem:[#allocation11 + $0x10] ss:$28 sps:$4 sm:$0xff]  }
 0x39c   :  { %5407 = vmatpush1.bf16.msra.mxu0 %v7294_v43 }
 0x39d   :  { %5544 = vmatpush1.bf16.msra.mxu1 %v7297_v44  ;;  %5408 = vmatprep.subr.bf16.mxu0 %v7302_v45  ;;  %v7351_v44 = vld [vmem:[#allocation11 + $0xc10] ss:$28 sps:$4 sm:$0xff]  }
 0x39e   :  { %5545 = vmatprep.subr.bf16.mxu1 %v7305_v46  ;;  %v7356_v45 = vld [vmem:[#allocation11 + $0x4c] ss:$28 sps:$4 sm:$0xff]  }
 0x39f   :  { %v7359_v46 = vld [vmem:[#allocation11 + $0xc4c] ss:$28 sps:$4 sm:$0xff]  }
 0x3a0   :  { %5409 = vmatpush1.bf16.msra.mxu0 %v7300_v47  ;;  %v7354_v47 = vld [vmem:[#allocation11 + $0x48] ss:$28 sps:$4 sm:$0xff]  }
 0x3a1   :  { %5546 = vmatpush1.bf16.msra.mxu1 %v7303_v49  ;;  %5410 = vmatprep.subr.bf16.mxu0 %v7308_v52  ;;  %v7357_v49 = vld [vmem:[#allocation11 + $0xc48] ss:$28 sps:$4 sm:$0xff]  }
 0x3a2   :  { %5556 = vmatprep.subr.bf16.mxu1 %v7311_v54  ;;  %v7362_v52 = vld [vmem:[#allocation11 + $0x84] ss:$28 sps:$4 sm:$0xff]  }
 0x3a3   :  { %v7365_v54 = vld [vmem:[#allocation11 + $0xc84] ss:$28 sps:$4 sm:$0xff]  }
 0x3a4   :  { %5411 = vmatpush1.bf16.msra.mxu0 %v7306_v55  ;;  %5548 = vmatmul.mubr.bf16.vlgmr.msra.gmra.mrb[16].mxu1 %v8078_v10  ;;  %v7360_v55 = vld [vmem:[#allocation11 + $0x80] ss:$28 sps:$4 sm:$0xff]  }
 0x3a5   :  { %5557 = vmatpush1.bf16.msra.mxu1 %v7309_v57  ;;  %5412 = vmatprep.subr.bf16.mxu0 %v7314_v58  ;;  %v7363_v57 = vld [vmem:[#allocation11 + $0xc80] ss:$28 sps:$4 sm:$0xff]  }
 0x3a6   :  { %5558 = vmatprep.subr.bf16.mxu1 %v7317_v59  ;;  %v7368_v58 = vld [vmem:[#allocation11 + $0xbc] ss:$28 sps:$4 sm:$0xff]  }
 0x3a7   :  { %v7371_v59 = vld [vmem:[#allocation11 + $0xcbc] ss:$28 sps:$4 sm:$0xff]  }
 0x3a8   :  { %5413 = vmatpush1.bf16.msra.mxu0 %v7312_v29  ;;  %v7366_v29 = vld [vmem:[#allocation11 + $0xb8] ss:$28 sps:$4 sm:$0xff]  }
 0x3a9   :  { %5559 = vmatpush1.bf16.msra.mxu1 %v7315_v60  ;;  %5414 = vmatprep.subr.bf16.mxu0 %v7320_v61  ;;  %v7369_v60 = vld [vmem:[#allocation11 + $0xcb8] ss:$28 sps:$4 sm:$0xff]  }
 0x3aa   :  { %5560 = vmatprep.subr.bf16.mxu1 %v7323_v1  ;;  %v7374_v61 = vld [vmem:[#allocation11 + $0xf4] ss:$28 sps:$4 sm:$0xff]  }
 0x3ab   :  { %v7377_v1 = vld [vmem:[#allocation11 + $0xcf4] ss:$28 sps:$4 sm:$0xff]  }
 0x3ac   :  { %5415 = vmatpush1.bf16.msra.mxu0 %v7318_v4  ;;  %v7372_v4 = vld [vmem:[#allocation11 + $0xf0] ss:$28 sps:$4 sm:$0xff]  }
 0x3ad   :  { %5561 = vmatpush1.bf16.msra.mxu1 %v7321_v5  ;;  %5416 = vmatprep.subr.bf16.mxu0 %v7326_v50  ;;  %v7375_v5 = vld [vmem:[#allocation11 + $0xcf0] ss:$28 sps:$4 sm:$0xff]  }
 0x3ae   :  { %5562 = vmatprep.subr.bf16.mxu1 %v7329_v6  ;;  %v7380_v50 = vld [vmem:[#allocation11 + $0x12c] ss:$28 sps:$4 sm:$0xff]  }
 0x3af   :  { %v7383_v6 = vld [vmem:[#allocation11 + $0xd2c] ss:$28 sps:$4 sm:$0xff]  }
 0x3b0   :  { %5417 = vmatpush1.bf16.msra.mxu0 %v7324_v28  ;;  %v7378_v28 = vld [vmem:[#allocation11 + $0x128] ss:$28 sps:$4 sm:$0xff]  }
 0x3b1   :  { %5563 = vmatpush1.bf16.msra.mxu1 %v7327_v7  ;;  %5418 = vmatprep.subr.bf16.mxu0 %v7332_v8  ;;  %v7381_v7 = vld [vmem:[#allocation11 + $0xd28] ss:$28 sps:$4 sm:$0xff]  }
 0x3b2   :  { %5564 = vmatprep.subr.bf16.mxu1 %v7335_v9  ;;  %v7386_v8 = vld [vmem:[#allocation11 + $0x164] ss:$28 sps:$4 sm:$0xff]  }
 0x3b3   :  { %v7389_v9 = vld [vmem:[#allocation11 + $0xd64] ss:$28 sps:$4 sm:$0xff]  }
 0x3b4   :  { %5419 = vmatpush1.bf16.msra.mxu0 %v7330_v11  ;;  %v7384_v11 = vld [vmem:[#allocation11 + $0x160] ss:$28 sps:$4 sm:$0xff]  }
 0x3b5   :  { %5565 = vmatpush1.bf16.msra.mxu1 %v7333_v13  ;;  %5420 = vmatprep.subr.bf16.mxu0 %v7338_v14  ;;  %v7392_v13 = vld [vmem:[#allocation11 + $0x19c] ss:$28 sps:$4 sm:$0xff]  }
 0x3b6   :  { %v2393_v21 = vpop.f32.mrb[12].mxu1  ;;  %5566 = vmatprep.subr.bf16.mxu1 %v7341_v15  ;;  %v7395_v14 = vld [vmem:[#allocation11 + $0xd9c] ss:$28 sps:$4 sm:$0xff]  }
 0x3b7   :  { %v6859_v24 = vadd.f32 %v2393_v21, %v779_v17  ;;  %v2395_v25 = vpop.f32.mrb[13].mxu1  ;;  %v7390_v15 = vld [vmem:[#allocation11 + $0x198] ss:$28 sps:$4 sm:$0xff]  }
 0x3b8   :  { %v6860_v26 = vadd.f32 %v2395_v25, %v783_v19  ;;  %5421 = vmatpush1.bf16.msra.mxu0 %v7336_v18  ;;  %v2397_v31 = vpop.f32.mrb[14].mxu1  ;;  %v7398_v17 = vld [vmem:[#allocation11 + $0x1d4] ss:$28 sps:$4 sm:$0xff]   ;;  %v7409_v25 = vld [vmem:[#allocation11 + $0x244] ss:$28 sps:$4 sm:$0xff]  }
 0x3b9   :  { %v2406_v33 = vmax.f32 %v6859_v24, 0.0  ;;  %5567 = vmatpush1.bf16.msra.mxu1 %v7339_v27  ;;  %v2398_v35 = vpop.f32.mrb[15].mxu1  ;;  %5422 = vmatprep.subr.bf16.mxu0 %v7344_v20  ;;  %v7401_v18 = vld [vmem:[#allocation11 + $0xdd4] ss:$28 sps:$4 sm:$0xff]   ;;  %v7404_v20 = vld [vmem:[#allocation11 + $0x20c] ss:$28 sps:$4 sm:$0xff]  }
 0x3ba   :  { %v2407_v30 = vmax.f32 %v6860_v26, 0.0  ;;  %5568 = vmatprep.subr.bf16.mxu1 %v7347_v23  ;;  %v7396_v19 = vld [vmem:[#allocation11 + $0x1d0] ss:$28 sps:$4 sm:$0xff]   ;;  %v7405_v21 = vld [vmem:[#allocation11 + $0x1d8] ss:$28 sps:$4 sm:$0xff]  }
 0x3bb   :  { %v8088_v43 = vpack.c.bf16 %v2406_v33, %v2406_v33  ;;  %v7399_v27 = vld [vmem:[#allocation11 + $0xdd0] ss:$28 sps:$4 sm:$0xff]   ;;  %v7402_v23 = vld [vmem:[#allocation11 + $0x208] ss:$28 sps:$4 sm:$0xff]   ;;  %v7406_v24 = vld [vmem:[#allocation11 + $0x18] ss:$28 sps:$4 sm:$0xff]  }
 0x3bc   :  { %v8086_v41 = vpack.c.bf16 %v2407_v30, %v2407_v30  ;;  %5423 = vmatpush1.bf16.msra.mxu0 %v7342_v32  ;;  %v7410_v26 = vld [vmem:[#allocation11 + $0x210] ss:$28 sps:$4 sm:$0xff]   ;;  %v7407_v31 = vld [vmem:[#allocation11 + $0x240] ss:$28 sps:$4 sm:$0xff]   ;;  %v7415_v35 = vld [vmem:[#allocation11 + $0x248] ss:$28 sps:$4 sm:$0xff]  }
 0x3bd   :  { %5569 = vmatpush1.bf16.msra.mxu1 %v7345_v37  ;;  %5597 = vmatprep.subr.bf16.mxu0 %v7350_v39  ;;  %v7411_v32 = vld [vmem:[#allocation11 + $0x50] ss:$28 sps:$4 sm:$0xff]   ;;  %v7414_v33 = vld [vmem:[#allocation11 + $0x27c] ss:$28 sps:$4 sm:$0xff]   ;;  %v7416_v39 = vld [vmem:[#allocation11 + $0x88] ss:$28 sps:$4 sm:$0xff]  }
 0x3be   :  { %5424 = vmatprep.mubr.bf16.mxu0 %v8086_v41  ;;  %5588 = vmatprep.mubr.bf16.mxu1 %v8086_v41  ;;  %v7412_v37 = vld [vmem:[#allocation11 + $0x278] ss:$28 sps:$4 sm:$0xff]  }
 0x3bf   :  { %5425 = vmatmul.mubr.bf16.vlgmr.msra.gmra.mrb[12].mxu0 %v8088_v43  ;;  %5570 = vmatprep.subr.bf16.mxu1 %v7353_v40  ;;  %v7419_v30 = vld [vmem:[#allocation11 + $0x2b4] ss:$28 sps:$4 sm:$0xff]   ;;  %v7420_v40 = vld [vmem:[#allocation11 + $0x280] ss:$28 sps:$4 sm:$0xff]  }
 0x3c0   :  { %5598 = vmatpush1.bf16.msra.mxu0 %v7348_v42  ;;  %5629 = vmatprep.mubr.bf16.mxu0 %v8042_v34  ;;  %v7417_v42 = vld [vmem:[#allocation11 + $0x2b0] ss:$28 sps:$4 sm:$0xff]  }
 0x3c1   :  { %5571 = vmatpush1.bf16.msra.mxu1 %v7351_v44  ;;  %5599 = vmatprep.subr.bf16.mxu0 %v7356_v45  ;;  %v7421_v44 = vld [vmem:[#allocation11 + $0xc0] ss:$28 sps:$4 sm:$0xff]   ;;  %v7424_v45 = vld [vmem:[#allocation11 + $0x2ec] ss:$28 sps:$4 sm:$0xff]  }
 0x3c2   :  { %5572 = vmatprep.subr.bf16.mxu1 %v7359_v46  ;;  %v7422_v46 = vld [vmem:[#allocation11 + $0x2e8] ss:$28 sps:$4 sm:$0xff]  }
 0x3c4   :  { %5600 = vmatpush1.bf16.msra.mxu0 %v7354_v47  ;;  %v7426_v47 = vld [vmem:[#allocation11 + $0xf8] ss:$28 sps:$4 sm:$0xff]  }
 0x3c5   :  { %5573 = vmatpush1.bf16.msra.mxu1 %v7357_v49  ;;  %5601 = vmatprep.subr.bf16.mxu0 %v7362_v52  ;;  %v7429_v49 = vld [vmem:[#allocation11 + $0x324] ss:$28 sps:$4 sm:$0xff]   ;;  %v7430_v52 = vld [vmem:[#allocation11 + $0x2f0] ss:$28 sps:$4 sm:$0xff]  }
 0x3c6   :  { %5574 = vmatprep.subr.bf16.mxu1 %v7365_v54  ;;  %v7427_v54 = vld [vmem:[#allocation11 + $0x320] ss:$28 sps:$4 sm:$0xff]  }
 0x3c8   :  { %5602 = vmatpush1.bf16.msra.mxu0 %v7360_v55  ;;  %v7431_v55 = vld [vmem:[#allocation11 + $0x130] ss:$28 sps:$4 sm:$0xff]  }
 0x3c9   :  { %5575 = vmatpush1.bf16.msra.mxu1 %v7363_v57  ;;  %5603 = vmatprep.subr.bf16.mxu0 %v7368_v58  ;;  %v7434_v57 = vld [vmem:[#allocation11 + $0x35c] ss:$28 sps:$4 sm:$0xff]   ;;  %v7435_v58 = vld [vmem:[#allocation11 + $0x328] ss:$28 sps:$4 sm:$0xff]  }
 0x3ca   :  { %5576 = vmatprep.subr.bf16.mxu1 %v7371_v59  ;;  %v7432_v59 = vld [vmem:[#allocation11 + $0x358] ss:$28 sps:$4 sm:$0xff]  }
 0x3cc   :  { %5604 = vmatpush1.bf16.msra.mxu0 %v7366_v29  ;;  %v7436_v29 = vld [vmem:[#allocation11 + $0x168] ss:$28 sps:$4 sm:$0xff]  }
 0x3cd   :  { %5577 = vmatpush1.bf16.msra.mxu1 %v7369_v60  ;;  %5605 = vmatprep.subr.bf16.mxu0 %v7374_v61  ;;  %v7439_v60 = vld [vmem:[#allocation11 + $0x394] ss:$28 sps:$4 sm:$0xff]   ;;  %v7440_v61 = vld [vmem:[#allocation11 + $0x360] ss:$28 sps:$4 sm:$0xff]  }
 0x3ce   :  { %5578 = vmatprep.subr.bf16.mxu1 %v7377_v1  ;;  %v7437_v1 = vld [vmem:[#allocation11 + $0x390] ss:$28 sps:$4 sm:$0xff]  }
 0x3d0   :  { %5606 = vmatpush1.bf16.msra.mxu0 %v7372_v4  ;;  %v7441_v4 = vld [vmem:[#allocation11 + $0x1a0] ss:$28 sps:$4 sm:$0xff]  }
 0x3d1   :  { %5579 = vmatpush1.bf16.msra.mxu1 %v7375_v5  ;;  %5607 = vmatprep.subr.bf16.mxu0 %v7380_v50  ;;  %v7444_v5 = vld [vmem:[#allocation11 + $0x3cc] ss:$28 sps:$4 sm:$0xff]   ;;  %v7445_v50 = vld [vmem:[#allocation11 + $0x558] ss:$28 sps:$4 sm:$0xff]  }
 0x3d2   :  { %5580 = vmatprep.subr.bf16.mxu1 %v7383_v6  ;;  %v7442_v6 = vld [vmem:[#allocation11 + $0x3c8] ss:$28 sps:$4 sm:$0xff]  }
 0x3d4   :  { %5608 = vmatpush1.bf16.msra.mxu0 %v7378_v28  ;;  %v7446_v28 = vld [vmem:[#allocation11 + $0x398] ss:$28 sps:$4 sm:$0xff]  }
 0x3d5   :  { %5581 = vmatpush1.bf16.msra.mxu1 %v7381_v7  ;;  %5609 = vmatprep.subr.bf16.mxu0 %v7386_v8  ;;  %v7449_v7 = vld [vmem:[#allocation11 + $0x404] ss:$28 sps:$4 sm:$0xff]   ;;  %v7450_v8 = vld [vmem:[#allocation11 + $0x590] ss:$28 sps:$4 sm:$0xff]  }
 0x3d6   :  { %5582 = vmatprep.subr.bf16.mxu1 %v7389_v9  ;;  %v7447_v9 = vld [vmem:[#allocation11 + $0x400] ss:$28 sps:$4 sm:$0xff]  }
 0x3d8   :  { %5610 = vmatpush1.bf16.msra.mxu0 %v7384_v11  ;;  %v7451_v11 = vld [vmem:[#allocation11 + $0x3d0] ss:$28 sps:$4 sm:$0xff]  }
 0x3d9   :  { %5583 = vmatpush1.bf16.msra.mxu1 %v7387_v12  ;;  %5611 = vmatprep.subr.bf16.mxu0 %v7392_v13  ;;  %v7454_v12 = vld [vmem:[#allocation11 + $0x43c] ss:$28 sps:$4 sm:$0xff]   ;;  %v7455_v13 = vld [vmem:[#allocation11 + $0x5c8] ss:$28 sps:$4 sm:$0xff]  }
 0x3da   :  { %5584 = vmatprep.subr.bf16.mxu1 %v7395_v14  ;;  %v7452_v14 = vld [vmem:[#allocation11 + $0x438] ss:$28 sps:$4 sm:$0xff]  }
 0x3dc   :  { %5612 = vmatpush1.bf16.msra.mxu0 %v7390_v15  ;;  %v7456_v15 = vld [vmem:[#allocation11 + $0x408] ss:$28 sps:$4 sm:$0xff]  }
 0x3dd   :  { %5585 = vmatpush1.bf16.msra.mxu1 %v7393_v16  ;;  %5613 = vmatprep.subr.bf16.mxu0 %v7398_v17  ;;  %v7459_v16 = vld [vmem:[#allocation11 + $0x474] ss:$28 sps:$4 sm:$0xff]   ;;  %v7460_v17 = vld [vmem:[#allocation11 + $0x600] ss:$28 sps:$4 sm:$0xff]  }
 0x3de   :  { %5586 = vmatprep.subr.bf16.mxu1 %v7401_v18  ;;  %v7457_v18 = vld [vmem:[#allocation11 + $0x470] ss:$28 sps:$4 sm:$0xff]  }
 0x3e0   :  { %5614 = vmatpush1.bf16.msra.mxu0 %v7396_v19  ;;  %v7464_v19 = vld [vmem:[#allocation11 + $0x4ac] ss:$28 sps:$4 sm:$0xff]  }
 0x3e1   :  { %5587 = vmatpush1.bf16.msra.mxu1 %v7399_v27  ;;  %5615 = vmatprep.subr.bf16.mxu0 %v7404_v20  ;;  %v7462_v27 = vld [vmem:[#allocation11 + $0x4a8] ss:$28 sps:$4 sm:$0xff]   ;;  %v7466_v20 = vld [vmem:[#allocation11 + $0x478] ss:$28 sps:$4 sm:$0xff]  }
 0x3e2   :  { %6763 = vmatprep.subr.bf16.mxu1 %v7405_v21  ;;  %v7469_v21 = vld [vmem:[#allocation11 + $0x4e4] ss:$28 sps:$4 sm:$0xff]  }
 0x3e4   :  { %5589 = vmatmul.mubr.bf16.vlgmr.msra.gmra.mrb[16].mxu1 %v8088_v43  ;;  %5616 = vmatpush1.bf16.msra.mxu0 %v7402_v23  ;;  %v7470_v23 = vld [vmem:[#allocation11 + $0x670] ss:$28 sps:$4 sm:$0xff]  }
 0x3e5   :  { %6764 = vmatpush3.bf16.msra.mxu1 %v7406_v24  ;;  %5793 = vmatprep.mubr.bf16.mxu1 %v8042_v34  ;;  %v7425_v34 = vld [vmem:[#allocation11 + $0x2b8] ss:$28 sps:$4 sm:$0xff]   ;;  %v7467_v24 = vld [vmem:[#allocation11 + $0x4e0] ss:$28 sps:$4 sm:$0xff]  }
 0x3e6   :  { %5617 = vmatprep.subr.bf16.mxu0 %v7409_v25  ;;  %6765 = vmatprep.subr.bf16.mxu1 %v7410_v26  ;;  %v7471_v25 = vld [vmem:[#allocation11 + $0x4b0] ss:$28 sps:$4 sm:$0xff]   ;;  %v7474_v26 = vld [vmem:[#allocation11 + $0x51c] ss:$28 sps:$4 sm:$0xff]  }
 0x3e8   :  { %5618 = vmatpush1.bf16.msra.mxu0 %v7407_v31  ;;  %v7475_v31 = vld [vmem:[#allocation11 + $0x6a8] ss:$28 sps:$4 sm:$0xff]  }
 0x3e9   :  { %6766 = vmatpush3.bf16.msra.mxu1 %v7411_v32  ;;  %5619 = vmatprep.subr.bf16.mxu0 %v7414_v33  ;;  %v7472_v32 = vld [vmem:[#allocation11 + $0x518] ss:$28 sps:$4 sm:$0xff]   ;;  %v7476_v33 = vld [vmem:[#allocation11 + $0x4e8] ss:$28 sps:$4 sm:$0xff]  }
 0x3ea   :  { %6767 = vmatprep.subr.bf16.mxu1 %v7415_v35  ;;  %v7479_v35 = vld [vmem:[#allocation11 + $0x554] ss:$28 sps:$4 sm:$0xff]  }
 0x3ec   :  { %5620 = vmatpush1.bf16.msra.mxu0 %v7412_v37  ;;  %v7480_v37 = vld [vmem:[#allocation11 + $0x6e0] ss:$28 sps:$4 sm:$0xff]  }
 0x3ed   :  { %6768 = vmatpush3.bf16.msra.mxu1 %v7416_v39  ;;  %5621 = vmatprep.subr.bf16.mxu0 %v7419_v30  ;;  %v7477_v39 = vld [vmem:[#allocation11 + $0x550] ss:$28 sps:$4 sm:$0xff]   ;;  %v7481_v30 = vld [vmem:[#allocation11 + $0x520] ss:$28 sps:$4 sm:$0xff]  }
 0x3ee   :  { %6769 = vmatprep.subr.bf16.mxu1 %v7420_v40  ;;  %v7484_v40 = vld [vmem:[#allocation11 + $0x58c] ss:$28 sps:$4 sm:$0xff]  }
 0x3f0   :  { %5622 = vmatpush1.bf16.msra.mxu0 %v7417_v42  ;;  %v7485_v42 = vld [vmem:[#allocation11 + $0x8d8] ss:$28 sps:$4 sm:$0xff]  }
 0x3f1   :  { %6770 = vmatpush3.bf16.msra.mxu1 %v7421_v44  ;;  %5623 = vmatprep.subr.bf16.mxu0 %v7424_v45  ;;  %v7482_v44 = vld [vmem:[#allocation11 + $0x588] ss:$28 sps:$4 sm:$0xff]   ;;  %v7486_v45 = vld [vmem:[#allocation11 + $0x718] ss:$28 sps:$4 sm:$0xff]  }
 0x3f2   :  { %6771 = vmatprep.subr.bf16.mxu1 %v7425_v34  ;;  %v7489_v34 = vld [vmem:[#allocation11 + $0x5c4] ss:$28 sps:$4 sm:$0xff]  }
 0x3f4   :  { %5624 = vmatpush1.bf16.msra.mxu0 %v7422_v46  ;;  %v7490_v46 = vld [vmem:[#allocation11 + $0x910] ss:$28 sps:$4 sm:$0xff]  }
 0x3f5   :  { %6772 = vmatpush3.bf16.msra.mxu1 %v7426_v47  ;;  %5625 = vmatprep.subr.bf16.mxu0 %v7429_v49  ;;  %v7487_v47 = vld [vmem:[#allocation11 + $0x5c0] ss:$28 sps:$4 sm:$0xff]   ;;  %v7491_v49 = vld [vmem:[#allocation11 + $0x750] ss:$28 sps:$4 sm:$0xff]  }
 0x3f6   :  { %6773 = vmatprep.subr.bf16.mxu1 %v7430_v52  ;;  %v7494_v52 = vld [vmem:[#allocation11 + $0x5fc] ss:$28 sps:$4 sm:$0xff]  }
 0x3f8   :  { %5626 = vmatpush1.bf16.msra.mxu0 %v7427_v54  ;;  %v7495_v54 = vld [vmem:[#allocation11 + $0x948] ss:$28 sps:$4 sm:$0xff]  }
 0x3f9   :  { %6774 = vmatpush3.bf16.msra.mxu1 %v7431_v55  ;;  %5627 = vmatprep.subr.bf16.mxu0 %v7434_v57  ;;  %v7492_v55 = vld [vmem:[#allocation11 + $0x5f8] ss:$28 sps:$4 sm:$0xff]   ;;  %v7496_v57 = vld [vmem:[#allocation11 + $0x788] ss:$28 sps:$4 sm:$0xff]  }
 0x3fa   :  { %6775 = vmatprep.subr.bf16.mxu1 %v7435_v58  ;;  %v7499_v58 = vld [vmem:[#allocation11 + $0x634] ss:$28 sps:$4 sm:$0xff]  }
 0x3fc   :  { %5628 = vmatpush1.bf16.msra.mxu0 %v7432_v59  ;;  %v7500_v59 = vld [vmem:[#allocation11 + $0x980] ss:$28 sps:$4 sm:$0xff]  }
 0x3fd   :  { %6776 = vmatpush3.bf16.msra.mxu1 %v7436_v29  ;;  %5638 = vmatprep.subr.bf16.mxu0 %v7439_v60  ;;  %v7497_v29 = vld [vmem:[#allocation11 + $0x630] ss:$28 sps:$4 sm:$0xff]   ;;  %v7501_v60 = vld [vmem:[#allocation11 + $0x7c0] ss:$28 sps:$4 sm:$0xff]  }
 0x3fe   :  { %6777 = vmatprep.subr.bf16.mxu1 %v7440_v61  ;;  %v7504_v61 = vld [vmem:[#allocation11 + $0x66c] ss:$28 sps:$4 sm:$0xff]  }
 0x3ff   :  { %5630 = vmatmul.mubr.bf16.vlgmr.msra.gmra.mrb[16].mxu0 %v8044_v38 }
 0x400   :  { %5639 = vmatpush1.bf16.msra.mxu0 %v7437_v1  ;;  %5670 = vmatprep.mubr.bf16.mxu0 %v8061_v51  ;;  %v7505_v1 = vld [vmem:[#allocation11 + $0x9b8] ss:$28 sps:$4 sm:$0xff]  }
 0x401   :  { %6778 = vmatpush3.bf16.msra.mxu1 %v7441_v4  ;;  %5640 = vmatprep.subr.bf16.mxu0 %v7444_v5  ;;  %v7502_v4 = vld [vmem:[#allocation11 + $0x668] ss:$28 sps:$4 sm:$0xff]   ;;  %v7506_v5 = vld [vmem:[#allocation11 + $0x7f8] ss:$28 sps:$4 sm:$0xff]  }
 0x402   :  { %6785 = vmatprep.subr.bf16.mxu1 %v7445_v50  ;;  %v7509_v50 = vld [vmem:[#allocation11 + $0x6a4] ss:$28 sps:$4 sm:$0xff]  }
 0x404   :  { %5641 = vmatpush1.bf16.msra.mxu0 %v7442_v6  ;;  %5794 = vmatmul.mubr.bf16.vlgmr.msra.gmra.mrb[20].mxu1 %v8044_v38  ;;  %v7461_v38 = vld [vmem:[#allocation11 + $0x440] ss:$28 sps:$4 sm:$0xff]   ;;  %v7510_v6 = vld [vmem:[#allocation11 + $0x9f0] ss:$28 sps:$4 sm:$0xff]  }
 0x405   :  { %6786 = vmatpush3.bf16.msra.mxu1 %v7446_v28  ;;  %5833 = vmatprep.mubr.bf16.mxu1 %v8061_v51  ;;  %v7465_v51 = vld [vmem:[#allocation11 + $0x638] ss:$28 sps:$4 sm:$0xff]   ;;  %v7507_v28 = vld [vmem:[#allocation11 + $0x6a0] ss:$28 sps:$4 sm:$0xff]  }
 0x406   :  { %5642 = vmatprep.subr.bf16.mxu0 %v7449_v7  ;;  %6787 = vmatprep.subr.bf16.mxu1 %v7450_v8  ;;  %v7511_v7 = vld [vmem:[#allocation11 + $0x830] ss:$28 sps:$4 sm:$0xff]   ;;  %v7514_v8 = vld [vmem:[#allocation11 + $0x6dc] ss:$28 sps:$4 sm:$0xff]  }
 0x408   :  { %5643 = vmatpush1.bf16.msra.mxu0 %v7447_v9  ;;  %v7515_v9 = vld [vmem:[#allocation11 + $0xa28] ss:$28 sps:$4 sm:$0xff]  }
 0x409   :  { %6788 = vmatpush3.bf16.msra.mxu1 %v7451_v11  ;;  %5644 = vmatprep.subr.bf16.mxu0 %v7454_v12  ;;  %v7512_v11 = vld [vmem:[#allocation11 + $0x6d8] ss:$28 sps:$4 sm:$0xff]   ;;  %v7516_v12 = vld [vmem:[#allocation11 + $0x868] ss:$28 sps:$4 sm:$0xff]  }
 0x40a   :  { %6789 = vmatprep.subr.bf16.mxu1 %v7455_v13  ;;  %v7519_v13 = vld [vmem:[#allocation11 + $0x714] ss:$28 sps:$4 sm:$0xff]  }
 0x40c   :  { %5645 = vmatpush1.bf16.msra.mxu0 %v7452_v14  ;;  %v7520_v14 = vld [vmem:[#allocation11 + $0xa60] ss:$28 sps:$4 sm:$0xff]  }
 0x40d   :  { %6790 = vmatpush3.bf16.msra.mxu1 %v7456_v15  ;;  %5646 = vmatprep.subr.bf16.mxu0 %v7459_v16  ;;  %v7517_v15 = vld [vmem:[#allocation11 + $0x710] ss:$28 sps:$4 sm:$0xff]   ;;  %v7521_v16 = vld [vmem:[#allocation11 + $0x8a0] ss:$28 sps:$4 sm:$0xff]  }
 0x40e   :  { %6791 = vmatprep.subr.bf16.mxu1 %v7460_v17  ;;  %v7524_v17 = vld [vmem:[#allocation11 + $0x74c] ss:$28 sps:$4 sm:$0xff]  }
 0x410   :  { %5647 = vmatpush1.bf16.msra.mxu0 %v7457_v18  ;;  %v7525_v18 = vld [vmem:[#allocation11 + $0xc58] ss:$28 sps:$4 sm:$0xff]  }
 0x411   :  { %6792 = vmatpush3.bf16.msra.mxu1 %v7461_v38  ;;  %5648 = vmatprep.subr.bf16.mxu0 %v7464_v19  ;;  %v7522_v38 = vld [vmem:[#allocation11 + $0x748] ss:$28 sps:$4 sm:$0xff]   ;;  %v7526_v19 = vld [vmem:[#allocation11 + $0xa98] ss:$28 sps:$4 sm:$0xff]  }
 0x412   :  { %6793 = vmatprep.subr.bf16.mxu1 %v7465_v51  ;;  %v7529_v51 = vld [vmem:[#allocation11 + $0x784] ss:$28 sps:$4 sm:$0xff]  }
 0x414   :  { %5649 = vmatpush1.bf16.msra.mxu0 %v7462_v27  ;;  %v7530_v27 = vld [vmem:[#allocation11 + $0xc90] ss:$28 sps:$4 sm:$0xff]  }
 0x415   :  { %6794 = vmatpush3.bf16.msra.mxu1 %v7466_v20  ;;  %5650 = vmatprep.subr.bf16.mxu0 %v7469_v21  ;;  %v7527_v20 = vld [vmem:[#allocation11 + $0x780] ss:$28 sps:$4 sm:$0xff]   ;;  %v7531_v21 = vld [vmem:[#allocation11 + $0xad0] ss:$28 sps:$4 sm:$0xff]  }
 0x416   :  { %6795 = vmatprep.subr.bf16.mxu1 %v7470_v23  ;;  %v7534_v23 = vld [vmem:[#allocation11 + $0x7bc] ss:$28 sps:$4 sm:$0xff]  }
 0x418   :  { %5651 = vmatpush1.bf16.msra.mxu0 %v7467_v24  ;;  %v7536_v24 = vld [vmem:[#allocation11 + $0xb08] ss:$28 sps:$4 sm:$0xff]  }
 0x419   :  { %6796 = vmatpush3.bf16.msra.mxu1 %v7471_v25  ;;  %5652 = vmatprep.subr.bf16.mxu0 %v7474_v26  ;;  %v7539_v25 = vld [vmem:[#allocation11 + $0x7f4] ss:$28 sps:$4 sm:$0xff]   ;;  %v7540_v26 = vld [vmem:[#allocation11 + $0xd00] ss:$28 sps:$4 sm:$0xff]  }
 0x41a   :  { %6797 = vmatprep.subr.bf16.mxu1 %v7475_v31  ;;  %v7537_v31 = vld [vmem:[#allocation11 + $0x7f0] ss:$28 sps:$4 sm:$0xff]  }
 0x41c   :  { %5653 = vmatpush1.bf16.msra.mxu0 %v7472_v32  ;;  %v7541_v32 = vld [vmem:[#allocation11 + $0xb40] ss:$28 sps:$4 sm:$0xff]  }
 0x41d   :  { %6798 = vmatpush3.bf16.msra.mxu1 %v7476_v33  ;;  %5654 = vmatprep.subr.bf16.mxu0 %v7479_v35  ;;  %v7544_v33 = vld [vmem:[#allocation11 + $0x82c] ss:$28 sps:$4 sm:$0xff]   ;;  %v7545_v35 = vld [vmem:[#allocation11 + $0xd38] ss:$28 sps:$4 sm:$0xff]  }
 0x41e   :  { %6799 = vmatprep.subr.bf16.mxu1 %v7480_v37  ;;  %v7542_v37 = vld [vmem:[#allocation11 + $0x828] ss:$28 sps:$4 sm:$0xff]  }
 0x420   :  { %5655 = vmatpush1.bf16.msra.mxu0 %v7477_v39  ;;  %v7546_v39 = vld [vmem:[#allocation11 + $0xb78] ss:$28 sps:$4 sm:$0xff]  }
 0x421   :  { %6800 = vmatpush3.bf16.msra.mxu1 %v7481_v30  ;;  %5656 = vmatprep.subr.bf16.mxu0 %v7484_v40  ;;  %v7549_v30 = vld [vmem:[#allocation11 + $0x864] ss:$28 sps:$4 sm:$0xff]   ;;  %v7550_v40 = vld [vmem:[#allocation11 + $0xd70] ss:$28 sps:$4 sm:$0xff]  }
 0x422   :  { %6807 = vmatprep.subr.bf16.mxu1 %v7485_v42  ;;  %v7547_v42 = vld [vmem:[#allocation11 + $0x860] ss:$28 sps:$4 sm:$0xff]  }
 0x424   :  { %5657 = vmatpush1.bf16.msra.mxu0 %v7482_v44  ;;  %5834 = vmatmul.mubr.bf16.vlgmr.msra.gmra.mrb[24].mxu1 %v8063_v53  ;;  %v7551_v44 = vld [vmem:[#allocation11 + $0xbb0] ss:$28 sps:$4 sm:$0xff]  }
 0x425   :  { %6808 = vmatpush3.bf16.msra.mxu1 %v7486_v45  ;;  %5873 = vmatprep.mubr.bf16.mxu1 %v8065_v56  ;;  %v7554_v45 = vld [vmem:[#allocation11 + $0x89c] ss:$28 sps:$4 sm:$0xff]  }
 0x426   :  { %5658 = vmatprep.subr.bf16.mxu0 %v7489_v34  ;;  %6809 = vmatprep.subr.bf16.mxu1 %v7490_v46  ;;  %v7555_v34 = vld [vmem:[#allocation11 + $0xda8] ss:$28 sps:$4 sm:$0xff]   ;;  %v7552_v46 = vld [vmem:[#allocation11 + $0x898] ss:$28 sps:$4 sm:$0xff]  }
 0x428   :  { %5659 = vmatpush1.bf16.msra.mxu0 %v7487_v47  ;;  %v7556_v47 = vld [vmem:[#allocation11 + $0xbe8] ss:$28 sps:$4 sm:$0xff]  }
 0x429   :  { %6810 = vmatpush3.bf16.msra.mxu1 %v7491_v49  ;;  %5660 = vmatprep.subr.bf16.mxu0 %v7494_v52  ;;  %v7559_v49 = vld [vmem:[#allocation11 + $0x8d4] ss:$28 sps:$4 sm:$0xff]   ;;  %v7560_v52 = vld [vmem:[#allocation11 + $0xde0] ss:$28 sps:$4 sm:$0xff]  }
 0x42a   :  { %6811 = vmatprep.subr.bf16.mxu1 %v7495_v54  ;;  %v7557_v54 = vld [vmem:[#allocation11 + $0x8d0] ss:$28 sps:$4 sm:$0xff]  }
 0x42c   :  { %5661 = vmatpush1.bf16.msra.mxu0 %v7492_v55  ;;  %v7561_v55 = vld [vmem:[#allocation11 + $0xc20] ss:$28 sps:$4 sm:$0xff]  }
 0x42d   :  { %6812 = vmatpush3.bf16.msra.mxu1 %v7496_v57  ;;  %5662 = vmatprep.subr.bf16.mxu0 %v7499_v58  ;;  %v7564_v57 = vld [vmem:[#allocation11 + $0x90c] ss:$28 sps:$4 sm:$0xff]  }
 0x42e   :  { %6813 = vmatprep.subr.bf16.mxu1 %v7500_v59  ;;  %v7562_v58 = vld [vmem:[#allocation11 + $0x908] ss:$28 sps:$4 sm:$0xff]  }
 0x42f   :  { %v7567_v59 = vld [vmem:[#allocation11 + $0x944] ss:$28 sps:$4 sm:$0xff]  }
 0x430   :  { %5663 = vmatpush1.bf16.msra.mxu0 %v7497_v29  ;;  %v7565_v29 = vld [vmem:[#allocation11 + $0x940] ss:$28 sps:$4 sm:$0xff]  }
 0x431   :  { %6814 = vmatpush3.bf16.msra.mxu1 %v7501_v60  ;;  %5664 = vmatprep.subr.bf16.mxu0 %v7504_v61  ;;  %v7570_v60 = vld [vmem:[#allocation11 + $0x97c] ss:$28 sps:$4 sm:$0xff]  }
 0x432   :  { %6815 = vmatprep.subr.bf16.mxu1 %v7505_v1  ;;  %v7568_v61 = vld [vmem:[#allocation11 + $0x978] ss:$28 sps:$4 sm:$0xff]  }
 0x433   :  { %v7573_v1 = vld [vmem:[#allocation11 + $0x9b4] ss:$28 sps:$4 sm:$0xff]  }
 0x434   :  { %5665 = vmatpush1.bf16.msra.mxu0 %v7502_v4  ;;  %v7571_v4 = vld [vmem:[#allocation11 + $0x9b0] ss:$28 sps:$4 sm:$0xff]  }
 0x435   :  { %6816 = vmatpush3.bf16.msra.mxu1 %v7506_v5  ;;  %5666 = vmatprep.subr.bf16.mxu0 %v7509_v50  ;;  %v7576_v5 = vld [vmem:[#allocation11 + $0x9ec] ss:$28 sps:$4 sm:$0xff]  }
 0x436   :  { %6817 = vmatprep.subr.bf16.mxu1 %v7510_v6  ;;  %v7574_v50 = vld [vmem:[#allocation11 + $0x9e8] ss:$28 sps:$4 sm:$0xff]  }
 0x437   :  { %v7579_v6 = vld [vmem:[#allocation11 + $0xa24] ss:$28 sps:$4 sm:$0xff]  }
 0x438   :  { %5667 = vmatpush1.bf16.msra.mxu0 %v7507_v28  ;;  %v7577_v28 = vld [vmem:[#allocation11 + $0xa20] ss:$28 sps:$4 sm:$0xff]  }
 0x439   :  { %6818 = vmatpush3.bf16.msra.mxu1 %v7511_v7  ;;  %5668 = vmatprep.subr.bf16.mxu0 %v7514_v8  ;;  %v7582_v7 = vld [vmem:[#allocation11 + $0xa5c] ss:$28 sps:$4 sm:$0xff]  }
 0x43a   :  { %6819 = vmatprep.subr.bf16.mxu1 %v7515_v9  ;;  %v7580_v8 = vld [vmem:[#allocation11 + $0xa58] ss:$28 sps:$4 sm:$0xff]  }
 0x43b   :  { %v7585_v9 = vld [vmem:[#allocation11 + $0xa94] ss:$28 sps:$4 sm:$0xff]  }
 0x43c   :  { %5669 = vmatpush1.bf16.msra.mxu0 %v7512_v11  ;;  %v7583_v11 = vld [vmem:[#allocation11 + $0xa90] ss:$28 sps:$4 sm:$0xff]  }
 0x43d   :  { %6820 = vmatpush3.bf16.msra.mxu1 %v7516_v12  ;;  %5679 = vmatprep.subr.bf16.mxu0 %v7519_v13  ;;  %v7588_v12 = vld [vmem:[#allocation11 + $0xacc] ss:$28 sps:$4 sm:$0xff]  }
 0x43e   :  { %6821 = vmatprep.subr.bf16.mxu1 %v7520_v14  ;;  %v7586_v13 = vld [vmem:[#allocation11 + $0xac8] ss:$28 sps:$4 sm:$0xff]  }
 0x43f   :  { %5671 = vmatmul.mubr.bf16.vlgmr.msra.gmra.mrb[16].mxu0 %v8063_v53  ;;  %v7535_v53 = vld [vmem:[#allocation11 + $0xcc8] ss:$28 sps:$4 sm:$0xff]  }
 0x440   :  { %5680 = vmatpush1.bf16.msra.mxu0 %v7517_v15  ;;  %5711 = vmatprep.mubr.bf16.mxu0 %v8065_v56  ;;  %v7532_v56 = vld [vmem:[#allocation11 + $0x7b8] ss:$28 sps:$4 sm:$0xff]   ;;  %v7591_v14 = vld [vmem:[#allocation11 + $0xb04] ss:$28 sps:$4 sm:$0xff]  }
 0x441   :  { %6822 = vmatpush3.bf16.msra.mxu1 %v7521_v16  ;;  %5681 = vmatprep.subr.bf16.mxu0 %v7524_v17  ;;  %v7589_v15 = vld [vmem:[#allocation11 + $0xb00] ss:$28 sps:$4 sm:$0xff]   ;;  %v7592_v17 = vld [vmem:[#allocation11 + $0xb38] ss:$28 sps:$4 sm:$0xff]  }
 0x442   :  { %6829 = vmatprep.subr.bf16.mxu1 %v7525_v18  ;;  %v7594_v16 = vld [vmem:[#allocation11 + $0xb3c] ss:$28 sps:$4 sm:$0xff]   ;;  %v7597_v18 = vld [vmem:[#allocation11 + $0xb74] ss:$28 sps:$4 sm:$0xff]  }
 0x444   :  { %5682 = vmatpush1.bf16.msra.mxu0 %v7522_v38  ;;  %5874 = vmatmul.mubr.bf16.vlgmr.msra.gmra.mrb[28].mxu1 %v8078_v10  ;;  %v7595_v38 = vld [vmem:[#allocation11 + $0xb70] ss:$28 sps:$4 sm:$0xff]  }
 0x445   :  { %6830 = vmatpush3.bf16.msra.mxu1 %v7526_v19  ;;  %5913 = vmatprep.mubr.bf16.mxu1 %v8086_v41  ;;  %v8109_v19 = vld [vmem:[#allocation13] sm:$0xff] }
 0x446   :  { %5683 = vmatprep.subr.bf16.mxu0 %v7529_v51  ;;  %6831 = vmatprep.subr.bf16.mxu1 %v7530_v27  ;;  %v7598_v51 = vld [vmem:[#allocation11 + $0xba8] ss:$28 sps:$4 sm:$0xff]   ;;  %v2937_v27 = vrot.slane %v8109_v19, %v8004_v2  ;;  %v7609_v2 = vld [vmem:[#allocation11 + $0xc54] ss:$28 sps:$4 sm:$0xff]  }
 0x448   :  { %5684 = vmatpush1.bf16.msra.mxu0 %v7527_v20  ;;  %v7603_v20 = vld [vmem:[#allocation11 + $0xbe4] ss:$28 sps:$4 sm:$0xff]  }
 0x449   :  { %6832 = vmatpush3.bf16.msra.mxu1 %v7531_v21  ;;  %5685 = vmatprep.subr.bf16.mxu0 %v7534_v23 }
 0x44a   :  { %6833 = vmatprep.subr.bf16.mxu1 %v7535_v53 }
 0x44c   :  { %5686 = vmatpush1.bf16.msra.mxu0 %v7532_v56 }
 0x44d   :  { %6834 = vmatpush3.bf16.msra.mxu1 %v7536_v24  ;;  %5687 = vmatprep.subr.bf16.mxu0 %v7539_v25  ;;  %v7601_v25 = vld [vmem:[#allocation11 + $0xbe0] ss:$28 sps:$4 sm:$0xff]  }
 0x44e   :  { %6835 = vmatprep.subr.bf16.mxu1 %v7540_v26 }
 0x450   :  { %5688 = vmatpush1.bf16.msra.mxu0 %v7537_v31 }
 0x451   :  { %6836 = vmatpush3.bf16.msra.mxu1 %v7541_v32  ;;  %5689 = vmatprep.subr.bf16.mxu0 %v7544_v33  ;;  %v7606_v32 = vld [vmem:[#allocation11 + $0xc1c] ss:$28 sps:$4 sm:$0xff]  }
 0x452   :  { %6837 = vmatprep.subr.bf16.mxu1 %v7545_v35 }
 0x454   :  { %5690 = vmatpush1.bf16.msra.mxu0 %v7542_v37  ;;  %v7604_v37 = vld [vmem:[#allocation11 + $0xc18] ss:$28 sps:$4 sm:$0xff]  }
 0x455   :  { %6838 = vmatpush3.bf16.msra.mxu1 %v7546_v39  ;;  %5691 = vmatprep.subr.bf16.mxu0 %v7549_v30  ;;  %v7607_v39 = vld [vmem:[#allocation11 + $0xc50] ss:$28 sps:$4 sm:$0xff]  }
 0x456   :  { %6839 = vmatprep.subr.bf16.mxu1 %v7550_v40  ;;  %v7612_v30 = vld [vmem:[#allocation11 + $0xc8c] ss:$28 sps:$4 sm:$0xff]  }
 0x457   :  { %v7610_v40 = vld [vmem:[#allocation11 + $0xc88] ss:$28 sps:$4 sm:$0xff]  }
 0x458   :  { %5692 = vmatpush1.bf16.msra.mxu0 %v7547_v42  ;;  %v7615_v42 = vld [vmem:[#allocation11 + $0xcc4] ss:$28 sps:$4 sm:$0xff]  }
 0x459   :  { %6840 = vmatpush3.bf16.msra.mxu1 %v7551_v44  ;;  %5693 = vmatprep.subr.bf16.mxu0 %v7554_v45 }
 0x45a   :  { %6841 = vmatprep.subr.bf16.mxu1 %v7555_v34 }
 0x45c   :  { %5694 = vmatpush1.bf16.msra.mxu0 %v7552_v46  ;;  %v7613_v46 = vld [vmem:[#allocation11 + $0xcc0] ss:$28 sps:$4 sm:$0xff]  }
 0x45d   :  { %6842 = vmatpush3.bf16.msra.mxu1 %v7556_v47  ;;  %5695 = vmatprep.subr.bf16.mxu0 %v7559_v49  ;;  %v7618_v49 = vld [vmem:[#allocation11 + $0xcfc] ss:$28 sps:$4 sm:$0xff]  }
 0x45e   :  { %6843 = vmatprep.subr.bf16.mxu1 %v7560_v52  ;;  %v7616_v52 = vld [vmem:[#allocation11 + $0xcf8] ss:$28 sps:$4 sm:$0xff]  }
 0x460   :  { %5696 = vmatpush1.bf16.msra.mxu0 %v7557_v54  ;;  %v7621_v54 = vld [vmem:[#allocation11 + $0xd34] ss:$28 sps:$4 sm:$0xff]  }
 0x461   :  { %6844 = vmatpush3.bf16.msra.mxu1 %v7561_v55  ;;  %5697 = vmatprep.subr.bf16.mxu0 %v7564_v57  ;;  %v7619_v55 = vld [vmem:[#allocation11 + $0xd30] ss:$28 sps:$4 sm:$0xff]  }
 0x462   :  { %v7624_v57 = vld [vmem:[#allocation11 + $0xd6c] ss:$28 sps:$4 sm:$0xff]  }
 0x464   :  { %5698 = vmatpush1.bf16.msra.mxu0 %v7562_v58  ;;  %5914 = vmatmul.mubr.bf16.vlgmr.msra.gmra.mrb[32].mxu1 %v8088_v43 }
 0x465   :  { %5699 = vmatprep.subr.bf16.mxu0 %v7567_v59  ;;  %v7622_v59 = vld [vmem:[#allocation11 + $0xd68] ss:$28 sps:$4 sm:$0xff]  }
 0x468   :  { %5700 = vmatpush1.bf16.msra.mxu0 %v7565_v29 }
 0x469   :  { %5701 = vmatprep.subr.bf16.mxu0 %v7570_v60  ;;  %v7627_v60 = vld [vmem:[#allocation11 + $0xda4] ss:$28 sps:$4 sm:$0xff]  }
 0x46c   :  { %5702 = vmatpush1.bf16.msra.mxu0 %v7568_v61 }
 0x46d   :  { %5703 = vmatprep.subr.bf16.mxu0 %v7573_v1  ;;  %v2941_v1 = vrot.slane %v8109_v19, %v8001_v0 }
 0x470   :  { %5704 = vmatpush1.bf16.msra.mxu0 %v7571_v4  ;;  %v7625_v4 = vld [vmem:[#allocation11 + $0xda0] ss:$28 sps:$4 sm:$0xff]  }
 0x471   :  { %5705 = vmatprep.subr.bf16.mxu0 %v7576_v5  ;;  %v2945_v5 = vrot.slane %v8109_v19, %v8007_v3 }
 0x474   :  { %5706 = vmatpush1.bf16.msra.mxu0 %v7574_v50  ;;  %v7630_v50 = vld [vmem:[#allocation11 + $0xddc] ss:$28 sps:$4 sm:$0xff]  }
 0x475   :  { %5707 = vmatprep.subr.bf16.mxu0 %v7579_v6 }
 0x478   :  { %5708 = vmatpush1.bf16.msra.mxu0 %v7577_v28 }
 0x479   :  { %5709 = vmatprep.subr.bf16.mxu0 %v7582_v7 }
 0x47c   :  { %5710 = vmatpush1.bf16.msra.mxu0 %v7580_v8  ;;  %v7628_v8 = vld [vmem:[#allocation11 + $0xdd8] ss:$28 sps:$4 sm:$0xff]  }
 0x47d   :  { %5720 = vmatprep.subr.bf16.mxu0 %v7585_v9 }
 0x47f   :  { %5712 = vmatmul.mubr.bf16.vlgmr.msra.gmra.mrb[16].mxu0 %v8078_v10  ;;  %v7600_v10 = vld [vmem:[#allocation11 + $0xbac] ss:$28 sps:$4 sm:$0xff]  }
 0x480   :  { %5721 = vmatpush1.bf16.msra.mxu0 %v7583_v11  ;;  %5752 = vmatprep.mubr.bf16.mxu0 %v8086_v41  ;;  %v2933_v41 = vrot.slane %v8109_v19, %v7998_v63 }
 0x481   :  { %5722 = vmatprep.subr.bf16.mxu0 %v7588_v12 }
 0x484   :  { %5723 = vmatpush1.bf16.msra.mxu0 %v7586_v13 }
 0x485   :  { %5724 = vmatprep.subr.bf16.mxu0 %v7591_v14 }
 0x488   :  { %5725 = vmatpush1.bf16.msra.mxu0 %v7589_v15 }
 0x489   :  { %5726 = vmatprep.subr.bf16.mxu0 %v7594_v16 }
 0x48c   :  { %5727 = vmatpush1.bf16.msra.mxu0 %v7592_v17 }
 0x48d   :  { %5728 = vmatprep.subr.bf16.mxu0 %v7597_v18 }
 0x490   :  { %5729 = vmatpush1.bf16.msra.mxu0 %v7595_v38 }
 0x491   :  { %5730 = vmatprep.subr.bf16.mxu0 %v7600_v10 }
 0x492   :  { %v5426_v21 = vpop.f32.mrb[12].mxu0 }
 0x493   :  { %v6861_v23 = vadd.f32 %v5426_v21, %v2933_v41  ;;  %v5428_v53 = vpop.f32.mrb[13].mxu0 }
 0x494   :  { %v6862_v56 = vadd.f32 %v5428_v53, %v2937_v27  ;;  %5731 = vmatpush1.bf16.msra.mxu0 %v7598_v51  ;;  %v5430_v24 = vpop.f32.mrb[14].mxu0  ;;  %v2957_v53 = vrot.slane %v8109_v19, %v778_v36 }
 0x495   :  { %v5921_v26 = vsub.f32 0.0, %v6861_v23  ;;  %v5431_v31 = vpop.f32.mrb[15].mxu0  ;;  %5732 = vmatprep.subr.bf16.mxu0 %v7603_v20 }
 0x496   :  { %v5922_v33 = vsub.f32 0.0, %v6862_v56 }
 0x497   :  { %v5928_v63 = vmul.f32 1.442695, %v5921_v26 }
 0x498   :  { %v5930_v35 = vmul.f32 1.442695, %v5922_v33  ;;  %5733 = vmatpush1.bf16.msra.mxu0 %v7601_v25 }
 0x499   :  { %7631 = vpow2.f32 %v5928_v63  ;;  %5734 = vmatprep.subr.bf16.mxu0 %v7606_v32 }
 0x49a   :  { %7633 = vpow2.f32 %v5930_v35 }
 0x49c   :  { %5735 = vmatpush1.bf16.msra.mxu0 %v7604_v37 }
 0x49d   :  { %5736 = vmatprep.subr.bf16.mxu0 %v7609_v2 }
 0x4a0   :  { %5737 = vmatpush1.bf16.msra.mxu0 %v7607_v39 }
 0x4a1   :  { %5738 = vmatprep.subr.bf16.mxu0 %v7612_v30 }
 0x4a3   :  { %v7632_v44 = vpop.eup %7631 }
 0x4a4   :  { %v7634_v45 = vpop.eup %7633  ;;  %v5942_v34 = vadd.f32 1.0, %v7632_v44  ;;  %5739 = vmatpush1.bf16.msra.mxu0 %v7610_v40 }
 0x4a5   :  { %v5943_v47 = vadd.f32 1.0, %v7634_v45  ;;  %5740 = vmatprep.subr.bf16.mxu0 %v7615_v42 }
 0x4a6   :  { %7635 = vrcp.f32 %v5942_v34 }
 0x4a7   :  { %7637 = vrcp.f32 %v5943_v47 }
 0x4a8   :  { %5741 = vmatpush1.bf16.msra.mxu0 %v7613_v46 }
 0x4a9   :  { %5742 = vmatprep.subr.bf16.mxu0 %v7618_v49 }
 0x4ac   :  { %5743 = vmatpush1.bf16.msra.mxu0 %v7616_v52 }
 0x4ad   :  { %5744 = vmatprep.subr.bf16.mxu0 %v7621_v54 }
 0x4b0   :  { %v7636_v58 = vpop.eup %7635  ;;  %5745 = vmatpush1.bf16.msra.mxu0 %v7619_v55  ;;  %v2949_v55 = vrot.slane %v8109_v19, %v770_v48 }
 0x4b1   :  { %v7638_v29 = vpop.eup %7637  ;;  %5746 = vmatprep.subr.bf16.mxu0 %v7624_v57  ;;  %v2953_v57 = vrot.slane %v8109_v19, %v774_v22 }
 0x4b2   :  { %v6759_v61 = vpack.c.bf16 %v7638_v29, %v7636_v58 }
 0x4b4   :  { %5747 = vmatpush1.bf16.msra.mxu0 %v7622_v59  ;;  %5985 = vst [vmem:[#allocation14] sm:$0xff] %v6759_v61 }
 0x4b5   :  { %5748 = vmatprep.subr.bf16.mxu0 %v7627_v60 }
 0x4b7   :  { %v5590_v6 = vpop.f32.mrb[16].mxu1 }
 0x4b8   :  { %v6863_v28 = vadd.f32 %v5590_v6, %v2941_v1  ;;  %v5592_v7 = vpop.f32.mrb[17].mxu1  ;;  %5749 = vmatpush1.bf16.msra.mxu0 %v7625_v4 }
 0x4b9   :  { %v6864_v9 = vadd.f32 %v5592_v7, %v2945_v5  ;;  %v5594_v11 = vpop.f32.mrb[18].mxu1  ;;  %5750 = vmatprep.subr.bf16.mxu0 %v7630_v50 }
 0x4ba   :  { %v5923_v12 = vsub.f32 0.0, %v6863_v28  ;;  %v5595_v13 = vpop.f32.mrb[19].mxu1 }
 0x4bb   :  { %v5924_v14 = vsub.f32 0.0, %v6864_v9 }
 0x4bc   :  { %v5932_v15 = vmul.f32 1.442695, %v5923_v12  ;;  %5751 = vmatpush1.bf16.msra.mxu0 %v7628_v8 }
 0x4bd   :  { %v5934_v0 = vmul.f32 1.442695, %v5924_v14 }
 0x4be   :  { %7639 = vpow2.f32 %v5932_v15 }
 0x4bf   :  { %7641 = vpow2.f32 %v5934_v0  ;;  %5753 = vmatmul.mubr.bf16.vlgmr.msra.gmra.mrb[16].mxu0 %v8088_v43 }
 0x4c8   :  { %v7640_v3 = vpop.eup %7639 }
 0x4c9   :  { %v7642_v16 = vpop.eup %7641  ;;  %v5944_v17 = vadd.f32 1.0, %v7640_v3 }
 0x4ca   :  { %v5945_v18 = vadd.f32 1.0, %v7642_v16 }
 0x4cb   :  { %7643 = vrcp.f32 %v5944_v17 }
 0x4cc   :  { %7645 = vrcp.f32 %v5945_v18 }
 0x4d5   :  { %v7644_v38 = vpop.eup %7643 }
 0x4d6   :  { %v7646_v10 = vpop.eup %7645 }
 0x4d7   :  { %v6779_v41 = vpop.f32.mrb[20].mxu1  ;;  %v6760_v51 = vpack.c.bf16 %v7646_v10, %v7644_v38 }
 0x4d8   :  { %v6780_v27 = vpop.f32.mrb[21].mxu1 }
 0x4d9   :  { %v6781_v20 = vadd.f32 %v6780_v27, %v6779_v41  ;;  %v6782_v21 = vpop.f32.mrb[22].mxu1  ;;  %5986 = vst [vmem:[#allocation14 + $0x8] sm:$0xff] %v6760_v51 }
 0x4da   :  { %v6783_v23 = vpop.f32.mrb[23].mxu1 }
 0x4db   :  { %v5796_v24 = vadd.f32 %v6781_v20, %v2957_v53 }
 0x4f7   :  { %v6801_v43 = vpop.f32.mrb[24].mxu1 }
 0x4f8   :  { %v6802_v56 = vpop.f32.mrb[25].mxu1 }
 0x4f9   :  { %v6803_v25 = vadd.f32 %v6802_v56, %v6801_v43  ;;  %v6804_v26 = vpop.f32.mrb[26].mxu1 }
 0x4fa   :  { %v6805_v31 = vpop.f32.mrb[27].mxu1 }
 0x4fb   :  { %v5836_v32 = vadd.f32 %v6803_v25, %v5796_v24 }
 0x517   :  { %v6823_v33 = vpop.f32.mrb[28].mxu1 }
 0x518   :  { %v6824_v63 = vpop.f32.mrb[29].mxu1 }
 0x519   :  { %v6825_v35 = vadd.f32 %v6824_v63, %v6823_v33  ;;  %v6826_v37 = vpop.f32.mrb[30].mxu1 }
 0x51a   :  { %v6827_v2 = vpop.f32.mrb[31].mxu1 }
 0x51b   :  { %v5876_v39 = vadd.f32 %v6825_v35, %v5836_v32 }
 0x537   :  { %v6845_v30 = vpop.f32.mrb[32].mxu1 }
 0x538   :  { %v6846_v40 = vpop.f32.mrb[33].mxu1 }
 0x539   :  { %v6847_v42 = vadd.f32 %v6846_v40, %v6845_v30  ;;  %v6848_v44 = vpop.f32.mrb[34].mxu1 }
 0x53a   :  { %v6849_v45 = vpop.f32.mrb[35].mxu1 }
 0x53b   :  { %v5916_v34 = vadd.f32 %v6847_v42, %v5876_v39 }
 0x53d   :  { %v5927_v36 = vsub.f32 0.0, %v5916_v34 }
 0x53f   :  { %v5940_v46 = vmul.f32 1.442695, %v5927_v36 }
 0x541   :  { %7647 = vpow2.f32 %v5940_v46 }
 0x54b   :  { %v7648_v47 = vpop.eup %7647 }
 0x54c   :  { %v5948_v49 = vadd.f32 1.0, %v7648_v47 }
 0x54e   :  { %7649 = vrcp.f32 %v5948_v49 }
 0x558   :  { %v7650_v52 = vpop.eup %7649 }
 0x559   :  { %v6762_v54 = vpack.c.bf16 %v7650_v52, %v7650_v52 }
 0x55b   :  { %5988 = vst [vmem:[#allocation14 + $0x18] sm:$0xf] %v6762_v54 }
 0x592   :  { %v5754_v58 = vpop.f32.mrb[16].mxu0 }
 0x593   :  { %v6865_v59 = vadd.f32 %v5754_v58, %v2949_v55  ;;  %v5756_v29 = vpop.f32.mrb[17].mxu0 }
 0x594   :  { %v6866_v60 = vadd.f32 %v5756_v29, %v2953_v57  ;;  %v5758_v61 = vpop.f32.mrb[18].mxu0 }
 0x595   :  { %v5925_v1 = vsub.f32 0.0, %v6865_v59  ;;  %v5759_v4 = vpop.f32.mrb[19].mxu0 }
 0x596   :  { %v5926_v5 = vsub.f32 0.0, %v6866_v60 }
 0x597   :  { %v5936_v50 = vmul.f32 1.442695, %v5925_v1 }
 0x598   :  { %v5938_v6 = vmul.f32 1.442695, %v5926_v5 }
 0x599   :  { %7651 = vpow2.f32 %v5936_v50 }
 0x59a   :  { %7653 = vpow2.f32 %v5938_v6 }
 0x5a3   :  { %v7652_v28 = vpop.eup %7651 }
 0x5a4   :  { %v7654_v7 = vpop.eup %7653  ;;  %v5946_v8 = vadd.f32 1.0, %v7652_v28 }
 0x5a5   :  { %v5947_v48 = vadd.f32 1.0, %v7654_v7 }
 0x5a6   :  { %7655 = vrcp.f32 %v5946_v8 }
 0x5a7   :  { %7657 = vrcp.f32 %v5947_v48 }
 0x5b0   :  { %v7656_v62 = vpop.eup %7655 }
 0x5b1   :  { %v7658_v22 = vpop.eup %7657 }
 0x5b2   :  { %v6761_v19 = vpack.c.bf16 %v7658_v22, %v7656_v62 }
 0x5b4   :  { %5987 = vst [vmem:[#allocation14 + $0x10] sm:$0xff] %v6761_v19 }
 0x5b5   :  { %7825 = shalt.err (!%p7822_p4)
}
 0x5b6   :  { %s7826_s23 = scalar_lea.hbm %s8149_s8, 448 }
 0x5b7   :  { %p7827_p5 = scmp.ne.s32.totalorder %s8149_s8, %s7826_s23  ;;  %p7830_p6 = scmp.lt.u32.totalorder %s7826_s23, %s8149_s8 }
 0x5b9   :  { %p7832_p7 = pnand %p7830_p6, %p7827_p5 }
 0x5bb   :  { %7835 = shalt.err (!%p7832_p7)
}
 0x5bc   :  { %5998 = dma.vmem_to_hbm [thread:$0]  %s5996_s7, 448, %s8149_s8, [#allocation4]  }
 0x5bd   :  { %7844 = dma.done.wait [#allocation4], 448  }
 0x5be   :  { %7845 = vsyncadd [#allocation4], 4294966848 }
 0x5bf   :  { %6002 = vsyncpa [#allocation3], 1 }
 0x5c0   :  { %6003 = vsyncpa [#allocation6], 1 }
 0x5c1   :  { %6004 = vsyncpa [#allocation9], 1 }
 0x5c2   :  { %6005 = vsyncpa [#allocation12], 1 }
 0x5c3   :  { %6006 = vsyncpa [#allocation4], 1 }

</bundles_post_ra>
